<compile_context>
chip_gen: v6e
topology: v6e:2x2x1
jax: 0.10.0
libtpu: 0.0.40
codegen_flags: <defaults>
</compile_context>

<pallas_src>
import jax
import jax.numpy as jnp
from jax.experimental import pallas as pl
from jax.experimental.pallas import tpu as pltpu


def _leaky(v, slope=0.1):
    return jnp.where(v > 0, v, slope * v)


def _im2col(pad_ref, col_ref, H, W):
    """Scatter the 9 shifted (H,W,Cs) windows of a zero-padded scratch into a
    (H*W, 9*Cs) im2col scratch (cast to the scratch dtype, bf16)."""
    Cs = pad_ref.shape[-1]
    HW = H * W
    t = 0
    for dh in range(3):
        for dw in range(3):
            patch = pad_ref[dh:dh + H, dw:dw + W, :]            # (H, W, Cs)
            col_ref[:, t * Cs:(t + 1) * Cs] = (
                patch.reshape(HW, Cs).astype(col_ref.dtype))
            t += 1


def atting_kernel(x_ref, w1_ref, wcv_ref, wp1_ref, wp2_ref, wc_ref, vec_ref,
                  xout_ref, inst_ref,
                  pad1_ref, pad2_ref, col1_ref, col2_ref):
    HW = x_ref.shape[1]
    C = w1_ref.shape[1]
    Ch = wp1_ref.shape[1]
    C2 = 2 * C
    H = pad1_ref.shape[0] - 2
    W = pad1_ref.shape[1] - 2
    inv_hw = 1.0 / HW

    # Zero the padded conv scratches ONCE: interiors are fully rewritten every
    # grid step, only the zero border has to persist across iterations.
    @pl.when(pl.program_id(0) == 0)
    def _init_pad():
        pad1_ref[...] = jnp.zeros_like(pad1_ref)
        pad2_ref[...] = jnp.zeros_like(pad2_ref)

    # packed bias-like vectors: [gamma | beta | proc1_b | proc2_b | conv1x1_b]
    gamma = vec_ref[:, 0:C]
    beta = vec_ref[:, C:2 * C]
    bp1 = vec_ref[:, 2 * C:2 * C + Ch]
    bp2 = vec_ref[:, 2 * C + Ch:4 * C + Ch]
    bc = vec_ref[:, 4 * C + Ch:5 * C + Ch]

    x = x_ref[0].astype(jnp.float32)                            # (HW, Cin)

    # conv1: 1x1 conv (no bias) == channel matmul (kept f32, feeds the norm)
    x1 = jnp.dot(x, w1_ref[...], preferred_element_type=jnp.float32)  # (HW, C)

    # InstanceNorm2d(affine=True, eps=1e-5): single-pass sum / sum-of-squares
    s = jnp.sum(x1, axis=0, keepdims=True)
    ss = jnp.sum(x1 * x1, axis=0, keepdims=True)
    mu = s * inv_hw
    var = jnp.maximum(ss * inv_hw - mu * mu, 0.0)
    inst = (x1 - mu) * jax.lax.rsqrt(var + 1e-5) * gamma + beta
    inst_ref[0] = inst.astype(inst_ref.dtype)

    # ---- conv2_1(inst) and conv2_2(x1) as ONE bf16 im2col matmul (K=18C) ---
    pad1_ref[1:H + 1, 1:W + 1, :] = (
        jnp.concatenate([inst, x1], axis=-1).reshape(H, W, C2))
    _im2col(pad1_ref, col1_ref, H, W)
    out_cat = jnp.dot(col1_ref[...], wcv_ref[:, 0:C2],
                      preferred_element_type=jnp.float32)       # (HW, 2C)

    # ---- interative gate: one bf16 im2col matmul on cat(out1, out2) --------
    pad2_ref[1:H + 1, 1:W + 1, :] = out_cat.reshape(H, W, C2)
    _im2col(pad2_ref, col2_ref, H, W)
    g = jnp.dot(col2_ref[...], wcv_ref[:, C2:C2 + C],
                preferred_element_type=jnp.float32)             # (HW, C)
    inter = jax.nn.sigmoid(_leaky(g))

    out1 = out_cat[:, 0:C]
    out2 = out_cat[:, C:C2]
    xp1 = inter * out2 + out1
    xp2 = (1.0 - inter) * out1 + out2
    xp = jnp.concatenate([xp1, xp2], axis=-1)                   # (HW, 2C)

    # contrast (channel stdv) + avgpool (channel mean), single-pass stats
    s2 = jnp.sum(xp, axis=0, keepdims=True)
    ss2 = jnp.sum(xp * xp, axis=0, keepdims=True)
    m = s2 * inv_hw
    v = jnp.maximum(ss2 * inv_hw - m * m, 0.0)
    stat = jnp.sqrt(v) + m                                      # (1, 2C)

    # process(): padded 3x3 convs on a 1x1 spatial tensor == centre-tap matmul
    tmid = _leaky(jnp.dot(stat, wp1_ref[...],
                          preferred_element_type=jnp.float32) + bp1)
    gate = jax.nn.sigmoid(jnp.dot(tmid, wp2_ref[...],
                                  preferred_element_type=jnp.float32) + bp2)

    # gated features through the final 1x1 conv (single merged K=2C matmul)
    xg = (gate * xp).astype(wc_ref.dtype)                       # bf16
    xout = jnp.dot(xg, wc_ref[...],
                   preferred_element_type=jnp.float32) + bc     # (HW, C)
    xout_ref[0] = xout.astype(xout_ref.dtype)


def init_params(key, in_channels, channels):
    """Deterministic synthetic init, PyTorch-layout shapes (OIHW etc.)."""
    C, Ch = channels, channels // 2
    ks = jax.random.split(key, 10)

    def w(k, shape, scale=0.1):
        return scale * jax.random.normal(k, shape, jnp.float32)

    return {
        'conv1_w':   w(ks[0], (C, in_channels, 1, 1)),
        'inst_gamma': jnp.ones((C,), jnp.float32),     # nn.InstanceNorm2d default
        'inst_beta':  jnp.zeros((C,), jnp.float32),
        'conv2_1_w': w(ks[1], (C, C, 3, 3)),
        'conv2_2_w': w(ks[2], (C, C, 3, 3)),
        'inter_w':   w(ks[3], (C, 2 * C, 3, 3)),
        'proc1_w':   w(ks[4], (Ch, 2 * C, 3, 3)),
        'proc1_b':   w(ks[5], (Ch,)),
        'proc2_w':   w(ks[6], (2 * C, Ch, 3, 3)),
        'proc2_b':   w(ks[7], (2 * C,)),
        'conv1x1_w': w(ks[8], (C, 2 * C, 1, 1)),
        'conv1x1_b': w(ks[9], (C,)),
    }


def _prepare_kernel_weights(p, channels):
    """Convert PyTorch-layout weights into the fused kernel layout."""
    C = channels
    Ch = C // 2
    C2 = 2 * C
    f32 = jnp.float32
    bf16 = jnp.bfloat16

    def hwio(wt):  # (O, I, kh, kw) -> (kh, kw, I, O)
        return jnp.transpose(wt, (2, 3, 1, 0))

    w1 = p['conv1_w'][:, :, 0, 0].T.astype(f32)                 # (Cin, C)

    w21 = hwio(p['conv2_1_w'])                                  # (3,3,C,C)
    w22 = hwio(p['conv2_2_w'])                                  # (3,3,C,C)
    wint = hwio(p['inter_w'])                                   # (3,3,2C,C)

    # Block-diagonal per-tap weight: im2col(cat(inst, x1)) @ w_bd
    #   = cat(conv2_1(inst), conv2_2(x1)).
    zeros = jnp.zeros((C, C), f32)
    taps = []
    for dh in range(3):
        for dw in range(3):
            top = jnp.concatenate([w21[dh, dw], zeros], axis=1)  # inst -> out1
            bot = jnp.concatenate([zeros, w22[dh, dw]], axis=1)  # x1   -> out2
            taps.append(jnp.concatenate([top, bot], axis=0))     # (2C, 2C)
    w_bd = jnp.concatenate(taps, axis=0)                         # (18C, 2C)
    w_int = wint.reshape(9 * C2, C)                              # (18C, C)
    # one packed conv-weight slab: [:, :2C] -> cat(out1,out2), [:, 2C:] -> gate
    w_cv = jnp.concatenate([w_bd, w_int], axis=1).astype(bf16)   # (18C, 3C)

    wp1 = p['proc1_w'][:, :, 1, 1].T.astype(f32)                 # (2C, C//2)
    wp2 = p['proc2_w'][:, :, 1, 1].T.astype(f32)                 # (C//2, 2C)
    wc = p['conv1x1_w'][:, :, 0, 0].T.astype(bf16)               # (2C, C)

    # packed bias-like vectors: [gamma | beta | proc1_b | proc2_b | conv1x1_b]
    vec = jnp.concatenate(
        [p['inst_gamma'], p['inst_beta'], p['proc1_b'], p['proc2_b'],
         p['conv1x1_b']], axis=0)[None, :].astype(f32)           # (1, 5C + C//2)

    return [w1, w_cv, wp1, wp2, wc, vec]


def atting_forward(x_nchw, params, channels):
    N, Cin, H, W = x_nchw.shape
    C = channels
    HW = H * W
    x = jnp.transpose(x_nchw, (0, 2, 3, 1)).reshape(N, HW, Cin).astype(jnp.float32)

    weights = _prepare_kernel_weights(params, C)

    def rep(a):
        return pl.BlockSpec(a.shape, lambda n, _nd=a.ndim: (0,) * _nd)

    grid_spec = pltpu.PrefetchScalarGridSpec(
        num_scalar_prefetch=0,
        grid=(N,),
        in_specs=[pl.BlockSpec((1, HW, Cin), lambda n: (n, 0, 0))]
                 + [rep(wt) for wt in weights],
        out_specs=(pl.BlockSpec((1, HW, C), lambda n: (n, 0, 0)),
                   pl.BlockSpec((1, HW, C), lambda n: (n, 0, 0))),
        scratch_shapes=[
            pltpu.VMEM((H + 2, W + 2, 2 * C), jnp.float32),   # pad: cat(inst, x1)
            pltpu.VMEM((H + 2, W + 2, 2 * C), jnp.float32),   # pad: cat(out1, out2)
            pltpu.VMEM((HW, 18 * C), jnp.bfloat16),           # im2col stage 1
            pltpu.VMEM((HW, 18 * C), jnp.bfloat16),           # im2col stage 2
        ])

    out_shape = (jax.ShapeDtypeStruct((N, HW, C), jnp.float32),
                 jax.ShapeDtypeStruct((N, HW, C), jnp.float32))

    xout, inst = pl.pallas_call(
        atting_kernel,
        out_shape=out_shape,
        grid_spec=grid_spec,
        compiler_params=pltpu.CompilerParams(
            dimension_semantics=("parallel",)),
    )(x, *weights)

    # (N, H*W, C) -> NHWC
    return xout.reshape(N, H, W, C), inst.reshape(N, H, W, C)


def reference(x, p):
    """Pure-JAX NCHW reference matching the PyTorch module."""
    def conv(inp, w, pad):
        return jax.lax.conv_general_dilated(
            inp, w, window_strides=(1, 1), padding=[(pad, pad), (pad, pad)],
            dimension_numbers=('NCHW', 'OIHW', 'NCHW'),
            precision=jax.lax.Precision.HIGHEST)

    def leaky(v):
        return jnp.where(v > 0, v, 0.1 * v)

    x1 = conv(x, p['conv1_w'], 0)
    mu = jnp.mean(x1, axis=(2, 3), keepdims=True)
    var = jnp.mean((x1 - mu) ** 2, axis=(2, 3), keepdims=True)
    inst = ((x1 - mu) / jnp.sqrt(var + 1e-5) *
            p['inst_gamma'][None, :, None, None] + p['inst_beta'][None, :, None, None])
    out1 = conv(inst, p['conv2_1_w'], 1)
    out2 = conv(x1, p['conv2_2_w'], 1)
    out = jnp.concatenate([out1, out2], axis=1)
    inter = jax.nn.sigmoid(leaky(conv(out, p['inter_w'], 1)))
    xp1 = inter * out2 + out1
    xp2 = (1.0 - inter) * out1 + out2
    xp = jnp.concatenate([xp1, xp2], axis=1)
    mean = jnp.mean(xp, axis=(2, 3), keepdims=True)
    std = jnp.sqrt(jnp.mean((xp - mean) ** 2, axis=(2, 3), keepdims=True))
    stats = std + mean
    t = leaky(conv(stats, p['proc1_w'], 1) + p['proc1_b'][None, :, None, None])
    gate = jax.nn.sigmoid(conv(t, p['proc2_w'], 1) + p['proc2_b'][None, :, None, None])
    xpg = gate * xp
    xout = conv(xpg, p['conv1x1_w'], 0) + p['conv1x1_b'][None, :, None, None]
    return xout, inst


if __name__ == "__main__":
    key = jax.random.PRNGKey(0)
    N, Cin, C, H, W = 2, 4, 8, 16, 16
    kx, kp = jax.random.split(key)
    x_nchw = jax.random.normal(kx, (N, Cin, H, W), jnp.float32)
    params = init_params(kp, Cin, C)

    xout_nhwc, inst_nhwc = atting_forward(x_nchw, params, C)
    xout_nhwc, inst_nhwc = jax.block_until_ready((xout_nhwc, inst_nhwc))

    # compare against the pure-JAX NCHW reference
    xout = jnp.transpose(xout_nhwc, (0, 3, 1, 2))
    inst = jnp.transpose(inst_nhwc, (0, 3, 1, 2))
    ref_xout, ref_inst = reference(x_nchw, params)
    err_x = float(jnp.max(jnp.abs(xout - ref_xout)))
    err_i = float(jnp.max(jnp.abs(inst - ref_inst)))
    assert err_x < 3e-2 and err_i < 3e-2, (err_x, err_i)
    print("KERNEL_OK")
</pallas_src>

<mosaic_0001>
module attributes {stable_mosaic.version = 11 : i64} {
  func.func @atting_kernel(%arg0: i32, %arg1: memref<1x256x4xf32, #tpu.memory_space<vmem>>, %arg2: memref<4x8xf32, #tpu.memory_space<vmem>>, %arg3: memref<144x24xbf16, #tpu.memory_space<vmem>>, %arg4: memref<16x4xf32, #tpu.memory_space<vmem>>, %arg5: memref<4x16xf32, #tpu.memory_space<vmem>>, %arg6: memref<16x8xbf16, #tpu.memory_space<vmem>>, %arg7: memref<1x44xf32, #tpu.memory_space<vmem>>, %arg8: memref<1x256x8xf32, #tpu.memory_space<vmem>>, %arg9: memref<1x256x8xf32, #tpu.memory_space<vmem>>, %arg10: memref<18x18x16xf32, #tpu.memory_space<vmem>>, %arg11: memref<18x18x16xf32, #tpu.memory_space<vmem>>, %arg12: memref<256x144xbf16, #tpu.memory_space<vmem>>, %arg13: memref<256x144xbf16, #tpu.memory_space<vmem>>) attributes {dimension_semantics = [#tpu.dimension_semantics<parallel>], iteration_bounds = array<i64: 2>, scalar_prefetch = 0 : i64, scratch_operands = 4 : i64, tpu.core_type = #tpu.core_type<tc>, window_params = [{transform_indices = @transform_0, window_bounds = array<i64: 1, 256, 4>}, {pipeline_mode = #tpu.pipeline_mode<synchronous>, transform_indices = @transform_1, window_bounds = array<i64: 4, 8>}, {pipeline_mode = #tpu.pipeline_mode<synchronous>, transform_indices = @transform_2, window_bounds = array<i64: 144, 24>}, {pipeline_mode = #tpu.pipeline_mode<synchronous>, transform_indices = @transform_3, window_bounds = array<i64: 16, 4>}, {pipeline_mode = #tpu.pipeline_mode<synchronous>, transform_indices = @transform_4, window_bounds = array<i64: 4, 16>}, {pipeline_mode = #tpu.pipeline_mode<synchronous>, transform_indices = @transform_5, window_bounds = array<i64: 16, 8>}, {pipeline_mode = #tpu.pipeline_mode<synchronous>, transform_indices = @transform_6, window_bounds = array<i64: 1, 44>}, {transform_indices = @transform_7, window_bounds = array<i64: 1, 256, 8>}, {transform_indices = @transform_8, window_bounds = array<i64: 1, 256, 8>}]} {
    %c0_i32 = arith.constant 0 : i32
    %0 = arith.cmpi eq, %arg0, %c0_i32 : i32
    %1 = arith.extui %0 : i1 to i32
    %c0_i32_0 = arith.constant 0 : i32
    %2 = arith.cmpi ne, %1, %c0_i32_0 : i32
    scf.if %2 {
      %cst_141 = arith.constant 0.000000e+00 : f32
      %182 = vector.broadcast %cst_141 : f32 to vector<18x18x16xf32>
      %c0_142 = arith.constant 0 : index
      %c0_143 = arith.constant 0 : index
      %c0_144 = arith.constant 0 : index
      %183 = vector.load %arg10[%c0_142, %c0_143, %c0_144] : memref<18x18x16xf32, #tpu.memory_space<vmem>>, vector<18x18x16xf32>
      tpu.vector_store %arg10[%c0_142, %c0_143, %c0_144], %182 {strides = array<i32>} : memref<18x18x16xf32, #tpu.memory_space<vmem>>, vector<18x18x16xf32>,
      %cst_145 = arith.constant 0.000000e+00 : f32
      %184 = vector.broadcast %cst_145 : f32 to vector<18x18x16xf32>
      %c0_146 = arith.constant 0 : index
      %c0_147 = arith.constant 0 : index
      %c0_148 = arith.constant 0 : index
      %185 = vector.load %arg11[%c0_146, %c0_147, %c0_148] : memref<18x18x16xf32, #tpu.memory_space<vmem>>, vector<18x18x16xf32>
      tpu.vector_store %arg11[%c0_146, %c0_147, %c0_148], %184 {strides = array<i32>} : memref<18x18x16xf32, #tpu.memory_space<vmem>>, vector<18x18x16xf32>,
    } else {
    }
    %c0 = arith.constant 0 : index
    %c0_1 = arith.constant 0 : index
    %3 = vector.load %arg7[%c0, %c0_1] : memref<1x44xf32, #tpu.memory_space<vmem>>, vector<1x8xf32>
    %c0_2 = arith.constant 0 : index
    %c8 = arith.constant 8 : index
    %4 = vector.load %arg7[%c0_2, %c8] : memref<1x44xf32, #tpu.memory_space<vmem>>, vector<1x8xf32>
    %c0_3 = arith.constant 0 : index
    %c16 = arith.constant 16 : index
    %5 = vector.load %arg7[%c0_3, %c16] : memref<1x44xf32, #tpu.memory_space<vmem>>, vector<1x4xf32>
    %c0_4 = arith.constant 0 : index
    %c20 = arith.constant 20 : index
    %6 = vector.load %arg7[%c0_4, %c20] : memref<1x44xf32, #tpu.memory_space<vmem>>, vector<1x16xf32>
    %c0_5 = arith.constant 0 : index
    %c36 = arith.constant 36 : index
    %7 = vector.load %arg7[%c0_5, %c36] : memref<1x44xf32, #tpu.memory_space<vmem>>, vector<1x8xf32>
    %c0_6 = arith.constant 0 : index
    %c0_7 = arith.constant 0 : index
    %c0_8 = arith.constant 0 : index
    %8 = vector.load %arg1[%c0_6, %c0_7, %c0_8] : memref<1x256x4xf32, #tpu.memory_space<vmem>>, vector<1x256x4xf32>
    %9 = vector.shape_cast %8 : vector<1x256x4xf32> to vector<256x4xf32>
    %c0_9 = arith.constant 0 : index
    %c0_10 = arith.constant 0 : index
    %10 = vector.load %arg2[%c0_9, %c0_10] : memref<4x8xf32, #tpu.memory_space<vmem>>, vector<4x8xf32>
    %cst = arith.constant dense<0.000000e+00> : vector<256x8xf32>
    %11 = tpu.matmul %9, %10, %cst {dimension_numbers = #tpu.dot_dimension_numbers<[1], [0], [0], [1], [0, 0, 1, 1], [], []>} : vector<256x4xf32>, vector<4x8xf32>, vector<256x8xf32> -> vector<256x8xf32>
    %cst_11 = arith.constant dense<0.000000e+00> : vector<8xf32>
    %12 = vector.multi_reduction <add>, %11, %cst_11 [0] : vector<256x8xf32> to vector<8xf32>
    %13 = vector.shape_cast %12 : vector<8xf32> to vector<1x8xf32>
    %14 = arith.mulf %11, %11 : vector<256x8xf32>
    %cst_12 = arith.constant dense<0.000000e+00> : vector<8xf32>
    %15 = vector.multi_reduction <add>, %14, %cst_12 [0] : vector<256x8xf32> to vector<8xf32>
    %16 = vector.shape_cast %15 : vector<8xf32> to vector<1x8xf32>
    %cst_13 = arith.constant 3.906250e-03 : f32
    %17 = vector.broadcast %cst_13 : f32 to vector<1x8xf32>
    %18 = arith.mulf %13, %17 : vector<1x8xf32>
    %cst_14 = arith.constant 3.906250e-03 : f32
    %19 = vector.broadcast %cst_14 : f32 to vector<1x8xf32>
    %20 = arith.mulf %16, %19 : vector<1x8xf32>
    %21 = arith.mulf %18, %18 : vector<1x8xf32>
    %22 = arith.subf %20, %21 : vector<1x8xf32>
    %cst_15 = arith.constant 0.000000e+00 : f32
    %23 = vector.broadcast %cst_15 : f32 to vector<1x8xf32>
    %24 = arith.maximumf %22, %23 : vector<1x8xf32>
    %25 = vector.broadcast %18 : vector<1x8xf32> to vector<256x8xf32>
    %26 = arith.subf %11, %25 : vector<256x8xf32>
    %cst_16 = arith.constant 9.99999974E-6 : f32
    %27 = vector.broadcast %cst_16 : f32 to vector<1x8xf32>
    %28 = arith.addf %24, %27 : vector<1x8xf32>
    %29 = math.rsqrt %28 : vector<1x8xf32>
    %30 = vector.broadcast %29 : vector<1x8xf32> to vector<256x8xf32>
    %31 = arith.mulf %26, %30 : vector<256x8xf32>
    %32 = vector.broadcast %3 : vector<1x8xf32> to vector<256x8xf32>
    %33 = arith.mulf %31, %32 : vector<256x8xf32>
    %34 = vector.broadcast %4 : vector<1x8xf32> to vector<256x8xf32>
    %35 = arith.addf %33, %34 : vector<256x8xf32>
    %c0_17 = arith.constant 0 : index
    %c0_18 = arith.constant 0 : index
    %c0_19 = arith.constant 0 : index
    %36 = vector.load %arg9[%c0_17, %c0_18, %c0_19] : memref<1x256x8xf32, #tpu.memory_space<vmem>>, vector<1x256x8xf32>
    %37 = vector.shape_cast %36 : vector<1x256x8xf32> to vector<256x8xf32>
    %38 = vector.shape_cast %35 : vector<256x8xf32> to vector<1x256x8xf32>
    tpu.vector_store %arg9[%c0_17, %c0_18, %c0_19], %38 {strides = array<i32>} : memref<1x256x8xf32, #tpu.memory_space<vmem>>, vector<1x256x8xf32>,
    %39 = tpu.concatenate %35, %11 in 1 : vector<256x8xf32>, vector<256x8xf32> -> vector<256x16xf32>
    %40 = vector.shape_cast %39 : vector<256x16xf32> to vector<16x16x16xf32>
    %c1 = arith.constant 1 : index
    %c1_20 = arith.constant 1 : index
    %c0_21 = arith.constant 0 : index
    %41 = vector.load %arg10[%c1, %c1_20, %c0_21] : memref<18x18x16xf32, #tpu.memory_space<vmem>>, vector<16x16x16xf32>
    tpu.vector_store %arg10[%c1, %c1_20, %c0_21], %40 {strides = array<i32>} : memref<18x18x16xf32, #tpu.memory_space<vmem>>, vector<16x16x16xf32>,
    %c0_22 = arith.constant 0 : index
    %c0_23 = arith.constant 0 : index
    %c0_24 = arith.constant 0 : index
    %42 = vector.load %arg10[%c0_22, %c0_23, %c0_24] : memref<18x18x16xf32, #tpu.memory_space<vmem>>, vector<16x16x16xf32>
    %43 = vector.shape_cast %42 : vector<16x16x16xf32> to vector<256x16xf32>
    %44 = arith.truncf %43 : vector<256x16xf32> to vector<256x16xbf16>
    %c0_25 = arith.constant 0 : index
    %c0_26 = arith.constant 0 : index
    %45 = vector.load %arg12[%c0_25, %c0_26] : memref<256x144xbf16, #tpu.memory_space<vmem>>, vector<256x16xbf16>
    tpu.vector_store %arg12[%c0_25, %c0_26], %44 {strides = array<i32>} : memref<256x144xbf16, #tpu.memory_space<vmem>>, vector<256x16xbf16>,
    %c0_27 = arith.constant 0 : index
    %c1_28 = arith.constant 1 : index
    %c0_29 = arith.constant 0 : index
    %46 = vector.load %arg10[%c0_27, %c1_28, %c0_29] : memref<18x18x16xf32, #tpu.memory_space<vmem>>, vector<16x16x16xf32>
    %47 = vector.shape_cast %46 : vector<16x16x16xf32> to vector<256x16xf32>
    %48 = arith.truncf %47 : vector<256x16xf32> to vector<256x16xbf16>
    %c0_30 = arith.constant 0 : index
    %c16_31 = arith.constant 16 : index
    %49 = vector.load %arg12[%c0_30, %c16_31] : memref<256x144xbf16, #tpu.memory_space<vmem>>, vector<256x16xbf16>
    tpu.vector_store %arg12[%c0_30, %c16_31], %48 {strides = array<i32>} : memref<256x144xbf16, #tpu.memory_space<vmem>>, vector<256x16xbf16>,
    %c0_32 = arith.constant 0 : index
    %c2 = arith.constant 2 : index
    %c0_33 = arith.constant 0 : index
    %50 = vector.load %arg10[%c0_32, %c2, %c0_33] : memref<18x18x16xf32, #tpu.memory_space<vmem>>, vector<16x16x16xf32>
    %51 = vector.shape_cast %50 : vector<16x16x16xf32> to vector<256x16xf32>
    %52 = arith.truncf %51 : vector<256x16xf32> to vector<256x16xbf16>
    %c0_34 = arith.constant 0 : index
    %c32 = arith.constant 32 : index
    %53 = vector.load %arg12[%c0_34, %c32] : memref<256x144xbf16, #tpu.memory_space<vmem>>, vector<256x16xbf16>
    tpu.vector_store %arg12[%c0_34, %c32], %52 {strides = array<i32>} : memref<256x144xbf16, #tpu.memory_space<vmem>>, vector<256x16xbf16>,
    %c1_35 = arith.constant 1 : index
    %c0_36 = arith.constant 0 : index
    %c0_37 = arith.constant 0 : index
    %54 = vector.load %arg10[%c1_35, %c0_36, %c0_37] : memref<18x18x16xf32, #tpu.memory_space<vmem>>, vector<16x16x16xf32>
    %55 = vector.shape_cast %54 : vector<16x16x16xf32> to vector<256x16xf32>
    %56 = arith.truncf %55 : vector<256x16xf32> to vector<256x16xbf16>
    %c0_38 = arith.constant 0 : index
    %c48 = arith.constant 48 : index
    %57 = vector.load %arg12[%c0_38, %c48] : memref<256x144xbf16, #tpu.memory_space<vmem>>, vector<256x16xbf16>
    tpu.vector_store %arg12[%c0_38, %c48], %56 {strides = array<i32>} : memref<256x144xbf16, #tpu.memory_space<vmem>>, vector<256x16xbf16>,
    %c1_39 = arith.constant 1 : index
    %c1_40 = arith.constant 1 : index
    %c0_41 = arith.constant 0 : index
    %58 = vector.load %arg10[%c1_39, %c1_40, %c0_41] : memref<18x18x16xf32, #tpu.memory_space<vmem>>, vector<16x16x16xf32>
    %59 = vector.shape_cast %58 : vector<16x16x16xf32> to vector<256x16xf32>
    %60 = arith.truncf %59 : vector<256x16xf32> to vector<256x16xbf16>
    %c0_42 = arith.constant 0 : index
    %c64 = arith.constant 64 : index
    %61 = vector.load %arg12[%c0_42, %c64] : memref<256x144xbf16, #tpu.memory_space<vmem>>, vector<256x16xbf16>
    tpu.vector_store %arg12[%c0_42, %c64], %60 {strides = array<i32>} : memref<256x144xbf16, #tpu.memory_space<vmem>>, vector<256x16xbf16>,
    %c1_43 = arith.constant 1 : index
    %c2_44 = arith.constant 2 : index
    %c0_45 = arith.constant 0 : index
    %62 = vector.load %arg10[%c1_43, %c2_44, %c0_45] : memref<18x18x16xf32, #tpu.memory_space<vmem>>, vector<16x16x16xf32>
    %63 = vector.shape_cast %62 : vector<16x16x16xf32> to vector<256x16xf32>
    %64 = arith.truncf %63 : vector<256x16xf32> to vector<256x16xbf16>
    %c0_46 = arith.constant 0 : index
    %c80 = arith.constant 80 : index
    %65 = vector.load %arg12[%c0_46, %c80] : memref<256x144xbf16, #tpu.memory_space<vmem>>, vector<256x16xbf16>
    tpu.vector_store %arg12[%c0_46, %c80], %64 {strides = array<i32>} : memref<256x144xbf16, #tpu.memory_space<vmem>>, vector<256x16xbf16>,
    %c2_47 = arith.constant 2 : index
    %c0_48 = arith.constant 0 : index
    %c0_49 = arith.constant 0 : index
    %66 = vector.load %arg10[%c2_47, %c0_48, %c0_49] : memref<18x18x16xf32, #tpu.memory_space<vmem>>, vector<16x16x16xf32>
    %67 = vector.shape_cast %66 : vector<16x16x16xf32> to vector<256x16xf32>
    %68 = arith.truncf %67 : vector<256x16xf32> to vector<256x16xbf16>
    %c0_50 = arith.constant 0 : index
    %c96 = arith.constant 96 : index
    %69 = vector.load %arg12[%c0_50, %c96] : memref<256x144xbf16, #tpu.memory_space<vmem>>, vector<256x16xbf16>
    tpu.vector_store %arg12[%c0_50, %c96], %68 {strides = array<i32>} : memref<256x144xbf16, #tpu.memory_space<vmem>>, vector<256x16xbf16>,
    %c2_51 = arith.constant 2 : index
    %c1_52 = arith.constant 1 : index
    %c0_53 = arith.constant 0 : index
    %70 = vector.load %arg10[%c2_51, %c1_52, %c0_53] : memref<18x18x16xf32, #tpu.memory_space<vmem>>, vector<16x16x16xf32>
    %71 = vector.shape_cast %70 : vector<16x16x16xf32> to vector<256x16xf32>
    %72 = arith.truncf %71 : vector<256x16xf32> to vector<256x16xbf16>
    %c0_54 = arith.constant 0 : index
    %c112 = arith.constant 112 : index
    %73 = vector.load %arg12[%c0_54, %c112] : memref<256x144xbf16, #tpu.memory_space<vmem>>, vector<256x16xbf16>
    tpu.vector_store %arg12[%c0_54, %c112], %72 {strides = array<i32>} : memref<256x144xbf16, #tpu.memory_space<vmem>>, vector<256x16xbf16>,
    %c2_55 = arith.constant 2 : index
    %c2_56 = arith.constant 2 : index
    %c0_57 = arith.constant 0 : index
    %74 = vector.load %arg10[%c2_55, %c2_56, %c0_57] : memref<18x18x16xf32, #tpu.memory_space<vmem>>, vector<16x16x16xf32>
    %75 = vector.shape_cast %74 : vector<16x16x16xf32> to vector<256x16xf32>
    %76 = arith.truncf %75 : vector<256x16xf32> to vector<256x16xbf16>
    %c0_58 = arith.constant 0 : index
    %c128 = arith.constant 128 : index
    %77 = vector.load %arg12[%c0_58, %c128] : memref<256x144xbf16, #tpu.memory_space<vmem>>, vector<256x16xbf16>
    tpu.vector_store %arg12[%c0_58, %c128], %76 {strides = array<i32>} : memref<256x144xbf16, #tpu.memory_space<vmem>>, vector<256x16xbf16>,
    %c0_59 = arith.constant 0 : index
    %c0_60 = arith.constant 0 : index
    %78 = vector.load %arg12[%c0_59, %c0_60] : memref<256x144xbf16, #tpu.memory_space<vmem>>, vector<256x144xbf16>
    %c0_61 = arith.constant 0 : index
    %c0_62 = arith.constant 0 : index
    %79 = vector.load %arg3[%c0_61, %c0_62] : memref<144x24xbf16, #tpu.memory_space<vmem>>, vector<144x16xbf16>
    %cst_63 = arith.constant dense<0.000000e+00> : vector<256x16xf32>
    %80 = tpu.matmul %78, %79, %cst_63 {dimension_numbers = #tpu.dot_dimension_numbers<[1], [0], [0], [1], [0, 0, 1, 1], [], []>} : vector<256x144xbf16>, vector<144x16xbf16>, vector<256x16xf32> -> vector<256x16xf32>
    %81 = vector.shape_cast %80 : vector<256x16xf32> to vector<16x16x16xf32>
    %c1_64 = arith.constant 1 : index
    %c1_65 = arith.constant 1 : index
    %c0_66 = arith.constant 0 : index
    %82 = vector.load %arg11[%c1_64, %c1_65, %c0_66] : memref<18x18x16xf32, #tpu.memory_space<vmem>>, vector<16x16x16xf32>
    tpu.vector_store %arg11[%c1_64, %c1_65, %c0_66], %81 {strides = array<i32>} : memref<18x18x16xf32, #tpu.memory_space<vmem>>, vector<16x16x16xf32>,
    %c0_67 = arith.constant 0 : index
    %c0_68 = arith.constant 0 : index
    %c0_69 = arith.constant 0 : index
    %83 = vector.load %arg11[%c0_67, %c0_68, %c0_69] : memref<18x18x16xf32, #tpu.memory_space<vmem>>, vector<16x16x16xf32>
    %84 = vector.shape_cast %83 : vector<16x16x16xf32> to vector<256x16xf32>
    %85 = arith.truncf %84 : vector<256x16xf32> to vector<256x16xbf16>
    %c0_70 = arith.constant 0 : index
    %c0_71 = arith.constant 0 : index
    %86 = vector.load %arg13[%c0_70, %c0_71] : memref<256x144xbf16, #tpu.memory_space<vmem>>, vector<256x16xbf16>
    tpu.vector_store %arg13[%c0_70, %c0_71], %85 {strides = array<i32>} : memref<256x144xbf16, #tpu.memory_space<vmem>>, vector<256x16xbf16>,
    %c0_72 = arith.constant 0 : index
    %c1_73 = arith.constant 1 : index
    %c0_74 = arith.constant 0 : index
    %87 = vector.load %arg11[%c0_72, %c1_73, %c0_74] : memref<18x18x16xf32, #tpu.memory_space<vmem>>, vector<16x16x16xf32>
    %88 = vector.shape_cast %87 : vector<16x16x16xf32> to vector<256x16xf32>
    %89 = arith.truncf %88 : vector<256x16xf32> to vector<256x16xbf16>
    %c0_75 = arith.constant 0 : index
    %c16_76 = arith.constant 16 : index
    %90 = vector.load %arg13[%c0_75, %c16_76] : memref<256x144xbf16, #tpu.memory_space<vmem>>, vector<256x16xbf16>
    tpu.vector_store %arg13[%c0_75, %c16_76], %89 {strides = array<i32>} : memref<256x144xbf16, #tpu.memory_space<vmem>>, vector<256x16xbf16>,
    %c0_77 = arith.constant 0 : index
    %c2_78 = arith.constant 2 : index
    %c0_79 = arith.constant 0 : index
    %91 = vector.load %arg11[%c0_77, %c2_78, %c0_79] : memref<18x18x16xf32, #tpu.memory_space<vmem>>, vector<16x16x16xf32>
    %92 = vector.shape_cast %91 : vector<16x16x16xf32> to vector<256x16xf32>
    %93 = arith.truncf %92 : vector<256x16xf32> to vector<256x16xbf16>
    %c0_80 = arith.constant 0 : index
    %c32_81 = arith.constant 32 : index
    %94 = vector.load %arg13[%c0_80, %c32_81] : memref<256x144xbf16, #tpu.memory_space<vmem>>, vector<256x16xbf16>
    tpu.vector_store %arg13[%c0_80, %c32_81], %93 {strides = array<i32>} : memref<256x144xbf16, #tpu.memory_space<vmem>>, vector<256x16xbf16>,
    %c1_82 = arith.constant 1 : index
    %c0_83 = arith.constant 0 : index
    %c0_84 = arith.constant 0 : index
    %95 = vector.load %arg11[%c1_82, %c0_83, %c0_84] : memref<18x18x16xf32, #tpu.memory_space<vmem>>, vector<16x16x16xf32>
    %96 = vector.shape_cast %95 : vector<16x16x16xf32> to vector<256x16xf32>
    %97 = arith.truncf %96 : vector<256x16xf32> to vector<256x16xbf16>
    %c0_85 = arith.constant 0 : index
    %c48_86 = arith.constant 48 : index
    %98 = vector.load %arg13[%c0_85, %c48_86] : memref<256x144xbf16, #tpu.memory_space<vmem>>, vector<256x16xbf16>
    tpu.vector_store %arg13[%c0_85, %c48_86], %97 {strides = array<i32>} : memref<256x144xbf16, #tpu.memory_space<vmem>>, vector<256x16xbf16>,
    %c1_87 = arith.constant 1 : index
    %c1_88 = arith.constant 1 : index
    %c0_89 = arith.constant 0 : index
    %99 = vector.load %arg11[%c1_87, %c1_88, %c0_89] : memref<18x18x16xf32, #tpu.memory_space<vmem>>, vector<16x16x16xf32>
    %100 = vector.shape_cast %99 : vector<16x16x16xf32> to vector<256x16xf32>
    %101 = arith.truncf %100 : vector<256x16xf32> to vector<256x16xbf16>
    %c0_90 = arith.constant 0 : index
    %c64_91 = arith.constant 64 : index
    %102 = vector.load %arg13[%c0_90, %c64_91] : memref<256x144xbf16, #tpu.memory_space<vmem>>, vector<256x16xbf16>
    tpu.vector_store %arg13[%c0_90, %c64_91], %101 {strides = array<i32>} : memref<256x144xbf16, #tpu.memory_space<vmem>>, vector<256x16xbf16>,
    %c1_92 = arith.constant 1 : index
    %c2_93 = arith.constant 2 : index
    %c0_94 = arith.constant 0 : index
    %103 = vector.load %arg11[%c1_92, %c2_93, %c0_94] : memref<18x18x16xf32, #tpu.memory_space<vmem>>, vector<16x16x16xf32>
    %104 = vector.shape_cast %103 : vector<16x16x16xf32> to vector<256x16xf32>
    %105 = arith.truncf %104 : vector<256x16xf32> to vector<256x16xbf16>
    %c0_95 = arith.constant 0 : index
    %c80_96 = arith.constant 80 : index
    %106 = vector.load %arg13[%c0_95, %c80_96] : memref<256x144xbf16, #tpu.memory_space<vmem>>, vector<256x16xbf16>
    tpu.vector_store %arg13[%c0_95, %c80_96], %105 {strides = array<i32>} : memref<256x144xbf16, #tpu.memory_space<vmem>>, vector<256x16xbf16>,
    %c2_97 = arith.constant 2 : index
    %c0_98 = arith.constant 0 : index
    %c0_99 = arith.constant 0 : index
    %107 = vector.load %arg11[%c2_97, %c0_98, %c0_99] : memref<18x18x16xf32, #tpu.memory_space<vmem>>, vector<16x16x16xf32>
    %108 = vector.shape_cast %107 : vector<16x16x16xf32> to vector<256x16xf32>
    %109 = arith.truncf %108 : vector<256x16xf32> to vector<256x16xbf16>
    %c0_100 = arith.constant 0 : index
    %c96_101 = arith.constant 96 : index
    %110 = vector.load %arg13[%c0_100, %c96_101] : memref<256x144xbf16, #tpu.memory_space<vmem>>, vector<256x16xbf16>
    tpu.vector_store %arg13[%c0_100, %c96_101], %109 {strides = array<i32>} : memref<256x144xbf16, #tpu.memory_space<vmem>>, vector<256x16xbf16>,
    %c2_102 = arith.constant 2 : index
    %c1_103 = arith.constant 1 : index
    %c0_104 = arith.constant 0 : index
    %111 = vector.load %arg11[%c2_102, %c1_103, %c0_104] : memref<18x18x16xf32, #tpu.memory_space<vmem>>, vector<16x16x16xf32>
    %112 = vector.shape_cast %111 : vector<16x16x16xf32> to vector<256x16xf32>
    %113 = arith.truncf %112 : vector<256x16xf32> to vector<256x16xbf16>
    %c0_105 = arith.constant 0 : index
    %c112_106 = arith.constant 112 : index
    %114 = vector.load %arg13[%c0_105, %c112_106] : memref<256x144xbf16, #tpu.memory_space<vmem>>, vector<256x16xbf16>
    tpu.vector_store %arg13[%c0_105, %c112_106], %113 {strides = array<i32>} : memref<256x144xbf16, #tpu.memory_space<vmem>>, vector<256x16xbf16>,
    %c2_107 = arith.constant 2 : index
    %c2_108 = arith.constant 2 : index
    %c0_109 = arith.constant 0 : index
    %115 = vector.load %arg11[%c2_107, %c2_108, %c0_109] : memref<18x18x16xf32, #tpu.memory_space<vmem>>, vector<16x16x16xf32>
    %116 = vector.shape_cast %115 : vector<16x16x16xf32> to vector<256x16xf32>
    %117 = arith.truncf %116 : vector<256x16xf32> to vector<256x16xbf16>
    %c0_110 = arith.constant 0 : index
    %c128_111 = arith.constant 128 : index
    %118 = vector.load %arg13[%c0_110, %c128_111] : memref<256x144xbf16, #tpu.memory_space<vmem>>, vector<256x16xbf16>
    tpu.vector_store %arg13[%c0_110, %c128_111], %117 {strides = array<i32>} : memref<256x144xbf16, #tpu.memory_space<vmem>>, vector<256x16xbf16>,
    %c0_112 = arith.constant 0 : index
    %c0_113 = arith.constant 0 : index
    %119 = vector.load %arg13[%c0_112, %c0_113] : memref<256x144xbf16, #tpu.memory_space<vmem>>, vector<256x144xbf16>
    %c0_114 = arith.constant 0 : index
    %c16_115 = arith.constant 16 : index
    %120 = vector.load %arg3[%c0_114, %c16_115] : memref<144x24xbf16, #tpu.memory_space<vmem>>, vector<144x8xbf16>
    %cst_116 = arith.constant dense<0.000000e+00> : vector<256x8xf32>
    %121 = tpu.matmul %119, %120, %cst_116 {dimension_numbers = #tpu.dot_dimension_numbers<[1], [0], [0], [1], [0, 0, 1, 1], [], []>} : vector<256x144xbf16>, vector<144x8xbf16>, vector<256x8xf32> -> vector<256x8xf32>
    %cst_117 = arith.constant 0.000000e+00 : f32
    %122 = vector.broadcast %cst_117 : f32 to vector<256x8xf32>
    %123 = arith.cmpf ogt, %121, %122 : vector<256x8xf32>
    %cst_118 = arith.constant 1.000000e-01 : f32
    %124 = vector.broadcast %cst_118 : f32 to vector<256x8xf32>
    %125 = arith.mulf %124, %121 : vector<256x8xf32>
    %126 = arith.select %123, %121, %125 : vector<256x8xi1>, vector<256x8xf32>
    %127 = arith.negf %126 : vector<256x8xf32>
    %128 = math.exp %127 : vector<256x8xf32>
    %cst_119 = arith.constant 1.000000e+00 : f32
    %129 = vector.broadcast %cst_119 : f32 to vector<256x8xf32>
    %130 = arith.addf %129, %128 : vector<256x8xf32>
    %131 = arith.divf %129, %130 : vector<256x8xf32>
    %132 = vector.extract_strided_slice %80 {offsets = [0, 0], sizes = [256, 8], strides = [1, 1]} : vector<256x16xf32> to vector<256x8xf32>
    %133 = vector.extract_strided_slice %80 {offsets = [0, 8], sizes = [256, 8], strides = [1, 1]} : vector<256x16xf32> to vector<256x8xf32>
    %134 = arith.mulf %131, %133 : vector<256x8xf32>
    %135 = arith.addf %134, %132 : vector<256x8xf32>
    %cst_120 = arith.constant 1.000000e+00 : f32
    %136 = vector.broadcast %cst_120 : f32 to vector<256x8xf32>
    %137 = arith.subf %136, %131 : vector<256x8xf32>
    %138 = arith.mulf %137, %132 : vector<256x8xf32>
    %139 = arith.addf %138, %133 : vector<256x8xf32>
    %140 = tpu.concatenate %135, %139 in 1 : vector<256x8xf32>, vector<256x8xf32> -> vector<256x16xf32>
    %cst_121 = arith.constant dense<0.000000e+00> : vector<16xf32>
    %141 = vector.multi_reduction <add>, %140, %cst_121 [0] : vector<256x16xf32> to vector<16xf32>
    %142 = vector.shape_cast %141 : vector<16xf32> to vector<1x16xf32>
    %143 = arith.mulf %140, %140 : vector<256x16xf32>
    %cst_122 = arith.constant dense<0.000000e+00> : vector<16xf32>
    %144 = vector.multi_reduction <add>, %143, %cst_122 [0] : vector<256x16xf32> to vector<16xf32>
    %145 = vector.shape_cast %144 : vector<16xf32> to vector<1x16xf32>
    %cst_123 = arith.constant 3.906250e-03 : f32
    %146 = vector.broadcast %cst_123 : f32 to vector<1x16xf32>
    %147 = arith.mulf %142, %146 : vector<1x16xf32>
    %cst_124 = arith.constant 3.906250e-03 : f32
    %148 = vector.broadcast %cst_124 : f32 to vector<1x16xf32>
    %149 = arith.mulf %145, %148 : vector<1x16xf32>
    %150 = arith.mulf %147, %147 : vector<1x16xf32>
    %151 = arith.subf %149, %150 : vector<1x16xf32>
    %cst_125 = arith.constant 0.000000e+00 : f32
    %152 = vector.broadcast %cst_125 : f32 to vector<1x16xf32>
    %153 = arith.maximumf %151, %152 : vector<1x16xf32>
    %154 = math.sqrt %153 : vector<1x16xf32>
    %155 = arith.addf %154, %147 : vector<1x16xf32>
    %c0_126 = arith.constant 0 : index
    %c0_127 = arith.constant 0 : index
    %156 = vector.load %arg4[%c0_126, %c0_127] : memref<16x4xf32, #tpu.memory_space<vmem>>, vector<16x4xf32>
    %cst_128 = arith.constant dense<0.000000e+00> : vector<1x4xf32>
    %157 = tpu.matmul %155, %156, %cst_128 {dimension_numbers = #tpu.dot_dimension_numbers<[1], [0], [0], [1], [0, 0, 1, 1], [], []>} : vector<1x16xf32>, vector<16x4xf32>, vector<1x4xf32> -> vector<1x4xf32>
    %158 = arith.addf %157, %5 : vector<1x4xf32>
    %cst_129 = arith.constant 0.000000e+00 : f32
    %159 = vector.broadcast %cst_129 : f32 to vector<1x4xf32>
    %160 = arith.cmpf ogt, %158, %159 : vector<1x4xf32>
    %cst_130 = arith.constant 1.000000e-01 : f32
    %161 = vector.broadcast %cst_130 : f32 to vector<1x4xf32>
    %162 = arith.mulf %161, %158 : vector<1x4xf32>
    %163 = arith.select %160, %158, %162 : vector<1x4xi1>, vector<1x4xf32>
    %c0_131 = arith.constant 0 : index
    %c0_132 = arith.constant 0 : index
    %164 = vector.load %arg5[%c0_131, %c0_132] : memref<4x16xf32, #tpu.memory_space<vmem>>, vector<4x16xf32>
    %cst_133 = arith.constant dense<0.000000e+00> : vector<1x16xf32>
    %165 = tpu.matmul %163, %164, %cst_133 {dimension_numbers = #tpu.dot_dimension_numbers<[1], [0], [0], [1], [0, 0, 1, 1], [], []>} : vector<1x4xf32>, vector<4x16xf32>, vector<1x16xf32> -> vector<1x16xf32>
    %166 = arith.addf %165, %6 : vector<1x16xf32>
    %167 = arith.negf %166 : vector<1x16xf32>
    %168 = math.exp %167 : vector<1x16xf32>
    %cst_134 = arith.constant 1.000000e+00 : f32
    %169 = vector.broadcast %cst_134 : f32 to vector<1x16xf32>
    %170 = arith.addf %169, %168 : vector<1x16xf32>
    %171 = arith.divf %169, %170 : vector<1x16xf32>
    %172 = vector.broadcast %171 : vector<1x16xf32> to vector<256x16xf32>
    %173 = arith.mulf %172, %140 : vector<256x16xf32>
    %174 = arith.truncf %173 : vector<256x16xf32> to vector<256x16xbf16>
    %c0_135 = arith.constant 0 : index
    %c0_136 = arith.constant 0 : index
    %175 = vector.load %arg6[%c0_135, %c0_136] : memref<16x8xbf16, #tpu.memory_space<vmem>>, vector<16x8xbf16>
    %cst_137 = arith.constant dense<0.000000e+00> : vector<256x8xf32>
    %176 = tpu.matmul %174, %175, %cst_137 {dimension_numbers = #tpu.dot_dimension_numbers<[1], [0], [0], [1], [0, 0, 1, 1], [], []>} : vector<256x16xbf16>, vector<16x8xbf16>, vector<256x8xf32> -> vector<256x8xf32>
    %177 = vector.broadcast %7 : vector<1x8xf32> to vector<256x8xf32>
    %178 = arith.addf %176, %177 : vector<256x8xf32>
    %c0_138 = arith.constant 0 : index
    %c0_139 = arith.constant 0 : index
    %c0_140 = arith.constant 0 : index
    %179 = vector.load %arg8[%c0_138, %c0_139, %c0_140] : memref<1x256x8xf32, #tpu.memory_space<vmem>>, vector<1x256x8xf32>
    %180 = vector.shape_cast %179 : vector<1x256x8xf32> to vector<256x8xf32>
    %181 = vector.shape_cast %178 : vector<256x8xf32> to vector<1x256x8xf32>
    tpu.vector_store %arg8[%c0_138, %c0_139, %c0_140], %181 {strides = array<i32>} : memref<1x256x8xf32, #tpu.memory_space<vmem>>, vector<1x256x8xf32>,
    return
  }
  func.func @transform_0(%arg0: i32) -> (i32, i32, i32) {
    %c0_i32 = arith.constant 0 : i32
    %c0_i32_0 = arith.constant 0 : i32
    %c0_i32_1 = arith.constant 0 : i32
    return %arg0, %c0_i32, %c0_i32_0 : i32, i32, i32
  }
  func.func @transform_1(%arg0: i32) -> (i32, i32) {
    %c0_i32 = arith.constant 0 : i32
    %c0_i32_0 = arith.constant 0 : i32
    %c0_i32_1 = arith.constant 0 : i32
    return %c0_i32, %c0_i32_0 : i32, i32
  }
  func.func @transform_2(%arg0: i32) -> (i32, i32) {
    %c0_i32 = arith.constant 0 : i32
    %c0_i32_0 = arith.constant 0 : i32
    %c0_i32_1 = arith.constant 0 : i32
    return %c0_i32, %c0_i32_0 : i32, i32
  }
  func.func @transform_3(%arg0: i32) -> (i32, i32) {
    %c0_i32 = arith.constant 0 : i32
    %c0_i32_0 = arith.constant 0 : i32
    %c0_i32_1 = arith.constant 0 : i32
    return %c0_i32, %c0_i32_0 : i32, i32
  }
  func.func @transform_4(%arg0: i32) -> (i32, i32) {
    %c0_i32 = arith.constant 0 : i32
    %c0_i32_0 = arith.constant 0 : i32
    %c0_i32_1 = arith.constant 0 : i32
    return %c0_i32, %c0_i32_0 : i32, i32
  }
  func.func @transform_5(%arg0: i32) -> (i32, i32) {
    %c0_i32 = arith.constant 0 : i32
    %c0_i32_0 = arith.constant 0 : i32
    %c0_i32_1 = arith.constant 0 : i32
    return %c0_i32, %c0_i32_0 : i32, i32
  }
  func.func @transform_6(%arg0: i32) -> (i32, i32) {
    %c0_i32 = arith.constant 0 : i32
    %c0_i32_0 = arith.constant 0 : i32
    %c0_i32_1 = arith.constant 0 : i32
    return %c0_i32, %c0_i32_0 : i32, i32
  }
  func.func @transform_7(%arg0: i32) -> (i32, i32, i32) {
    %c0_i32 = arith.constant 0 : i32
    %c0_i32_0 = arith.constant 0 : i32
    %c0_i32_1 = arith.constant 0 : i32
    return %arg0, %c0_i32, %c0_i32_0 : i32, i32, i32
  }
  func.func @transform_8(%arg0: i32) -> (i32, i32, i32) {
    %c0_i32 = arith.constant 0 : i32
    %c0_i32_0 = arith.constant 0 : i32
    %c0_i32_1 = arith.constant 0 : i32
    return %arg0, %c0_i32, %c0_i32_0 : i32, i32, i32
  }
}

</mosaic_0001>

<bundles_post_ra>
// kernel: tpu_custom_call.1
= control target key start
LH: loop header
LB: loop body
LE: loop exit
PB: predicated region body
PF: predicated region fallthrough
CT: control target
= control target key end

     0   :  { %s10000_s27 = smov 0   ;;  %s13786_s0 = inlined_call_operand.vmem [shape: f32[2,256,4], index: 0, kind: input, shape index: {}]   ;;  %s13787_s1 = inlined_call_operand.vmem [shape: f32[4,8], index: 1, kind: input, shape index: {}]   ;;  %s13788_s2 = inlined_call_operand.vmem [shape: bf16[144,24], index: 2, kind: input, shape index: {}]   ;;  %s13789_s3 = inlined_call_operand.vmem [shape: f32[16,4], index: 3, kind: input, shape index: {}]   ;;  %s13790_s4 = inlined_call_operand.vmem [shape: f32[4,16], index: 4, kind: input, shape index: {}]   ;;  %s13791_s5 = inlined_call_operand.vmem [shape: bf16[16,8], index: 5, kind: input, shape index: {}]   ;;  %s13792_s6 = inlined_call_operand.vmem [shape: f32[1,44], index: 6, kind: input, shape index: {}]   ;;  %s13793_s7 = inlined_call_operand.vmem [shape: f32[2,256,8], index: 7, kind: output, shape index: {0}]   ;;  %s13794_s8 = inlined_call_operand.vmem [shape: f32[2,256,8], index: 8, kind: output, shape index: {1}]  }
   0x1 LB: > { %s8140_s28 = sadd.s32 4294967295, %s9938_s27   ;;  %p8144_p0 = scmp.ge.s32.totalorder %s9938_s27, 1  ;;  %s9938_s27 = sphi %s10000_s27, %s19_s27  }
   0x2   : > { %p265_p1 = scmp.lt.s32.totalorder %s9938_s27, 3 }
   0x4   : > { %p266_p2 = pnand %p8144_p0, %p265_p1 }
   0x6   : > { %269 = sbr.rel (%p266_p2) target bundleno = 2500 (0x9c4), region = 48 }
   0xb   : > { %p304_p3 = scmp.lt.s32.totalorder %s8140_s28, 1  ;;  %p8151_p4 = scmp.ne.s32.totalorder %s8140_s28, 0 }
   0xd   : > { %s305_s29 = scalar_select %p304_p3, %s8140_s28, 1 }
   0xe   : > { %323 = sbr.rel (%p8151_p4) target bundleno = 74 (0x4a), region = 52 }
   0xf   : > { %s8931_s30 = sshll.u32 %s305_s29, 8 }
  0x10   : > { %s10011_s11 = scalar_lea.vmem %s13786_s0, %s8931_s30  ;;  %s10016_s14 = scalar_lea.vmem %s13793_s7, %s8931_s30 }
  0x11   : > { %s10021_s17 = scalar_lea.vmem %s13794_s8, %s8931_s30 }
  0x13   : > { %vm324_vm0 = vcmask 130048   ;;  %vm327_vm1 = vcmask 123904   ;;  %v9940_v0 = vmov 0.0  }
  0x14   : > { %325 = vst.msk [vmem:[#allocation2] sm:$0xff] %vm324_vm0, %v9940_v0  ;;  %326 = vst.msk [vmem:[#allocation2 + $0x8] sm:$0xff] %vm324_vm0, %v9940_v0 }
  0x15   : > { %329 = vst.msk [vmem:[#allocation2 + $0x18] sm:$0xff] %vm324_vm0, %v9940_v0  ;;  %330 = vst.msk [vmem:[#allocation2 + $0x20] sm:$0xff] %vm324_vm0, %v9940_v0 }
  0x16   : > { %332 = vst.msk [vmem:[#allocation2 + $0x30] sm:$0xff] %vm324_vm0, %v9940_v0  ;;  %333 = vst.msk [vmem:[#allocation2 + $0x38] sm:$0xff] %vm324_vm0, %v9940_v0 }
  0x17   : > { %335 = vst.msk [vmem:[#allocation2 + $0x48] sm:$0xff] %vm324_vm0, %v9940_v0  ;;  %336 = vst.msk [vmem:[#allocation2 + $0x50] sm:$0xff] %vm324_vm0, %v9940_v0 }
  0x18   : > { %338 = vst.msk [vmem:[#allocation2 + $0x60] sm:$0xff] %vm324_vm0, %v9940_v0  ;;  %339 = vst.msk [vmem:[#allocation2 + $0x68] sm:$0xff] %vm324_vm0, %v9940_v0 }
  0x19   : > { %341 = vst.msk [vmem:[#allocation2 + $0x78] sm:$0xff] %vm324_vm0, %v9940_v0  ;;  %342 = vst.msk [vmem:[#allocation2 + $0x80] sm:$0xff] %vm324_vm0, %v9940_v0 }
  0x1a   : > { %344 = vst.msk [vmem:[#allocation2 + $0x90] sm:$0xff] %vm324_vm0, %v9940_v0  ;;  %345 = vst.msk [vmem:[#allocation2 + $0x98] sm:$0xff] %vm324_vm0, %v9940_v0 }
  0x1b   : > { %347 = vst.msk [vmem:[#allocation2 + $0xa8] sm:$0xff] %vm324_vm0, %v9940_v0  ;;  %348 = vst.msk [vmem:[#allocation2 + $0xb0] sm:$0xff] %vm324_vm0, %v9940_v0 }
  0x1c   : > { %350 = vst.msk [vmem:[#allocation2 + $0xc0] sm:$0xff] %vm324_vm0, %v9940_v0  ;;  %351 = vst.msk [vmem:[#allocation2 + $0xc8] sm:$0xff] %vm324_vm0, %v9940_v0 }
  0x1d   : > { %353 = vst.msk [vmem:[#allocation2 + $0xd8] sm:$0xff] %vm324_vm0, %v9940_v0  ;;  %354 = vst.msk [vmem:[#allocation2 + $0xe0] sm:$0xff] %vm324_vm0, %v9940_v0 }
  0x1e   : > { %356 = vst.msk [vmem:[#allocation2 + $0xf0] sm:$0xff] %vm324_vm0, %v9940_v0  ;;  %357 = vst.msk [vmem:[#allocation2 + $0xf8] sm:$0xff] %vm324_vm0, %v9940_v0 }
  0x1f   : > { %359 = vst.msk [vmem:[#allocation2 + $0x108] sm:$0xff] %vm324_vm0, %v9940_v0  ;;  %360 = vst.msk [vmem:[#allocation2 + $0x110] sm:$0xff] %vm324_vm0, %v9940_v0 }
  0x20   : > { %362 = vst.msk [vmem:[#allocation2 + $0x120] sm:$0xff] %vm324_vm0, %v9940_v0  ;;  %363 = vst.msk [vmem:[#allocation2 + $0x128] sm:$0xff] %vm324_vm0, %v9940_v0 }
  0x21   : > { %365 = vst.msk [vmem:[#allocation2 + $0x138] sm:$0xff] %vm324_vm0, %v9940_v0  ;;  %366 = vst.msk [vmem:[#allocation2 + $0x140] sm:$0xff] %vm324_vm0, %v9940_v0 }
  0x22   : > { %368 = vst.msk [vmem:[#allocation2 + $0x150] sm:$0xff] %vm324_vm0, %v9940_v0  ;;  %369 = vst.msk [vmem:[#allocation2 + $0x158] sm:$0xff] %vm324_vm0, %v9940_v0 }
  0x23   : > { %371 = vst.msk [vmem:[#allocation2 + $0x168] sm:$0xff] %vm324_vm0, %v9940_v0  ;;  %372 = vst.msk [vmem:[#allocation2 + $0x170] sm:$0xff] %vm324_vm0, %v9940_v0 }
  0x24   : > { %374 = vst.msk [vmem:[#allocation2 + $0x180] sm:$0xff] %vm324_vm0, %v9940_v0  ;;  %375 = vst.msk [vmem:[#allocation2 + $0x188] sm:$0xff] %vm324_vm0, %v9940_v0 }
  0x25   : > { %377 = vst.msk [vmem:[#allocation2 + $0x198] sm:$0xff] %vm324_vm0, %v9940_v0  ;;  %378 = vst.msk [vmem:[#allocation2 + $0x1a0] sm:$0xff] %vm324_vm0, %v9940_v0 }
  0x26   : > { %380 = vst.msk [vmem:[#allocation3] sm:$0xff] %vm324_vm0, %v9940_v0  ;;  %381 = vst.msk [vmem:[#allocation3 + $0x8] sm:$0xff] %vm324_vm0, %v9940_v0 }
  0x27   : > { %383 = vst.msk [vmem:[#allocation3 + $0x18] sm:$0xff] %vm324_vm0, %v9940_v0  ;;  %384 = vst.msk [vmem:[#allocation3 + $0x20] sm:$0xff] %vm324_vm0, %v9940_v0 }
  0x28   : > { %386 = vst.msk [vmem:[#allocation3 + $0x30] sm:$0xff] %vm324_vm0, %v9940_v0  ;;  %387 = vst.msk [vmem:[#allocation3 + $0x38] sm:$0xff] %vm324_vm0, %v9940_v0 }
  0x29   : > { %389 = vst.msk [vmem:[#allocation3 + $0x48] sm:$0xff] %vm324_vm0, %v9940_v0  ;;  %390 = vst.msk [vmem:[#allocation3 + $0x50] sm:$0xff] %vm324_vm0, %v9940_v0 }
  0x2a   : > { %392 = vst.msk [vmem:[#allocation3 + $0x60] sm:$0xff] %vm324_vm0, %v9940_v0  ;;  %393 = vst.msk [vmem:[#allocation3 + $0x68] sm:$0xff] %vm324_vm0, %v9940_v0 }
  0x2b   : > { %395 = vst.msk [vmem:[#allocation3 + $0x78] sm:$0xff] %vm324_vm0, %v9940_v0  ;;  %396 = vst.msk [vmem:[#allocation3 + $0x80] sm:$0xff] %vm324_vm0, %v9940_v0 }
  0x2c   : > { %398 = vst.msk [vmem:[#allocation3 + $0x90] sm:$0xff] %vm324_vm0, %v9940_v0  ;;  %399 = vst.msk [vmem:[#allocation3 + $0x98] sm:$0xff] %vm324_vm0, %v9940_v0 }
  0x2d   : > { %401 = vst.msk [vmem:[#allocation3 + $0xa8] sm:$0xff] %vm324_vm0, %v9940_v0  ;;  %402 = vst.msk [vmem:[#allocation3 + $0xb0] sm:$0xff] %vm324_vm0, %v9940_v0 }
  0x2e   : > { %404 = vst.msk [vmem:[#allocation3 + $0xc0] sm:$0xff] %vm324_vm0, %v9940_v0  ;;  %405 = vst.msk [vmem:[#allocation3 + $0xc8] sm:$0xff] %vm324_vm0, %v9940_v0 }
  0x2f   : > { %407 = vst.msk [vmem:[#allocation3 + $0xd8] sm:$0xff] %vm324_vm0, %v9940_v0  ;;  %408 = vst.msk [vmem:[#allocation3 + $0xe0] sm:$0xff] %vm324_vm0, %v9940_v0 }
  0x30   : > { %410 = vst.msk [vmem:[#allocation3 + $0xf0] sm:$0xff] %vm324_vm0, %v9940_v0  ;;  %411 = vst.msk [vmem:[#allocation3 + $0xf8] sm:$0xff] %vm324_vm0, %v9940_v0 }
  0x31   : > { %413 = vst.msk [vmem:[#allocation3 + $0x108] sm:$0xff] %vm324_vm0, %v9940_v0  ;;  %414 = vst.msk [vmem:[#allocation3 + $0x110] sm:$0xff] %vm324_vm0, %v9940_v0 }
  0x32   : > { %416 = vst.msk [vmem:[#allocation3 + $0x120] sm:$0xff] %vm324_vm0, %v9940_v0  ;;  %417 = vst.msk [vmem:[#allocation3 + $0x128] sm:$0xff] %vm324_vm0, %v9940_v0 }
  0x33   : > { %419 = vst.msk [vmem:[#allocation3 + $0x138] sm:$0xff] %vm324_vm0, %v9940_v0  ;;  %420 = vst.msk [vmem:[#allocation3 + $0x140] sm:$0xff] %vm324_vm0, %v9940_v0 }
  0x34   : > { %422 = vst.msk [vmem:[#allocation3 + $0x150] sm:$0xff] %vm324_vm0, %v9940_v0  ;;  %423 = vst.msk [vmem:[#allocation3 + $0x158] sm:$0xff] %vm324_vm0, %v9940_v0 }
  0x35   : > { %425 = vst.msk [vmem:[#allocation3 + $0x168] sm:$0xff] %vm324_vm0, %v9940_v0  ;;  %426 = vst.msk [vmem:[#allocation3 + $0x170] sm:$0xff] %vm324_vm0, %v9940_v0 }
  0x36   : > { %428 = vst.msk [vmem:[#allocation3 + $0x180] sm:$0xff] %vm324_vm0, %v9940_v0  ;;  %429 = vst.msk [vmem:[#allocation3 + $0x188] sm:$0xff] %vm324_vm0, %v9940_v0 }
  0x37   : > { %431 = vst.msk [vmem:[#allocation3 + $0x198] sm:$0xff] %vm324_vm0, %v9940_v0  ;;  %432 = vst.msk [vmem:[#allocation3 + $0x1a0] sm:$0xff] %vm324_vm0, %v9940_v0 }
  0x38   : > { %328 = vst.msk [vmem:[#allocation2 + $0x10] sm:$0x3] %vm327_vm1, %v9940_v0  ;;  %331 = vst.msk [vmem:[#allocation2 + $0x28] sm:$0x3] %vm327_vm1, %v9940_v0 }
  0x39   : > { %334 = vst.msk [vmem:[#allocation2 + $0x40] sm:$0x3] %vm327_vm1, %v9940_v0  ;;  %337 = vst.msk [vmem:[#allocation2 + $0x58] sm:$0x3] %vm327_vm1, %v9940_v0 }
  0x3a   : > { %340 = vst.msk [vmem:[#allocation2 + $0x70] sm:$0x3] %vm327_vm1, %v9940_v0  ;;  %343 = vst.msk [vmem:[#allocation2 + $0x88] sm:$0x3] %vm327_vm1, %v9940_v0 }
  0x3b   : > { %346 = vst.msk [vmem:[#allocation2 + $0xa0] sm:$0x3] %vm327_vm1, %v9940_v0  ;;  %349 = vst.msk [vmem:[#allocation2 + $0xb8] sm:$0x3] %vm327_vm1, %v9940_v0 }
  0x3c   : > { %352 = vst.msk [vmem:[#allocation2 + $0xd0] sm:$0x3] %vm327_vm1, %v9940_v0  ;;  %355 = vst.msk [vmem:[#allocation2 + $0xe8] sm:$0x3] %vm327_vm1, %v9940_v0 }
  0x3d   : > { %358 = vst.msk [vmem:[#allocation2 + $0x100] sm:$0x3] %vm327_vm1, %v9940_v0  ;;  %361 = vst.msk [vmem:[#allocation2 + $0x118] sm:$0x3] %vm327_vm1, %v9940_v0 }
  0x3e   : > { %364 = vst.msk [vmem:[#allocation2 + $0x130] sm:$0x3] %vm327_vm1, %v9940_v0  ;;  %367 = vst.msk [vmem:[#allocation2 + $0x148] sm:$0x3] %vm327_vm1, %v9940_v0 }
  0x3f   : > { %370 = vst.msk [vmem:[#allocation2 + $0x160] sm:$0x3] %vm327_vm1, %v9940_v0  ;;  %373 = vst.msk [vmem:[#allocation2 + $0x178] sm:$0x3] %vm327_vm1, %v9940_v0 }
  0x40   : > { %376 = vst.msk [vmem:[#allocation2 + $0x190] sm:$0x3] %vm327_vm1, %v9940_v0  ;;  %379 = vst.msk [vmem:[#allocation2 + $0x1a8] sm:$0x3] %vm327_vm1, %v9940_v0 }
  0x41   : > { %382 = vst.msk [vmem:[#allocation3 + $0x10] sm:$0x3] %vm327_vm1, %v9940_v0  ;;  %385 = vst.msk [vmem:[#allocation3 + $0x28] sm:$0x3] %vm327_vm1, %v9940_v0 }
  0x42   : > { %388 = vst.msk [vmem:[#allocation3 + $0x40] sm:$0x3] %vm327_vm1, %v9940_v0  ;;  %391 = vst.msk [vmem:[#allocation3 + $0x58] sm:$0x3] %vm327_vm1, %v9940_v0 }
  0x43   : > { %394 = vst.msk [vmem:[#allocation3 + $0x70] sm:$0x3] %vm327_vm1, %v9940_v0  ;;  %397 = vst.msk [vmem:[#allocation3 + $0x88] sm:$0x3] %vm327_vm1, %v9940_v0 }
  0x44   : > { %400 = vst.msk [vmem:[#allocation3 + $0xa0] sm:$0x3] %vm327_vm1, %v9940_v0  ;;  %403 = vst.msk [vmem:[#allocation3 + $0xb8] sm:$0x3] %vm327_vm1, %v9940_v0 }
  0x45   : > { %406 = vst.msk [vmem:[#allocation3 + $0xd0] sm:$0x3] %vm327_vm1, %v9940_v0  ;;  %409 = vst.msk [vmem:[#allocation3 + $0xe8] sm:$0x3] %vm327_vm1, %v9940_v0 }
  0x46   : > { %412 = vst.msk [vmem:[#allocation3 + $0x100] sm:$0x3] %vm327_vm1, %v9940_v0  ;;  %415 = vst.msk [vmem:[#allocation3 + $0x118] sm:$0x3] %vm327_vm1, %v9940_v0 }
  0x47   : > { %418 = vst.msk [vmem:[#allocation3 + $0x130] sm:$0x3] %vm327_vm1, %v9940_v0  ;;  %421 = vst.msk [vmem:[#allocation3 + $0x148] sm:$0x3] %vm327_vm1, %v9940_v0 }
  0x48   : > { %424 = vst.msk [vmem:[#allocation3 + $0x160] sm:$0x3] %vm327_vm1, %v9940_v0  ;;  %427 = vst.msk [vmem:[#allocation3 + $0x178] sm:$0x3] %vm327_vm1, %v9940_v0 }
  0x49   : > { %430 = vst.msk [vmem:[#allocation3 + $0x190] sm:$0x3] %vm327_vm1, %v9940_v0  ;;  %433 = vst.msk [vmem:[#allocation3 + $0x1a8] sm:$0x3] %vm327_vm1, %v9940_v0 }
  0x4a PF: > { %v467_v1 = vld [vmem:[%s13787_s1] sm:$0xf]  ;;  %vm565_vm2 = vcmask 1043456   ;;  %vm468_vm3 = vcmask 31744   ;;  %v436_v3 = vld [vmem:[%s10011_s11 + $0x8] sm:$0xff]  ;;  %v437_v4 = vld [vmem:[%s10011_s11 + $0x10] sm:$0xff] }
  0x4b   : > { %v435_v2 = vld [vmem:[%s10011_s11] sm:$0xff]  ;;  %9565 = vmatprep.subr.msk.mxu0 %vm565_vm2, %v467_v1  ;;  %v438_v5 = vld [vmem:[%s10011_s11 + $0x18] sm:$0xff]  ;;  %v440_v7 = vld [vmem:[%s10011_s11 + $0x28] sm:$0xff]  ;;  %s9941_s22 = smov 120   ;;  %s9942_s23 = smov 16   ;;  %vm1495_vm4 = vcmask 125952  }
  0x4c   : > { %9567 = vmatprep.mubr.msk.f32.mxu0 %vm468_vm3, %v435_v2  ;;  %9566 = vmatpush3.msk.msra.mxu0 %vm565_vm2, %v467_v1  ;;  %v439_v6 = vld [vmem:[%s10011_s11 + $0x20] sm:$0xff]  ;;  %v441_v8 = vld [vmem:[%s10011_s11 + $0x30] sm:$0xff]  ;;  %v442_v9 = vld [vmem:[%s10011_s11 + $0x38] sm:$0xff]  ;;  %s9943_s24 = smov 32   ;;  %vm1752_vm5 = vcmask 257152   ;;  %vm2009_vm6 = vcmask 388352  }
  0x4d   : > { %9568 = vmatmul.mubr.msk.f32.vlgmr.msra.gmra.mxu0 %vm468_vm3, %v436_v3  ;;  %v443_v10 = vld [vmem:[%s10011_s11 + $0x40] sm:$0xff]  ;;  %v1529_v13 = vld [vmem:[#allocation2 + $0x9] sm:$0xff]  ;;  %v446_v22 = vld [vmem:[%s10011_s11 + $0x58] sm:$0xff]  ;;  %s9944_s25 = smov 8   ;;  %vm794_vm7 = vcmask 64512   ;;  %vm1302_vm8 = vcmask 130048  }
  0x4e   : > { %9570 = vmatprep.mubr.msk.f32.mxu0 %vm468_vm3, %v437_v4  ;;  %v10262_v11 = vld [vmem:[%s13792_s6] ss:$0 sm:$0xff]  ;;  %v1528_v12 = vld [vmem:[#allocation2 + $0x1] sm:$0xff]  ;;  %v8967_v15 = vpack.c.bf16 %v1529_v13, %v1529_v13  ;;  %v1786_v17 = vld [vmem:[#allocation2 + $0xa] sm:$0xff]  ;;  %s9945_s29 = smov 64   ;;  %s9946_s30 = smov 48  }
  0x4f   : > { %1074 = vrot.lane.b32.xlu0 %v10262_v11, %s9941_s22  ;;  %v8966_v14 = vpack.c.bf16 %v1528_v12, %v1528_v12  ;;  %v1785_v16 = vld [vmem:[#allocation2 + $0x2] sm:$0xff]  ;;  %v445_v20 = vld [vmem:[%s10011_s11 + $0x50] sm:$0xff]  ;;  %v8999_v21 = vpack.c.bf16 %v1786_v17, %v1786_v17  ;;  %v450_v26 = vld [vmem:[%s10011_s11 + $0x78] sm:$0xff]  ;;  %s9947_s9 = smov 80   ;;  %s9949_s19 = smov 112   ;;  %vm2266_vm9 = vcmask 519552  }
  0x50   : > { %v444_v18 = vld [vmem:[%s10011_s11 + $0x48] sm:$0xff]  ;;  %v8998_v19 = vpack.c.bf16 %v1785_v16, %v1785_v16  ;;  %v447_v23 = vld [vmem:[%s10011_s11 + $0x60] sm:$0xff]  ;;  %v449_v25 = vld [vmem:[%s10011_s11 + $0x70] sm:$0xff]  ;;  %s9950_s26 = smov 96   ;;  %vm2523_vm10 = vcmask 650752   ;;  %vm2780_vm11 = vcmask 781952  }
  0x51   : > { %9571 = vmatmul.mubr.msk.f32.gmra.mxu0 %vm468_vm3, %v438_v5  ;;  %1656 = vrot.lane.b32.xlu1 %v8966_v14, %s9942_s23  ;;  %v448_v24 = vld [vmem:[%s10011_s11 + $0x68] sm:$0xff]  ;;  %v451_v27 = vld [vmem:[%s10011_s11 + $0x80] sm:$0xff]  ;;  %v453_v29 = vld [vmem:[%s10011_s11 + $0x90] sm:$0xff]  ;;  %vm3038_vm12 = vcmask 913152   ;;  %vm3295_vm13 = vcmask 1044352   ;;  %s9954_s16 = smov 92  }
  0x52   : > { %9573 = vmatprep.mubr.msk.f32.mxu0 %vm468_vm3, %v439_v6  ;;  %v452_v28 = vld [vmem:[%s10011_s11 + $0x88] sm:$0xff]  ;;  %v454_v30 = vld [vmem:[%s10011_s11 + $0x98] sm:$0xff]  ;;  %v455_v31 = vld [vmem:[%s10011_s11 + $0xa0] sm:$0xff] }
  0x53   : > { %1658 = vrot.lane.b32.xlu0 %v8967_v15, %s9942_s23  ;;  %v456_v32 = vld [vmem:[%s10011_s11 + $0xa8] sm:$0xff]  ;;  %v457_v33 = vld [vmem:[%s10011_s11 + $0xb0] sm:$0xff]  ;;  %v458_v34 = vld [vmem:[%s10011_s11 + $0xb8] sm:$0xff] }
  0x54   : > { %v459_v35 = vld [vmem:[%s10011_s11 + $0xc0] sm:$0xff]  ;;  %v460_v36 = vld [vmem:[%s10011_s11 + $0xc8] sm:$0xff]  ;;  %v461_v37 = vld [vmem:[%s10011_s11 + $0xd0] sm:$0xff] }
  0x55   : > { %9574 = vmatmul.mubr.msk.f32.gmra.mxu0 %vm468_vm3, %v440_v7  ;;  %1913 = vrot.lane.b32.xlu1 %v8998_v19, %s9943_s24  ;;  %v462_v38 = vld [vmem:[%s10011_s11 + $0xd8] sm:$0xff]  ;;  %v463_v39 = vld [vmem:[%s10011_s11 + $0xe0] sm:$0xff]  ;;  %v464_v40 = vld [vmem:[%s10011_s11 + $0xe8] sm:$0xff] }
  0x56   : > { %9576 = vmatprep.mubr.msk.f32.mxu0 %vm468_vm3, %v441_v8  ;;  %v465_v41 = vld [vmem:[%s10011_s11 + $0xf0] sm:$0xff]  ;;  %v466_v42 = vld [vmem:[%s10011_s11 + $0xf8] sm:$0xff]  ;;  %v1335_v45 = vld [vmem:[#allocation2] sm:$0xff] }
  0x57   : > { %1915 = vrot.lane.b32.xlu0 %v8999_v21, %s9943_s24  ;;  %v1336_v46 = vld [vmem:[#allocation2 + $0x8] sm:$0xff]  ;;  %v8934_v47 = vpack.c.bf16 %v1335_v45, %v1335_v45 }
  0x58   : > { %v8935_v48 = vpack.c.bf16 %v1336_v46, %v1336_v46 }
  0x59   : > { %9577 = vmatmul.mubr.msk.f32.gmra.mxu0 %vm468_vm3, %v442_v9  ;;  %1496 = vst.msk [vmem:[#allocation4] sm:$0xf] %vm1495_vm4, %v8934_v47 }
  0x5a   : > { %9579 = vmatprep.mubr.msk.f32.mxu0 %vm468_vm3, %v443_v10  ;;  %1497 = vst.msk [vmem:[#allocation4 + $0x8] sm:$0xf] %vm1495_vm4, %v8935_v48 }
  0x5d   : > { %9580 = vmatmul.mubr.msk.f32.gmra.mxu0 %vm468_vm3, %v444_v18 }
  0x5e   : > { %9582 = vmatprep.mubr.msk.f32.mxu0 %vm468_vm3, %v445_v20 }
  0x61   : > { %9583 = vmatmul.mubr.msk.f32.gmra.mxu0 %vm468_vm3, %v446_v22 }
  0x62   : > { %9585 = vmatprep.mubr.msk.f32.mxu0 %vm468_vm3, %v447_v23 }
  0x65   : > { %9586 = vmatmul.mubr.msk.f32.gmra.mxu0 %vm468_vm3, %v448_v24 }
  0x66   : > { %9588 = vmatprep.mubr.msk.f32.mxu0 %vm468_vm3, %v449_v25 }
  0x69   : > { %9589 = vmatmul.mubr.msk.f32.gmra.mxu0 %vm468_vm3, %v450_v26 }
  0x6a   : > { %9591 = vmatprep.mubr.msk.f32.mxu0 %vm468_vm3, %v451_v27 }
  0x6d   : > { %9592 = vmatmul.mubr.msk.f32.gmra.mxu0 %vm468_vm3, %v452_v28 }
  0x6e   : > { %9594 = vmatprep.mubr.msk.f32.mxu0 %vm468_vm3, %v453_v29 }
  0x71   : > { %9595 = vmatmul.mubr.msk.f32.gmra.mxu0 %vm468_vm3, %v454_v30 }
  0x72   : > { %9597 = vmatprep.mubr.msk.f32.mxu0 %vm468_vm3, %v455_v31 }
  0x75   : > { %9598 = vmatmul.mubr.msk.f32.gmra.mxu0 %vm468_vm3, %v456_v32 }
  0x76   : > { %9600 = vmatprep.mubr.msk.f32.mxu0 %vm468_vm3, %v457_v33 }
  0x79   : > { %9601 = vmatmul.mubr.msk.f32.gmra.mxu0 %vm468_vm3, %v458_v34 }
  0x7a   : > { %9603 = vmatprep.mubr.msk.f32.mxu0 %vm468_vm3, %v459_v35 }
  0x7d   : > { %9604 = vmatmul.mubr.msk.f32.gmra.mxu0 %vm468_vm3, %v460_v36 }
  0x7e   : > { %9606 = vmatprep.mubr.msk.f32.mxu0 %vm468_vm3, %v461_v37 }
  0x81   : > { %9607 = vmatmul.mubr.msk.f32.gmra.mxu0 %vm468_vm3, %v462_v38 }
  0x82   : > { %9609 = vmatprep.mubr.msk.f32.mxu0 %vm468_vm3, %v463_v39 }
  0x85   : > { %9610 = vmatmul.mubr.msk.f32.gmra.mxu0 %vm468_vm3, %v464_v40 }
  0x86   : > { %9612 = vmatprep.mubr.msk.f32.mxu0 %vm468_vm3, %v465_v41 }
  0x89   : > { %9613 = vmatmul.mubr.msk.f32.gmra.mxu0 %vm468_vm3, %v466_v42 }
  0xc1   : > { %v10319_v43 = vpop.permute.xlu0 %1074 }
  0xc3   : > { %v1657_v44 = vpop.permute.xlu1 %1656 }
  0xc4   : > { %1753 = vst.msk [vmem:[#allocation4] sm:$0xf] %vm1752_vm5, %v1657_v44 }
  0xc5   : > { %v1659_v49 = vpop.permute.xlu0 %1658 }
  0xc6   : > { %1754 = vst.msk [vmem:[#allocation4 + $0x8] sm:$0xf] %vm1752_vm5, %v1659_v49 }
  0xc7   : > { %v1914_v50 = vpop.permute.xlu1 %1913 }
  0xc8   : > { %2010 = vst.msk [vmem:[#allocation4] sm:$0xf] %vm2009_vm6, %v1914_v50 }
  0xc9   : > { %v1916_v51 = vpop.permute.xlu0 %1915 }
  0xca   : > { %2011 = vst.msk [vmem:[#allocation4 + $0x8] sm:$0xf] %vm2009_vm6, %v1916_v51 }
 0x10d   : > { %v10327_v52 = vpop.f32.mrf.mxu0 }
 0x10e   : > { %1175 = vrot.lane.b32.xlu1 %v10327_v52, %s9944_s25  ;;  %v865_v54 = vmul.f32 %v10327_v52, %v10327_v52  ;;  %v796_v58 = vsel %vm794_vm7, %v10327_v52, 0.0 }
 0x10f   : > { %v10331_v53 = vpop.f32.mrf.mxu0 }
 0x110   : > { %v795_v55 = vsel %vm794_vm7, %v10331_v53, 0.0  ;;  %v864_v56 = vmul.f32 %v10331_v53, %v10331_v53  ;;  %1173 = vrot.lane.b32.xlu0 %v10331_v53, %s9944_s25  ;;  %v897_v63 = vsel %vm794_vm7, %v865_v54, 0.0 }
 0x111   : > { %v10341_v57 = vpop.f32.mrf.mxu0  ;;  %v797_v61 = vadd.f32 %v796_v58, %v795_v55 }
 0x112   : > { %v896_v59 = vsel %vm794_vm7, %v864_v56, 0.0  ;;  %v867_v60 = vmul.f32 %v10341_v57, %v10341_v57  ;;  %v800_v0 = vsel %vm794_vm7, %v10341_v57, 0.0 }
 0x113   : > { %v10348_v62 = vpop.f32.mrf.mxu0  ;;  %v898_v3 = vadd.f32 %v897_v63, %v896_v59 }
 0x114   : > { %v798_v1 = vsel %vm794_vm7, %v10348_v62, 0.0  ;;  %v866_v2 = vmul.f32 %v10348_v62, %v10348_v62  ;;  %1177 = vrot.lane.b32.xlu1 %v10348_v62, %s9944_s25  ;;  %1179 = vrot.lane.b32.xlu0 %v10341_v57, %s9944_s25  ;;  %v901_v6 = vsel %vm794_vm7, %v867_v60, 0.0 }
 0x115   : > { %v799_v4 = vadd.f32 %v798_v1, %v797_v61  ;;  %v10361_v5 = vpop.f32.mrf.mxu0 }
 0x116   : > { %v899_v7 = vsel %vm794_vm7, %v866_v2, 0.0  ;;  %v869_v8 = vmul.f32 %v10361_v5, %v10361_v5  ;;  %v804_v13 = vsel %vm794_vm7, %v10361_v5, 0.0 }
 0x117   : > { %v900_v9 = vadd.f32 %v899_v7, %v898_v3  ;;  %v10367_v10 = vpop.f32.mrf.mxu0  ;;  %v801_v12 = vadd.f32 %v800_v0, %v799_v4 }
 0x118   : > { %v802_v14 = vsel %vm794_vm7, %v10367_v10, 0.0  ;;  %v868_v15 = vmul.f32 %v10367_v10, %v10367_v10  ;;  %1181 = vrot.lane.b32.xlu1 %v10367_v10, %s9944_s25  ;;  %1183 = vrot.lane.b32.xlu0 %v10361_v5, %s9944_s25  ;;  %v905_v19 = vsel %vm794_vm7, %v869_v8, 0.0 }
 0x119   : > { %v803_v16 = vadd.f32 %v802_v14, %v801_v12  ;;  %v902_v17 = vadd.f32 %v901_v6, %v900_v9  ;;  %v10379_v18 = vpop.f32.mrf.mxu0 }
 0x11a   : > { %v903_v20 = vsel %vm794_vm7, %v868_v15, 0.0  ;;  %v871_v21 = vmul.f32 %v10379_v18, %v10379_v18  ;;  %v808_v25 = vsel %vm794_vm7, %v10379_v18, 0.0 }
 0x11b   : > { %v904_v22 = vadd.f32 %v903_v20, %v902_v17  ;;  %v10385_v23 = vpop.f32.mrf.mxu0  ;;  %v805_v24 = vadd.f32 %v804_v13, %v803_v16 }
 0x11c   : > { %v806_v26 = vsel %vm794_vm7, %v10385_v23, 0.0  ;;  %v870_v27 = vmul.f32 %v10385_v23, %v10385_v23  ;;  %1185 = vrot.lane.b32.xlu1 %v10385_v23, %s9944_s25  ;;  %1187 = vrot.lane.b32.xlu0 %v10379_v18, %s9944_s25  ;;  %v909_v31 = vsel %vm794_vm7, %v871_v21, 0.0 }
 0x11d   : > { %v807_v28 = vadd.f32 %v806_v26, %v805_v24  ;;  %v906_v29 = vadd.f32 %v905_v19, %v904_v22  ;;  %v10397_v30 = vpop.f32.mrf.mxu0 }
 0x11e   : > { %v907_v32 = vsel %vm794_vm7, %v870_v27, 0.0  ;;  %v873_v33 = vmul.f32 %v10397_v30, %v10397_v30  ;;  %v812_v37 = vsel %vm794_vm7, %v10397_v30, 0.0 }
 0x11f   : > { %v908_v34 = vadd.f32 %v907_v32, %v906_v29  ;;  %v10403_v35 = vpop.f32.mrf.mxu0  ;;  %v809_v36 = vadd.f32 %v808_v25, %v807_v28 }
 0x120   : > { %v810_v38 = vsel %vm794_vm7, %v10403_v35, 0.0  ;;  %v872_v39 = vmul.f32 %v10403_v35, %v10403_v35  ;;  %1189 = vrot.lane.b32.xlu1 %v10403_v35, %s9944_s25  ;;  %1191 = vrot.lane.b32.xlu0 %v10397_v30, %s9944_s25  ;;  %v913_v44 = vsel %vm794_vm7, %v873_v33, 0.0 }
 0x121   : > { %v811_v40 = vadd.f32 %v810_v38, %v809_v36  ;;  %v910_v41 = vadd.f32 %v909_v31, %v908_v34  ;;  %v10415_v42 = vpop.f32.mrf.mxu0 }
 0x122   : > { %v911_v45 = vsel %vm794_vm7, %v872_v39, 0.0  ;;  %v875_v46 = vmul.f32 %v10415_v42, %v10415_v42  ;;  %v816_v50 = vsel %vm794_vm7, %v10415_v42, 0.0 }
 0x123   : > { %v912_v47 = vadd.f32 %v911_v45, %v910_v41  ;;  %v10421_v48 = vpop.f32.mrf.mxu0  ;;  %v813_v49 = vadd.f32 %v812_v37, %v811_v40 }
 0x124   : > { %v814_v51 = vsel %vm794_vm7, %v10421_v48, 0.0  ;;  %v874_v54 = vmul.f32 %v10421_v48, %v10421_v48  ;;  %1193 = vrot.lane.b32.xlu1 %v10421_v48, %s9944_s25  ;;  %1195 = vrot.lane.b32.xlu0 %v10415_v42, %s9944_s25  ;;  %v917_v59 = vsel %vm794_vm7, %v875_v46, 0.0 }
 0x125   : > { %v815_v55 = vadd.f32 %v814_v51, %v813_v49  ;;  %v914_v56 = vadd.f32 %v913_v44, %v912_v47  ;;  %v10433_v58 = vpop.f32.mrf.mxu0 }
 0x126   : > { %v915_v60 = vsel %vm794_vm7, %v874_v54, 0.0  ;;  %v877_v61 = vmul.f32 %v10433_v58, %v10433_v58  ;;  %v820_v2 = vsel %vm794_vm7, %v10433_v58, 0.0 }
 0x127   : > { %v916_v63 = vadd.f32 %v915_v60, %v914_v56  ;;  %v10439_v0 = vpop.f32.mrf.mxu0  ;;  %v817_v1 = vadd.f32 %v816_v50, %v815_v55 }
 0x128   : > { %v818_v3 = vsel %vm794_vm7, %v10439_v0, 0.0  ;;  %v876_v4 = vmul.f32 %v10439_v0, %v10439_v0  ;;  %1197 = vrot.lane.b32.xlu1 %v10439_v0, %s9944_s25  ;;  %1199 = vrot.lane.b32.xlu0 %v10433_v58, %s9944_s25  ;;  %v921_v9 = vsel %vm794_vm7, %v877_v61, 0.0 }
 0x129   : > { %v819_v6 = vadd.f32 %v818_v3, %v817_v1  ;;  %v918_v7 = vadd.f32 %v917_v59, %v916_v63  ;;  %v10451_v8 = vpop.f32.mrf.mxu0 }
 0x12a   : > { %v919_v12 = vsel %vm794_vm7, %v876_v4, 0.0  ;;  %v879_v13 = vmul.f32 %v10451_v8, %v10451_v8  ;;  %v824_v17 = vsel %vm794_vm7, %v10451_v8, 0.0 }
 0x12b   : > { %v920_v14 = vadd.f32 %v919_v12, %v918_v7  ;;  %v10457_v15 = vpop.f32.mrf.mxu0  ;;  %v821_v16 = vadd.f32 %v820_v2, %v819_v6 }
 0x12c   : > { %v822_v19 = vsel %vm794_vm7, %v10457_v15, 0.0  ;;  %v878_v20 = vmul.f32 %v10457_v15, %v10457_v15  ;;  %1201 = vrot.lane.b32.xlu1 %v10457_v15, %s9944_s25  ;;  %1203 = vrot.lane.b32.xlu0 %v10451_v8, %s9944_s25  ;;  %v925_v25 = vsel %vm794_vm7, %v879_v13, 0.0 }
 0x12d   : > { %v823_v21 = vadd.f32 %v822_v19, %v821_v16  ;;  %v922_v22 = vadd.f32 %v921_v9, %v920_v14  ;;  %v10469_v24 = vpop.f32.mrf.mxu0 }
 0x12e   : > { %v923_v26 = vsel %vm794_vm7, %v878_v20, 0.0  ;;  %v881_v27 = vmul.f32 %v10469_v24, %v10469_v24  ;;  %v828_v32 = vsel %vm794_vm7, %v10469_v24, 0.0 }
 0x12f   : > { %v924_v28 = vadd.f32 %v923_v26, %v922_v22  ;;  %v10475_v29 = vpop.f32.mrf.mxu0  ;;  %v825_v31 = vadd.f32 %v824_v17, %v823_v21 }
 0x130   : > { %v826_v33 = vsel %vm794_vm7, %v10475_v29, 0.0  ;;  %v880_v34 = vmul.f32 %v10475_v29, %v10475_v29  ;;  %1205 = vrot.lane.b32.xlu1 %v10475_v29, %s9944_s25  ;;  %1207 = vrot.lane.b32.xlu0 %v10469_v24, %s9944_s25  ;;  %v929_v39 = vsel %vm794_vm7, %v881_v27, 0.0 }
 0x131   : > { %v827_v36 = vadd.f32 %v826_v33, %v825_v31  ;;  %v926_v37 = vadd.f32 %v925_v25, %v924_v28  ;;  %v10487_v38 = vpop.f32.mrf.mxu0 }
 0x132   : > { %v927_v40 = vsel %vm794_vm7, %v880_v34, 0.0  ;;  %v883_v41 = vmul.f32 %v10487_v38, %v10487_v38  ;;  %v832_v47 = vsel %vm794_vm7, %v10487_v38, 0.0 }
 0x133   : > { %v928_v44 = vadd.f32 %v927_v40, %v926_v37  ;;  %v10493_v45 = vpop.f32.mrf.mxu0  ;;  %v829_v46 = vadd.f32 %v828_v32, %v827_v36 }
 0x134   : > { %v830_v49 = vsel %vm794_vm7, %v10493_v45, 0.0  ;;  %v882_v50 = vmul.f32 %v10493_v45, %v10493_v45  ;;  %1209 = vrot.lane.b32.xlu1 %v10493_v45, %s9944_s25  ;;  %1211 = vrot.lane.b32.xlu0 %v10487_v38, %s9944_s25  ;;  %v933_v56 = vsel %vm794_vm7, %v883_v41, 0.0 }
 0x135   : > { %v831_v51 = vadd.f32 %v830_v49, %v829_v46  ;;  %v930_v54 = vadd.f32 %v929_v39, %v928_v44  ;;  %v10505_v55 = vpop.f32.mrf.mxu0 }
 0x136   : > { %v931_v59 = vsel %vm794_vm7, %v882_v50, 0.0  ;;  %v885_v60 = vmul.f32 %v10505_v55, %v10505_v55  ;;  %v836_v2 = vsel %vm794_vm7, %v10505_v55, 0.0 }
 0x137   : > { %v932_v61 = vadd.f32 %v931_v59, %v930_v54  ;;  %v10511_v63 = vpop.f32.mrf.mxu0  ;;  %v833_v1 = vadd.f32 %v832_v47, %v831_v51 }
 0x138   : > { %v834_v3 = vsel %vm794_vm7, %v10511_v63, 0.0  ;;  %v884_v4 = vmul.f32 %v10511_v63, %v10511_v63  ;;  %1213 = vrot.lane.b32.xlu1 %v10511_v63, %s9944_s25  ;;  %1215 = vrot.lane.b32.xlu0 %v10505_v55, %s9944_s25  ;;  %v937_v12 = vsel %vm794_vm7, %v885_v60, 0.0 }
 0x139   : > { %v835_v6 = vadd.f32 %v834_v3, %v833_v1  ;;  %v934_v7 = vadd.f32 %v933_v56, %v932_v61  ;;  %v10523_v9 = vpop.f32.mrf.mxu0 }
 0x13a   : > { %v935_v13 = vsel %vm794_vm7, %v884_v4, 0.0  ;;  %v887_v14 = vmul.f32 %v10523_v9, %v10523_v9  ;;  %v840_v20 = vsel %vm794_vm7, %v10523_v9, 0.0 }
 0x13b   : > { %v936_v16 = vadd.f32 %v935_v13, %v934_v7  ;;  %v10529_v17 = vpop.f32.mrf.mxu0  ;;  %v837_v19 = vadd.f32 %v836_v2, %v835_v6 }
 0x13c   : > { %v838_v21 = vsel %vm794_vm7, %v10529_v17, 0.0  ;;  %v886_v22 = vmul.f32 %v10529_v17, %v10529_v17  ;;  %1217 = vrot.lane.b32.xlu1 %v10529_v17, %s9944_s25  ;;  %1219 = vrot.lane.b32.xlu0 %v10523_v9, %s9944_s25  ;;  %v941_v28 = vsel %vm794_vm7, %v887_v14, 0.0 }
 0x13d   : > { %v839_v25 = vadd.f32 %v838_v21, %v837_v19  ;;  %v938_v26 = vadd.f32 %v937_v12, %v936_v16  ;;  %v10541_v27 = vpop.f32.mrf.mxu0 }
 0x13e   : > { %v939_v31 = vsel %vm794_vm7, %v886_v22, 0.0  ;;  %v889_v32 = vmul.f32 %v10541_v27, %v10541_v27  ;;  %v844_v37 = vsel %vm794_vm7, %v10541_v27, 0.0 }
 0x13f   : > { %v940_v33 = vadd.f32 %v939_v31, %v938_v26  ;;  %v10547_v34 = vpop.f32.mrf.mxu0  ;;  %v841_v36 = vadd.f32 %v840_v20, %v839_v25 }
 0x140   : > { %v842_v39 = vsel %vm794_vm7, %v10547_v34, 0.0  ;;  %v888_v40 = vmul.f32 %v10547_v34, %v10547_v34  ;;  %1221 = vrot.lane.b32.xlu1 %v10547_v34, %s9944_s25  ;;  %1223 = vrot.lane.b32.xlu0 %v10541_v27, %s9944_s25  ;;  %v945_v47 = vsel %vm794_vm7, %v889_v32, 0.0 }
 0x141   : > { %v843_v41 = vadd.f32 %v842_v39, %v841_v36  ;;  %v942_v44 = vadd.f32 %v941_v28, %v940_v33  ;;  %v10559_v46 = vpop.f32.mrf.mxu0 }
 0x142   : > { %v943_v49 = vsel %vm794_vm7, %v888_v40, 0.0  ;;  %v891_v50 = vmul.f32 %v10559_v46, %v10559_v46  ;;  %v848_v59 = vsel %vm794_vm7, %v10559_v46, 0.0 }
 0x143   : > { %v944_v51 = vadd.f32 %v943_v49, %v942_v44  ;;  %v10565_v54 = vpop.f32.mrf.mxu0  ;;  %v845_v56 = vadd.f32 %v844_v37, %v843_v41 }
 0x144   : > { %v846_v60 = vsel %vm794_vm7, %v10565_v54, 0.0  ;;  %v890_v61 = vmul.f32 %v10565_v54, %v10565_v54  ;;  %1225 = vrot.lane.b32.xlu1 %v10565_v54, %s9944_s25  ;;  %1227 = vrot.lane.b32.xlu0 %v10559_v46, %s9944_s25  ;;  %v949_v4 = vsel %vm794_vm7, %v891_v50, 0.0 }
 0x145   : > { %v847_v1 = vadd.f32 %v846_v60, %v845_v56  ;;  %v946_v2 = vadd.f32 %v945_v47, %v944_v51  ;;  %v10577_v3 = vpop.f32.mrf.mxu0 }
 0x146   : > { %v947_v6 = vsel %vm794_vm7, %v890_v61, 0.0  ;;  %v893_v7 = vmul.f32 %v10577_v3, %v10577_v3  ;;  %v852_v16 = vsel %vm794_vm7, %v10577_v3, 0.0 }
 0x147   : > { %v948_v12 = vadd.f32 %v947_v6, %v946_v2  ;;  %v10583_v13 = vpop.f32.mrf.mxu0  ;;  %v849_v14 = vadd.f32 %v848_v59, %v847_v1 }
 0x148   : > { %v850_v19 = vsel %vm794_vm7, %v10583_v13, 0.0  ;;  %v892_v20 = vmul.f32 %v10583_v13, %v10583_v13  ;;  %1229 = vrot.lane.b32.xlu1 %v10583_v13, %s9944_s25  ;;  %1231 = vrot.lane.b32.xlu0 %v10577_v3, %s9944_s25  ;;  %v953_v26 = vsel %vm794_vm7, %v893_v7, 0.0 }
 0x149   : > { %v851_v21 = vadd.f32 %v850_v19, %v849_v14  ;;  %v950_v22 = vadd.f32 %v949_v4, %v948_v12  ;;  %v10595_v25 = vpop.f32.mrf.mxu0 }
 0x14a   : > { %v951_v28 = vsel %vm794_vm7, %v892_v20, 0.0  ;;  %v895_v31 = vmul.f32 %v10595_v25, %v10595_v25  ;;  %v856_v37 = vsel %vm794_vm7, %v10595_v25, 0.0 }
 0x14b   : > { %v952_v32 = vadd.f32 %v951_v28, %v950_v22  ;;  %v10601_v33 = vpop.f32.mrf.mxu0  ;;  %v853_v36 = vadd.f32 %v852_v16, %v851_v21 }
 0x14c   : > { %v854_v39 = vsel %vm794_vm7, %v10601_v33, 0.0  ;;  %v894_v40 = vmul.f32 %v10601_v33, %v10601_v33  ;;  %1233 = vrot.lane.b32.xlu1 %v10601_v33, %s9944_s25  ;;  %1235 = vrot.lane.b32.xlu0 %v10595_v25, %s9944_s25  ;;  %v957_v47 = vsel %vm794_vm7, %v895_v31, 0.0 }
 0x14d   : > { %v855_v41 = vadd.f32 %v854_v39, %v853_v36  ;;  %v954_v44 = vadd.f32 %v953_v26, %v952_v32 }
 0x14e   : > { %v955_v49 = vsel %vm794_vm7, %v894_v40, 0.0 }
 0x14f   : > { %v857_v50 = vadd.f32 %v856_v37, %v855_v41  ;;  %v956_v51 = vadd.f32 %v955_v49, %v954_v44 }
 0x151   : > { %v858_v56 = vrot.slane %v857_v50, 4  ;;  %v958_v59 = vadd.f32 %v957_v47, %v956_v51 }
 0x153   : > { %v859_v60 = vadd.f32 %v858_v56, %v857_v50  ;;  %v959_v61 = vrot.slane %v958_v59, 4 }
 0x155   : > { %v860_v1 = vrot.slane %v859_v60, 2  ;;  %v960_v2 = vadd.f32 %v959_v61, %v958_v59 }
 0x157   : > { %v861_v4 = vadd.f32 %v860_v1, %v859_v60  ;;  %v961_v6 = vrot.slane %v960_v2, 2 }
 0x159   : > { %v862_v7 = vrot.slane %v861_v4, 1  ;;  %v962_v12 = vadd.f32 %v961_v6, %v960_v2 }
 0x15b   : > { %v863_v14 = vadd.f32 %v862_v7, %v861_v4  ;;  %v963_v16 = vrot.slane %v962_v12, 1 }
 0x15d   : > { %v964_v19 = vadd.f32 %v963_v16, %v962_v12  ;;  %v10615_v20 = vmul.f32 0.00390625, %v863_v14 }
 0x15f   : > { %v966_v21 = vmul.f32 0.00390625, %v964_v19  ;;  %v967_v22 = vmul.f32 %v10615_v20, %v10615_v20  ;;  %v1000_v32 = vsub.f32 %v10601_v33, %v10615_v20  ;;  %v970_v36 = vsub.f32 %v10331_v53, %v10615_v20 }
 0x160   : > { %v971_v37 = vsub.f32 %v10327_v52, %v10615_v20  ;;  %v972_v39 = vsub.f32 %v10348_v62, %v10615_v20  ;;  %v973_v40 = vsub.f32 %v10341_v57, %v10615_v20  ;;  %v974_v41 = vsub.f32 %v10367_v10, %v10615_v20 }
 0x161   : > { %v968_v26 = vsub.f32 %v966_v21, %v967_v22  ;;  %v975_v44 = vsub.f32 %v10361_v5, %v10615_v20  ;;  %v976_v33 = vsub.f32 %v10385_v23, %v10615_v20  ;;  %v977_v53 = vsub.f32 %v10379_v18, %v10615_v20 }
 0x162   : > { %v978_v52 = vsub.f32 %v10403_v35, %v10615_v20  ;;  %v979_v62 = vsub.f32 %v10397_v30, %v10615_v20  ;;  %v980_v57 = vsub.f32 %v10421_v48, %v10615_v20  ;;  %v981_v10 = vsub.f32 %v10415_v42, %v10615_v20 }
 0x163   : > { %v969_v28 = vmax.f32 %v968_v26, 0.0  ;;  %v982_v5 = vsub.f32 %v10439_v0, %v10615_v20  ;;  %v983_v23 = vsub.f32 %v10433_v58, %v10615_v20  ;;  %v984_v18 = vsub.f32 %v10457_v15, %v10615_v20 }
 0x164   : > { %v985_v35 = vsub.f32 %v10451_v8, %v10615_v20  ;;  %v986_v30 = vsub.f32 %v10475_v29, %v10615_v20  ;;  %v987_v48 = vsub.f32 %v10469_v24, %v10615_v20  ;;  %v988_v42 = vsub.f32 %v10493_v45, %v10615_v20 }
 0x165   : > { %v1002_v31 = vadd.f32 1e-05, %v969_v28  ;;  %v989_v0 = vsub.f32 %v10487_v38, %v10615_v20  ;;  %v990_v58 = vsub.f32 %v10511_v63, %v10615_v20  ;;  %v991_v15 = vsub.f32 %v10505_v55, %v10615_v20 }
 0x166   : > { %v992_v8 = vsub.f32 %v10529_v17, %v10615_v20  ;;  %v993_v29 = vsub.f32 %v10523_v9, %v10615_v20  ;;  %v994_v24 = vsub.f32 %v10547_v34, %v10615_v20  ;;  %v995_v45 = vsub.f32 %v10541_v27, %v10615_v20 }
 0x167   : > { %9794 = vrsqrt.f32 %v1002_v31  ;;  %v996_v38 = vsub.f32 %v10565_v54, %v10615_v20  ;;  %v997_v55 = vsub.f32 %v10559_v46, %v10615_v20  ;;  %v998_v63 = vsub.f32 %v10583_v13, %v10615_v20 }
 0x168   : > { %v999_v9 = vsub.f32 %v10577_v3, %v10615_v20  ;;  %v1001_v27 = vsub.f32 %v10595_v25, %v10615_v20 }
 0x174   : > { %v10673_v47 = vpop.eup %9794 }
 0x175   : > { %v10684_v17 = vmul.f32 %v10673_v47, %v1000_v32  ;;  %v1004_v34 = vmul.f32 %v10673_v47, %v970_v36  ;;  %v1005_v49 = vmul.f32 %v10673_v47, %v971_v37  ;;  %v1006_v54 = vmul.f32 %v10673_v47, %v972_v39 }
 0x176   : > { %v1007_v46 = vmul.f32 %v10673_v47, %v973_v40  ;;  %v1008_v50 = vmul.f32 %v10673_v47, %v974_v41  ;;  %v1009_v13 = vmul.f32 %v10673_v47, %v975_v44  ;;  %v1010_v3 = vmul.f32 %v10673_v47, %v976_v33 }
 0x177   : > { %v1011_v51 = vmul.f32 %v10673_v47, %v977_v53  ;;  %v1012_v56 = vmul.f32 %v10673_v47, %v978_v52  ;;  %v1013_v59 = vmul.f32 %v10673_v47, %v979_v62  ;;  %v1014_v60 = vmul.f32 %v10673_v47, %v980_v57 }
 0x178   : > { %v1015_v61 = vmul.f32 %v10673_v47, %v981_v10  ;;  %v1016_v1 = vmul.f32 %v10673_v47, %v982_v5  ;;  %v1017_v2 = vmul.f32 %v10673_v47, %v983_v23  ;;  %v1018_v4 = vmul.f32 %v10673_v47, %v984_v18 }
 0x179   : > { %v1019_v6 = vmul.f32 %v10673_v47, %v985_v35  ;;  %v1020_v7 = vmul.f32 %v10673_v47, %v986_v30  ;;  %v1021_v12 = vmul.f32 %v10673_v47, %v987_v48  ;;  %v1022_v14 = vmul.f32 %v10673_v47, %v988_v42 }
 0x17a   : > { %v10708_v16 = vmul.f32 %v10673_v47, %v989_v0  ;;  %v10711_v19 = vmul.f32 %v10673_v47, %v990_v58  ;;  %v10714_v21 = vmul.f32 %v10673_v47, %v991_v15  ;;  %v10717_v22 = vmul.f32 %v10673_v47, %v992_v8 }
 0x17b   : > { %v10720_v26 = vmul.f32 %v10673_v47, %v993_v29  ;;  %v10723_v28 = vmul.f32 %v10673_v47, %v994_v24  ;;  %v10726_v31 = vmul.f32 %v10673_v47, %v995_v45  ;;  %v10729_v32 = vmul.f32 %v10673_v47, %v996_v38 }
 0x17c   : > { %v10732_v36 = vmul.f32 %v10673_v47, %v997_v55  ;;  %v10735_v37 = vmul.f32 %v10673_v47, %v998_v63  ;;  %v10738_v39 = vmul.f32 %v10673_v47, %v999_v9  ;;  %v1043_v40 = vmul.f32 %v10262_v11, %v1005_v49 }
 0x17d   : > { %v1042_v41 = vmul.f32 %v10262_v11, %v1004_v34  ;;  %v1044_v44 = vmul.f32 %v10262_v11, %v1006_v54  ;;  %v1045_v33 = vmul.f32 %v10262_v11, %v1007_v46  ;;  %v1046_v53 = vmul.f32 %v10262_v11, %v1008_v50 }
 0x17e   : > { %v1047_v52 = vmul.f32 %v10262_v11, %v1009_v13  ;;  %v1048_v62 = vmul.f32 %v10262_v11, %v1010_v3  ;;  %v1049_v57 = vmul.f32 %v10262_v11, %v1011_v51  ;;  %v1078_v10 = vadd.f32 %v10319_v43, %v1043_v40 }
 0x17f   : > { %v1077_v5 = vadd.f32 %v10319_v43, %v1042_v41  ;;  %v1079_v23 = vadd.f32 %v10319_v43, %v1044_v44  ;;  %v1080_v18 = vadd.f32 %v10319_v43, %v1045_v33  ;;  %v10753_v30 = vadd.f32 %v10319_v43, %v1046_v53 }
 0x180   : > { %v1176_v35 = vpop.permute.xlu1 %1175  ;;  %v10756_v48 = vadd.f32 %v10319_v43, %v1047_v52  ;;  %v10759_v42 = vadd.f32 %v10319_v43, %v1048_v62  ;;  %v10762_v0 = vadd.f32 %v10319_v43, %v1049_v57  ;;  %1110 = vst.msk [vmem:[%s10021_s17 + $0x8] sm:$0xff] %vm794_vm7, %v1078_v10  ;;  %v1050_v15 = vmul.f32 %v10262_v11, %v1012_v56 }
 0x181   : > { %v1270_v58 = vsel %vm794_vm7, %v1078_v10, %v1176_v35  ;;  %1109 = vst.msk [vmem:[%s10021_s17] sm:$0xff] %vm794_vm7, %v1077_v5  ;;  %1111 = vst.msk [vmem:[%s10021_s17 + $0x10] sm:$0xff] %vm794_vm7, %v1079_v23  ;;  %v1051_v8 = vmul.f32 %v10262_v11, %v1013_v59  ;;  %v1052_v29 = vmul.f32 %v10262_v11, %v1014_v60 }
 0x182   : > { %1112 = vst.msk [vmem:[%s10021_s17 + $0x18] sm:$0xff] %vm794_vm7, %v1080_v18  ;;  %v1174_v24 = vpop.permute.xlu0 %1173  ;;  %1113 = vst.msk [vmem:[%s10021_s17 + $0x20] sm:$0xff] %vm794_vm7, %v10753_v30  ;;  %v1053_v45 = vmul.f32 %v10262_v11, %v1015_v61  ;;  %v1054_v38 = vmul.f32 %v10262_v11, %v1016_v1  ;;  %v1055_v55 = vmul.f32 %v10262_v11, %v1017_v2 }
 0x183   : > { %1304 = vst.msk [vmem:[#allocation2 + $0x21] sm:$0xff] %vm1302_vm8, %v1270_v58  ;;  %v1056_v63 = vmul.f32 %v10262_v11, %v1018_v4  ;;  %v1269_v9 = vsel %vm794_vm7, %v1077_v5, %v1174_v24  ;;  %v10795_v34 = vadd.f32 %v10319_v43, %v1050_v15  ;;  %v10798_v49 = vadd.f32 %v10319_v43, %v1051_v8 }
 0x184   : > { %1114 = vst.msk [vmem:[%s10021_s17 + $0x28] sm:$0xff] %vm794_vm7, %v10756_v48  ;;  %1115 = vst.msk [vmem:[%s10021_s17 + $0x30] sm:$0xff] %vm794_vm7, %v10759_v42  ;;  %v10801_v54 = vadd.f32 %v10319_v43, %v1052_v29  ;;  %v10805_v46 = vadd.f32 %v10319_v43, %v1053_v45  ;;  %v10808_v50 = vadd.f32 %v10319_v43, %v1054_v38 }
 0x185   : > { %1116 = vst.msk [vmem:[%s10021_s17 + $0x38] sm:$0xff] %vm794_vm7, %v10762_v0  ;;  %v10811_v13 = vadd.f32 %v10319_v43, %v1055_v55  ;;  %v10814_v3 = vadd.f32 %v10319_v43, %v1056_v63  ;;  %1117 = vst.msk [vmem:[%s10021_s17 + $0x40] sm:$0xff] %vm794_vm7, %v10795_v34  ;;  %v1057_v51 = vmul.f32 %v10262_v11, %v1019_v6 }
 0x186   : > { %1303 = vst.msk [vmem:[#allocation2 + $0x19] sm:$0xff] %vm1302_vm8, %v1269_v9  ;;  %v1058_v56 = vmul.f32 %v10262_v11, %v1020_v7  ;;  %v1059_v59 = vmul.f32 %v10262_v11, %v1021_v12  ;;  %v1060_v60 = vmul.f32 %v10262_v11, %v1022_v14  ;;  %v1178_v61 = vpop.permute.xlu1 %1177  ;;  %v1180_v1 = vpop.permute.xlu0 %1179  ;;  %v1061_v2 = vmul.f32 %v10262_v11, %v10708_v16 }
 0x187   : > { %1118 = vst.msk [vmem:[%s10021_s17 + $0x48] sm:$0xff] %vm794_vm7, %v10798_v49  ;;  %1119 = vst.msk [vmem:[%s10021_s17 + $0x50] sm:$0xff] %vm794_vm7, %v10801_v54  ;;  %v1062_v4 = vmul.f32 %v10262_v11, %v10711_v19  ;;  %v1063_v6 = vmul.f32 %v10262_v11, %v10714_v21  ;;  %v1064_v7 = vmul.f32 %v10262_v11, %v10717_v22 }
 0x188   : > { %1120 = vst.msk [vmem:[%s10021_s17 + $0x58] sm:$0xff] %vm794_vm7, %v10805_v46  ;;  %1121 = vst.msk [vmem:[%s10021_s17 + $0x60] sm:$0xff] %vm794_vm7, %v10808_v50  ;;  %v1271_v12 = vsel %vm794_vm7, %v1079_v23, %v1178_v61  ;;  %v1272_v14 = vsel %vm794_vm7, %v1080_v18, %v1180_v1  ;;  %v10852_v40 = vadd.f32 %v10319_v43, %v1057_v51 }
 0x189   : > { %1122 = vst.msk [vmem:[%s10021_s17 + $0x68] sm:$0xff] %vm794_vm7, %v10811_v13  ;;  %1123 = vst.msk [vmem:[%s10021_s17 + $0x70] sm:$0xff] %vm794_vm7, %v10814_v3  ;;  %v10855_v41 = vadd.f32 %v10319_v43, %v1058_v56  ;;  %v10860_v16 = vadd.f32 %v10319_v43, %v1059_v59  ;;  %v10863_v19 = vadd.f32 %v10319_v43, %v1060_v60 }
 0x18a   : > { %1305 = vst.msk [vmem:[#allocation2 + $0x31] sm:$0xff] %vm1302_vm8, %v1271_v12  ;;  %1306 = vst.msk [vmem:[#allocation2 + $0x39] sm:$0xff] %vm1302_vm8, %v1272_v14  ;;  %v10866_v21 = vadd.f32 %v10319_v43, %v1061_v2  ;;  %v10869_v22 = vadd.f32 %v10319_v43, %v1062_v4  ;;  %v2300_v44 = vld [vmem:[#allocation2 + $0x21] sm:$0xff]  ;;  %v10878_v33 = vadd.f32 %v10319_v43, %v1063_v6  ;;  %v1182_v10 = vpop.permute.xlu1 %1181  ;;  %v1184_v5 = vpop.permute.xlu0 %1183  ;;  %v9686_v12 = vld [vmem:[%s13788_s2 + $0x38] sm:$0xff]  }
 0x18b   : > { %1124 = vst.msk [vmem:[%s10021_s17 + $0x78] sm:$0xff] %vm794_vm7, %v10852_v40  ;;  %1125 = vst.msk [vmem:[%s10021_s17 + $0x80] sm:$0xff] %vm794_vm7, %v10855_v41  ;;  %v10881_v53 = vadd.f32 %v10319_v43, %v1064_v7  ;;  %v1065_v52 = vmul.f32 %v10262_v11, %v10720_v26  ;;  %v1066_v62 = vmul.f32 %v10262_v11, %v10723_v28  ;;  %v9930_v11 = vld [vmem:[%s13792_s6] ss:$0 sm:$0xff]  ;;  %v2557_v28 = vld [vmem:[#allocation2 + $0x22] sm:$0xff] }
 0x18c   : > { %v1035_v57 = vmul.f32 %v10673_v47, %v1001_v27  ;;  %v10891_v23 = vpack.c.bf16 %v2300_v44, %v2300_v44  ;;  %1126 = vst.msk [vmem:[%s10021_s17 + $0x88] sm:$0xff] %vm794_vm7, %v10860_v16  ;;  %1127 = vst.msk [vmem:[%s10021_s17 + $0x90] sm:$0xff] %vm794_vm7, %v10863_v19  ;;  %v1067_v25 = vmul.f32 %v9930_v11, %v10726_v31 }
 0x18d   : > { %1128 = vst.msk [vmem:[%s10021_s17 + $0x98] sm:$0xff] %vm794_vm7, %v10866_v21  ;;  %1129 = vst.msk [vmem:[%s10021_s17 + $0xa0] sm:$0xff] %vm794_vm7, %v10869_v22  ;;  %v1068_v20 = vmul.f32 %v9930_v11, %v10729_v32  ;;  %v1273_v47 = vsel %vm794_vm7, %v10753_v30, %v1182_v10  ;;  %v1274_v27 = vsel %vm794_vm7, %v10756_v48, %v1184_v5  ;;  %v2042_v26 = vld [vmem:[#allocation2 + $0x18] sm:$0xff]  ;;  %v2043_v35 = vld [vmem:[#allocation2 + $0x20] sm:$0xff] }
 0x18e   : > { %1130 = vst.msk [vmem:[%s10021_s17 + $0xa8] sm:$0xff] %vm794_vm7, %v10878_v33  ;;  %1131 = vst.msk [vmem:[%s10021_s17 + $0xb0] sm:$0xff] %vm794_vm7, %v10881_v53  ;;  %v10921_v31 = vadd.f32 %v10319_v43, %v1065_v52  ;;  %v10924_v32 = vadd.f32 %v10319_v43, %v1066_v62  ;;  %2429 = vrot.lane.b32.xlu0 %v10891_v23, %s9945_s29  ;;  %v9030_v18 = vpack.c.bf16 %v2042_v26, %v2042_v26  ;;  %v2299_v48 = vld [vmem:[#allocation2 + $0x19] sm:$0xff]  ;;  %v1186_v24 = vpop.permute.xlu1 %1185  ;;  %v1188_v45 = vpop.permute.xlu0 %1187 }
 0x18f   : > { %1307 = vst.msk [vmem:[#allocation2 + $0x49] sm:$0xff] %vm1302_vm8, %v1273_v47  ;;  %1308 = vst.msk [vmem:[#allocation2 + $0x51] sm:$0xff] %vm1302_vm8, %v1274_v27  ;;  %v10931_v30 = vadd.f32 %v10319_v43, %v1067_v25  ;;  %v10933_v58 = vpack.c.bf16 %v2043_v35, %v2043_v35  ;;  %v10942_v15 = vadd.f32 %v10319_v43, %v1068_v20  ;;  %v2556_v2 = vld [vmem:[#allocation2 + $0x1a] sm:$0xff]  ;;  %v9687_v47 = vld [vmem:[%s13788_s2 + $0x30] sm:$0xff]  }
 0x190   : > { %1132 = vst.msk [vmem:[%s10021_s17 + $0xb8] sm:$0xff] %vm794_vm7, %v10921_v31  ;;  %1133 = vst.msk [vmem:[%s10021_s17 + $0xc0] sm:$0xff] %vm794_vm7, %v10924_v32  ;;  %v1069_v8 = vmul.f32 %v9930_v11, %v10732_v36  ;;  %v1070_v29 = vmul.f32 %v9930_v11, %v10735_v37  ;;  %2170 = vrot.lane.b32.xlu1 %v9030_v18, %s9946_s30  ;;  %v10947_v38 = vpack.c.bf16 %v2557_v28, %v2557_v28 }
 0x191   : > { %1134 = vst.msk [vmem:[%s10021_s17 + $0xc8] sm:$0xff] %vm794_vm7, %v10931_v30  ;;  %v1071_v55 = vmul.f32 %v9930_v11, %v10738_v39  ;;  %v1072_v63 = vmul.f32 %v9930_v11, %v10684_v17  ;;  %v1073_v9 = vmul.f32 %v9930_v11, %v1035_v57  ;;  %v3328_v36 = vld [vmem:[#allocation2 + $0x32] sm:$0xff]  ;;  %v3329_v51 = vld [vmem:[#allocation2 + $0x3a] sm:$0xff]  ;;  %v1275_v37 = vsel %vm794_vm7, %v10759_v42, %v1186_v24 }
 0x192   : > { %1498 = vst.msk [vmem:[#allocation4 + $0x10] sm:$0xf] %vm1495_vm4, %v9030_v18  ;;  %v1276_v56 = vsel %vm794_vm7, %v10762_v0, %v1188_v45  ;;  %v10963_v59 = vadd.f32 %v10319_v43, %v1069_v8  ;;  %v10966_v17 = vadd.f32 %v10319_v43, %v1070_v29  ;;  %1499 = vst.msk [vmem:[#allocation4 + $0x18] sm:$0xf] %vm1495_vm4, %v10933_v58  ;;  %2686 = vrot.lane.b32.xlu0 %v10947_v38, %s9947_s9  ;;  %v2814_v60 = vld [vmem:[#allocation2 + $0x30] sm:$0xff]  ;;  %v2815_v61 = vld [vmem:[#allocation2 + $0x38] sm:$0xff]  ;;  %v1190_v14 = vpop.permute.xlu1 %1189  ;;  %v1192_v44 = vpop.permute.xlu0 %1191 }
 0x193   : > { %1135 = vst.msk [vmem:[%s10021_s17 + $0xd0] sm:$0xff] %vm794_vm7, %v10942_v15  ;;  %v10970_v39 = vpack.c.bf16 %v3328_v36, %v3328_v36  ;;  %v10972_v42 = vpack.c.bf16 %v3329_v51, %v3329_v51  ;;  %v10978_v0 = vpack.c.bf16 %v2299_v48, %v2299_v48  ;;  %v10981_v1 = vadd.f32 %v10319_v43, %v1071_v55 }
 0x194   : > { %1309 = vst.msk [vmem:[#allocation2 + $0x61] sm:$0xff] %vm1302_vm8, %v1275_v37  ;;  %1310 = vst.msk [vmem:[#allocation2 + $0x69] sm:$0xff] %vm1302_vm8, %v1276_v56  ;;  %v10983_v4 = vpack.c.bf16 %v2814_v60, %v2814_v60  ;;  %v10985_v6 = vpack.c.bf16 %v2815_v61, %v2815_v61  ;;  %v10994_v7 = vadd.f32 %v10319_v43, %v1072_v63  ;;  %v9948_v11 = vmov 0   ;;  %v3072_v60 = vld [vmem:[#allocation2 + $0x39] sm:$0xff] }
 0x195   : > { %1136 = vst.msk [vmem:[%s10021_s17 + $0xd8] sm:$0xff] %vm794_vm7, %v10963_v59  ;;  %1137 = vst.msk [vmem:[%s10021_s17 + $0xe0] sm:$0xff] %vm794_vm7, %v10966_v17  ;;  %2427 = vrot.lane.b32.xlu1 %v10978_v0, %s9945_s29  ;;  %v11009_v52 = vadd.f32 %v10319_v43, %v1073_v9  ;;  %v1277_v10 = vsel %vm794_vm7, %v10795_v34, %v1190_v14  ;;  %v1278_v5 = vsel %vm794_vm7, %v10798_v49, %v1192_v44 }
 0x196   : > { %3488 = vst.msk [vmem:[#allocation4 + $0x4] sm:$0xf] %vm1495_vm4, %v10970_v39  ;;  %3489 = vst.msk [vmem:[#allocation4 + $0xc] sm:$0xf] %vm1495_vm4, %v10972_v42  ;;  %v3330_v62 = vld [vmem:[#allocation2 + $0x4a] sm:$0xff]  ;;  %v3331_v57 = vld [vmem:[#allocation2 + $0x52] sm:$0xff]  ;;  %3816 = vmatprep.subr.bf16.mxu1 %v9948_v11  ;;  %6501 = vmatprep.subr.bf16.mxu0 %v9948_v11  ;;  %v9094_v49 = vpack.c.bf16 %v2556_v2, %v2556_v2  ;;  %v1196_v28 = vpop.permute.xlu0 %1195 }
 0x197   : > { %1138 = vst.msk [vmem:[%s10021_s17 + $0xe8] sm:$0xff] %vm794_vm7, %v10981_v1  ;;  %1139 = vst.msk [vmem:[%s10021_s17 + $0xf0] sm:$0xff] %vm794_vm7, %v10994_v7  ;;  %v11024_v43 = vpack.c.bf16 %v3330_v62, %v3330_v62  ;;  %v11026_v34 = vpack.c.bf16 %v3331_v57, %v3331_v57  ;;  %1662 = vrot.lane.b32.xlu0 %v10891_v23, %s9942_s23  ;;  %v2816_v25 = vld [vmem:[#allocation2 + $0x48] sm:$0xff]  ;;  %v2817_v20 = vld [vmem:[#allocation2 + $0x50] sm:$0xff]  ;;  %3817 = vmatpush1.bf16.msra.mxu1 %v9686_v12  ;;  %v1194_v23 = vpop.permute.xlu1 %1193 }
 0x198   : > { %1501 = vst.msk [vmem:[#allocation4 + $0x28] sm:$0xf] %vm1495_vm4, %v10985_v6  ;;  %1500 = vst.msk [vmem:[#allocation4 + $0x20] sm:$0xf] %vm1495_vm4, %v10983_v4  ;;  %v11038_v27 = vpack.c.bf16 %v2816_v25, %v2816_v25  ;;  %v11040_v26 = vpack.c.bf16 %v2817_v20, %v2817_v20  ;;  %3818 = vmatprep.subr.bf16.mxu1 %v9948_v11  ;;  %v1279_v48 = vsel %vm794_vm7, %v10801_v54, %v1194_v23 }
 0x199   : > { %1311 = vst.msk [vmem:[#allocation2 + $0x79] sm:$0xff] %vm1302_vm8, %v1277_v10  ;;  %1312 = vst.msk [vmem:[#allocation2 + $0x81] sm:$0xff] %vm1302_vm8, %v1278_v5  ;;  %2684 = vrot.lane.b32.xlu1 %v9094_v49, %s9947_s9  ;;  %v1280_v8 = vsel %vm794_vm7, %v10805_v46, %v1196_v28  ;;  %v9688_v46 = vld [vmem:[%s13788_s2 + $0x28] sm:$0xff]   ;;  %v11107_v62 = vpack.c.bf16 %v3072_v60, %v3072_v60 }
 0x19a   : > { %1140 = vst.msk [vmem:[%s10021_s17 + $0xf8] sm:$0xff] %vm794_vm7, %v11009_v52  ;;  %v1200_v9 = vpop.permute.xlu0 %1199 }
 0x19b   : > { %3490 = vst.msk [vmem:[#allocation4 + $0x14] sm:$0xf] %vm1495_vm4, %v11024_v43  ;;  %3491 = vst.msk [vmem:[#allocation4 + $0x1c] sm:$0xf] %vm1495_vm4, %v11026_v34  ;;  %v3332_v18 = vld [vmem:[#allocation2 + $0x62] sm:$0xff]  ;;  %v3333_v35 = vld [vmem:[#allocation2 + $0x6a] sm:$0xff]  ;;  %1919 = vrot.lane.b32.xlu0 %v10947_v38, %s9943_s24  ;;  %3819 = vmatpush1.bf16.msra.mxu1 %v9687_v47  ;;  %v1198_v38 = vpop.permute.xlu1 %1197  ;;  %v1282_v56 = vsel %vm794_vm7, %v10811_v13, %v1200_v9 }
 0x19c   : > { %1503 = vst.msk [vmem:[#allocation4 + $0x38] sm:$0xf] %vm1495_vm4, %v11040_v26  ;;  %1502 = vst.msk [vmem:[#allocation4 + $0x30] sm:$0xf] %vm1495_vm4, %v11038_v27  ;;  %v11056_v29 = vpack.c.bf16 %v3332_v18, %v3332_v18  ;;  %v11058_v24 = vpack.c.bf16 %v3333_v35, %v3333_v35  ;;  %v2818_v54 = vld [vmem:[#allocation2 + $0x60] sm:$0xff]  ;;  %v2819_v45 = vld [vmem:[#allocation2 + $0x68] sm:$0xff]  ;;  %3820 = vmatprep.subr.bf16.mxu1 %v9948_v11  ;;  %v1281_v37 = vsel %vm794_vm7, %v10808_v50, %v1198_v38 }
 0x19d   : > { %1313 = vst.msk [vmem:[#allocation2 + $0x91] sm:$0xff] %vm1302_vm8, %v1279_v48  ;;  %1314 = vst.msk [vmem:[#allocation2 + $0x99] sm:$0xff] %vm1302_vm8, %v1280_v8  ;;  %v11067_v55 = vpack.c.bf16 %v2818_v54, %v2818_v54  ;;  %v11069_v63 = vpack.c.bf16 %v2819_v45, %v2819_v45  ;;  %1660 = vrot.lane.b32.xlu1 %v10978_v0, %s9942_s23  ;;  %v9689_v0 = vld [vmem:[%s13788_s2 + $0x20] sm:$0xff]  }
 0x19e   : > { %3492 = vst.msk [vmem:[#allocation4 + $0x24] sm:$0xf] %vm1495_vm4, %v11056_v29  ;;  %3493 = vst.msk [vmem:[#allocation4 + $0x2c] sm:$0xf] %vm1495_vm4, %v11058_v24  ;;  %v1204_v44 = vpop.permute.xlu0 %1203 }
 0x19f   : > { %1505 = vst.msk [vmem:[#allocation4 + $0x48] sm:$0xf] %vm1495_vm4, %v11069_v63  ;;  %1504 = vst.msk [vmem:[#allocation4 + $0x40] sm:$0xf] %vm1495_vm4, %v11067_v55  ;;  %2172 = vrot.lane.b32.xlu0 %v10933_v58, %s9946_s30  ;;  %3821 = vmatpush1.bf16.msra.mxu1 %v9688_v46  ;;  %v1202_v58 = vpop.permute.xlu1 %1201  ;;  %v1284_v25 = vsel %vm794_vm7, %v10852_v40, %v1204_v44  ;;  %v9690_v40 = vld [vmem:[%s13788_s2 + $0x18] sm:$0xff]  }
 0x1a0   : > { %v3334_v36 = vld [vmem:[#allocation2 + $0x7a] sm:$0xff]  ;;  %v3335_v51 = vld [vmem:[#allocation2 + $0x82] sm:$0xff]  ;;  %1315 = vst.msk [vmem:[#allocation2 + $0xa9] sm:$0xff] %vm1302_vm8, %v1281_v37  ;;  %1316 = vst.msk [vmem:[#allocation2 + $0xb1] sm:$0xff] %vm1302_vm8, %v1282_v56  ;;  %3822 = vmatprep.subr.bf16.mxu1 %v9948_v11  ;;  %v1283_v5 = vsel %vm794_vm7, %v10814_v3, %v1202_v58 }
 0x1a1   : > { %v11086_v61 = vpack.c.bf16 %v3334_v36, %v3334_v36  ;;  %v11088_v2 = vpack.c.bf16 %v3335_v51, %v3335_v51  ;;  %v2820_v50 = vld [vmem:[#allocation2 + $0x78] sm:$0xff]  ;;  %v2821_v13 = vld [vmem:[#allocation2 + $0x80] sm:$0xff]  ;;  %1917 = vrot.lane.b32.xlu1 %v9094_v49, %s9943_s24  ;;  %1317 = vst.msk [vmem:[#allocation2 + $0xc1] sm:$0xff] %vm1302_vm8, %v1283_v5  ;;  %1318 = vst.msk [vmem:[#allocation2 + $0xc9] sm:$0xff] %vm1302_vm8, %v1284_v25 }
 0x1a2   : > { %v11097_v12 = vpack.c.bf16 %v2820_v50, %v2820_v50  ;;  %v11099_v14 = vpack.c.bf16 %v2821_v13, %v2821_v13  ;;  %v3071_v49 = vld [vmem:[#allocation2 + $0x31] sm:$0xff]  ;;  %v1208_v35 = vpop.permute.xlu0 %1207 }
 0x1a3   : > { %3494 = vst.msk [vmem:[#allocation4 + $0x34] sm:$0xf] %vm1495_vm4, %v11086_v61  ;;  %3495 = vst.msk [vmem:[#allocation4 + $0x3c] sm:$0xf] %vm1495_vm4, %v11088_v2  ;;  %3201 = vrot.lane.b32.xlu0 %v11107_v62, %s9949_s19  ;;  %3823 = vmatpush1.bf16.msra.mxu1 %v9689_v0  ;;  %v1206_v18 = vpop.permute.xlu1 %1205  ;;  %v1286_v46 = vsel %vm794_vm7, %v10860_v16, %v1208_v35  ;;  %v11149_v36 = vpack.c.bf16 %v3071_v49, %v3071_v49 }
 0x1a4   : > { %v3336_v57 = vld [vmem:[#allocation2 + $0x92] sm:$0xff]  ;;  %v3337_v10 = vld [vmem:[#allocation2 + $0x9a] sm:$0xff]  ;;  %1507 = vst.msk [vmem:[#allocation4 + $0x58] sm:$0xf] %vm1495_vm4, %v11099_v14  ;;  %1506 = vst.msk [vmem:[#allocation4 + $0x50] sm:$0xf] %vm1495_vm4, %v11097_v12  ;;  %3824 = vmatprep.subr.bf16.mxu1 %v9948_v11  ;;  %v1285_v45 = vsel %vm794_vm7, %v10855_v41, %v1206_v18 }
 0x1a5   : > { %v11117_v20 = vpack.c.bf16 %v3336_v57, %v3336_v57  ;;  %v11119_v47 = vpack.c.bf16 %v3337_v10, %v3337_v10  ;;  %v2822_v3 = vld [vmem:[#allocation2 + $0x90] sm:$0xff]  ;;  %v2823_v28 = vld [vmem:[#allocation2 + $0x98] sm:$0xff]  ;;  %2942 = vrot.lane.b32.xlu1 %v10983_v4, %s9950_s26  ;;  %1319 = vst.msk [vmem:[#allocation2 + $0xd9] sm:$0xff] %vm1302_vm8, %v1285_v45  ;;  %1320 = vst.msk [vmem:[#allocation2 + $0xe1] sm:$0xff] %vm1302_vm8, %v1286_v46 }
 0x1a6   : > { %v11128_v23 = vpack.c.bf16 %v2822_v3, %v2822_v3  ;;  %v11137_v48 = vpack.c.bf16 %v2823_v28, %v2823_v28  ;;  %v9691_v41 = vld [vmem:[%s13788_s2 + $0x10] sm:$0xff]   ;;  %v1212_v60 = vpop.permute.xlu0 %1211 }
 0x1a7   : > { %3496 = vst.msk [vmem:[#allocation4 + $0x44] sm:$0xf] %vm1495_vm4, %v11117_v20  ;;  %3497 = vst.msk [vmem:[#allocation4 + $0x4c] sm:$0xf] %vm1495_vm4, %v11119_v47  ;;  %v3338_v8 = vld [vmem:[#allocation2 + $0xaa] sm:$0xff]  ;;  %v3339_v54 = vld [vmem:[#allocation2 + $0xb2] sm:$0xff]  ;;  %2433 = vrot.lane.b32.xlu0 %v11107_v62, %s9945_s29  ;;  %3825 = vmatpush1.bf16.msra.mxu1 %v9690_v40  ;;  %v1210_v56 = vpop.permute.xlu1 %1209  ;;  %v1288_v44 = vsel %vm794_vm7, %v10866_v21, %v1212_v60 }
 0x1a8   : > { %1508 = vst.msk [vmem:[#allocation4 + $0x60] sm:$0xf] %vm1495_vm4, %v11128_v23  ;;  %v9200_v38 = vpack.c.bf16 %v3338_v8, %v3338_v8  ;;  %v9201_v9 = vpack.c.bf16 %v3339_v54, %v3339_v54  ;;  %v2824_v16 = vld [vmem:[#allocation2 + $0xa8] sm:$0xff]  ;;  %1509 = vst.msk [vmem:[#allocation4 + $0x68] sm:$0xf] %vm1495_vm4, %v11137_v48  ;;  %3826 = vmatprep.subr.bf16.mxu1 %v9948_v11  ;;  %v2825_v37 = vld [vmem:[#allocation2 + $0xb0] sm:$0xff]  ;;  %v1287_v58 = vsel %vm794_vm7, %v10863_v19, %v1210_v56 }
 0x1a9   : > { %v11157_v51 = vpack.c.bf16 %v2824_v16, %v2824_v16  ;;  %3199 = vrot.lane.b32.xlu1 %v11149_v36, %s9949_s19  ;;  %v11163_v50 = vpack.c.bf16 %v2825_v37, %v2825_v37  ;;  %v3340_v13 = vld [vmem:[#allocation2 + $0xc2] sm:$0xff]  ;;  %v3341_v0 = vld [vmem:[#allocation2 + $0xca] sm:$0xff]  ;;  %1321 = vst.msk [vmem:[#allocation2 + $0xf1] sm:$0xff] %vm1302_vm8, %v1287_v58  ;;  %1322 = vst.msk [vmem:[#allocation2 + $0xf9] sm:$0xff] %vm1302_vm8, %v1288_v44 }
 0x1aa   : > { %3498 = vst.msk [vmem:[#allocation4 + $0x54] sm:$0xf] %vm1495_vm4, %v9200_v38  ;;  %3499 = vst.msk [vmem:[#allocation4 + $0x5c] sm:$0xf] %vm1495_vm4, %v9201_v9  ;;  %v9202_v57 = vpack.c.bf16 %v3340_v13, %v3340_v13  ;;  %v9203_v10 = vpack.c.bf16 %v3341_v0, %v3341_v0  ;;  %v9692_v19 = vld [vmem:[%s13788_s2 + $0x8] sm:$0xff]   ;;  %v2826_v5 = vld [vmem:[#allocation2 + $0xc0] sm:$0xff]  ;;  %v1216_v40 = vpop.permute.xlu0 %1215 }
 0x1ab   : > { %1510 = vst.msk [vmem:[#allocation4 + $0x70] sm:$0xf] %vm1495_vm4, %v11157_v51  ;;  %2690 = vrot.lane.b32.xlu0 %v10972_v42, %s9947_s9  ;;  %3827 = vmatpush1.bf16.msra.mxu1 %v9691_v41  ;;  %1511 = vst.msk [vmem:[#allocation4 + $0x78] sm:$0xf] %vm1495_vm4, %v11163_v50  ;;  %v11181_v21 = vpack.c.bf16 %v2826_v5, %v2826_v5  ;;  %v2827_v25 = vld [vmem:[#allocation2 + $0xc8] sm:$0xff]  ;;  %v1214_v3 = vpop.permute.xlu1 %1213  ;;  %v1290_v8 = vsel %vm794_vm7, %v10878_v33, %v1216_v40 }
 0x1ac   : > { %3828 = vmatprep.subr.bf16.mxu1 %v9948_v11  ;;  %3500 = vst.msk [vmem:[#allocation4 + $0x64] sm:$0xf] %vm1495_vm4, %v9202_v57  ;;  %3501 = vst.msk [vmem:[#allocation4 + $0x6c] sm:$0xf] %vm1495_vm4, %v9203_v10  ;;  %v11187_v49 = vpack.c.bf16 %v2827_v25, %v2827_v25  ;;  %v3342_v28 = vld [vmem:[#allocation2 + $0xda] sm:$0xff]  ;;  %v3343_v18 = vld [vmem:[#allocation2 + $0xe2] sm:$0xff]  ;;  %v1289_v35 = vsel %vm794_vm7, %v10869_v22, %v1214_v3 }
 0x1ad   : > { %2174 = vrot.lane.b32.xlu1 %v10983_v4, %s9946_s30  ;;  %1512 = vst.msk [vmem:[#allocation4 + $0x80] sm:$0xf] %vm1495_vm4, %v11181_v21  ;;  %v9204_v54 = vpack.c.bf16 %v3342_v28, %v3342_v28  ;;  %v9205_v45 = vpack.c.bf16 %v3343_v18, %v3343_v18  ;;  %v2828_v4 = vld [vmem:[#allocation2 + $0xd8] sm:$0xff]  ;;  %v9693_v22 = vld [vmem:[%s13788_s2] sm:$0xff]  }
 0x1ae   : > { %1323 = vst.msk [vmem:[#allocation2 + $0x109] sm:$0xff] %vm1302_vm8, %v1289_v35  ;;  %1324 = vst.msk [vmem:[#allocation2 + $0x111] sm:$0xff] %vm1302_vm8, %v1290_v8  ;;  %v11205_v33 = vpack.c.bf16 %v2828_v4, %v2828_v4  ;;  %v2829_v46 = vld [vmem:[#allocation2 + $0xe0] sm:$0xff]  ;;  %v3074_v8 = vld [vmem:[#allocation2 + $0x51] sm:$0xff] }
 0x1af   : > { %1666 = vrot.lane.b32.xlu0 %v11107_v62, %s9942_s23  ;;  %3829 = vmatpush1.bf16.msra.mxu1 %v9692_v19  ;;  %1513 = vst.msk [vmem:[#allocation4 + $0x88] sm:$0xf] %vm1495_vm4, %v11187_v49  ;;  %3502 = vst.msk [vmem:[#allocation4 + $0x74] sm:$0xf] %vm1495_vm4, %v9204_v54  ;;  %v1218_v38 = vpop.permute.xlu1 %1217  ;;  %v1220_v62 = vpop.permute.xlu0 %1219  ;;  %v11211_v9 = vpack.c.bf16 %v2829_v46, %v2829_v46 }
 0x1b0   : > { %3830 = vmatprep.subr.bf16.mxu1 %v9948_v11  ;;  %3503 = vst.msk [vmem:[#allocation4 + $0x7c] sm:$0xf] %vm1495_vm4, %v9205_v45  ;;  %v3344_v41 = vld [vmem:[#allocation2 + $0xf2] sm:$0xff]  ;;  %v3345_v16 = vld [vmem:[#allocation2 + $0xfa] sm:$0xff]  ;;  %v1291_v37 = vsel %vm794_vm7, %v10881_v53, %v1218_v38  ;;  %v1292_v56 = vsel %vm794_vm7, %v10921_v31, %v1220_v62  ;;  %1514 = vst.msk [vmem:[#allocation4 + $0x90] sm:$0xf] %vm1495_vm4, %v11205_v33 }
 0x1b1   : > { %2431 = vrot.lane.b32.xlu1 %v11149_v36, %s9945_s29  ;;  %v9206_v60 = vpack.c.bf16 %v3344_v41, %v3344_v41  ;;  %v9207_v13 = vpack.c.bf16 %v3345_v16, %v3345_v16  ;;  %1325 = vst.msk [vmem:[#allocation2 + $0x121] sm:$0xff] %vm1302_vm8, %v1291_v37  ;;  %1326 = vst.msk [vmem:[#allocation2 + $0x129] sm:$0xff] %vm1302_vm8, %v1292_v56  ;;  %v9694_v53 = vld [vmem:[%s13788_s2 + $0x40] sm:$0xff]   ;;  %v2830_v0 = vld [vmem:[#allocation2 + $0xf0] sm:$0xff]  ;;  %v9161_v56 = vpack.c.bf16 %v3074_v8, %v3074_v8 }
 0x1b2   : > { %1515 = vst.msk [vmem:[#allocation4 + $0x98] sm:$0xf] %vm1495_vm4, %v11211_v9  ;;  %v11229_v31 = vpack.c.bf16 %v2830_v0, %v2830_v0  ;;  %v2831_v58 = vld [vmem:[#allocation2 + $0xf8] sm:$0xff] }
 0x1b3   : > { %1923 = vrot.lane.b32.xlu0 %v10972_v42, %s9943_s24  ;;  %3831 = vmatpush1.bf16.msra.mxu1 %v9693_v22  ;;  %3504 = vst.msk [vmem:[#allocation4 + $0x84] sm:$0xf] %vm1495_vm4, %v9206_v60  ;;  %3505 = vst.msk [vmem:[#allocation4 + $0x8c] sm:$0xf] %vm1495_vm4, %v9207_v13  ;;  %v1222_v44 = vpop.permute.xlu1 %1221  ;;  %v1224_v42 = vpop.permute.xlu0 %1223  ;;  %v11235_v57 = vpack.c.bf16 %v2831_v58, %v2831_v58 }
 0x1b4   : > { %3846 = vmatprep.subr.bf16.mxu1 %v9948_v11  ;;  %v1293_v5 = vsel %vm794_vm7, %v10924_v32, %v1222_v44  ;;  %v1294_v25 = vsel %vm794_vm7, %v10931_v30, %v1224_v42  ;;  %1516 = vst.msk [vmem:[#allocation4 + $0xa0] sm:$0xf] %vm1495_vm4, %v11229_v31 }
 0x1b5   : > { %2688 = vrot.lane.b32.xlu1 %v10970_v39, %s9947_s9  ;;  %v3346_v10 = vld [vmem:[#allocation2 + $0x10a] sm:$0xff]  ;;  %v3347_v19 = vld [vmem:[#allocation2 + $0x112] sm:$0xff]  ;;  %1327 = vst.msk [vmem:[#allocation2 + $0x139] sm:$0xff] %vm1302_vm8, %v1293_v5  ;;  %1328 = vst.msk [vmem:[#allocation2 + $0x141] sm:$0xff] %vm1302_vm8, %v1294_v25 }
 0x1b6   : > { %v9208_v3 = vpack.c.bf16 %v3346_v10, %v3346_v10  ;;  %v9209_v40 = vpack.c.bf16 %v3347_v19, %v3347_v19  ;;  %v2832_v28 = vld [vmem:[#allocation2 + $0x108] sm:$0xff]  ;;  %1517 = vst.msk [vmem:[#allocation4 + $0xa8] sm:$0xf] %vm1495_vm4, %v11235_v57  ;;  %v2833_v30 = vld [vmem:[#allocation2 + $0x110] sm:$0xff] }
 0x1b7   : > { %2944 = vrot.lane.b32.xlu0 %v10985_v6, %s9950_s26  ;;  %3847 = vmatpush2.bf16.msra.mxu1 %v9694_v53  ;;  %v11249_v32 = vpack.c.bf16 %v2832_v28, %v2832_v28  ;;  %v1226_v18 = vpop.permute.xlu1 %1225  ;;  %v1228_v35 = vpop.permute.xlu0 %1227  ;;  %v11255_v54 = vpack.c.bf16 %v2833_v30, %v2833_v30  ;;  %v3073_v10 = vld [vmem:[#allocation2 + $0x49] sm:$0xff] }
 0x1b8   : > { %3506 = vst.msk [vmem:[#allocation4 + $0x94] sm:$0xf] %vm1495_vm4, %v9208_v3  ;;  %3507 = vst.msk [vmem:[#allocation4 + $0x9c] sm:$0xf] %vm1495_vm4, %v9209_v40  ;;  %v3348_v45 = vld [vmem:[#allocation2 + $0x122] sm:$0xff]  ;;  %v3349_v4 = vld [vmem:[#allocation2 + $0x12a] sm:$0xff]  ;;  %v1295_v22 = vsel %vm794_vm7, %v10942_v15, %v1226_v18  ;;  %v1296_v46 = vsel %vm794_vm7, %v10963_v59, %v1228_v35  ;;  %v9160_v35 = vpack.c.bf16 %v3073_v10, %v3073_v10 }
 0x1b9   : > { %1664 = vrot.lane.b32.xlu1 %v11149_v36, %s9942_s23  ;;  %v2835_v38 = vld [vmem:[#allocation2 + $0x128] sm:$0xff]  ;;  %1518 = vst.msk [vmem:[#allocation4 + $0xb0] sm:$0xf] %vm1495_vm4, %v11249_v32  ;;  %v9210_v62 = vpack.c.bf16 %v3348_v45, %v3348_v45  ;;  %v9211_v41 = vpack.c.bf16 %v3349_v4, %v3349_v4  ;;  %v2834_v16 = vld [vmem:[#allocation2 + $0x120] sm:$0xff]  ;;  %1519 = vst.msk [vmem:[#allocation4 + $0xb8] sm:$0xf] %vm1495_vm4, %v11255_v54 }
 0x1ba   : > { %1329 = vst.msk [vmem:[#allocation2 + $0x151] sm:$0xff] %vm1302_vm8, %v1295_v22  ;;  %1330 = vst.msk [vmem:[#allocation2 + $0x159] sm:$0xff] %vm1302_vm8, %v1296_v46  ;;  %v11267_v36 = vpack.c.bf16 %v2835_v38, %v2835_v38  ;;  %v11271_v15 = vpack.c.bf16 %v2834_v16, %v2834_v16 }
 0x1bb   : > { %2176 = vrot.lane.b32.xlu0 %v10985_v6, %s9946_s30  ;;  %3508 = vst.msk [vmem:[#allocation4 + $0xa4] sm:$0xf] %vm1495_vm4, %v9210_v62  ;;  %3509 = vst.msk [vmem:[#allocation4 + $0xac] sm:$0xf] %vm1495_vm4, %v9211_v41  ;;  %v1230_v59 = vpop.permute.xlu1 %1229  ;;  %v1232_v37 = vpop.permute.xlu0 %1231 }
 0x1bc   : > { %1521 = vst.msk [vmem:[#allocation4 + $0xc8] sm:$0xf] %vm1495_vm4, %v11267_v36  ;;  %v3350_v6 = vld [vmem:[#allocation2 + $0x13a] sm:$0xff]  ;;  %v3351_v60 = vld [vmem:[#allocation2 + $0x142] sm:$0xff]  ;;  %v1297_v13 = vsel %vm794_vm7, %v10966_v17, %v1230_v59  ;;  %v1298_v53 = vsel %vm794_vm7, %v10981_v1, %v1232_v37  ;;  %1520 = vst.msk [vmem:[#allocation4 + $0xc0] sm:$0xf] %vm1495_vm4, %v11271_v15 }
 0x1bd   : > { %1921 = vrot.lane.b32.xlu1 %v10970_v39, %s9943_s24  ;;  %v2837_v0 = vld [vmem:[#allocation2 + $0x140] sm:$0xff]  ;;  %v9212_v58 = vpack.c.bf16 %v3350_v6, %v3350_v6  ;;  %v9213_v44 = vpack.c.bf16 %v3351_v60, %v3351_v60  ;;  %1331 = vst.msk [vmem:[#allocation2 + $0x169] sm:$0xff] %vm1302_vm8, %v1297_v13  ;;  %1332 = vst.msk [vmem:[#allocation2 + $0x171] sm:$0xff] %vm1302_vm8, %v1298_v53  ;;  %v2836_v42 = vld [vmem:[#allocation2 + $0x138] sm:$0xff] }
 0x1be   : > { %v11288_v39 = vpack.c.bf16 %v2837_v0, %v2837_v0  ;;  %v11290_v17 = vpack.c.bf16 %v2836_v42, %v2836_v42  ;;  %v3075_v13 = vld [vmem:[#allocation2 + $0x61] sm:$0xff] }
 0x1bf   : > { %3205 = vrot.lane.b32.xlu0 %v9161_v56, %s9949_s19  ;;  %3510 = vst.msk [vmem:[#allocation4 + $0xb4] sm:$0xf] %vm1495_vm4, %v9212_v58  ;;  %3511 = vst.msk [vmem:[#allocation4 + $0xbc] sm:$0xf] %vm1495_vm4, %v9213_v44  ;;  %v1234_v1 = vpop.permute.xlu1 %1233  ;;  %v1236_v19 = vpop.permute.xlu0 %1235 }
 0x1c0   : > { %1523 = vst.msk [vmem:[#allocation4 + $0xd8] sm:$0xf] %vm1495_vm4, %v11288_v39  ;;  %v1299_v3 = vsel %vm794_vm7, %v10994_v7, %v1234_v1  ;;  %v1300_v40 = vsel %vm794_vm7, %v11009_v52, %v1236_v19  ;;  %1522 = vst.msk [vmem:[#allocation4 + $0xd0] sm:$0xf] %vm1495_vm4, %v11290_v17 }
 0x1c1   : > { %2946 = vrot.lane.b32.xlu1 %v11038_v27, %s9950_s26  ;;  %v3352_v5 = vld [vmem:[#allocation2 + $0x152] sm:$0xff]  ;;  %v3353_v25 = vld [vmem:[#allocation2 + $0x15a] sm:$0xff]  ;;  %1333 = vst.msk [vmem:[#allocation2 + $0x181] sm:$0xff] %vm1302_vm8, %v1299_v3  ;;  %1334 = vst.msk [vmem:[#allocation2 + $0x189] sm:$0xff] %vm1302_vm8, %v1300_v40 }
 0x1c2   : > { %v2839_v28 = vld [vmem:[#allocation2 + $0x158] sm:$0xff]  ;;  %v9214_v30 = vpack.c.bf16 %v3352_v5, %v3352_v5  ;;  %v9215_v18 = vpack.c.bf16 %v3353_v25, %v3353_v25  ;;  %v2838_v45 = vld [vmem:[#allocation2 + $0x150] sm:$0xff] }
 0x1c3   : > { %2437 = vrot.lane.b32.xlu0 %v9161_v56, %s9945_s29  ;;  %v11307_v8 = vpack.c.bf16 %v2839_v28, %v2839_v28  ;;  %v11309_v7 = vpack.c.bf16 %v2838_v45, %v2838_v45 }
 0x1c4   : > { %3512 = vst.msk [vmem:[#allocation4 + $0xc4] sm:$0xf] %vm1495_vm4, %v9214_v30  ;;  %3513 = vst.msk [vmem:[#allocation4 + $0xcc] sm:$0xf] %vm1495_vm4, %v9215_v18  ;;  %v3354_v52 = vld [vmem:[#allocation2 + $0x16a] sm:$0xff]  ;;  %v3355_v4 = vld [vmem:[#allocation2 + $0x172] sm:$0xff] }
 0x1c5   : > { %3203 = vrot.lane.b32.xlu1 %v9160_v35, %s9949_s19  ;;  %1525 = vst.msk [vmem:[#allocation4 + $0xe8] sm:$0xf] %vm1495_vm4, %v11307_v8  ;;  %v2841_v22 = vld [vmem:[#allocation2 + $0x170] sm:$0xff]  ;;  %1524 = vst.msk [vmem:[#allocation4 + $0xe0] sm:$0xf] %vm1495_vm4, %v11309_v7  ;;  %v9216_v46 = vpack.c.bf16 %v3354_v52, %v3354_v52  ;;  %v9217_v38 = vpack.c.bf16 %v3355_v4, %v3355_v4  ;;  %v2840_v41 = vld [vmem:[#allocation2 + $0x168] sm:$0xff] }
 0x1c6   : > { %v11320_v62 = vpack.c.bf16 %v2841_v22, %v2841_v22  ;;  %v11322_v16 = vpack.c.bf16 %v2840_v41, %v2840_v41 }
 0x1c7   : > { %2694 = vrot.lane.b32.xlu0 %v11026_v34, %s9947_s9  ;;  %3514 = vst.msk [vmem:[#allocation4 + $0xd4] sm:$0xf] %vm1495_vm4, %v9216_v46  ;;  %3515 = vst.msk [vmem:[#allocation4 + $0xdc] sm:$0xf] %vm1495_vm4, %v9217_v38 }
 0x1c8   : > { %1527 = vst.msk [vmem:[#allocation4 + $0xf8] sm:$0xf] %vm1495_vm4, %v11320_v62  ;;  %v3356_v59 = vld [vmem:[#allocation2 + $0x182] sm:$0xff]  ;;  %v3357_v37 = vld [vmem:[#allocation2 + $0x18a] sm:$0xff]  ;;  %1526 = vst.msk [vmem:[#allocation4 + $0xf0] sm:$0xf] %vm1495_vm4, %v11322_v16 }
 0x1c9   : > { %2178 = vrot.lane.b32.xlu1 %v11038_v27, %s9946_s30  ;;  %v9218_v6 = vpack.c.bf16 %v3356_v59, %v3356_v59  ;;  %v9219_v60 = vpack.c.bf16 %v3357_v37, %v3357_v37  ;;  %v3076_v27 = vld [vmem:[#allocation2 + $0x69] sm:$0xff]  ;;  %v2569_v59 = vld [vmem:[#allocation2 + $0xb2] sm:$0xff] }
 0x1cb   : > { %1670 = vrot.lane.b32.xlu0 %v9161_v56, %s9942_s23  ;;  %3516 = vst.msk [vmem:[#allocation4 + $0xe4] sm:$0xf] %vm1495_vm4, %v9218_v6  ;;  %3517 = vst.msk [vmem:[#allocation4 + $0xec] sm:$0xf] %vm1495_vm4, %v9219_v60  ;;  %v9163_v56 = vpack.c.bf16 %v3076_v27, %v3076_v27 }
 0x1cd   : > { %2435 = vrot.lane.b32.xlu1 %v9160_v35, %s9945_s29 }
 0x1cf   : > { %1927 = vrot.lane.b32.xlu0 %v11026_v34, %s9943_s24  ;;  %v9162_v34 = vpack.c.bf16 %v3075_v13, %v3075_v13 }
 0x1d1   : > { %2692 = vrot.lane.b32.xlu1 %v11024_v43, %s9947_s9 }
 0x1d3   : > { %2948 = vrot.lane.b32.xlu0 %v11040_v26, %s9950_s26 }
 0x1d5   : > { %1668 = vrot.lane.b32.xlu1 %v9160_v35, %s9942_s23 }
 0x1d7   : > { %2180 = vrot.lane.b32.xlu0 %v11040_v26, %s9946_s30 }
 0x1d9   : > { %1925 = vrot.lane.b32.xlu1 %v11024_v43, %s9943_s24  ;;  %v3078_v43 = vld [vmem:[#allocation2 + $0x81] sm:$0xff] }
 0x1da   : > { %v9165_v26 = vpack.c.bf16 %v3078_v43, %v3078_v43 }
 0x1db   : > { %3209 = vrot.lane.b32.xlu0 %v9163_v56, %s9949_s19 }
 0x1dd   : > { %2950 = vrot.lane.b32.xlu1 %v11067_v55, %s9950_s26 }
 0x1df   : > { %2441 = vrot.lane.b32.xlu0 %v9163_v56, %s9945_s29 }
 0x1e1   : > { %3207 = vrot.lane.b32.xlu1 %v9162_v34, %s9949_s19 }
 0x1e3   : > { %2698 = vrot.lane.b32.xlu0 %v11058_v24, %s9947_s9 }
 0x1e5   : > { %2182 = vrot.lane.b32.xlu1 %v11067_v55, %s9946_s30  ;;  %v3077_v55 = vld [vmem:[#allocation2 + $0x79] sm:$0xff] }
 0x1e7   : > { %1674 = vrot.lane.b32.xlu0 %v9163_v56, %s9942_s23  ;;  %v9107_v56 = vpack.c.bf16 %v2569_v59, %v2569_v59  ;;  %v9701_v59 = vld [vmem:[#allocation4 + $0x24] ss:$8 sps:$4 sm:$0xff]  }
 0x1e9   : > { %2439 = vrot.lane.b32.xlu1 %v9162_v34, %s9945_s29 }
 0x1eb   : > { %1931 = vrot.lane.b32.xlu0 %v11058_v24, %s9943_s24  ;;  %v9164_v24 = vpack.c.bf16 %v3077_v55, %v3077_v55 }
 0x1ed   : > { %2696 = vrot.lane.b32.xlu1 %v11056_v29, %s9947_s9 }
 0x1ef   : > { %2952 = vrot.lane.b32.xlu0 %v11069_v63, %s9950_s26 }
 0x1f1   : > { %1672 = vrot.lane.b32.xlu1 %v9162_v34, %s9942_s23 }
 0x1f3   : > { %2184 = vrot.lane.b32.xlu0 %v11069_v63, %s9946_s30 }
 0x1f5   : > { %1929 = vrot.lane.b32.xlu1 %v11056_v29, %s9943_s24 }
 0x1f7   : > { %3213 = vrot.lane.b32.xlu0 %v9165_v26, %s9949_s19 }
 0x1f9   : > { %2954 = vrot.lane.b32.xlu1 %v11097_v12, %s9950_s26 }
 0x1fb   : > { %2445 = vrot.lane.b32.xlu0 %v9165_v26, %s9945_s29 }
 0x1fd   : > { %3211 = vrot.lane.b32.xlu1 %v9164_v24, %s9949_s19 }
 0x1ff   : > { %2702 = vrot.lane.b32.xlu0 %v11088_v2, %s9947_s9 }
 0x200   : > { %v2430_v53 = vpop.permute.xlu0 %2429 }
 0x201   : > { %2186 = vrot.lane.b32.xlu1 %v11097_v12, %s9946_s30 }
 0x202   : > { %v2171_v29 = vpop.permute.xlu1 %2170 }
 0x203   : > { %1678 = vrot.lane.b32.xlu0 %v9165_v26, %s9942_s23  ;;  %2267 = vst.msk [vmem:[#allocation4] sm:$0xf] %vm2266_vm9, %v2171_v29  ;;  %v2568_v26 = vld [vmem:[#allocation2 + $0xaa] sm:$0xff] }
 0x204   : > { %v2687_v63 = vpop.permute.xlu0 %2686 }
 0x205   : > { %2443 = vrot.lane.b32.xlu1 %v9164_v24, %s9945_s29 }
 0x207   : > { %1935 = vrot.lane.b32.xlu0 %v11088_v2, %s9943_s24  ;;  %v2428_v0 = vpop.permute.xlu1 %2427  ;;  %v3080_v2 = vld [vmem:[#allocation2 + $0x99] sm:$0xff] }
 0x208   : > { %2524 = vst.msk [vmem:[#allocation4] sm:$0xf] %vm2523_vm10, %v2428_v0  ;;  %v9167_v1 = vpack.c.bf16 %v3080_v2, %v3080_v2  ;;  %v3084_v0 = vld [vmem:[#allocation2 + $0xc9] sm:$0xff] }
 0x209   : > { %v1663_v58 = vpop.permute.xlu0 %1662  ;;  %2700 = vrot.lane.b32.xlu1 %v11086_v61, %s9947_s9 }
 0x20a   : > { %1756 = vst.msk [vmem:[#allocation4 + $0x18] sm:$0xf] %vm1752_vm5, %v1663_v58 }
 0x20b   : > { %2956 = vrot.lane.b32.xlu0 %v11099_v14, %s9950_s26  ;;  %v2685_v12 = vpop.permute.xlu1 %2684 }
 0x20c   : > { %2781 = vst.msk [vmem:[#allocation4] sm:$0xf] %vm2780_vm11, %v2685_v12 }
 0x20d   : > { %v1920_v44 = vpop.permute.xlu0 %1919  ;;  %1676 = vrot.lane.b32.xlu1 %v9164_v24, %s9942_s23 }
 0x20e   : > { %2013 = vst.msk [vmem:[#allocation4 + $0x18] sm:$0xf] %vm2009_vm6, %v1920_v44  ;;  %v9171_v44 = vpack.c.bf16 %v3084_v0, %v3084_v0 }
 0x20f   : > { %2188 = vrot.lane.b32.xlu0 %v11099_v14, %s9946_s30  ;;  %v1661_v42 = vpop.permute.xlu1 %1660  ;;  %v3079_v14 = vld [vmem:[#allocation2 + $0x91] sm:$0xff] }
 0x210   : > { %1755 = vst.msk [vmem:[#allocation4 + $0x10] sm:$0xf] %vm1752_vm5, %v1661_v42  ;;  %v9166_v25 = vpack.c.bf16 %v3079_v14, %v3079_v14  ;;  %v3083_v42 = vld [vmem:[#allocation2 + $0xc1] sm:$0xff] }
 0x211   : > { %v2173_v10 = vpop.permute.xlu0 %2172  ;;  %1933 = vrot.lane.b32.xlu1 %v11086_v61, %s9943_s24 }
 0x212   : > { %2268 = vst.msk [vmem:[#allocation4 + $0x8] sm:$0xf] %vm2266_vm9, %v2173_v10  ;;  %v2571_v10 = vld [vmem:[#allocation2 + $0xca] sm:$0xff] }
 0x213   : > { %2525 = vst.msk [vmem:[#allocation4 + $0x8] sm:$0xf] %vm2523_vm10, %v2430_v53  ;;  %3217 = vrot.lane.b32.xlu0 %v9167_v1, %s9949_s19  ;;  %v1918_v19 = vpop.permute.xlu1 %1917  ;;  %v9106_v53 = vpack.c.bf16 %v2568_v26, %v2568_v26 }
 0x214   : > { %2782 = vst.msk [vmem:[#allocation4 + $0x8] sm:$0xf] %vm2780_vm11, %v2687_v63 }
 0x215   : > { %2012 = vst.msk [vmem:[#allocation4 + $0x10] sm:$0xf] %vm2009_vm6, %v1918_v19  ;;  %v3202_v5 = vpop.permute.xlu0 %3201  ;;  %2958 = vrot.lane.b32.xlu1 %v11128_v23, %s9950_s26 }
 0x217   : > { %2449 = vrot.lane.b32.xlu0 %v9167_v1, %s9945_s29  ;;  %v2943_v61 = vpop.permute.xlu1 %2942 }
 0x218   : > { %3039 = vst.msk [vmem:[#allocation4] sm:$0xf] %vm3038_vm12, %v2943_v61 }
 0x219   : > { %v2434_v3 = vpop.permute.xlu0 %2433  ;;  %3215 = vrot.lane.b32.xlu1 %v9166_v25, %s9949_s19 }
 0x21b   : > { %2706 = vrot.lane.b32.xlu0 %v11119_v47, %s9947_s9  ;;  %v3200_v40 = vpop.permute.xlu1 %3199 }
 0x21c   : > { %3296 = vst.msk [vmem:[#allocation4] sm:$0xf] %vm3295_vm13, %v3200_v40 }
 0x21d   : > { %v2691_v28 = vpop.permute.xlu0 %2690  ;;  %2190 = vrot.lane.b32.xlu1 %v11128_v23, %s9946_s30 }
 0x21f   : > { %1682 = vrot.lane.b32.xlu0 %v9167_v1, %s9942_s23  ;;  %v2175_v30 = vpop.permute.xlu1 %2174  ;;  %v9698_v1 = vld [vmem:[#allocation4 + $0x14] ss:$8 sps:$4 sm:$0xff]  }
 0x220   : > { %2269 = vst.msk [vmem:[#allocation4 + $0x10] sm:$0xf] %vm2266_vm9, %v2175_v30  ;;  %v2570_v30 = vld [vmem:[#allocation2 + $0xc2] sm:$0xff] }
 0x221   : > { %v1667_v18 = vpop.permute.xlu0 %1666  ;;  %2447 = vrot.lane.b32.xlu1 %v9166_v25, %s9945_s29 }
 0x222   : > { %1758 = vst.msk [vmem:[#allocation4 + $0x28] sm:$0xf] %vm1752_vm5, %v1667_v18 }
 0x223   : > { %1939 = vrot.lane.b32.xlu0 %v11119_v47, %s9943_s24  ;;  %v2432_v35 = vpop.permute.xlu1 %2431  ;;  %v3082_v47 = vld [vmem:[#allocation2 + $0xb1] sm:$0xff] }
 0x224   : > { %2526 = vst.msk [vmem:[#allocation4 + $0x10] sm:$0xf] %vm2523_vm10, %v2432_v35  ;;  %v9169_v46 = vpack.c.bf16 %v3082_v47, %v3082_v47  ;;  %v3086_v47 = vld [vmem:[#allocation2 + $0xe1] sm:$0xff] }
 0x225   : > { %v1924_v45 = vpop.permute.xlu0 %1923  ;;  %2704 = vrot.lane.b32.xlu1 %v11117_v20, %s9947_s9 }
 0x226   : > { %2015 = vst.msk [vmem:[#allocation4 + $0x28] sm:$0xf] %vm2009_vm6, %v1924_v45  ;;  %v9108_v45 = vpack.c.bf16 %v2570_v30, %v2570_v30 }
 0x227   : > { %2960 = vrot.lane.b32.xlu0 %v11137_v48, %s9950_s26  ;;  %v2689_v23 = vpop.permute.xlu1 %2688 }
 0x228   : > { %2783 = vst.msk [vmem:[#allocation4 + $0x10] sm:$0xf] %vm2780_vm11, %v2689_v23 }
 0x229   : > { %v2945_v52 = vpop.permute.xlu0 %2944  ;;  %1680 = vrot.lane.b32.xlu1 %v9166_v25, %s9942_s23  ;;  %v9109_v25 = vpack.c.bf16 %v2571_v10, %v2571_v10 }
 0x22a   : > { %3040 = vst.msk [vmem:[#allocation4 + $0x8] sm:$0xf] %vm3038_vm12, %v2945_v52 }
 0x22b   : > { %3297 = vst.msk [vmem:[#allocation4 + $0x8] sm:$0xf] %vm3295_vm13, %v3202_v5  ;;  %2192 = vrot.lane.b32.xlu0 %v11137_v48, %s9946_s30  ;;  %v1665_v4 = vpop.permute.xlu1 %1664  ;;  %v3081_v48 = vld [vmem:[#allocation2 + $0xa9] sm:$0xff]  ;;  %v9170_v5 = vpack.c.bf16 %v3083_v42, %v3083_v42  ;;  %v9704_v42 = vld [vmem:[#allocation4 + $0x34] ss:$8 sps:$4 sm:$0xff]  }
 0x22c   : > { %1757 = vst.msk [vmem:[#allocation4 + $0x20] sm:$0xf] %vm1752_vm5, %v1665_v4  ;;  %v9168_v60 = vpack.c.bf16 %v3081_v48, %v3081_v48  ;;  %v3085_v48 = vld [vmem:[#allocation2 + $0xd9] sm:$0xff] }
 0x22d   : > { %v2177_v22 = vpop.permute.xlu0 %2176  ;;  %1937 = vrot.lane.b32.xlu1 %v11117_v20, %s9943_s24  ;;  %v9697_v20 = vld [vmem:[#allocation4 + $0x4] ss:$8 sps:$4 sm:$0xff]  }
 0x22e   : > { %2270 = vst.msk [vmem:[#allocation4 + $0x18] sm:$0xf] %vm2266_vm9, %v2177_v22  ;;  %8515 = vmatprep.mubr.msk.bf16.mxu1 %vm1302_vm8, %v9697_v20 }
 0x22f   : > { %2527 = vst.msk [vmem:[#allocation4 + $0x18] sm:$0xf] %vm2523_vm10, %v2434_v3  ;;  %3221 = vrot.lane.b32.xlu0 %v9169_v46, %s9949_s19  ;;  %v1922_v38 = vpop.permute.xlu1 %1921 }
 0x230   : > { %2784 = vst.msk [vmem:[#allocation4 + $0x18] sm:$0xf] %vm2780_vm11, %v2691_v28 }
 0x231   : > { %2014 = vst.msk [vmem:[#allocation4 + $0x20] sm:$0xf] %vm2009_vm6, %v1922_v38  ;;  %v3206_v41 = vpop.permute.xlu0 %3205  ;;  %2962 = vrot.lane.b32.xlu1 %v11157_v51, %s9950_s26 }
 0x232   : > { %v9695_v37 = vld [vmem:[#allocation4] ss:$8 sps:$4 sm:$0xff]  }
 0x233   : > { %2453 = vrot.lane.b32.xlu0 %v9169_v46, %s9945_s29  ;;  %v2947_v6 = vpop.permute.xlu1 %2946  ;;  %3849 = vmatmul.mubr.bf16.vlgmr.msra.gmra.mxu1 %v9695_v37 }
 0x234   : > { %3041 = vst.msk [vmem:[#allocation4 + $0x10] sm:$0xf] %vm3038_vm12, %v2947_v6  ;;  %8516 = vmatprep.mubr.msk.bf16.mxu1 %vm1302_vm8, %v9698_v1  ;;  %v9172_v6 = vpack.c.bf16 %v3085_v48, %v3085_v48 }
 0x235   : > { %v2438_v27 = vpop.permute.xlu0 %2437  ;;  %3219 = vrot.lane.b32.xlu1 %v9168_v60, %s9949_s19 }
 0x237   : > { %2710 = vrot.lane.b32.xlu0 %v9107_v56, %s9947_s9  ;;  %v3204_v13 = vpop.permute.xlu1 %3203 }
 0x238   : > { %3298 = vst.msk [vmem:[#allocation4 + $0x10] sm:$0xf] %vm3295_vm13, %v3204_v13 }
 0x239   : > { %v2695_v34 = vpop.permute.xlu0 %2694  ;;  %2194 = vrot.lane.b32.xlu1 %v11157_v51, %s9946_s30 }
 0x23b   : > { %1686 = vrot.lane.b32.xlu0 %v9169_v46, %s9942_s23  ;;  %v2179_v43 = vpop.permute.xlu1 %2178  ;;  %v9173_v46 = vpack.c.bf16 %v3086_v47, %v3086_v47 }
 0x23c   : > { %2271 = vst.msk [vmem:[#allocation4 + $0x20] sm:$0xf] %vm2266_vm9, %v2179_v43  ;;  %v2572_v43 = vld [vmem:[#allocation2 + $0xda] sm:$0xff] }
 0x23d   : > { %v1671_v55 = vpop.permute.xlu0 %1670  ;;  %2451 = vrot.lane.b32.xlu1 %v9168_v60, %s9945_s29 }
 0x23e   : > { %1760 = vst.msk [vmem:[#allocation4 + $0x38] sm:$0xf] %vm1752_vm5, %v1671_v55 }
 0x23f   : > { %1943 = vrot.lane.b32.xlu0 %v9107_v56, %s9943_s24  ;;  %v2436_v24 = vpop.permute.xlu1 %2435 }
 0x240   : > { %2528 = vst.msk [vmem:[#allocation4 + $0x20] sm:$0xf] %vm2523_vm10, %v2436_v24  ;;  %v9110_v24 = vpack.c.bf16 %v2572_v43, %v2572_v43 }
 0x241   : > { %v1928_v29 = vpop.permute.xlu0 %1927  ;;  %2708 = vrot.lane.b32.xlu1 %v9106_v53, %s9947_s9 }
 0x242   : > { %2017 = vst.msk [vmem:[#allocation4 + $0x38] sm:$0xf] %vm2009_vm6, %v1928_v29 }
 0x243   : > { %2964 = vrot.lane.b32.xlu0 %v11163_v50, %s9950_s26  ;;  %v2693_v51 = vpop.permute.xlu1 %2692 }
 0x244   : > { %2785 = vst.msk [vmem:[#allocation4 + $0x20] sm:$0xf] %vm2780_vm11, %v2693_v51  ;;  %v3088_v51 = vld [vmem:[#allocation2 + $0xf9] sm:$0xff] }
 0x245   : > { %v2949_v63 = vpop.permute.xlu0 %2948  ;;  %1684 = vrot.lane.b32.xlu1 %v9168_v60, %s9942_s23 }
 0x246   : > { %3042 = vst.msk [vmem:[#allocation4 + $0x18] sm:$0xf] %vm3038_vm12, %v2949_v63 }
 0x247   : > { %3299 = vst.msk [vmem:[#allocation4 + $0x18] sm:$0xf] %vm3295_vm13, %v3206_v41  ;;  %2196 = vrot.lane.b32.xlu0 %v11163_v50, %s9946_s30  ;;  %v1669_v58 = vpop.permute.xlu1 %1668  ;;  %v2573_v41 = vld [vmem:[#allocation2 + $0xe2] sm:$0xff] }
 0x248   : > { %1759 = vst.msk [vmem:[#allocation4 + $0x30] sm:$0xf] %vm1752_vm5, %v1669_v58  ;;  %v9175_v58 = vpack.c.bf16 %v3088_v51, %v3088_v51 }
 0x249   : > { %v2181_v12 = vpop.permute.xlu0 %2180  ;;  %1941 = vrot.lane.b32.xlu1 %v9106_v53, %s9943_s24 }
 0x24a   : > { %2272 = vst.msk [vmem:[#allocation4 + $0x28] sm:$0xf] %vm2266_vm9, %v2181_v12 }
 0x24b   : > { %2529 = vst.msk [vmem:[#allocation4 + $0x28] sm:$0xf] %vm2523_vm10, %v2438_v27  ;;  %3225 = vrot.lane.b32.xlu0 %v9171_v44, %s9949_s19  ;;  %v1926_v2 = vpop.permute.xlu1 %1925  ;;  %v9111_v27 = vpack.c.bf16 %v2573_v41, %v2573_v41 }
 0x24c   : > { %2786 = vst.msk [vmem:[#allocation4 + $0x28] sm:$0xf] %vm2780_vm11, %v2695_v34 }
 0x24d   : > { %2016 = vst.msk [vmem:[#allocation4 + $0x30] sm:$0xf] %vm2009_vm6, %v1926_v2  ;;  %v3210_v50 = vpop.permute.xlu0 %3209  ;;  %2966 = vrot.lane.b32.xlu1 %v11181_v21, %s9950_s26  ;;  %v2575_v2 = vld [vmem:[#allocation2 + $0xfa] sm:$0xff] }
 0x24e   : > { %v9700_v19 = vld [vmem:[#allocation4 + $0x10] ss:$8 sps:$4 sm:$0xff]  }
 0x24f   : > { %2457 = vrot.lane.b32.xlu0 %v9171_v44, %s9945_s29  ;;  %v2951_v14 = vpop.permute.xlu1 %2950  ;;  %3857 = vmatmul.mubr.bf16.gmra.mxu1 %v9700_v19 }
 0x250   : > { %3043 = vst.msk [vmem:[#allocation4 + $0x20] sm:$0xf] %vm3038_vm12, %v2951_v14  ;;  %8517 = vmatprep.mubr.msk.bf16.mxu1 %vm1302_vm8, %v9701_v59  ;;  %v9113_v14 = vpack.c.bf16 %v2575_v2, %v2575_v2  ;;  %v2579_v2 = vld [vmem:[#allocation2 + $0x12a] sm:$0xff] }
 0x251   : > { %v2442_v61 = vpop.permute.xlu0 %2441  ;;  %3223 = vrot.lane.b32.xlu1 %v9170_v5, %s9949_s19 }
 0x253   : > { %2714 = vrot.lane.b32.xlu0 %v9109_v25, %s9947_s9  ;;  %v3208_v3 = vpop.permute.xlu1 %3207 }
 0x254   : > { %3300 = vst.msk [vmem:[#allocation4 + $0x20] sm:$0xf] %vm3295_vm13, %v3208_v3  ;;  %v2574_v3 = vld [vmem:[#allocation2 + $0xf2] sm:$0xff] }
 0x255   : > { %v2699_v40 = vpop.permute.xlu0 %2698  ;;  %2198 = vrot.lane.b32.xlu1 %v11181_v21, %s9946_s30  ;;  %v9112_v30 = vpack.c.bf16 %v2574_v3, %v2574_v3 }
 0x257   : > { %1690 = vrot.lane.b32.xlu0 %v9171_v44, %s9942_s23  ;;  %v2183_v28 = vpop.permute.xlu1 %2182  ;;  %v3087_v44 = vld [vmem:[#allocation2 + $0xf1] sm:$0xff] }
 0x258   : > { %2273 = vst.msk [vmem:[#allocation4 + $0x30] sm:$0xf] %vm2266_vm9, %v2183_v28  ;;  %v9174_v1 = vpack.c.bf16 %v3087_v44, %v3087_v44 }
 0x259   : > { %v1675_v18 = vpop.permute.xlu0 %1674  ;;  %2455 = vrot.lane.b32.xlu1 %v9170_v5, %s9945_s29 }
 0x25a   : > { %1762 = vst.msk [vmem:[#allocation4 + $0x48] sm:$0xf] %vm1752_vm5, %v1675_v18 }
 0x25b   : > { %1947 = vrot.lane.b32.xlu0 %v9109_v25, %s9943_s24  ;;  %v2440_v35 = vpop.permute.xlu1 %2439 }
 0x25c   : > { %2530 = vst.msk [vmem:[#allocation4 + $0x30] sm:$0xf] %vm2523_vm10, %v2440_v35 }
 0x25d   : > { %v1932_v23 = vpop.permute.xlu0 %1931  ;;  %2712 = vrot.lane.b32.xlu1 %v9108_v45, %s9947_s9 }
 0x25e   : > { %2019 = vst.msk [vmem:[#allocation4 + $0x48] sm:$0xf] %vm2009_vm6, %v1932_v23 }
 0x25f   : > { %2968 = vrot.lane.b32.xlu0 %v11187_v49, %s9950_s26  ;;  %v2697_v21 = vpop.permute.xlu1 %2696 }
 0x260   : > { %2787 = vst.msk [vmem:[#allocation4 + $0x30] sm:$0xf] %vm2780_vm11, %v2697_v21 }
 0x261   : > { %v2953_v52 = vpop.permute.xlu0 %2952  ;;  %1688 = vrot.lane.b32.xlu1 %v9170_v5, %s9942_s23 }
 0x262   : > { %3044 = vst.msk [vmem:[#allocation4 + $0x28] sm:$0xf] %vm3038_vm12, %v2953_v52 }
 0x263   : > { %3301 = vst.msk [vmem:[#allocation4 + $0x28] sm:$0xf] %vm3295_vm13, %v3210_v50  ;;  %2200 = vrot.lane.b32.xlu0 %v11187_v49, %s9946_s30  ;;  %v1673_v4 = vpop.permute.xlu1 %1672 }
 0x264   : > { %1761 = vst.msk [vmem:[#allocation4 + $0x40] sm:$0xf] %vm1752_vm5, %v1673_v4  ;;  %v3089_v4 = vld [vmem:[#allocation2 + $0x109] sm:$0xff] }
 0x265   : > { %v2185_v22 = vpop.permute.xlu0 %2184  ;;  %1945 = vrot.lane.b32.xlu1 %v9108_v45, %s9943_s24  ;;  %v3090_v45 = vld [vmem:[#allocation2 + $0x111] sm:$0xff] }
 0x266   : > { %2274 = vst.msk [vmem:[#allocation4 + $0x38] sm:$0xf] %vm2266_vm9, %v2185_v22  ;;  %v9177_v52 = vpack.c.bf16 %v3090_v45, %v3090_v45  ;;  %v2577_v22 = vld [vmem:[#allocation2 + $0x112] sm:$0xff] }
 0x267   : > { %2531 = vst.msk [vmem:[#allocation4 + $0x38] sm:$0xf] %vm2523_vm10, %v2442_v61  ;;  %3229 = vrot.lane.b32.xlu0 %v9173_v46, %s9949_s19  ;;  %v1930_v38 = vpop.permute.xlu1 %1929  ;;  %v9115_v59 = vpack.c.bf16 %v2577_v22, %v2577_v22  ;;  %v2580_v22 = vld [vmem:[#allocation2 + $0x13a] sm:$0xff] }
 0x268   : > { %2788 = vst.msk [vmem:[#allocation4 + $0x38] sm:$0xf] %vm2780_vm11, %v2699_v40 }
 0x269   : > { %2018 = vst.msk [vmem:[#allocation4 + $0x40] sm:$0xf] %vm2009_vm6, %v1930_v38  ;;  %v3214_v49 = vpop.permute.xlu0 %3213  ;;  %2970 = vrot.lane.b32.xlu1 %v11205_v33, %s9950_s26 }
 0x26a   : > { %v9703_v37 = vld [vmem:[#allocation4 + $0x20] ss:$8 sps:$4 sm:$0xff]  }
 0x26b   : > { %2461 = vrot.lane.b32.xlu0 %v9173_v46, %s9945_s29  ;;  %v2955_v20 = vpop.permute.xlu1 %2954  ;;  %3865 = vmatmul.mubr.bf16.gmra.mxu1 %v9703_v37 }
 0x26c   : > { %3045 = vst.msk [vmem:[#allocation4 + $0x30] sm:$0xf] %vm3038_vm12, %v2955_v20  ;;  %8518 = vmatprep.mubr.msk.bf16.mxu1 %vm1302_vm8, %v9704_v42 }
 0x26d   : > { %v2446_v60 = vpop.permute.xlu0 %2445  ;;  %3227 = vrot.lane.b32.xlu1 %v9172_v6, %s9949_s19 }
 0x26f   : > { %2718 = vrot.lane.b32.xlu0 %v9111_v27, %s9947_s9  ;;  %v3212_v56 = vpop.permute.xlu1 %3211 }
 0x270   : > { %3302 = vst.msk [vmem:[#allocation4 + $0x30] sm:$0xf] %vm3295_vm13, %v3212_v56 }
 0x271   : > { %v2703_v13 = vpop.permute.xlu0 %2702  ;;  %2202 = vrot.lane.b32.xlu1 %v11205_v33, %s9946_s30 }
 0x273   : > { %1694 = vrot.lane.b32.xlu0 %v9173_v46, %s9942_s23  ;;  %v2187_v34 = vpop.permute.xlu1 %2186  ;;  %v9707_v46 = vld [vmem:[#allocation4 + $0x44] ss:$8 sps:$4 sm:$0xff]  }
 0x274   : > { %2275 = vst.msk [vmem:[#allocation4 + $0x40] sm:$0xf] %vm2266_vm9, %v2187_v34  ;;  %v3092_v34 = vld [vmem:[#allocation2 + $0x129] sm:$0xff] }
 0x275   : > { %v1679_v26 = vpop.permute.xlu0 %1678  ;;  %2459 = vrot.lane.b32.xlu1 %v9172_v6, %s9945_s29 }
 0x276   : > { %1764 = vst.msk [vmem:[#allocation4 + $0x58] sm:$0xf] %vm1752_vm5, %v1679_v26  ;;  %v3091_v26 = vld [vmem:[#allocation2 + $0x121] sm:$0xff] }
 0x277   : > { %1951 = vrot.lane.b32.xlu0 %v9111_v27, %s9943_s24  ;;  %v2444_v55 = vpop.permute.xlu1 %2443 }
 0x278   : > { %2532 = vst.msk [vmem:[#allocation4 + $0x40] sm:$0xf] %vm2523_vm10, %v2444_v55 }
 0x279   : > { %v1936_v53 = vpop.permute.xlu0 %1935  ;;  %2716 = vrot.lane.b32.xlu1 %v9110_v24, %s9947_s9 }
 0x27a   : > { %2021 = vst.msk [vmem:[#allocation4 + $0x58] sm:$0xf] %vm2009_vm6, %v1936_v53  ;;  %v11601_v53 = vpack.c.bf16 %v3091_v26, %v3091_v26  ;;  %v9716_v26 = vld [vmem:[#allocation4 + $0x74] ss:$8 sps:$4 sm:$0xff]  }
 0x27b   : > { %2972 = vrot.lane.b32.xlu0 %v11211_v9, %s9950_s26  ;;  %v2701_v33 = vpop.permute.xlu1 %2700 }
 0x27c   : > { %2789 = vst.msk [vmem:[#allocation4 + $0x40] sm:$0xf] %vm2780_vm11, %v2701_v33 }
 0x27d   : > { %v2957_v29 = vpop.permute.xlu0 %2956  ;;  %1692 = vrot.lane.b32.xlu1 %v9172_v6, %s9942_s23 }
 0x27e   : > { %3046 = vst.msk [vmem:[#allocation4 + $0x38] sm:$0xf] %vm3038_vm12, %v2957_v29 }
 0x27f   : > { %3303 = vst.msk [vmem:[#allocation4 + $0x38] sm:$0xf] %vm3295_vm13, %v3214_v49  ;;  %2204 = vrot.lane.b32.xlu0 %v11211_v9, %s9946_s30  ;;  %v1677_v63 = vpop.permute.xlu1 %1676  ;;  %v9176_v49 = vpack.c.bf16 %v3089_v4, %v3089_v4  ;;  %v2581_v4 = vld [vmem:[#allocation2 + $0x142] sm:$0xff] }
 0x280   : > { %1763 = vst.msk [vmem:[#allocation4 + $0x50] sm:$0xf] %vm1752_vm5, %v1677_v63  ;;  %v9710_v63 = vld [vmem:[#allocation4 + $0x54] ss:$8 sps:$4 sm:$0xff]  }
 0x281   : > { %v2189_v0 = vpop.permute.xlu0 %2188  ;;  %1949 = vrot.lane.b32.xlu1 %v9110_v24, %s9943_s24 }
 0x282   : > { %2276 = vst.msk [vmem:[#allocation4 + $0x48] sm:$0xf] %vm2266_vm9, %v2189_v0 }
 0x283   : > { %2533 = vst.msk [vmem:[#allocation4 + $0x48] sm:$0xf] %vm2523_vm10, %v2446_v60  ;;  %3233 = vrot.lane.b32.xlu0 %v9175_v58, %s9949_s19  ;;  %v1934_v12 = vpop.permute.xlu1 %1933  ;;  %v2576_v60 = vld [vmem:[#allocation2 + $0x10a] sm:$0xff] }
 0x284   : > { %2790 = vst.msk [vmem:[#allocation4 + $0x48] sm:$0xf] %vm2780_vm11, %v2703_v13  ;;  %v9114_v13 = vpack.c.bf16 %v2576_v60, %v2576_v60 }
 0x285   : > { %2020 = vst.msk [vmem:[#allocation4 + $0x50] sm:$0xf] %vm2009_vm6, %v1934_v12  ;;  %v3218_v9 = vpop.permute.xlu0 %3217  ;;  %2974 = vrot.lane.b32.xlu1 %v11229_v31, %s9950_s26 }
 0x286   : > { %v9706_v50 = vld [vmem:[#allocation4 + $0x30] ss:$8 sps:$4 sm:$0xff]  }
 0x287   : > { %2465 = vrot.lane.b32.xlu0 %v9175_v58, %s9945_s29  ;;  %v2959_v10 = vpop.permute.xlu1 %2958  ;;  %3873 = vmatmul.mubr.bf16.gmra.mxu1 %v9706_v50  ;;  %v2578_v50 = vld [vmem:[#allocation2 + $0x122] sm:$0xff] }
 0x288   : > { %3047 = vst.msk [vmem:[#allocation4 + $0x40] sm:$0xf] %vm3038_vm12, %v2959_v10  ;;  %8519 = vmatprep.mubr.msk.bf16.mxu1 %vm1302_vm8, %v9707_v46 }
 0x289   : > { %v2450_v19 = vpop.permute.xlu0 %2449  ;;  %3231 = vrot.lane.b32.xlu1 %v9174_v1, %s9949_s19 }
 0x28b   : > { %2722 = vrot.lane.b32.xlu0 %v9113_v14, %s9947_s9  ;;  %v3216_v5 = vpop.permute.xlu1 %3215 }
 0x28c   : > { %3304 = vst.msk [vmem:[#allocation4 + $0x40] sm:$0xf] %vm3295_vm13, %v3216_v5 }
 0x28d   : > { %v2707_v61 = vpop.permute.xlu0 %2706  ;;  %2206 = vrot.lane.b32.xlu1 %v11229_v31, %s9946_s30 }
 0x28f   : > { %1698 = vrot.lane.b32.xlu0 %v9175_v58, %s9942_s23  ;;  %v2191_v25 = vpop.permute.xlu1 %2190 }
 0x290   : > { %2277 = vst.msk [vmem:[#allocation4 + $0x50] sm:$0xf] %vm2266_vm9, %v2191_v25 }
 0x291   : > { %v1683_v40 = vpop.permute.xlu0 %1682  ;;  %2463 = vrot.lane.b32.xlu1 %v9174_v1, %s9945_s29 }
 0x292   : > { %1766 = vst.msk [vmem:[#allocation4 + $0x68] sm:$0xf] %vm1752_vm5, %v1683_v40 }
 0x293   : > { %1955 = vrot.lane.b32.xlu0 %v9113_v14, %s9943_s24  ;;  %v2448_v28 = vpop.permute.xlu1 %2447  ;;  %v3094_v14 = vld [vmem:[#allocation2 + $0x141] sm:$0xff] }
 0x294   : > { %2534 = vst.msk [vmem:[#allocation4 + $0x50] sm:$0xf] %vm2523_vm10, %v2448_v28  ;;  %v11636_v3 = vpack.c.bf16 %v3094_v14, %v3094_v14 }
 0x295   : > { %v1940_v18 = vpop.permute.xlu0 %1939  ;;  %2720 = vrot.lane.b32.xlu1 %v9112_v30, %s9947_s9 }
 0x296   : > { %2023 = vst.msk [vmem:[#allocation4 + $0x68] sm:$0xf] %vm2009_vm6, %v1940_v18 }
 0x297   : > { %2976 = vrot.lane.b32.xlu0 %v11235_v57, %s9950_s26  ;;  %v2705_v31 = vpop.permute.xlu1 %2704 }
 0x298   : > { %2791 = vst.msk [vmem:[#allocation4 + $0x50] sm:$0xf] %vm2780_vm11, %v2705_v31 }
 0x299   : > { %v2961_v35 = vpop.permute.xlu0 %2960  ;;  %1696 = vrot.lane.b32.xlu1 %v9174_v1, %s9942_s23 }
 0x29a   : > { %3048 = vst.msk [vmem:[#allocation4 + $0x48] sm:$0xf] %vm3038_vm12, %v2961_v35  ;;  %v9713_v35 = vld [vmem:[#allocation4 + $0x64] ss:$8 sps:$4 sm:$0xff]  }
 0x29b   : > { %3305 = vst.msk [vmem:[#allocation4 + $0x48] sm:$0xf] %vm3295_vm13, %v3218_v9  ;;  %2208 = vrot.lane.b32.xlu0 %v11235_v57, %s9946_s30  ;;  %v1681_v23 = vpop.permute.xlu1 %1680 }
 0x29c   : > { %1765 = vst.msk [vmem:[#allocation4 + $0x60] sm:$0xf] %vm1752_vm5, %v1681_v23 }
 0x29d   : > { %v2193_v21 = vpop.permute.xlu0 %2192  ;;  %1953 = vrot.lane.b32.xlu1 %v9112_v30, %s9943_s24 }
 0x29e   : > { %2278 = vst.msk [vmem:[#allocation4 + $0x58] sm:$0xf] %vm2266_vm9, %v2193_v21 }
 0x29f   : > { %2535 = vst.msk [vmem:[#allocation4 + $0x58] sm:$0xf] %vm2523_vm10, %v2450_v19  ;;  %3237 = vrot.lane.b32.xlu0 %v9177_v52, %s9949_s19  ;;  %v1938_v47 = vpop.permute.xlu1 %1937  ;;  %v9116_v19 = vpack.c.bf16 %v2578_v50, %v2578_v50 }
 0x2a0   : > { %2792 = vst.msk [vmem:[#allocation4 + $0x58] sm:$0xf] %vm2780_vm11, %v2707_v61  ;;  %v3093_v61 = vld [vmem:[#allocation2 + $0x139] sm:$0xff] }
 0x2a1   : > { %2022 = vst.msk [vmem:[#allocation4 + $0x60] sm:$0xf] %vm2009_vm6, %v1938_v47  ;;  %v3222_v57 = vpop.permute.xlu0 %3221  ;;  %2978 = vrot.lane.b32.xlu1 %v11249_v32, %s9950_s26  ;;  %v11642_v28 = vpack.c.bf16 %v3093_v61, %v3093_v61 }
 0x2a2   : > { %v9709_v38 = vld [vmem:[#allocation4 + $0x40] ss:$8 sps:$4 sm:$0xff]  }
 0x2a3   : > { %2469 = vrot.lane.b32.xlu0 %v9177_v52, %s9945_s29  ;;  %v2963_v48 = vpop.permute.xlu1 %2962  ;;  %3881 = vmatmul.mubr.bf16.gmra.mxu1 %v9709_v38 }
 0x2a4   : > { %3049 = vst.msk [vmem:[#allocation4 + $0x50] sm:$0xf] %vm3038_vm12, %v2963_v48  ;;  %8520 = vmatprep.mubr.msk.bf16.mxu1 %vm1302_vm8, %v9710_v63  ;;  %v9118_v48 = vpack.c.bf16 %v2580_v22, %v2580_v22 }
 0x2a5   : > { %v2454_v41 = vpop.permute.xlu0 %2453  ;;  %3235 = vrot.lane.b32.xlu1 %v9176_v49, %s9949_s19 }
 0x2a7   : > { %2726 = vrot.lane.b32.xlu0 %v9115_v59, %s9947_s9  ;;  %v3220_v37 = vpop.permute.xlu1 %3219 }
 0x2a8   : > { %3306 = vst.msk [vmem:[#allocation4 + $0x50] sm:$0xf] %vm3295_vm13, %v3220_v37 }
 0x2a9   : > { %v2711_v20 = vpop.permute.xlu0 %2710  ;;  %2210 = vrot.lane.b32.xlu1 %v11249_v32, %s9946_s30 }
 0x2ab   : > { %2980 = vrot.lane.b32.xlu0 %v11255_v54, %s9950_s26  ;;  %v2195_v6 = vpop.permute.xlu1 %2194 }
 0x2ac   : > { %2279 = vst.msk [vmem:[#allocation4 + $0x60] sm:$0xf] %vm2266_vm9, %v2195_v6 }
 0x2ad   : > { %v1687_v27 = vpop.permute.xlu0 %1686  ;;  %2467 = vrot.lane.b32.xlu1 %v9176_v49, %s9945_s29 }
 0x2ae   : > { %1768 = vst.msk [vmem:[#allocation4 + $0x78] sm:$0xf] %vm1752_vm5, %v1687_v27 }
 0x2af   : > { %2212 = vrot.lane.b32.xlu0 %v11255_v54, %s9946_s30  ;;  %v2452_v56 = vpop.permute.xlu1 %2451  ;;  %v11595_v54 = vpack.c.bf16 %v3092_v34, %v3092_v34 }
 0x2b0   : > { %2536 = vst.msk [vmem:[#allocation4 + $0x60] sm:$0xf] %vm2523_vm10, %v2452_v56 }
 0x2b1   : > { %v1944_v32 = vpop.permute.xlu0 %1943  ;;  %2724 = vrot.lane.b32.xlu1 %v9114_v13, %s9947_s9 }
 0x2b2   : > { %2025 = vst.msk [vmem:[#allocation4 + $0x78] sm:$0xf] %vm2009_vm6, %v1944_v32 }
 0x2b3   : > { %2984 = vrot.lane.b32.xlu0 %v11267_v36, %s9950_s26  ;;  %v2709_v43 = vpop.permute.xlu1 %2708 }
 0x2b4   : > { %2793 = vst.msk [vmem:[#allocation4 + $0x60] sm:$0xf] %vm2780_vm11, %v2709_v43 }
 0x2b5   : > { %v2965_v55 = vpop.permute.xlu0 %2964  ;;  %2982 = vrot.lane.b32.xlu1 %v11271_v15, %s9950_s26 }
 0x2b6   : > { %3050 = vst.msk [vmem:[#allocation4 + $0x58] sm:$0xf] %vm3038_vm12, %v2965_v55 }
 0x2b7   : > { %3307 = vst.msk [vmem:[#allocation4 + $0x58] sm:$0xf] %vm3295_vm13, %v3222_v57  ;;  %3241 = vrot.lane.b32.xlu0 %v11595_v54, %s9949_s19  ;;  %v1685_v24 = vpop.permute.xlu1 %1684 }
 0x2b8   : > { %1767 = vst.msk [vmem:[#allocation4 + $0x70] sm:$0xf] %vm1752_vm5, %v1685_v24 }
 0x2b9   : > { %v2197_v33 = vpop.permute.xlu0 %2196  ;;  %3239 = vrot.lane.b32.xlu1 %v11601_v53, %s9949_s19 }
 0x2ba   : > { %2280 = vst.msk [vmem:[#allocation4 + $0x68] sm:$0xf] %vm2266_vm9, %v2197_v33 }
 0x2bb   : > { %2537 = vst.msk [vmem:[#allocation4 + $0x68] sm:$0xf] %vm2523_vm10, %v2454_v41  ;;  %1702 = vrot.lane.b32.xlu0 %v9177_v52, %s9942_s23  ;;  %v1942_v29 = vpop.permute.xlu1 %1941 }
 0x2bc   : > { %2794 = vst.msk [vmem:[#allocation4 + $0x68] sm:$0xf] %vm2780_vm11, %v2711_v20 }
 0x2bd   : > { %2024 = vst.msk [vmem:[#allocation4 + $0x70] sm:$0xf] %vm2009_vm6, %v1942_v29  ;;  %v3226_v51 = vpop.permute.xlu0 %3225  ;;  %1700 = vrot.lane.b32.xlu1 %v9176_v49, %s9942_s23  ;;  %v3096_v49 = vld [vmem:[#allocation2 + $0x159] sm:$0xff] }
 0x2be   : > { %v9712_v0 = vld [vmem:[#allocation4 + $0x50] ss:$8 sps:$4 sm:$0xff]   ;;  %v11679_v20 = vpack.c.bf16 %v3096_v49, %v3096_v49 }
 0x2bf   : > { %1959 = vrot.lane.b32.xlu0 %v9115_v59, %s9943_s24  ;;  %v2967_v58 = vpop.permute.xlu1 %2966  ;;  %3889 = vmatmul.mubr.bf16.gmra.mxu1 %v9712_v0  ;;  %v3095_v59 = vld [vmem:[#allocation2 + $0x151] sm:$0xff] }
 0x2c0   : > { %3051 = vst.msk [vmem:[#allocation4 + $0x60] sm:$0xf] %vm3038_vm12, %v2967_v58  ;;  %8521 = vmatprep.mubr.msk.bf16.mxu1 %vm1302_vm8, %v9713_v35  ;;  %v11685_v60 = vpack.c.bf16 %v3095_v59, %v3095_v59  ;;  %v2583_v58 = vld [vmem:[#allocation2 + $0x15a] sm:$0xff]  ;;  %v9718_v35 = vld [vmem:[#allocation4 + $0x84] ss:$8 sps:$4 sm:$0xff]  }
 0x2c1   : > { %v2458_v12 = vpop.permute.xlu0 %2457  ;;  %1957 = vrot.lane.b32.xlu1 %v9114_v13, %s9943_s24 }
 0x2c3   : > { %2216 = vrot.lane.b32.xlu0 %v11267_v36, %s9946_s30  ;;  %v3224_v44 = vpop.permute.xlu1 %3223  ;;  %v9117_v36 = vpack.c.bf16 %v2579_v2, %v2579_v2  ;;  %v9121_v2 = vpack.c.bf16 %v2583_v58, %v2583_v58 }
 0x2c4   : > { %3308 = vst.msk [vmem:[#allocation4 + $0x60] sm:$0xf] %vm3295_vm13, %v3224_v44 }
 0x2c5   : > { %v2715_v9 = vpop.permute.xlu0 %2714  ;;  %2214 = vrot.lane.b32.xlu1 %v11271_v15, %s9946_s30 }
 0x2c7   : > { %2473 = vrot.lane.b32.xlu0 %v11595_v54, %s9945_s29  ;;  %v2199_v42 = vpop.permute.xlu1 %2198 }
 0x2c8   : > { %2281 = vst.msk [vmem:[#allocation4 + $0x70] sm:$0xf] %vm2266_vm9, %v2199_v42 }
 0x2c9   : > { %v1691_v10 = vpop.permute.xlu0 %1690  ;;  %2471 = vrot.lane.b32.xlu1 %v11601_v53, %s9945_s29 }
 0x2ca   : > { %1770 = vst.msk [vmem:[#allocation4 + $0x88] sm:$0xf] %vm1752_vm5, %v1691_v10 }
 0x2cb   : > { %2730 = vrot.lane.b32.xlu0 %v9117_v36, %s9947_s9  ;;  %v2456_v1 = vpop.permute.xlu1 %2455 }
 0x2cc   : > { %2538 = vst.msk [vmem:[#allocation4 + $0x70] sm:$0xf] %vm2523_vm10, %v2456_v1  ;;  %v3098_v1 = vld [vmem:[#allocation2 + $0x171] sm:$0xff] }
 0x2cd   : > { %v1948_v15 = vpop.permute.xlu0 %1947  ;;  %2728 = vrot.lane.b32.xlu1 %v9116_v19, %s9947_s9 }
 0x2ce   : > { %2027 = vst.msk [vmem:[#allocation4 + $0x88] sm:$0xf] %vm2009_vm6, %v1948_v15  ;;  %v3097_v15 = vld [vmem:[#allocation2 + $0x169] sm:$0xff] }
 0x2cf   : > { %2988 = vrot.lane.b32.xlu0 %v11288_v39, %s9950_s26  ;;  %v2713_v5 = vpop.permute.xlu1 %2712 }
 0x2d0   : > { %2795 = vst.msk [vmem:[#allocation4 + $0x70] sm:$0xf] %vm2780_vm11, %v2713_v5  ;;  %v11738_v5 = vpack.c.bf16 %v3098_v1, %v3098_v1 }
 0x2d1   : > { %v2969_v25 = vpop.permute.xlu0 %2968  ;;  %2986 = vrot.lane.b32.xlu1 %v11290_v17, %s9950_s26 }
 0x2d2   : > { %3052 = vst.msk [vmem:[#allocation4 + $0x68] sm:$0xf] %vm3038_vm12, %v2969_v25  ;;  %v11744_v25 = vpack.c.bf16 %v3097_v15, %v3097_v15 }
 0x2d3   : > { %3309 = vst.msk [vmem:[#allocation4 + $0x68] sm:$0xf] %vm3295_vm13, %v3226_v51  ;;  %3245 = vrot.lane.b32.xlu0 %v11636_v3, %s9949_s19  ;;  %v1689_v40 = vpop.permute.xlu1 %1688 }
 0x2d4   : > { %1769 = vst.msk [vmem:[#allocation4 + $0x80] sm:$0xf] %vm1752_vm5, %v1689_v40 }
 0x2d5   : > { %v2201_v30 = vpop.permute.xlu0 %2200  ;;  %3243 = vrot.lane.b32.xlu1 %v11642_v28, %s9949_s19 }
 0x2d6   : > { %2282 = vst.msk [vmem:[#allocation4 + $0x78] sm:$0xf] %vm2266_vm9, %v2201_v30 }
 0x2d7   : > { %2539 = vst.msk [vmem:[#allocation4 + $0x78] sm:$0xf] %vm2523_vm10, %v2458_v12  ;;  %1706 = vrot.lane.b32.xlu0 %v11595_v54, %s9942_s23  ;;  %v1946_v18 = vpop.permute.xlu1 %1945 }
 0x2d8   : > { %2796 = vst.msk [vmem:[#allocation4 + $0x78] sm:$0xf] %vm2780_vm11, %v2715_v9  ;;  %v2582_v9 = vld [vmem:[#allocation2 + $0x152] sm:$0xff] }
 0x2d9   : > { %2026 = vst.msk [vmem:[#allocation4 + $0x80] sm:$0xf] %vm2009_vm6, %v1946_v18  ;;  %v3230_v31 = vpop.permute.xlu0 %3229  ;;  %1704 = vrot.lane.b32.xlu1 %v11601_v53, %s9942_s23  ;;  %v9120_v10 = vpack.c.bf16 %v2582_v9, %v2582_v9 }
 0x2da   : > { %v9715_v45 = vld [vmem:[#allocation4 + $0x60] ss:$8 sps:$4 sm:$0xff]  }
 0x2db   : > { %1963 = vrot.lane.b32.xlu0 %v9117_v36, %s9943_s24  ;;  %v2971_v23 = vpop.permute.xlu1 %2970  ;;  %3897 = vmatmul.mubr.bf16.gmra.mxu1 %v9715_v45 }
 0x2dc   : > { %3053 = vst.msk [vmem:[#allocation4 + $0x70] sm:$0xf] %vm3038_vm12, %v2971_v23  ;;  %8522 = vmatprep.mubr.msk.bf16.mxu1 %vm1302_vm8, %v9716_v26  ;;  %v3100_v26 = vld [vmem:[#allocation2 + $0x189] sm:$0xff] }
 0x2dd   : > { %v2462_v21 = vpop.permute.xlu0 %2461  ;;  %1961 = vrot.lane.b32.xlu1 %v9116_v19, %s9943_s24 }
 0x2df   : > { %2220 = vrot.lane.b32.xlu0 %v11288_v39, %s9946_s30  ;;  %v3228_v52 = vpop.permute.xlu1 %3227  ;;  %v9119_v39 = vpack.c.bf16 %v2581_v4, %v2581_v4 }
 0x2e0   : > { %3310 = vst.msk [vmem:[#allocation4 + $0x70] sm:$0xf] %vm3295_vm13, %v3228_v52 }
 0x2e1   : > { %v2719_v47 = vpop.permute.xlu0 %2718  ;;  %2218 = vrot.lane.b32.xlu1 %v11290_v17, %s9946_s30 }
 0x2e3   : > { %2477 = vrot.lane.b32.xlu0 %v11636_v3, %s9945_s29  ;;  %v2203_v57 = vpop.permute.xlu1 %2202 }
 0x2e4   : > { %2283 = vst.msk [vmem:[#allocation4 + $0x80] sm:$0xf] %vm2266_vm9, %v2203_v57 }
 0x2e5   : > { %v1695_v46 = vpop.permute.xlu0 %1694  ;;  %2475 = vrot.lane.b32.xlu1 %v11642_v28, %s9945_s29 }
 0x2e6   : > { %1772 = vst.msk [vmem:[#allocation4 + $0x98] sm:$0xf] %vm1752_vm5, %v1695_v46 }
 0x2e7   : > { %2734 = vrot.lane.b32.xlu0 %v9119_v39, %s9947_s9  ;;  %v2460_v38 = vpop.permute.xlu1 %2459  ;;  %v3534_v34 = vld [vmem:[#allocation4 + $0x70] sm:$0xff] }
 0x2e8   : > { %2540 = vst.msk [vmem:[#allocation4 + $0x80] sm:$0xf] %vm2523_vm10, %v2460_v38 }
 0x2e9   : > { %v1952_v17 = vpop.permute.xlu0 %1951  ;;  %2732 = vrot.lane.b32.xlu1 %v9118_v48, %s9947_s9 }
 0x2ea   : > { %2029 = vst.msk [vmem:[#allocation4 + $0x98] sm:$0xf] %vm2009_vm6, %v1952_v17  ;;  %v2584_v17 = vld [vmem:[#allocation2 + $0x16a] sm:$0xff] }
 0x2eb   : > { %2992 = vrot.lane.b32.xlu0 %v11307_v8, %s9950_s26  ;;  %v2717_v41 = vpop.permute.xlu1 %2716 }
 0x2ec   : > { %2797 = vst.msk [vmem:[#allocation4 + $0x80] sm:$0xf] %vm2780_vm11, %v2717_v41 }
 0x2ed   : > { %v2973_v37 = vpop.permute.xlu0 %2972  ;;  %2990 = vrot.lane.b32.xlu1 %v11309_v7, %s9950_s26 }
 0x2ee   : > { %3054 = vst.msk [vmem:[#allocation4 + $0x78] sm:$0xf] %vm3038_vm12, %v2973_v37 }
 0x2ef   : > { %3311 = vst.msk [vmem:[#allocation4 + $0x78] sm:$0xf] %vm3295_vm13, %v3230_v31  ;;  %3249 = vrot.lane.b32.xlu0 %v11679_v20, %s9949_s19  ;;  %v1693_v6 = vpop.permute.xlu1 %1692 }
 0x2f0   : > { %1771 = vst.msk [vmem:[#allocation4 + $0x90] sm:$0xf] %vm1752_vm5, %v1693_v6  ;;  %v2843_v6 = vld [vmem:[#allocation2 + $0x188] sm:$0xff] }
 0x2f1   : > { %v2205_v27 = vpop.permute.xlu0 %2204  ;;  %3247 = vrot.lane.b32.xlu1 %v11685_v60, %s9949_s19 }
 0x2f2   : > { %2284 = vst.msk [vmem:[#allocation4 + $0x88] sm:$0xf] %vm2266_vm9, %v2205_v27 }
 0x2f3   : > { %2541 = vst.msk [vmem:[#allocation4 + $0x88] sm:$0xf] %vm2523_vm10, %v2462_v21  ;;  %1710 = vrot.lane.b32.xlu0 %v11636_v3, %s9942_s23  ;;  %v1950_v56 = vpop.permute.xlu1 %1949  ;;  %v11698_v32 = vpop.f32.mrf.mxu1 }
 0x2f4   : > { %2798 = vst.msk [vmem:[#allocation4 + $0x88] sm:$0xf] %vm2780_vm11, %v2719_v47 }
 0x2f5   : > { %2028 = vst.msk [vmem:[#allocation4 + $0x90] sm:$0xf] %vm2009_vm6, %v1950_v56  ;;  %v3234_v13 = vpop.permute.xlu0 %3233  ;;  %1708 = vrot.lane.b32.xlu1 %v11642_v28, %s9942_s23  ;;  %v3852_v54 = vpop.f32.mrf.mxu1  ;;  %v9122_v56 = vpack.c.bf16 %v2584_v17, %v2584_v17 }
 0x2f6   : > { %3978 = vst.msk [vmem:[#allocation3 + $0x19] sm:$0xff] %vm1302_vm8, %v11698_v32  ;;  %v3535_v43 = vld [vmem:[#allocation4 + $0x78] sm:$0xff] }
 0x2f7   : > { %1967 = vrot.lane.b32.xlu0 %v9119_v39, %s9943_s24  ;;  %v2975_v55 = vpop.permute.xlu1 %2974  ;;  %v8488_v24 = vcombine.low %v3534_v34, %v3535_v43  ;;  %v11706_v33 = vpop.f32.mrf.mxu1  ;;  %v2585_v39 = vld [vmem:[#allocation2 + $0x172] sm:$0xff]  ;;  %v9155_v43 = vpack.c.bf16 %v2843_v6, %v2843_v6 }
 0x2f8   : > { %3055 = vst.msk [vmem:[#allocation4 + $0x80] sm:$0xf] %vm3038_vm12, %v2975_v55 }
 0x2f9   : > { %v2466_v53 = vpop.permute.xlu0 %2465  ;;  %1965 = vrot.lane.b32.xlu1 %v9118_v48, %s9943_s24  ;;  %3905 = vmatmul.mubr.bf16.gmra.mxu1 %v8488_v24  ;;  %3979 = vst.msk [vmem:[#allocation3 + $0x21] sm:$0xff] %vm1302_vm8, %v11706_v33  ;;  %v3855_v51 = vpop.f32.mrf.mxu1  ;;  %v3099_v24 = vld [vmem:[#allocation2 + $0x181] sm:$0xff] }
 0x2fa   : > { %8523 = vmatprep.mubr.msk.bf16.mxu1 %vm1302_vm8, %v9718_v35  ;;  %v9720_v51 = vld [vmem:[#allocation4 + $0x94] ss:$8 sps:$4 sm:$0xff]   ;;  %v9186_v58 = vpack.c.bf16 %v3099_v24, %v3099_v24  ;;  %v2845_v35 = vld [vmem:[#allocation2 + $0x1a0] sm:$0xff] }
 0x2fb   : > { %2224 = vrot.lane.b32.xlu0 %v11307_v8, %s9946_s30  ;;  %v3232_v29 = vpop.permute.xlu1 %3231  ;;  %v9727_v24 = vld [vmem:[%s13788_s2 + $0x20] sm:$0xff]  }
 0x2fc   : > { %3312 = vst.msk [vmem:[#allocation4 + $0x80] sm:$0xf] %vm3295_vm13, %v3232_v29  ;;  %v9187_v29 = vpack.c.bf16 %v3100_v26, %v3100_v26 }
 0x2fd   : > { %v2723_v63 = vpop.permute.xlu0 %2722  ;;  %2222 = vrot.lane.b32.xlu1 %v11309_v7, %s9946_s30  ;;  %v4714_v0 = vld [vmem:[#allocation3 + $0x18] sm:$0xff] }
 0x2fe   : > { %v11715_v12 = vpack.c.bf16 %v4714_v0, %v4714_v0 }
 0x2ff   : > { %2481 = vrot.lane.b32.xlu0 %v11679_v20, %s9945_s29  ;;  %v2207_v44 = vpop.permute.xlu1 %2206 }
 0x300   : > { %2285 = vst.msk [vmem:[#allocation4 + $0x90] sm:$0xf] %vm2266_vm9, %v2207_v44  ;;  %v4715_v7 = vld [vmem:[#allocation3 + $0x20] sm:$0xff] }
 0x301   : > { %4172 = vst.msk [vmem:[#allocation5 + $0x10] sm:$0xf] %vm1495_vm4, %v11715_v12  ;;  %v1699_v8 = vpop.permute.xlu0 %1698  ;;  %2479 = vrot.lane.b32.xlu1 %v11685_v60, %s9945_s29  ;;  %v11725_v42 = vpack.c.bf16 %v4715_v7, %v4715_v7 }
 0x302   : > { %1774 = vst.msk [vmem:[#allocation4 + $0xa8] sm:$0xf] %vm1752_vm5, %v1699_v8 }
 0x303   : > { %2738 = vrot.lane.b32.xlu0 %v9121_v2, %s9947_s9  ;;  %v2464_v50 = vpop.permute.xlu1 %2463  ;;  %4173 = vst.msk [vmem:[#allocation5 + $0x18] sm:$0xf] %vm1495_vm4, %v11725_v42  ;;  %v3536_v18 = vld [vmem:[#allocation4 + $0x80] sm:$0xff] }
 0x304   : > { %2542 = vst.msk [vmem:[#allocation4 + $0x90] sm:$0xf] %vm2523_vm10, %v2464_v50 }
 0x305   : > { %v1956_v36 = vpop.permute.xlu0 %1955  ;;  %2736 = vrot.lane.b32.xlu1 %v9120_v10, %s9947_s9 }
 0x306   : > { %2031 = vst.msk [vmem:[#allocation4 + $0xa8] sm:$0xf] %vm2009_vm6, %v1956_v36 }
 0x307   : > { %2996 = vrot.lane.b32.xlu0 %v11320_v62, %s9950_s26  ;;  %v2721_v19 = vpop.permute.xlu1 %2720 }
 0x308   : > { %2799 = vst.msk [vmem:[#allocation4 + $0x90] sm:$0xf] %vm2780_vm11, %v2721_v19 }
 0x309   : > { %v2977_v14 = vpop.permute.xlu0 %2976  ;;  %2994 = vrot.lane.b32.xlu1 %v11322_v16, %s9950_s26 }
 0x30a   : > { %3056 = vst.msk [vmem:[#allocation4 + $0x88] sm:$0xf] %vm3038_vm12, %v2977_v14 }
 0x30b   : > { %3313 = vst.msk [vmem:[#allocation4 + $0x88] sm:$0xf] %vm3295_vm13, %v3234_v13  ;;  %3253 = vrot.lane.b32.xlu0 %v11738_v5, %s9949_s19  ;;  %v1697_v61 = vpop.permute.xlu1 %1696  ;;  %v2842_v13 = vld [vmem:[#allocation2 + $0x180] sm:$0xff] }
 0x30c   : > { %1773 = vst.msk [vmem:[#allocation4 + $0xa0] sm:$0xf] %vm1752_vm5, %v1697_v61  ;;  %v9154_v54 = vpack.c.bf16 %v2842_v13, %v2842_v13 }
 0x30d   : > { %v2209_v3 = vpop.permute.xlu0 %2208  ;;  %3251 = vrot.lane.b32.xlu1 %v11744_v25, %s9949_s19 }
 0x30e   : > { %2286 = vst.msk [vmem:[#allocation4 + $0x98] sm:$0xf] %vm2266_vm9, %v2209_v3 }
 0x30f   : > { %2543 = vst.msk [vmem:[#allocation4 + $0x98] sm:$0xf] %vm2523_vm10, %v2466_v53  ;;  %1714 = vrot.lane.b32.xlu0 %v11679_v20, %s9942_s23  ;;  %v1954_v40 = vpop.permute.xlu1 %1953  ;;  %v11757_v30 = vpop.f32.mrf.mxu1 }
 0x310   : > { %2800 = vst.msk [vmem:[#allocation4 + $0x98] sm:$0xf] %vm2780_vm11, %v2723_v63 }
 0x311   : > { %2030 = vst.msk [vmem:[#allocation4 + $0xa0] sm:$0xf] %vm2009_vm6, %v1954_v40  ;;  %v3238_v28 = vpop.permute.xlu0 %3237  ;;  %1712 = vrot.lane.b32.xlu1 %v11685_v60, %s9942_s23  ;;  %v3860_v23 = vpop.f32.mrf.mxu1  ;;  %v2587_v40 = vld [vmem:[#allocation2 + $0x18a] sm:$0xff] }
 0x312   : > { %3980 = vst.msk [vmem:[#allocation3 + $0x31] sm:$0xff] %vm1302_vm8, %v11757_v30  ;;  %v3537_v31 = vld [vmem:[#allocation4 + $0x88] sm:$0xff] }
 0x313   : > { %1971 = vrot.lane.b32.xlu0 %v9121_v2, %s9943_s24  ;;  %v2979_v45 = vpop.permute.xlu1 %2978  ;;  %v8490_v21 = vcombine.low %v3536_v18, %v3537_v31  ;;  %v11765_v47 = vpop.f32.mrf.mxu1  ;;  %v2586_v31 = vld [vmem:[#allocation2 + $0x182] sm:$0xff] }
 0x314   : > { %3057 = vst.msk [vmem:[#allocation4 + $0x90] sm:$0xf] %vm3038_vm12, %v2979_v45  ;;  %v9124_v17 = vpack.c.bf16 %v2586_v31, %v2586_v31 }
 0x315   : > { %v2470_v52 = vpop.permute.xlu0 %2469  ;;  %1969 = vrot.lane.b32.xlu1 %v9120_v10, %s9943_s24  ;;  %3913 = vmatmul.mubr.bf16.gmra.mxu1 %v8490_v21  ;;  %3981 = vst.msk [vmem:[#allocation3 + $0x39] sm:$0xff] %vm1302_vm8, %v11765_v47  ;;  %v3863_v57 = vpop.f32.mrf.mxu1 }
 0x316   : > { %8524 = vmatprep.mubr.msk.bf16.mxu1 %vm1302_vm8, %v9720_v51  ;;  %v3358_v51 = vld [vmem:[#allocation2 + $0x19a] sm:$0xff] }
 0x317   : > { %2228 = vrot.lane.b32.xlu0 %v11320_v62, %s9946_s30  ;;  %v3236_v4 = vpop.permute.xlu1 %3235 }
 0x318   : > { %3314 = vst.msk [vmem:[#allocation4 + $0x90] sm:$0xf] %vm3295_vm13, %v3236_v4 }
 0x319   : > { %v2727_v22 = vpop.permute.xlu0 %2726  ;;  %2226 = vrot.lane.b32.xlu1 %v11322_v16, %s9946_s30  ;;  %v4716_v46 = vld [vmem:[#allocation3 + $0x30] sm:$0xff]  ;;  %v9123_v16 = vpack.c.bf16 %v2585_v39, %v2585_v39 }
 0x31a   : > { %v11774_v38 = vpack.c.bf16 %v4716_v46, %v4716_v46  ;;  %v2844_v46 = vld [vmem:[#allocation2 + $0x198] sm:$0xff] }
 0x31b   : > { %2485 = vrot.lane.b32.xlu0 %v11738_v5, %s9945_s29  ;;  %v2211_v48 = vpop.permute.xlu1 %2210 }
 0x31c   : > { %2287 = vst.msk [vmem:[#allocation4 + $0xa0] sm:$0xf] %vm2266_vm9, %v2211_v48  ;;  %v5995_v62 = vld [vmem:[#allocation3 + $0x32] sm:$0xff]  ;;  %v5996_v49 = vld [vmem:[#allocation3 + $0x3a] sm:$0xff] }
 0x31d   : > { %4174 = vst.msk [vmem:[#allocation5 + $0x20] sm:$0xf] %vm1495_vm4, %v11774_v38  ;;  %v2981_v41 = vpop.permute.xlu0 %2980  ;;  %2483 = vrot.lane.b32.xlu1 %v11744_v25, %s9945_s29  ;;  %v5484_v59 = vld [vmem:[#allocation3 + $0x38] sm:$0xff]  ;;  %v11783_v37 = vpack.c.bf16 %v5995_v62, %v5995_v62  ;;  %v11785_v20 = vpack.c.bf16 %v5996_v49, %v5996_v49  ;;  %v9157_v62 = vpack.c.bf16 %v2845_v35, %v2845_v35 }
 0x31e   : > { %3058 = vst.msk [vmem:[#allocation4 + $0x98] sm:$0xf] %vm3038_vm12, %v2981_v41  ;;  %v11788_v60 = vpack.c.bf16 %v5484_v59, %v5484_v59  ;;  %v3102_v49 = vld [vmem:[#allocation2 + $0x1a1] sm:$0xff]  ;;  %v3101_v59 = vld [vmem:[#allocation2 + $0x199] sm:$0xff] }
 0x31f   : > { %3315 = vst.msk [vmem:[#allocation4 + $0x98] sm:$0xf] %vm3295_vm13, %v3238_v28  ;;  %2742 = vrot.lane.b32.xlu0 %v9123_v16, %s9947_s9  ;;  %v2468_v27 = vpop.permute.xlu1 %2467  ;;  %v9188_v13 = vpack.c.bf16 %v3101_v59, %v3101_v59 }
 0x320   : > { %6155 = vst.msk [vmem:[#allocation5 + $0x4] sm:$0xf] %vm1495_vm4, %v11783_v37  ;;  %6156 = vst.msk [vmem:[#allocation5 + $0xc] sm:$0xf] %vm1495_vm4, %v11785_v20 }
 0x321   : > { %2544 = vst.msk [vmem:[#allocation4 + $0xa0] sm:$0xf] %vm2523_vm10, %v2468_v27  ;;  %v2213_v34 = vpop.permute.xlu0 %2212  ;;  %2740 = vrot.lane.b32.xlu1 %v9122_v56, %s9947_s9  ;;  %v9189_v27 = vpack.c.bf16 %v3102_v49, %v3102_v49  ;;  %v9732_v49 = vld [vmem:[%s13788_s2 + $0x10] sm:$0xff]  }
 0x322   : > { %4175 = vst.msk [vmem:[#allocation5 + $0x28] sm:$0xf] %vm1495_vm4, %v11788_v60 }
 0x323   : > { %2288 = vst.msk [vmem:[#allocation4 + $0xa8] sm:$0xf] %vm2266_vm9, %v2213_v34  ;;  %3000 = vrot.lane.b32.xlu0 %v9155_v43, %s9950_s26  ;;  %v2725_v55 = vpop.permute.xlu1 %2724 }
 0x324   : > { %2545 = vst.msk [vmem:[#allocation4 + $0xa8] sm:$0xf] %vm2523_vm10, %v2470_v52  ;;  %v9125_v52 = vpack.c.bf16 %v2587_v40, %v2587_v40 }
 0x325   : > { %2802 = vst.msk [vmem:[#allocation4 + $0xa8] sm:$0xf] %vm2780_vm11, %v2727_v22  ;;  %2801 = vst.msk [vmem:[#allocation4 + $0xa0] sm:$0xf] %vm2780_vm11, %v2725_v55  ;;  %v2985_v53 = vpop.permute.xlu0 %2984  ;;  %2998 = vrot.lane.b32.xlu1 %v9154_v54, %s9950_s26  ;;  %v9726_v55 = vld [vmem:[%s13788_s2 + $0x38] sm:$0xff]  }
 0x326   : > { %3060 = vst.msk [vmem:[#allocation4 + $0xa8] sm:$0xf] %vm3038_vm12, %v2985_v53  ;;  %v9722_v63 = vld [vmem:[#allocation4 + $0x90] ss:$8 sps:$4 sm:$0xff]  }
 0x327   : > { %3257 = vrot.lane.b32.xlu0 %v9187_v29, %s9949_s19  ;;  %v2983_v0 = vpop.permute.xlu1 %2982  ;;  %3921 = vmatmul.mubr.bf16.gmra.mxu1 %v9722_v63  ;;  %v4202_v53 = vld [vmem:[#allocation3 + $0x1] sm:$0xff]  ;;  %v3359_v63 = vld [vmem:[#allocation2 + $0x1a2] sm:$0xff] }
 0x328   : > { %3059 = vst.msk [vmem:[#allocation4 + $0xa0] sm:$0xf] %vm3038_vm12, %v2983_v0 }
 0x329   : > { %v3242_v44 = vpop.permute.xlu0 %3241  ;;  %3255 = vrot.lane.b32.xlu1 %v9186_v58, %s9949_s19 }
 0x32a   : > { %3317 = vst.msk [vmem:[#allocation4 + $0xa8] sm:$0xf] %vm3295_vm13, %v3242_v44  ;;  %v9728_v44 = vld [vmem:[%s13788_s2 + $0x28] sm:$0xff]  }
 0x32b   : > { %1718 = vrot.lane.b32.xlu0 %v11738_v5, %s9942_s23  ;;  %v3240_v9 = vpop.permute.xlu1 %3239  ;;  %v11817_v2 = vpop.f32.mrf.mxu1  ;;  %v9723_v5 = vld [vmem:[#allocation4 + $0xa4] ss:$8 sps:$4 sm:$0xff]  }
 0x32c   : > { %3316 = vst.msk [vmem:[#allocation4 + $0xa0] sm:$0xf] %vm3295_vm13, %v3240_v9  ;;  %8525 = vmatprep.mubr.msk.bf16.mxu1 %vm1302_vm8, %v9723_v5 }
 0x32d   : > { %v1703_v8 = vpop.permute.xlu0 %1702  ;;  %1716 = vrot.lane.b32.xlu1 %v11744_v25, %s9942_s23  ;;  %3982 = vst.msk [vmem:[#allocation3 + $0x49] sm:$0xff] %vm1302_vm8, %v11817_v2  ;;  %v3868_v50 = vpop.f32.mrf.mxu1 }
 0x32e   : > { %1776 = vst.msk [vmem:[#allocation4 + $0xb8] sm:$0xf] %vm1752_vm5, %v1703_v8  ;;  %v9220_v8 = vpack.c.bf16 %v3358_v51, %v3358_v51  ;;  %v4011_v50 = vld [vmem:[#allocation3 + $0x8] sm:$0xff]  ;;  %v4204_v51 = vld [vmem:[#allocation3 + $0x19] sm:$0xff] }
 0x32f   : > { %1975 = vrot.lane.b32.xlu0 %v9123_v16, %s9943_s24  ;;  %v1701_v7 = vpop.permute.xlu1 %1700  ;;  %v11825_v36 = vpop.f32.mrf.mxu1  ;;  %v9156_v16 = vpack.c.bf16 %v2844_v46, %v2844_v46 }
 0x330   : > { %1775 = vst.msk [vmem:[#allocation4 + $0xb0] sm:$0xf] %vm1752_vm5, %v1701_v7  ;;  %v9221_v7 = vpack.c.bf16 %v3359_v63, %v3359_v63 }
 0x331   : > { %v1960_v10 = vpop.permute.xlu0 %1959  ;;  %1973 = vrot.lane.b32.xlu1 %v9122_v56, %s9943_s24  ;;  %3983 = vst.msk [vmem:[#allocation3 + $0x51] sm:$0xff] %vm1302_vm8, %v11825_v36  ;;  %v3871_v19 = vpop.f32.mrf.mxu1  ;;  %v3541_v14 = vld [vmem:[#allocation4 + $0xa8] sm:$0xff] }
 0x332   : > { %2033 = vst.msk [vmem:[#allocation4 + $0xb8] sm:$0xf] %vm2009_vm6, %v1960_v10  ;;  %v9223_v10 = vpack.c.bf16 %v4011_v50, %v4011_v50 }
 0x333   : > { %2232 = vrot.lane.b32.xlu0 %v9155_v43, %s9946_s30  ;;  %v1958_v1 = vpop.permute.xlu1 %1957  ;;  %v3540_v15 = vld [vmem:[#allocation4 + $0xa0] sm:$0xff]  ;;  %v9725_v43 = vld [vmem:[%s13788_s2 + $0x30] sm:$0xff]   ;;  %3518 = vst.msk [vmem:[#allocation4 + $0xf4] sm:$0xf] %vm1495_vm4, %v9220_v8  ;;  %3519 = vst.msk [vmem:[#allocation4 + $0xfc] sm:$0xf] %vm1495_vm4, %v9221_v7 }
 0x334   : > { %2032 = vst.msk [vmem:[#allocation4 + $0xb0] sm:$0xf] %vm2009_vm6, %v1958_v1  ;;  %v8494_v61 = vcombine.low %v3540_v15, %v3541_v14  ;;  %v4718_v3 = vld [vmem:[#allocation3 + $0x48] sm:$0xff]  ;;  %v9254_v15 = vpack.c.bf16 %v4202_v53, %v4202_v53 }
 0x335   : > { %v2217_v25 = vpop.permute.xlu0 %2216  ;;  %2230 = vrot.lane.b32.xlu1 %v9154_v54, %s9946_s30  ;;  %v11835_v28 = vpack.c.bf16 %v4718_v3, %v4718_v3  ;;  %v4458_v14 = vld [vmem:[#allocation3 + $0x2] sm:$0xff]  ;;  %4171 = vst.msk [vmem:[#allocation5 + $0x8] sm:$0xf] %vm1495_vm4, %v9223_v10 }
 0x336   : > { %2290 = vst.msk [vmem:[#allocation4 + $0xb8] sm:$0xf] %vm2266_vm9, %v2217_v25  ;;  %3929 = vmatmul.mubr.bf16.gmra.mxu1 %v8494_v61  ;;  %v9729_v25 = vld [vmem:[%s13788_s2 + $0x18] sm:$0xff]  }
 0x337   : > { %2489 = vrot.lane.b32.xlu0 %v9187_v29, %s9945_s29  ;;  %v2215_v18 = vpop.permute.xlu1 %2214  ;;  %4176 = vst.msk [vmem:[#allocation5 + $0x30] sm:$0xf] %vm1495_vm4, %v11835_v28  ;;  %v4010_v29 = vld [vmem:[#allocation3] sm:$0xff]  ;;  %v4203_v3 = vld [vmem:[#allocation3 + $0x9] sm:$0xff] }
 0x338   : > { %2289 = vst.msk [vmem:[#allocation4 + $0xb0] sm:$0xf] %vm2266_vm9, %v2215_v18  ;;  %v5997_v45 = vld [vmem:[#allocation3 + $0x4a] sm:$0xff]  ;;  %v5998_v23 = vld [vmem:[#allocation3 + $0x52] sm:$0xff]  ;;  %v9222_v9 = vpack.c.bf16 %v4010_v29, %v4010_v29  ;;  %v5227_v10 = vld [vmem:[#allocation3 + $0x22] sm:$0xff] }
 0x339   : > { %v2474_v21 = vpop.permute.xlu0 %2473  ;;  %2487 = vrot.lane.b32.xlu1 %v9186_v58, %s9945_s29  ;;  %v5486_v4 = vld [vmem:[#allocation3 + $0x50] sm:$0xff]  ;;  %v11842_v57 = vpack.c.bf16 %v5997_v45, %v5997_v45  ;;  %v11844_v22 = vpack.c.bf16 %v5998_v23, %v5998_v23  ;;  %v9730_v45 = vld [vmem:[#allocation4 + $0xb4] ss:$8 sps:$4 sm:$0xff]   ;;  %v9286_v23 = vpack.c.bf16 %v4458_v14, %v4458_v14 }
 0x33a   : > { %2547 = vst.msk [vmem:[#allocation4 + $0xb8] sm:$0xf] %vm2523_vm10, %v2474_v21  ;;  %v11847_v39 = vpack.c.bf16 %v5486_v4, %v5486_v4  ;;  %8526 = vmatprep.mubr.msk.bf16.mxu1 %vm1302_vm8, %v9730_v45  ;;  %v9255_v4 = vpack.c.bf16 %v4203_v3, %v4203_v3  ;;  %v9735_v29 = vld [vmem:[%s13788_s2 + $0x40] sm:$0xff]  }
 0x33b   : > { %2746 = vrot.lane.b32.xlu0 %v9125_v52, %s9947_s9  ;;  %v2472_v48 = vpop.permute.xlu1 %2471  ;;  %6157 = vst.msk [vmem:[#allocation5 + $0x14] sm:$0xf] %vm1495_vm4, %v11842_v57  ;;  %6158 = vst.msk [vmem:[#allocation5 + $0x1c] sm:$0xf] %vm1495_vm4, %v11844_v22  ;;  %v9736_v45 = vld [vmem:[#allocation4 + $0xc4] ss:$8 sps:$4 sm:$0xff]  }
 0x33c   : > { %2546 = vst.msk [vmem:[#allocation4 + $0xb0] sm:$0xf] %vm2523_vm10, %v2472_v48  ;;  %v4459_v48 = vld [vmem:[#allocation3 + $0xa] sm:$0xff] }
 0x33d   : > { %4177 = vst.msk [vmem:[#allocation5 + $0x38] sm:$0xf] %vm1495_vm4, %v11847_v39  ;;  %v2731_v41 = vpop.permute.xlu0 %2730  ;;  %2744 = vrot.lane.b32.xlu1 %v9124_v17, %s9947_s9  ;;  %4170 = vst.msk [vmem:[#allocation5] sm:$0xf] %vm1495_vm4, %v9222_v9  ;;  %v4971_v9 = vld [vmem:[#allocation3 + $0x21] sm:$0xff] }
 0x33e   : > { %2804 = vst.msk [vmem:[#allocation4 + $0xb8] sm:$0xf] %vm2780_vm11, %v2731_v41 }
 0x33f   : > { %3004 = vrot.lane.b32.xlu0 %v9157_v62, %s9950_s26  ;;  %v2729_v6 = vpop.permute.xlu1 %2728 }
 0x340   : > { %2803 = vst.msk [vmem:[#allocation4 + $0xb0] sm:$0xf] %vm2780_vm11, %v2729_v6  ;;  %v9287_v6 = vpack.c.bf16 %v4459_v48, %v4459_v48 }
 0x341   : > { %v2989_v56 = vpop.permute.xlu0 %2988  ;;  %3002 = vrot.lane.b32.xlu1 %v9156_v16, %s9950_s26 }
 0x342   : > { %3062 = vst.msk [vmem:[#allocation4 + $0xb8] sm:$0xf] %vm3038_vm12, %v2989_v56 }
 0x343   : > { %3261 = vrot.lane.b32.xlu0 %v9189_v27, %s9949_s19  ;;  %v2987_v34 = vpop.permute.xlu1 %2986 }
 0x344   : > { %3061 = vst.msk [vmem:[#allocation4 + $0xb0] sm:$0xf] %vm3038_vm12, %v2987_v34 }
 0x345   : > { %v3246_v26 = vpop.permute.xlu0 %3245  ;;  %3259 = vrot.lane.b32.xlu1 %v9188_v13, %s9949_s19 }
 0x346   : > { %3319 = vst.msk [vmem:[#allocation4 + $0xb8] sm:$0xf] %vm3295_vm13, %v3246_v26  ;;  %v9733_v26 = vld [vmem:[%s13788_s2] sm:$0xff]  }
 0x347   : > { %6438 = vrot.lane.b32.xlu0 %v9725_v43, %s9949_s19  ;;  %v3244_v54 = vpop.permute.xlu1 %3243  ;;  %v11879_v58 = vpop.f32.mrf.mxu1 }
 0x348   : > { %3318 = vst.msk [vmem:[#allocation4 + $0xb0] sm:$0xf] %vm3295_vm13, %v3244_v54  ;;  %13823 = vst [vmem:[#allocation6_spill] sm:$0xff] %v11879_v58  ;;  %v9734_v54 = vld [vmem:[%s13788_s2 + $0x8] sm:$0xff]  }
 0x349   : > { %v1707_v0 = vpop.permute.xlu0 %1706  ;;  %6440 = vrot.lane.b32.xlu1 %v9726_v55, %s9949_s19  ;;  %3984 = vst.msk [vmem:[#allocation3 + $0x61] sm:$0xff] %vm1302_vm8, %v11879_v58  ;;  %v3876_v19 = vpop.f32.mrf.mxu1 }
 0x34a   : > { %1778 = vst.msk [vmem:[#allocation4 + $0xc8] sm:$0xf] %vm1752_vm5, %v1707_v0 }
 0x34b   : > { %6434 = vrot.lane.b32.xlu0 %v9727_v24, %s9949_s19  ;;  %v1705_v1 = vpop.permute.xlu1 %1704  ;;  %v11894_v61 = vpop.f32.mrf.mxu1 }
 0x34c   : > { %1777 = vst.msk [vmem:[#allocation4 + $0xc0] sm:$0xf] %vm1752_vm5, %v1705_v1 }
 0x34d   : > { %v1964_v5 = vpop.permute.xlu0 %1963  ;;  %6436 = vrot.lane.b32.xlu1 %v9728_v44, %s9949_s19  ;;  %3985 = vst.msk [vmem:[#allocation3 + $0x69] sm:$0xff] %vm1302_vm8, %v11894_v61  ;;  %v3879_v18 = vpop.f32.mrf.mxu1  ;;  %v3543_v35 = vld [vmem:[#allocation4 + $0xb8] sm:$0xff]  ;;  %v9256_v44 = vpack.c.bf16 %v4204_v51, %v4204_v51 }
 0x34e   : > { %2035 = vst.msk [vmem:[#allocation4 + $0xc8] sm:$0xf] %vm2009_vm6, %v1964_v5 }
 0x34f   : > { %4330 = vrot.lane.b32.xlu0 %v9254_v15, %s9942_s23  ;;  %v1962_v40 = vpop.permute.xlu1 %1961  ;;  %v3542_v31 = vld [vmem:[#allocation4 + $0xb0] sm:$0xff] }
 0x350   : > { %2034 = vst.msk [vmem:[#allocation4 + $0xc0] sm:$0xf] %vm2009_vm6, %v1962_v40  ;;  %v8496_v21 = vcombine.low %v3542_v31, %v3543_v35  ;;  %v5487_v46 = vld [vmem:[#allocation3 + $0x60] sm:$0xff] }
 0x351   : > { %v2221_v52 = vpop.permute.xlu0 %2220  ;;  %6432 = vrot.lane.b32.xlu1 %v9729_v25, %s9949_s19  ;;  %v11907_v17 = vpack.c.bf16 %v5487_v46, %v5487_v46  ;;  %v5226_v15 = vld [vmem:[#allocation3 + $0x1a] sm:$0xff]  ;;  %v9383_v25 = vpack.c.bf16 %v5227_v10, %v5227_v10 }
 0x352   : > { %2292 = vst.msk [vmem:[#allocation4 + $0xc8] sm:$0xf] %vm2266_vm9, %v2221_v52  ;;  %3937 = vmatmul.mubr.bf16.gmra.mxu1 %v8496_v21  ;;  %v9382_v18 = vpack.c.bf16 %v5226_v15, %v5226_v15  ;;  %v9738_v15 = vld [vmem:[#allocation4 + $0xd4] ss:$8 sps:$4 sm:$0xff]  }
 0x353   : > { %4586 = vrot.lane.b32.xlu0 %v9286_v23, %s9943_s24  ;;  %v2219_v62 = vpop.permute.xlu1 %2218  ;;  %4178 = vst.msk [vmem:[#allocation5 + $0x40] sm:$0xf] %vm1495_vm4, %v11907_v17  ;;  %8527 = vmatprep.mubr.msk.bf16.mxu1 %vm1302_vm8, %v9736_v45 }
 0x354   : > { %2291 = vst.msk [vmem:[#allocation4 + $0xc0] sm:$0xf] %vm2266_vm9, %v2219_v62  ;;  %v5999_v41 = vld [vmem:[#allocation3 + $0x62] sm:$0xff]  ;;  %v6000_v16 = vld [vmem:[#allocation3 + $0x6a] sm:$0xff] }
 0x355   : > { %v2478_v59 = vpop.permute.xlu0 %2477  ;;  %4332 = vrot.lane.b32.xlu1 %v9255_v4, %s9942_s23  ;;  %v5488_v27 = vld [vmem:[#allocation3 + $0x68] sm:$0xff]  ;;  %v11917_v56 = vpack.c.bf16 %v5999_v41, %v5999_v41  ;;  %v11919_v13 = vpack.c.bf16 %v6000_v16, %v6000_v16 }
 0x356   : > { %2549 = vst.msk [vmem:[#allocation4 + $0xc8] sm:$0xf] %vm2523_vm10, %v2478_v59  ;;  %v11922_v34 = vpack.c.bf16 %v5488_v27, %v5488_v27  ;;  %v4206_v59 = vld [vmem:[#allocation3 + $0x31] sm:$0xff] }
 0x357   : > { %6430 = vrot.lane.b32.xlu0 %v9732_v49, %s9949_s19  ;;  %v2476_v43 = vpop.permute.xlu1 %2475  ;;  %6159 = vst.msk [vmem:[#allocation5 + $0x24] sm:$0xf] %vm1495_vm4, %v11917_v56  ;;  %6160 = vst.msk [vmem:[#allocation5 + $0x2c] sm:$0xf] %vm1495_vm4, %v11919_v13 }
 0x358   : > { %2548 = vst.msk [vmem:[#allocation4 + $0xc0] sm:$0xf] %vm2523_vm10, %v2476_v43 }
 0x359   : > { %4179 = vst.msk [vmem:[#allocation5 + $0x48] sm:$0xf] %vm1495_vm4, %v11922_v34  ;;  %v2735_v55 = vpop.permute.xlu0 %2734  ;;  %4588 = vrot.lane.b32.xlu1 %v9287_v6, %s9943_s24 }
 0x35a   : > { %2806 = vst.msk [vmem:[#allocation4 + $0xc8] sm:$0xf] %vm2780_vm11, %v2735_v55 }
 0x35b   : > { %6426 = vrot.lane.b32.xlu0 %v9733_v26, %s9949_s19  ;;  %v2733_v24 = vpop.permute.xlu1 %2732  ;;  %v9258_v26 = vpack.c.bf16 %v4206_v59, %v4206_v59 }
 0x35c   : > { %2805 = vst.msk [vmem:[#allocation4 + $0xc0] sm:$0xf] %vm2780_vm11, %v2733_v24  ;;  %v5740_v24 = vld [vmem:[#allocation3 + $0x39] sm:$0xff] }
 0x35d   : > { %v2993_v53 = vpop.permute.xlu0 %2992  ;;  %6428 = vrot.lane.b32.xlu1 %v9734_v54, %s9949_s19  ;;  %v9447_v51 = vpack.c.bf16 %v5740_v24, %v5740_v24 }
 0x35e   : > { %3064 = vst.msk [vmem:[#allocation4 + $0xc8] sm:$0xf] %vm3038_vm12, %v2993_v53 }
 0x35f   : > { %4842 = vrot.lane.b32.xlu0 %v11715_v12, %s9946_s30  ;;  %v2991_v63 = vpop.permute.xlu1 %2990  ;;  %v9351_v12 = vpack.c.bf16 %v4971_v9, %v4971_v9 }
 0x360   : > { %3063 = vst.msk [vmem:[#allocation4 + $0xc0] sm:$0xf] %vm3038_vm12, %v2991_v63 }
 0x361   : > { %v3250_v0 = vpop.permute.xlu0 %3249  ;;  %6442 = vrot.lane.b32.xlu1 %v9735_v29, %s9949_s19 }
 0x362   : > { %3321 = vst.msk [vmem:[#allocation4 + $0xc8] sm:$0xf] %vm3295_vm13, %v3250_v0 }
 0x363   : > { %4334 = vrot.lane.b32.xlu0 %v9256_v44, %s9942_s23  ;;  %v3248_v8 = vpop.permute.xlu1 %3247  ;;  %v11955_v50 = vpop.f32.mrf.mxu1 }
 0x364   : > { %3320 = vst.msk [vmem:[#allocation4 + $0xc0] sm:$0xf] %vm3295_vm13, %v3248_v8  ;;  %13824 = vst [vmem:[#allocation7_spill] sm:$0xff] %v11955_v50 }
 0x365   : > { %v1711_v7 = vpop.permute.xlu0 %1710  ;;  %5098 = vrot.lane.b32.xlu1 %v9256_v44, %s9945_s29  ;;  %3986 = vst.msk [vmem:[#allocation3 + $0x79] sm:$0xff] %vm1302_vm8, %v11955_v50  ;;  %v3884_v19 = vpop.f32.mrf.mxu1 }
 0x366   : > { %1780 = vst.msk [vmem:[#allocation4 + $0xd8] sm:$0xf] %vm1752_vm5, %v1711_v7 }
 0x367   : > { %5100 = vrot.lane.b32.xlu0 %v9351_v12, %s9945_s29  ;;  %v1709_v1 = vpop.permute.xlu1 %1708  ;;  %v11964_v5 = vpop.f32.mrf.mxu1 }
 0x368   : > { %1779 = vst.msk [vmem:[#allocation4 + $0xd0] sm:$0xf] %vm1752_vm5, %v1709_v1 }
 0x369   : > { %v1968_v14 = vpop.permute.xlu0 %1967  ;;  %4844 = vrot.lane.b32.xlu1 %v11725_v42, %s9946_s30  ;;  %3987 = vst.msk [vmem:[#allocation3 + $0x81] sm:$0xff] %vm1302_vm8, %v11964_v5  ;;  %v3887_v40 = vpop.f32.mrf.mxu1  ;;  %v3545_v35 = vld [vmem:[#allocation4 + $0xc8] sm:$0xff] }
 0x36a   : > { %2037 = vst.msk [vmem:[#allocation4 + $0xd8] sm:$0xf] %vm2009_vm6, %v1968_v14 }
 0x36b   : > { %5356 = vrot.lane.b32.xlu0 %v9383_v25, %s9947_s9  ;;  %v1966_v3 = vpop.permute.xlu1 %1965  ;;  %v3544_v31 = vld [vmem:[#allocation4 + $0xc0] sm:$0xff] }
 0x36c   : > { %2036 = vst.msk [vmem:[#allocation4 + $0xd0] sm:$0xf] %vm2009_vm6, %v1966_v3  ;;  %v8498_v23 = vcombine.low %v3544_v31, %v3545_v35  ;;  %v5489_v21 = vld [vmem:[#allocation3 + $0x78] sm:$0xff] }
 0x36d   : > { %v2225_v42 = vpop.permute.xlu0 %2224  ;;  %5354 = vrot.lane.b32.xlu1 %v9382_v18, %s9947_s9  ;;  %v11974_v52 = vpack.c.bf16 %v5489_v21, %v5489_v21  ;;  %v4974_v21 = vld [vmem:[#allocation3 + $0x49] sm:$0xff] }
 0x36e   : > { %2294 = vst.msk [vmem:[#allocation4 + $0xd8] sm:$0xf] %vm2266_vm9, %v2225_v42  ;;  %3945 = vmatmul.mubr.bf16.gmra.mxu1 %v8498_v23 }
 0x36f   : > { %4590 = vrot.lane.b32.xlu0 %v9382_v18, %s9943_s24  ;;  %v2223_v4 = vpop.permute.xlu1 %2222  ;;  %4180 = vst.msk [vmem:[#allocation5 + $0x50] sm:$0xf] %vm1495_vm4, %v11974_v52  ;;  %8528 = vmatprep.mubr.msk.bf16.mxu1 %vm1302_vm8, %v9738_v15 }
 0x370   : > { %2293 = vst.msk [vmem:[#allocation4 + $0xd0] sm:$0xf] %vm2266_vm9, %v2223_v4  ;;  %v6001_v46 = vld [vmem:[#allocation3 + $0x7a] sm:$0xff]  ;;  %v6002_v48 = vld [vmem:[#allocation3 + $0x82] sm:$0xff] }
 0x371   : > { %v2482_v62 = vpop.permute.xlu0 %2481  ;;  %4336 = vrot.lane.b32.xlu1 %v9351_v12, %s9942_s23  ;;  %v5490_v49 = vld [vmem:[#allocation3 + $0x80] sm:$0xff]  ;;  %v11981_v41 = vpack.c.bf16 %v6001_v46, %v6001_v46  ;;  %v11983_v16 = vpack.c.bf16 %v6002_v48, %v6002_v48  ;;  %v9354_v48 = vpack.c.bf16 %v4974_v21, %v4974_v21 }
 0x372   : > { %2551 = vst.msk [vmem:[#allocation4 + $0xd8] sm:$0xf] %vm2523_vm10, %v2482_v62  ;;  %v11986_v6 = vpack.c.bf16 %v5490_v49, %v5490_v49 }
 0x373   : > { %v2480_v27 = vpop.permute.xlu1 %2479  ;;  %4846 = vrot.lane.b32.xlu0 %v11774_v38, %s9946_s30  ;;  %6161 = vst.msk [vmem:[#allocation5 + $0x34] sm:$0xf] %vm1495_vm4, %v11981_v41  ;;  %6162 = vst.msk [vmem:[#allocation5 + $0x3c] sm:$0xf] %vm1495_vm4, %v11983_v16 }
 0x374   : > { %2550 = vst.msk [vmem:[#allocation4 + $0xd0] sm:$0xf] %vm2523_vm10, %v2480_v27  ;;  %v5742_v27 = vld [vmem:[#allocation3 + $0x51] sm:$0xff] }
 0x375   : > { %4181 = vst.msk [vmem:[#allocation5 + $0x58] sm:$0xf] %vm1495_vm4, %v11986_v6  ;;  %v2739_v43 = vpop.permute.xlu0 %2738  ;;  %4592 = vrot.lane.b32.xlu1 %v9383_v25, %s9943_s24 }
 0x376   : > { %2808 = vst.msk [vmem:[#allocation4 + $0xd8] sm:$0xf] %vm2780_vm11, %v2739_v43 }
 0x377   : > { %v2737_v55 = vpop.permute.xlu1 %2736  ;;  %4338 = vrot.lane.b32.xlu0 %v9258_v26, %s9942_s23 }
 0x378   : > { %2807 = vst.msk [vmem:[#allocation4 + $0xd0] sm:$0xf] %vm2780_vm11, %v2737_v55  ;;  %v9449_v55 = vpack.c.bf16 %v5742_v27, %v5742_v27 }
 0x379   : > { %v2997_v54 = vpop.permute.xlu0 %2996  ;;  %5611 = vrot.lane.b32.xlu1 %v11774_v38, %s9950_s26 }
 0x37a   : > { %3066 = vst.msk [vmem:[#allocation4 + $0xd8] sm:$0xf] %vm3038_vm12, %v2997_v54 }
 0x37b   : > { %v2995_v53 = vpop.permute.xlu1 %2994  ;;  %5613 = vrot.lane.b32.xlu0 %v11788_v60, %s9950_s26 }
 0x37c   : > { %3065 = vst.msk [vmem:[#allocation4 + $0xd0] sm:$0xf] %vm3038_vm12, %v2995_v53 }
 0x37d   : > { %v3254_v29 = vpop.permute.xlu0 %3253  ;;  %5867 = vrot.lane.b32.xlu1 %v9258_v26, %s9949_s19 }
 0x37e   : > { %3323 = vst.msk [vmem:[#allocation4 + $0xd8] sm:$0xf] %vm3295_vm13, %v3254_v29 }
 0x37f   : > { %v3252_v63 = vpop.permute.xlu1 %3251  ;;  %5869 = vrot.lane.b32.xlu0 %v9447_v51, %s9949_s19  ;;  %v12012_v0 = vpop.f32.mrf.mxu1 }
 0x380   : > { %3322 = vst.msk [vmem:[#allocation4 + $0xd0] sm:$0xf] %vm3295_vm13, %v3252_v63  ;;  %13825 = vst [vmem:[#allocation8_spill] sm:$0xff] %v12012_v0 }
 0x381   : > { %v1715_v38 = vpop.permute.xlu0 %1714  ;;  %5102 = vrot.lane.b32.xlu1 %v9258_v26, %s9945_s29  ;;  %3988 = vst.msk [vmem:[#allocation3 + $0x91] sm:$0xff] %vm1302_vm8, %v12012_v0  ;;  %v3892_v9 = vpop.f32.mrf.mxu1 }
 0x382   : > { %1782 = vst.msk [vmem:[#allocation4 + $0xe8] sm:$0xf] %vm1752_vm5, %v1715_v38 }
 0x383   : > { %v1713_v44 = vpop.permute.xlu1 %1712  ;;  %5104 = vrot.lane.b32.xlu0 %v9447_v51, %s9945_s29  ;;  %v12021_v7 = vpop.f32.mrf.mxu1 }
 0x384   : > { %1781 = vst.msk [vmem:[#allocation4 + $0xe0] sm:$0xf] %vm1752_vm5, %v1713_v44  ;;  %v9740_v44 = vld [vmem:[#allocation4 + $0xe4] ss:$8 sps:$4 sm:$0xff]  }
 0x385   : > { %v1972_v8 = vpop.permute.xlu0 %1971  ;;  %4848 = vrot.lane.b32.xlu1 %v11788_v60, %s9946_s30  ;;  %3989 = vst.msk [vmem:[#allocation3 + $0x99] sm:$0xff] %vm1302_vm8, %v12021_v7  ;;  %v3895_v10 = vpop.f32.mrf.mxu1  ;;  %v3547_v19 = vld [vmem:[#allocation4 + $0xd8] sm:$0xff] }
 0x386   : > { %2039 = vst.msk [vmem:[#allocation4 + $0xe8] sm:$0xf] %vm2009_vm6, %v1972_v8 }
 0x387   : > { %v1970_v12 = vpop.permute.xlu1 %1969  ;;  %5360 = vrot.lane.b32.xlu0 %v11785_v20, %s9947_s9  ;;  %v3546_v1 = vld [vmem:[#allocation4 + $0xd0] sm:$0xff] }
 0x388   : > { %2038 = vst.msk [vmem:[#allocation4 + $0xe0] sm:$0xf] %vm2009_vm6, %v1970_v12  ;;  %v8500_v14 = vcombine.low %v3546_v1, %v3547_v19  ;;  %v5491_v60 = vld [vmem:[#allocation3 + $0x90] sm:$0xff] }
 0x389   : > { %v2229_v25 = vpop.permute.xlu0 %2228  ;;  %5358 = vrot.lane.b32.xlu1 %v11783_v37, %s9947_s9  ;;  %v12033_v3 = vpack.c.bf16 %v5491_v60, %v5491_v60 }
 0x38a   : > { %2296 = vst.msk [vmem:[#allocation4 + $0xe8] sm:$0xf] %vm2266_vm9, %v2229_v25  ;;  %3953 = vmatmul.mubr.bf16.gmra.mxu1 %v8500_v14 }
 0x38b   : > { %v2227_v40 = vpop.permute.xlu1 %2226  ;;  %4594 = vrot.lane.b32.xlu0 %v11783_v37, %s9943_s24  ;;  %4182 = vst.msk [vmem:[#allocation5 + $0x60] sm:$0xf] %vm1495_vm4, %v12033_v3  ;;  %8529 = vmatprep.mubr.msk.bf16.mxu1 %vm1302_vm8, %v9740_v44 }
 0x38c   : > { %2295 = vst.msk [vmem:[#allocation4 + $0xe0] sm:$0xf] %vm2266_vm9, %v2227_v40  ;;  %v6003_v18 = vld [vmem:[#allocation3 + $0x92] sm:$0xff]  ;;  %v6004_v31 = vld [vmem:[#allocation3 + $0x9a] sm:$0xff] }
 0x38d   : > { %v2486_v35 = vpop.permute.xlu0 %2485  ;;  %4340 = vrot.lane.b32.xlu1 %v9447_v51, %s9942_s23  ;;  %v5492_v45 = vld [vmem:[#allocation3 + $0x98] sm:$0xff]  ;;  %v12041_v23 = vpack.c.bf16 %v6003_v18, %v6003_v18  ;;  %v12043_v42 = vpack.c.bf16 %v6004_v31, %v6004_v31  ;;  %v5743_v18 = vld [vmem:[#allocation3 + $0x61] sm:$0xff] }
 0x38e   : > { %2553 = vst.msk [vmem:[#allocation4 + $0xe8] sm:$0xf] %vm2523_vm10, %v2486_v35  ;;  %v12046_v4 = vpack.c.bf16 %v5492_v45, %v5492_v45  ;;  %v9450_v45 = vpack.c.bf16 %v5743_v18, %v5743_v18 }
 0x38f   : > { %v2484_v37 = vpop.permute.xlu1 %2483  ;;  %4850 = vrot.lane.b32.xlu0 %v11835_v28, %s9946_s30  ;;  %6163 = vst.msk [vmem:[#allocation5 + $0x44] sm:$0xf] %vm1495_vm4, %v12041_v23  ;;  %6164 = vst.msk [vmem:[#allocation5 + $0x4c] sm:$0xf] %vm1495_vm4, %v12043_v42 }
 0x390   : > { %2552 = vst.msk [vmem:[#allocation4 + $0xe0] sm:$0xf] %vm2523_vm10, %v2484_v37  ;;  %v5744_v37 = vld [vmem:[#allocation3 + $0x69] sm:$0xff] }
 0x391   : > { %4183 = vst.msk [vmem:[#allocation5 + $0x68] sm:$0xf] %vm1495_vm4, %v12046_v4  ;;  %v2743_v46 = vpop.permute.xlu0 %2742  ;;  %4596 = vrot.lane.b32.xlu1 %v11785_v20, %s9943_s24 }
 0x392   : > { %2810 = vst.msk [vmem:[#allocation4 + $0xe8] sm:$0xf] %vm2780_vm11, %v2743_v46 }
 0x393   : > { %v2741_v62 = vpop.permute.xlu1 %2740  ;;  %5106 = vrot.lane.b32.xlu0 %v9354_v48, %s9945_s29 }
 0x394   : > { %2809 = vst.msk [vmem:[#allocation4 + $0xe0] sm:$0xf] %vm2780_vm11, %v2741_v62 }
 0x395   : > { %v3001_v49 = vpop.permute.xlu0 %3000  ;;  %5615 = vrot.lane.b32.xlu1 %v11835_v28, %s9950_s26 }
 0x396   : > { %3068 = vst.msk [vmem:[#allocation4 + $0xe8] sm:$0xf] %vm3038_vm12, %v3001_v49 }
 0x397   : > { %v2999_v59 = vpop.permute.xlu1 %2998  ;;  %4342 = vrot.lane.b32.xlu0 %v9354_v48, %s9942_s23 }
 0x398   : > { %3067 = vst.msk [vmem:[#allocation4 + $0xe0] sm:$0xf] %vm3038_vm12, %v2999_v59 }
 0x399   : > { %v3258_v20 = vpop.permute.xlu0 %3257  ;;  %5871 = vrot.lane.b32.xlu1 %v9354_v48, %s9949_s19 }
 0x39a   : > { %3325 = vst.msk [vmem:[#allocation4 + $0xe8] sm:$0xf] %vm3295_vm13, %v3258_v20 }
 0x39b   : > { %v3256_v43 = vpop.permute.xlu1 %3255  ;;  %5617 = vrot.lane.b32.xlu0 %v11847_v39, %s9950_s26  ;;  %v12074_v26 = vpop.f32.mrf.mxu1 }
 0x39c   : > { %3324 = vst.msk [vmem:[#allocation4 + $0xe0] sm:$0xf] %vm3295_vm13, %v3256_v43  ;;  %13826 = vst [vmem:[#allocation9_spill] sm:$0xff] %v12074_v26 }
 0x39d   : > { %v1719_v28 = vpop.permute.xlu0 %1718  ;;  %4852 = vrot.lane.b32.xlu1 %v11847_v39, %s9946_s30  ;;  %3990 = vst.msk [vmem:[#allocation3 + $0xa9] sm:$0xff] %vm1302_vm8, %v12074_v26  ;;  %v3900_v24 = vpop.f32.mrf.mxu1 }
 0x39e   : > { %1784 = vst.msk [vmem:[#allocation4 + $0xf8] sm:$0xf] %vm1752_vm5, %v1719_v28 }
 0x39f   : > { %v1717_v54 = vpop.permute.xlu1 %1716  ;;  %5873 = vrot.lane.b32.xlu0 %v9449_v55, %s9949_s19  ;;  %v12082_v29 = vpop.f32.mrf.mxu1 }
 0x3a0   : > { %1783 = vst.msk [vmem:[#allocation4 + $0xf0] sm:$0xf] %vm1752_vm5, %v1717_v54  ;;  %v9742_v54 = vld [vmem:[#allocation4 + $0xf4] ss:$8 sps:$4 sm:$0xff]  }
 0x3a1   : > { %v1976_v53 = vpop.permute.xlu0 %1975  ;;  %5108 = vrot.lane.b32.xlu1 %v9449_v55, %s9945_s29  ;;  %3991 = vst.msk [vmem:[#allocation3 + $0xb1] sm:$0xff] %vm1302_vm8, %v12082_v29  ;;  %v3903_v51 = vpop.f32.mrf.mxu1  ;;  %v3549_v38 = vld [vmem:[#allocation4 + $0xe8] sm:$0xff] }
 0x3a2   : > { %2041 = vst.msk [vmem:[#allocation4 + $0xf8] sm:$0xf] %vm2009_vm6, %v1976_v53 }
 0x3a3   : > { %v1974_v39 = vpop.permute.xlu1 %1973  ;;  %5362 = vrot.lane.b32.xlu0 %v11842_v57, %s9947_s9  ;;  %v3548_v63 = vld [vmem:[#allocation4 + $0xe0] sm:$0xff] }
 0x3a4   : > { %2040 = vst.msk [vmem:[#allocation4 + $0xf0] sm:$0xf] %vm2009_vm6, %v1974_v39  ;;  %v8502_v9 = vcombine.low %v3548_v63, %v3549_v38  ;;  %v5493_v12 = vld [vmem:[#allocation3 + $0xa8] sm:$0xff] }
 0x3a5   : > { %v2233_v8 = vpop.permute.xlu0 %2232  ;;  %5364 = vrot.lane.b32.xlu1 %v11844_v22, %s9947_s9  ;;  %v12094_v10 = vpack.c.bf16 %v5493_v12, %v5493_v12 }
 0x3a6   : > { %2298 = vst.msk [vmem:[#allocation4 + $0xf8] sm:$0xf] %vm2266_vm9, %v2233_v8  ;;  %3961 = vmatmul.mubr.bf16.gmra.mxu1 %v8502_v9 }
 0x3a7   : > { %v2231_v1 = vpop.permute.xlu1 %2230  ;;  %4598 = vrot.lane.b32.xlu0 %v11842_v57, %s9943_s24  ;;  %4184 = vst.msk [vmem:[#allocation5 + $0x70] sm:$0xf] %vm1495_vm4, %v12094_v10  ;;  %8530 = vmatprep.mubr.msk.bf16.mxu1 %vm1302_vm8, %v9742_v54 }
 0x3a8   : > { %2297 = vst.msk [vmem:[#allocation4 + $0xf0] sm:$0xf] %vm2266_vm9, %v2231_v1  ;;  %v6005_v19 = vld [vmem:[#allocation3 + $0xaa] sm:$0xff]  ;;  %v6006_v15 = vld [vmem:[#allocation3 + $0xb2] sm:$0xff] }
 0x3a9   : > { %v2490_v14 = vpop.permute.xlu0 %2489  ;;  %4344 = vrot.lane.b32.xlu1 %v9449_v55, %s9942_s23  ;;  %v5494_v25 = vld [vmem:[#allocation3 + $0xb0] sm:$0xff]  ;;  %v12102_v60 = vpack.c.bf16 %v6005_v19, %v6005_v19  ;;  %v12104_v40 = vpack.c.bf16 %v6006_v15, %v6006_v15  ;;  %v5745_v19 = vld [vmem:[#allocation3 + $0x79] sm:$0xff] }
 0x3aa   : > { %2555 = vst.msk [vmem:[#allocation4 + $0xf8] sm:$0xf] %vm2523_vm10, %v2490_v14  ;;  %v12107_v31 = vpack.c.bf16 %v5494_v25, %v5494_v25  ;;  %v9452_v25 = vpack.c.bf16 %v5745_v19, %v5745_v19  ;;  %v5748_v19 = vld [vmem:[#allocation3 + $0x99] sm:$0xff] }
 0x3ab   : > { %v2488_v57 = vpop.permute.xlu1 %2487  ;;  %5619 = vrot.lane.b32.xlu0 %v11907_v17, %s9950_s26  ;;  %6165 = vst.msk [vmem:[#allocation5 + $0x54] sm:$0xf] %vm1495_vm4, %v12102_v60  ;;  %6166 = vst.msk [vmem:[#allocation5 + $0x5c] sm:$0xf] %vm1495_vm4, %v12104_v40 }
 0x3ac   : > { %2554 = vst.msk [vmem:[#allocation4 + $0xf0] sm:$0xf] %vm2523_vm10, %v2488_v57  ;;  %v5746_v57 = vld [vmem:[#allocation3 + $0x81] sm:$0xff] }
 0x3ad   : > { %4185 = vst.msk [vmem:[#allocation5 + $0x78] sm:$0xf] %vm1495_vm4, %v12107_v31  ;;  %v2747_v35 = vpop.permute.xlu0 %2746  ;;  %4600 = vrot.lane.b32.xlu1 %v11844_v22, %s9943_s24  ;;  %v9451_v22 = vpack.c.bf16 %v5744_v37, %v5744_v37 }
 0x3ae   : > { %2812 = vst.msk [vmem:[#allocation4 + $0xf8] sm:$0xf] %vm2780_vm11, %v2747_v35 }
 0x3af   : > { %v2745_v21 = vpop.permute.xlu1 %2744  ;;  %5875 = vrot.lane.b32.xlu0 %v9450_v45, %s9949_s19 }
 0x3b0   : > { %2811 = vst.msk [vmem:[#allocation4 + $0xf0] sm:$0xf] %vm2780_vm11, %v2745_v21 }
 0x3b1   : > { %v3005_v46 = vpop.permute.xlu0 %3004  ;;  %5621 = vrot.lane.b32.xlu1 %v11922_v34, %s9950_s26 }
 0x3b2   : > { %3070 = vst.msk [vmem:[#allocation4 + $0xf8] sm:$0xf] %vm3038_vm12, %v3005_v46 }
 0x3b3   : > { %v3003_v48 = vpop.permute.xlu1 %3002  ;;  %4854 = vrot.lane.b32.xlu0 %v11907_v17, %s9946_s30 }
 0x3b4   : > { %3069 = vst.msk [vmem:[#allocation4 + $0xf0] sm:$0xf] %vm3038_vm12, %v3003_v48 }
 0x3b5   : > { %v3262_v62 = vpop.permute.xlu0 %3261  ;;  %5877 = vrot.lane.b32.xlu1 %v9451_v22, %s9949_s19 }
 0x3b6   : > { %3327 = vst.msk [vmem:[#allocation4 + $0xf8] sm:$0xf] %vm3295_vm13, %v3262_v62 }
 0x3b7   : > { %v3260_v49 = vpop.permute.xlu1 %3259  ;;  %5110 = vrot.lane.b32.xlu0 %v9450_v45, %s9945_s29 }
 0x3b8   : > { %3326 = vst.msk [vmem:[#allocation4 + $0xf0] sm:$0xf] %vm3295_vm13, %v3260_v49 }
 0x3b9   : > { %v6439_v59 = vpop.permute.xlu0 %6438  ;;  %4856 = vrot.lane.b32.xlu1 %v11922_v34, %s9946_s30  ;;  %v12135_v20 = vpop.f32.mrf.mxu1 }
 0x3ba   : > { %3992 = vst.msk [vmem:[#allocation3 + $0xc1] sm:$0xff] %vm1302_vm8, %v12135_v20 }
 0x3bb   : > { %v6441_v17 = vpop.permute.xlu1 %6440  ;;  %4346 = vrot.lane.b32.xlu0 %v9450_v45, %s9942_s23  ;;  %v3908_v27 = vpop.f32.mrf.mxu1 }
 0x3bc   : > { %6502 = vmatpush1.bf16.msra.mxu0 %v6441_v17 }
 0x3bd   : > { %v6435_v43 = vpop.permute.xlu0 %6434  ;;  %5112 = vrot.lane.b32.xlu1 %v9451_v22, %s9945_s29  ;;  %v12141_v28 = vpop.f32.mrf.mxu1  ;;  %6503 = vmatprep.subr.bf16.mxu0 %v9948_v11 }
 0x3be   : > { %3993 = vst.msk [vmem:[#allocation3 + $0xc9] sm:$0xff] %vm1302_vm8, %v12141_v28 }
 0x3bf   : > { %v6437_v34 = vpop.permute.xlu1 %6436  ;;  %5366 = vrot.lane.b32.xlu0 %v11917_v56, %s9947_s9  ;;  %v3911_v55 = vpop.f32.mrf.mxu1  ;;  %v9744_v24 = vld [vmem:[#allocation4 + $0xf0] ss:$8 sps:$4 sm:$0xff]  }
 0x3c0   : > { %6504 = vmatpush1.bf16.msra.mxu0 %v6439_v59  ;;  %3969 = vmatmul.mubr.bf16.gmra.mxu1 %v9744_v24 }
 0x3c1   : > { %v4331_v53 = vpop.permute.xlu0 %4330  ;;  %5368 = vrot.lane.b32.xlu1 %v11919_v13, %s9947_s9  ;;  %v5495_v39 = vld [vmem:[#allocation3 + $0xc0] sm:$0xff]  ;;  %6505 = vmatprep.subr.bf16.mxu0 %v9948_v11 }
 0x3c2   : > { %4426 = vst.msk [vmem:[#allocation5] sm:$0xf] %vm1752_vm5, %v4331_v53  ;;  %v12153_v51 = vpack.c.bf16 %v5495_v39, %v5495_v39 }
 0x3c3   : > { %v6433_v63 = vpop.permute.xlu1 %6432  ;;  %4602 = vrot.lane.b32.xlu0 %v11917_v56, %s9943_s24 }
 0x3c4   : > { %6506 = vmatpush1.bf16.msra.mxu0 %v6437_v34  ;;  %4186 = vst.msk [vmem:[#allocation5 + $0x80] sm:$0xf] %vm1495_vm4, %v12153_v51 }
 0x3c5   : > { %v6007_v38 = vld [vmem:[#allocation3 + $0xc2] sm:$0xff]  ;;  %v6008_v44 = vld [vmem:[#allocation3 + $0xca] sm:$0xff]  ;;  %v4587_v9 = vpop.permute.xlu0 %4586  ;;  %4348 = vrot.lane.b32.xlu1 %v9451_v22, %s9942_s23  ;;  %6507 = vmatprep.subr.bf16.mxu0 %v9948_v11 }
 0x3c6   : > { %v5496_v8 = vld [vmem:[#allocation3 + $0xc8] sm:$0xff]  ;;  %v12161_v12 = vpack.c.bf16 %v6007_v38, %v6007_v38  ;;  %v12163_v1 = vpack.c.bf16 %v6008_v44, %v6008_v44  ;;  %4682 = vst.msk [vmem:[#allocation5] sm:$0xf] %vm2009_vm6, %v4587_v9 }
 0x3c7   : > { %v12166_v56 = vpack.c.bf16 %v5496_v8, %v5496_v8  ;;  %v4333_v15 = vpop.permute.xlu1 %4332  ;;  %5623 = vrot.lane.b32.xlu0 %v11974_v52, %s9950_s26 }
 0x3c8   : > { %6167 = vst.msk [vmem:[#allocation5 + $0x64] sm:$0xf] %vm1495_vm4, %v12161_v12  ;;  %6168 = vst.msk [vmem:[#allocation5 + $0x6c] sm:$0xf] %vm1495_vm4, %v12163_v1  ;;  %6508 = vmatpush1.bf16.msra.mxu0 %v6435_v43 }
 0x3c9   : > { %4427 = vst.msk [vmem:[#allocation5 + $0x8] sm:$0xf] %vm1752_vm5, %v4333_v15  ;;  %v6431_v14 = vpop.permute.xlu0 %6430  ;;  %4604 = vrot.lane.b32.xlu1 %v11919_v13, %s9943_s24  ;;  %6509 = vmatprep.subr.bf16.mxu0 %v9948_v11  ;;  %v9453_v13 = vpack.c.bf16 %v5746_v57, %v5746_v57 }
 0x3ca   : > { %4187 = vst.msk [vmem:[#allocation5 + $0x88] sm:$0xf] %vm1495_vm4, %v12166_v56 }
 0x3cb   : > { %v4589_v18 = vpop.permute.xlu1 %4588  ;;  %5879 = vrot.lane.b32.xlu0 %v9452_v25, %s9949_s19 }
 0x3cc   : > { %4683 = vst.msk [vmem:[#allocation5 + $0x8] sm:$0xf] %vm2009_vm6, %v4589_v18  ;;  %6510 = vmatpush1.bf16.msra.mxu0 %v6433_v63  ;;  %v5747_v63 = vld [vmem:[#allocation3 + $0x91] sm:$0xff]  ;;  %v9455_v18 = vpack.c.bf16 %v5748_v19, %v5748_v19 }
 0x3cd   : > { %v6427_v35 = vpop.permute.xlu0 %6426  ;;  %5625 = vrot.lane.b32.xlu1 %v11986_v6, %s9950_s26  ;;  %6511 = vmatprep.subr.bf16.mxu0 %v9948_v11  ;;  %v9454_v9 = vpack.c.bf16 %v5747_v63, %v5747_v63 }
 0x3cf   : > { %v6429_v45 = vpop.permute.xlu1 %6428  ;;  %4858 = vrot.lane.b32.xlu0 %v11974_v52, %s9946_s30 }
 0x3d0   : > { %6512 = vmatpush1.bf16.msra.mxu0 %v6431_v14 }
 0x3d1   : > { %v4843_v21 = vpop.permute.xlu0 %4842  ;;  %5881 = vrot.lane.b32.xlu1 %v9453_v13, %s9949_s19  ;;  %6513 = vmatprep.subr.bf16.mxu0 %v9948_v11 }
 0x3d2   : > { %4938 = vst.msk [vmem:[#allocation5] sm:$0xf] %vm2266_vm9, %v4843_v21 }
 0x3d3   : > { %v6443_v37 = vpop.permute.xlu1 %6442  ;;  %5114 = vrot.lane.b32.xlu0 %v9452_v25, %s9945_s29 }
 0x3d4   : > { %6514 = vmatpush1.bf16.msra.mxu0 %v6429_v45 }
 0x3d5   : > { %v4335_v46 = vpop.permute.xlu0 %4334  ;;  %4860 = vrot.lane.b32.xlu1 %v11986_v6, %s9946_s30  ;;  %v12193_v48 = vpop.f32.mrf.mxu1  ;;  %6515 = vmatprep.subr.bf16.mxu0 %v9948_v11 }
 0x3d6   : > { %4428 = vst.msk [vmem:[#allocation5 + $0x10] sm:$0xf] %vm1752_vm5, %v4335_v46 }
 0x3d7   : > { %3994 = vst.msk [vmem:[#allocation3 + $0xd9] sm:$0xff] %vm1302_vm8, %v12193_v48  ;;  %v5099_v52 = vpop.permute.xlu1 %5098  ;;  %4350 = vrot.lane.b32.xlu0 %v9452_v25, %s9942_s23  ;;  %v3916_v22 = vpop.f32.mrf.mxu1 }
 0x3d8   : > { %5194 = vst.msk [vmem:[#allocation5] sm:$0xf] %vm2523_vm10, %v5099_v52  ;;  %6516 = vmatpush1.bf16.msra.mxu0 %v6427_v35 }
 0x3d9   : > { %v5101_v62 = vpop.permute.xlu0 %5100  ;;  %5116 = vrot.lane.b32.xlu1 %v9453_v13, %s9945_s29  ;;  %v12202_v6 = vpop.f32.mrf.mxu1  ;;  %6531 = vmatprep.subr.bf16.mxu0 %v9948_v11 }
 0x3da   : > { %13827 = vst [vmem:[#allocation10_spill] sm:$0xff] %v12202_v6  ;;  %3995 = vst.msk [vmem:[#allocation3 + $0xe1] sm:$0xff] %vm1302_vm8, %v12202_v6 }
 0x3db   : > { %v4845_v49 = vpop.permute.xlu1 %4844  ;;  %5370 = vrot.lane.b32.xlu0 %v11981_v41, %s9947_s9  ;;  %v3919_v59 = vpop.f32.mrf.mxu1 }
 0x3dc   : > { %4939 = vst.msk [vmem:[#allocation5 + $0x8] sm:$0xf] %vm2266_vm9, %v4845_v49  ;;  %6532 = vmatpush2.bf16.msra.mxu0 %v6443_v37 }
 0x3dd   : > { %5195 = vst.msk [vmem:[#allocation5 + $0x8] sm:$0xf] %vm2523_vm10, %v5101_v62  ;;  %v5357_v17 = vpop.permute.xlu0 %5356  ;;  %5372 = vrot.lane.b32.xlu1 %v11983_v16, %s9947_s9 }
 0x3de   : > { %v5497_v27 = vld [vmem:[#allocation3 + $0xd8] sm:$0xff]  ;;  %5451 = vst.msk [vmem:[#allocation5 + $0x8] sm:$0xf] %vm2780_vm11, %v5357_v17 }
 0x3df   : > { %v12214_v11 = vpack.c.bf16 %v5497_v27, %v5497_v27  ;;  %v5355_v43 = vpop.permute.xlu1 %5354  ;;  %4606 = vrot.lane.b32.xlu0 %v11981_v41, %s9943_s24 }
 0x3e0   : > { %5450 = vst.msk [vmem:[#allocation5] sm:$0xf] %vm2780_vm11, %v5355_v43 }
 0x3e1   : > { %4188 = vst.msk [vmem:[#allocation5 + $0x90] sm:$0xf] %vm1495_vm4, %v12214_v11  ;;  %v6009_v34 = vld [vmem:[#allocation3 + $0xda] sm:$0xff]  ;;  %v6010_v55 = vld [vmem:[#allocation3 + $0xe2] sm:$0xff]  ;;  %v4591_v54 = vpop.permute.xlu0 %4590  ;;  %4352 = vrot.lane.b32.xlu1 %v9453_v13, %s9942_s23 }
 0x3e2   : > { %v5498_v24 = vld [vmem:[#allocation3 + $0xe0] sm:$0xff]  ;;  %v12222_v53 = vpack.c.bf16 %v6009_v34, %v6009_v34  ;;  %v12224_v39 = vpack.c.bf16 %v6010_v55, %v6010_v55  ;;  %4684 = vst.msk [vmem:[#allocation5 + $0x10] sm:$0xf] %vm2009_vm6, %v4591_v54 }
 0x3e3   : > { %v12227_v38 = vpack.c.bf16 %v5498_v24, %v5498_v24  ;;  %v4337_v41 = vpop.permute.xlu1 %4336  ;;  %5627 = vrot.lane.b32.xlu0 %v12033_v3, %s9950_s26  ;;  %v9747_v24 = vld [vmem:[#allocation5 + $0x4] ss:$8 sps:$4 sm:$0xff]  }
 0x3e4   : > { %6169 = vst.msk [vmem:[#allocation5 + $0x74] sm:$0xf] %vm1495_vm4, %v12222_v53  ;;  %6170 = vst.msk [vmem:[#allocation5 + $0x7c] sm:$0xf] %vm1495_vm4, %v12224_v39  ;;  %8860 = vmatprep.mubr.msk.bf16.mxu0 %vm1302_vm8, %v9747_v24  ;;  %v5751_v24 = vld [vmem:[#allocation3 + $0xc1] sm:$0xff] }
 0x3e5   : > { %4429 = vst.msk [vmem:[#allocation5 + $0x18] sm:$0xf] %vm1752_vm5, %v4337_v41  ;;  %v4847_v44 = vpop.permute.xlu0 %4846  ;;  %4608 = vrot.lane.b32.xlu1 %v11983_v16, %s9943_s24 }
 0x3e6   : > { %4189 = vst.msk [vmem:[#allocation5 + $0x98] sm:$0xf] %vm1495_vm4, %v12227_v38 }
 0x3e7   : > { %4940 = vst.msk [vmem:[#allocation5 + $0x10] sm:$0xf] %vm2266_vm9, %v4847_v44  ;;  %v4593_v8 = vpop.permute.xlu1 %4592  ;;  %5883 = vrot.lane.b32.xlu0 %v9454_v9, %s9949_s19  ;;  %v12245_v14 = vpop.f32.mrf.mxu1 }
 0x3e8   : > { %4685 = vst.msk [vmem:[#allocation5 + $0x18] sm:$0xf] %vm2009_vm6, %v4593_v8  ;;  %v5749_v8 = vld [vmem:[#allocation3 + $0xa9] sm:$0xff] }
 0x3e9   : > { %v4339_v15 = vpop.permute.xlu0 %4338  ;;  %5629 = vrot.lane.b32.xlu1 %v12046_v4, %s9950_s26  ;;  %3996 = vst.msk [vmem:[#allocation3 + $0xf1] sm:$0xff] %vm1302_vm8, %v12245_v14  ;;  %v3924_v25 = vpop.f32.mrf.mxu1 }
 0x3ea   : > { %4430 = vst.msk [vmem:[#allocation5 + $0x20] sm:$0xf] %vm1752_vm5, %v4339_v15  ;;  %v9456_v25 = vpack.c.bf16 %v5749_v8, %v5749_v8 }
 0x3eb   : > { %v5612_v16 = vpop.permute.xlu1 %5611  ;;  %4862 = vrot.lane.b32.xlu0 %v12033_v3, %s9946_s30  ;;  %v12254_v35 = vpop.f32.mrf.mxu1 }
 0x3ec   : > { %5707 = vst.msk [vmem:[#allocation5] sm:$0xf] %vm3038_vm12, %v5612_v16  ;;  %13828 = vst [vmem:[#allocation11_spill] sm:$0xff] %v12254_v35 }
 0x3ed   : > { %v5614_v57 = vpop.permute.xlu0 %5613  ;;  %5885 = vrot.lane.b32.xlu1 %v9455_v18, %s9949_s19  ;;  %3997 = vst.msk [vmem:[#allocation3 + $0xf9] sm:$0xff] %vm1302_vm8, %v12254_v35  ;;  %v3927_v13 = vpop.f32.mrf.mxu1 }
 0x3ee   : > { %5708 = vst.msk [vmem:[#allocation5 + $0x8] sm:$0xf] %vm3038_vm12, %v5614_v57 }
 0x3ef   : > { %v5868_v45 = vpop.permute.xlu1 %5867  ;;  %5118 = vrot.lane.b32.xlu0 %v9454_v9, %s9945_s29 }
 0x3f0   : > { %5963 = vst.msk [vmem:[#allocation5] sm:$0xf] %vm3295_vm13, %v5868_v45  ;;  %v5499_v21 = vld [vmem:[#allocation3 + $0xf0] sm:$0xff] }
 0x3f1   : > { %v5870_v3 = vpop.permute.xlu0 %5869  ;;  %4864 = vrot.lane.b32.xlu1 %v12046_v4, %s9946_s30  ;;  %v12264_v37 = vpack.c.bf16 %v5499_v21, %v5499_v21 }
 0x3f2   : > { %5964 = vst.msk [vmem:[#allocation5 + $0x8] sm:$0xf] %vm3295_vm13, %v5870_v3 }
 0x3f3   : > { %v5103_v46 = vpop.permute.xlu1 %5102  ;;  %4354 = vrot.lane.b32.xlu0 %v9454_v9, %s9942_s23  ;;  %4190 = vst.msk [vmem:[#allocation5 + $0xa0] sm:$0xf] %vm1495_vm4, %v12264_v37 }
 0x3f4   : > { %5196 = vst.msk [vmem:[#allocation5 + $0x10] sm:$0xf] %vm2523_vm10, %v5103_v46  ;;  %v6011_v52 = vld [vmem:[#allocation3 + $0xf2] sm:$0xff]  ;;  %v6012_v22 = vld [vmem:[#allocation3 + $0xfa] sm:$0xff] }
 0x3f5   : > { %v5105_v62 = vpop.permute.xlu0 %5104  ;;  %5120 = vrot.lane.b32.xlu1 %v9455_v18, %s9945_s29  ;;  %v5500_v49 = vld [vmem:[#allocation3 + $0xf8] sm:$0xff]  ;;  %v12271_v4 = vpack.c.bf16 %v6011_v52, %v6011_v52  ;;  %v12273_v59 = vpack.c.bf16 %v6012_v22, %v6012_v22 }
 0x3f6   : > { %v12275_v17 = vpop.f32.mrf.mxu1  ;;  %v12277_v27 = vpack.c.bf16 %v5500_v49, %v5500_v49 }
 0x3f7   : > { %v4849_v43 = vpop.permute.xlu1 %4848  ;;  %5374 = vrot.lane.b32.xlu0 %v12041_v23, %s9947_s9  ;;  %3998 = vst.msk [vmem:[#allocation3 + $0x109] sm:$0xff] %vm1302_vm8, %v12275_v17 }
 0x3f8   : > { %6171 = vst.msk [vmem:[#allocation5 + $0x84] sm:$0xf] %vm1495_vm4, %v12271_v4  ;;  %6172 = vst.msk [vmem:[#allocation5 + $0x8c] sm:$0xf] %vm1495_vm4, %v12273_v59  ;;  %v3932_v34 = vpop.f32.mrf.mxu1 }
 0x3f9   : > { %4941 = vst.msk [vmem:[#allocation5 + $0x18] sm:$0xf] %vm2266_vm9, %v4849_v43  ;;  %v5361_v55 = vpop.permute.xlu0 %5360  ;;  %5376 = vrot.lane.b32.xlu1 %v12043_v42, %s9947_s9  ;;  %v9745_v54 = vld [vmem:[#allocation5] ss:$8 sps:$4 sm:$0xff]  }
 0x3fa   : > { %4191 = vst.msk [vmem:[#allocation5 + $0xa8] sm:$0xf] %vm1495_vm4, %v12277_v27  ;;  %v12294_v63 = vpop.f32.mrf.mxu1  ;;  %6534 = vmatmul.mubr.bf16.vlgmr.msra.gmra.mxu0 %v9745_v54 }
 0x3fb   : > { %5197 = vst.msk [vmem:[#allocation5 + $0x18] sm:$0xf] %vm2523_vm10, %v5105_v62  ;;  %13829 = vst [vmem:[#allocation12_spill] sm:$0xff] %v12294_v63  ;;  %v5359_v41 = vpop.permute.xlu1 %5358  ;;  %4610 = vrot.lane.b32.xlu0 %v12041_v23, %s9943_s24 }
 0x3fc   : > { %5453 = vst.msk [vmem:[#allocation5 + $0x18] sm:$0xf] %vm2780_vm11, %v5361_v55  ;;  %5452 = vst.msk [vmem:[#allocation5 + $0x10] sm:$0xf] %vm2780_vm11, %v5359_v41  ;;  %v3935_v44 = vpop.f32.mrf.mxu1 }
 0x3fd   : > { %3999 = vst.msk [vmem:[#allocation3 + $0x111] sm:$0xff] %vm1302_vm8, %v12294_v63  ;;  %v4595_v9 = vpop.permute.xlu0 %4594  ;;  %4356 = vrot.lane.b32.xlu1 %v9455_v18, %s9942_s23 }
 0x3fe   : > { %4686 = vst.msk [vmem:[#allocation5 + $0x20] sm:$0xf] %vm2009_vm6, %v4595_v9  ;;  %v4032_v19 = vld [vmem:[#allocation3 + $0x108] sm:$0xff]  ;;  %v12356_v9 = vpack.c.bf16 %v5751_v24, %v5751_v24 }
 0x3ff   : > { %v4341_v15 = vpop.permute.xlu1 %4340  ;;  %5631 = vrot.lane.b32.xlu0 %v12094_v10, %s9950_s26  ;;  %v9244_v23 = vpack.c.bf16 %v4032_v19, %v4032_v19 }
 0x400   : > { %4431 = vst.msk [vmem:[#allocation5 + $0x28] sm:$0xf] %vm1752_vm5, %v4341_v15 }
 0x401   : > { %v4851_v16 = vpop.permute.xlu0 %4850  ;;  %4612 = vrot.lane.b32.xlu1 %v12043_v42, %s9943_s24  ;;  %4192 = vst.msk [vmem:[#allocation5 + $0xb0] sm:$0xf] %vm1495_vm4, %v9244_v23  ;;  %v5750_v42 = vld [vmem:[#allocation3 + $0xb1] sm:$0xff]  ;;  %v5752_v23 = vld [vmem:[#allocation3 + $0xc9] sm:$0xff] }
 0x402   : > { %4942 = vst.msk [vmem:[#allocation5 + $0x20] sm:$0xf] %vm2266_vm9, %v4851_v16  ;;  %v12330_v62 = vpack.c.bf16 %v5750_v42, %v5750_v42  ;;  %v12371_v42 = vpack.c.bf16 %v5752_v23, %v5752_v23 }
 0x403   : > { %v4597_v21 = vpop.permute.xlu1 %4596  ;;  %5887 = vrot.lane.b32.xlu0 %v9456_v25, %s9949_s19 }
 0x404   : > { %v6013_v57 = vld [vmem:[#allocation3 + $0x10a] sm:$0xff]  ;;  %v6014_v18 = vld [vmem:[#allocation3 + $0x112] sm:$0xff]  ;;  %4687 = vst.msk [vmem:[#allocation5 + $0x28] sm:$0xf] %vm2009_vm6, %v4597_v21 }
 0x405   : > { %v5502_v45 = vld [vmem:[#allocation3 + $0x110] sm:$0xff]  ;;  %v12311_v13 = vpack.c.bf16 %v6013_v57, %v6013_v57  ;;  %v12313_v3 = vpack.c.bf16 %v6014_v18, %v6014_v18  ;;  %v5107_v52 = vpop.permute.xlu0 %5106  ;;  %5633 = vrot.lane.b32.xlu1 %v12107_v31, %s9950_s26  ;;  %v9748_v57 = vld [vmem:[#allocation5 + $0x14] ss:$8 sps:$4 sm:$0xff]  }
 0x406   : > { %v12316_v46 = vpack.c.bf16 %v5502_v45, %v5502_v45  ;;  %5198 = vst.msk [vmem:[#allocation5 + $0x20] sm:$0xf] %vm2523_vm10, %v5107_v52  ;;  %8861 = vmatprep.mubr.msk.bf16.mxu0 %vm1302_vm8, %v9748_v57 }
 0x407   : > { %6173 = vst.msk [vmem:[#allocation5 + $0x94] sm:$0xf] %vm1495_vm4, %v12311_v13  ;;  %6174 = vst.msk [vmem:[#allocation5 + $0x9c] sm:$0xf] %vm1495_vm4, %v12313_v3  ;;  %v5616_v22 = vpop.permute.xlu1 %5615  ;;  %4866 = vrot.lane.b32.xlu0 %v12094_v10, %s9946_s30 }
 0x408   : > { %4193 = vst.msk [vmem:[#allocation5 + $0xb8] sm:$0xf] %vm1495_vm4, %v12316_v46 }
 0x409   : > { %5709 = vst.msk [vmem:[#allocation5 + $0x10] sm:$0xf] %vm3038_vm12, %v5616_v22  ;;  %v4343_v49 = vpop.permute.xlu0 %4342  ;;  %5889 = vrot.lane.b32.xlu1 %v12330_v62, %s9949_s19 }
 0x40a   : > { %4432 = vst.msk [vmem:[#allocation5 + $0x30] sm:$0xf] %vm1752_vm5, %v4343_v49 }
 0x40b   : > { %v5872_v43 = vpop.permute.xlu1 %5871  ;;  %5122 = vrot.lane.b32.xlu0 %v9456_v25, %s9945_s29 }
 0x40c   : > { %5965 = vst.msk [vmem:[#allocation5 + $0x10] sm:$0xf] %vm3295_vm13, %v5872_v43 }
 0x40d   : > { %v5618_v34 = vpop.permute.xlu0 %5617  ;;  %4868 = vrot.lane.b32.xlu1 %v12107_v31, %s9946_s30 }
 0x40e   : > { %5710 = vst.msk [vmem:[#allocation5 + $0x18] sm:$0xf] %vm3038_vm12, %v5618_v34 }
 0x40f   : > { %v4853_v10 = vpop.permute.xlu1 %4852  ;;  %5378 = vrot.lane.b32.xlu0 %v12102_v60, %s9947_s9 }
 0x410   : > { %4943 = vst.msk [vmem:[#allocation5 + $0x28] sm:$0xf] %vm2266_vm9, %v4853_v10 }
 0x411   : > { %v5874_v55 = vpop.permute.xlu0 %5873  ;;  %5124 = vrot.lane.b32.xlu1 %v12330_v62, %s9945_s29 }
 0x412   : > { %5966 = vst.msk [vmem:[#allocation5 + $0x18] sm:$0xf] %vm3295_vm13, %v5874_v55  ;;  %v12347_v54 = vpop.f32.mrf.mxu1 }
 0x413   : > { %13830 = vst [vmem:[#allocation13_spill] sm:$0xff] %v12347_v54  ;;  %v5109_v41 = vpop.permute.xlu1 %5108  ;;  %5635 = vrot.lane.b32.xlu0 %v12153_v51, %s9950_s26  ;;  %4000 = vst.msk [vmem:[#allocation3 + $0x121] sm:$0xff] %vm1302_vm8, %v12347_v54 }
 0x414   : > { %5199 = vst.msk [vmem:[#allocation5 + $0x28] sm:$0xf] %vm2523_vm10, %v5109_v41  ;;  %v3940_v31 = vpop.f32.mrf.mxu1 }
 0x415   : > { %v5363_v44 = vpop.permute.xlu0 %5362  ;;  %5380 = vrot.lane.b32.xlu1 %v12104_v40, %s9947_s9 }
 0x416   : > { %5454 = vst.msk [vmem:[#allocation5 + $0x20] sm:$0xf] %vm2780_vm11, %v5363_v44  ;;  %v12359_v8 = vpop.f32.mrf.mxu1 }
 0x417   : > { %13831 = vst [vmem:[#allocation14_spill] sm:$0xff] %v12359_v8  ;;  %v5365_v19 = vpop.permute.xlu1 %5364  ;;  %5891 = vrot.lane.b32.xlu0 %v12356_v9, %s9949_s19  ;;  %4001 = vst.msk [vmem:[#allocation3 + $0x129] sm:$0xff] %vm1302_vm8, %v12359_v8 }
 0x418   : > { %5455 = vst.msk [vmem:[#allocation5 + $0x28] sm:$0xf] %vm2780_vm11, %v5365_v19  ;;  %v3943_v15 = vpop.f32.mrf.mxu1 }
 0x419   : > { %v4599_v16 = vpop.permute.xlu0 %4598  ;;  %5637 = vrot.lane.b32.xlu1 %v12166_v56, %s9950_s26  ;;  %v9750_v18 = vld [vmem:[#allocation5 + $0x10] ss:$8 sps:$4 sm:$0xff]  }
 0x41a   : > { %4688 = vst.msk [vmem:[#allocation5 + $0x30] sm:$0xf] %vm2009_vm6, %v4599_v16  ;;  %v4034_v45 = vld [vmem:[#allocation3 + $0x120] sm:$0xff]  ;;  %6542 = vmatmul.mubr.bf16.gmra.mxu0 %v9750_v18 }
 0x41b   : > { %v4345_v21 = vpop.permute.xlu1 %4344  ;;  %4358 = vrot.lane.b32.xlu0 %v9456_v25, %s9942_s23  ;;  %v9246_v52 = vpack.c.bf16 %v4034_v45, %v4034_v45  ;;  %v5753_v15 = vld [vmem:[#allocation3 + $0xd9] sm:$0xff] }
 0x41c   : > { %4433 = vst.msk [vmem:[#allocation5 + $0x38] sm:$0xf] %vm1752_vm5, %v4345_v21  ;;  %v12424_v45 = vpack.c.bf16 %v5753_v15, %v5753_v15 }
 0x41d   : > { %v5620_v22 = vpop.permute.xlu0 %5619  ;;  %5893 = vrot.lane.b32.xlu1 %v12371_v42, %s9949_s19  ;;  %4194 = vst.msk [vmem:[#allocation5 + $0xc0] sm:$0xf] %vm1495_vm4, %v9246_v52 }
 0x41e   : > { %v6015_v49 = vld [vmem:[#allocation3 + $0x122] sm:$0xff]  ;;  %v6016_v43 = vld [vmem:[#allocation3 + $0x12a] sm:$0xff]  ;;  %5711 = vst.msk [vmem:[#allocation5 + $0x20] sm:$0xf] %vm3038_vm12, %v5620_v22 }
 0x41f   : > { %v5504_v34 = vld [vmem:[#allocation3 + $0x128] sm:$0xff]  ;;  %v12378_v25 = vpack.c.bf16 %v6015_v49, %v6015_v49  ;;  %v12380_v10 = vpack.c.bf16 %v6016_v43, %v6016_v43  ;;  %v4601_v55 = vpop.permute.xlu1 %4600  ;;  %4614 = vrot.lane.b32.xlu0 %v12102_v60, %s9943_s24 }
 0x420   : > { %v12384_v24 = vpack.c.bf16 %v5504_v34, %v5504_v34  ;;  %4689 = vst.msk [vmem:[#allocation5 + $0x38] sm:$0xf] %vm2009_vm6, %v4601_v55  ;;  %v5754_v49 = vld [vmem:[#allocation3 + $0xe1] sm:$0xff] }
 0x421   : > { %6175 = vst.msk [vmem:[#allocation5 + $0xa4] sm:$0xf] %vm1495_vm4, %v12378_v25  ;;  %6176 = vst.msk [vmem:[#allocation5 + $0xac] sm:$0xf] %vm1495_vm4, %v12380_v10  ;;  %v5876_v41 = vpop.permute.xlu0 %5875  ;;  %4360 = vrot.lane.b32.xlu1 %v12330_v62, %s9942_s23 }
 0x422   : > { %4195 = vst.msk [vmem:[#allocation5 + $0xc8] sm:$0xf] %vm1495_vm4, %v12384_v24 }
 0x423   : > { %5967 = vst.msk [vmem:[#allocation5 + $0x20] sm:$0xf] %vm3295_vm13, %v5876_v41  ;;  %v5622_v60 = vpop.permute.xlu1 %5621  ;;  %4870 = vrot.lane.b32.xlu0 %v12153_v51, %s9946_s30  ;;  %v12439_v41 = vpack.c.bf16 %v5754_v49, %v5754_v49 }
 0x424   : > { %5712 = vst.msk [vmem:[#allocation5 + $0x28] sm:$0xf] %vm3038_vm12, %v5622_v60 }
 0x425   : > { %v4855_v31 = vpop.permute.xlu0 %4854  ;;  %4616 = vrot.lane.b32.xlu1 %v12104_v40, %s9943_s24 }
 0x426   : > { %4944 = vst.msk [vmem:[#allocation5 + $0x30] sm:$0xf] %vm2266_vm9, %v4855_v31 }
 0x427   : > { %v5878_v44 = vpop.permute.xlu1 %5877  ;;  %5126 = vrot.lane.b32.xlu0 %v12356_v9, %s9945_s29 }
 0x428   : > { %5968 = vst.msk [vmem:[#allocation5 + $0x28] sm:$0xf] %vm3295_vm13, %v5878_v44 }
 0x429   : > { %v5111_v62 = vpop.permute.xlu0 %5110  ;;  %4872 = vrot.lane.b32.xlu1 %v12166_v56, %s9946_s30  ;;  %v9751_v56 = vld [vmem:[#allocation5 + $0x24] ss:$8 sps:$4 sm:$0xff]  }
 0x42a   : > { %5200 = vst.msk [vmem:[#allocation5 + $0x30] sm:$0xf] %vm2523_vm10, %v5111_v62  ;;  %8862 = vmatprep.mubr.msk.bf16.mxu0 %vm1302_vm8, %v9751_v56 }
 0x42b   : > { %v4857_v51 = vpop.permute.xlu1 %4856  ;;  %5382 = vrot.lane.b32.xlu0 %v12161_v12, %s9947_s9 }
 0x42c   : > { %4945 = vst.msk [vmem:[#allocation5 + $0x38] sm:$0xf] %vm2266_vm9, %v4857_v51 }
 0x42d   : > { %v4347_v40 = vpop.permute.xlu0 %4346  ;;  %5128 = vrot.lane.b32.xlu1 %v12371_v42, %s9945_s29 }
 0x42e   : > { %4434 = vst.msk [vmem:[#allocation5 + $0x40] sm:$0xf] %vm1752_vm5, %v4347_v40  ;;  %v12414_v19 = vpop.f32.mrf.mxu1 }
 0x42f   : > { %13832 = vst [vmem:[#allocation15_spill] sm:$0xff] %v12414_v19  ;;  %v5113_v23 = vpop.permute.xlu1 %5112  ;;  %5639 = vrot.lane.b32.xlu0 %v12214_v11, %s9950_s26  ;;  %4002 = vst.msk [vmem:[#allocation3 + $0x139] sm:$0xff] %vm1302_vm8, %v12414_v19  ;;  %v9753_v16 = vld [vmem:[#allocation5 + $0x20] ss:$8 sps:$4 sm:$0xff]  }
 0x430   : > { %5201 = vst.msk [vmem:[#allocation5 + $0x38] sm:$0xf] %vm2523_vm10, %v5113_v23  ;;  %v3948_v57 = vpop.f32.mrf.mxu1  ;;  %6550 = vmatmul.mubr.bf16.gmra.mxu0 %v9753_v16 }
 0x431   : > { %v5367_v18 = vpop.permute.xlu0 %5366  ;;  %5384 = vrot.lane.b32.xlu1 %v12163_v1, %s9947_s9 }
 0x432   : > { %5456 = vst.msk [vmem:[#allocation5 + $0x30] sm:$0xf] %vm2780_vm11, %v5367_v18  ;;  %v12427_v21 = vpop.f32.mrf.mxu1 }
 0x433   : > { %13833 = vst [vmem:[#allocation16_spill] sm:$0xff] %v12427_v21  ;;  %v5369_v52 = vpop.permute.xlu1 %5368  ;;  %5895 = vrot.lane.b32.xlu0 %v12424_v45, %s9949_s19  ;;  %4003 = vst.msk [vmem:[#allocation3 + $0x141] sm:$0xff] %vm1302_vm8, %v12427_v21 }
 0x434   : > { %5457 = vst.msk [vmem:[#allocation5 + $0x38] sm:$0xf] %vm2780_vm11, %v5369_v52  ;;  %v3951_v22 = vpop.f32.mrf.mxu1  ;;  %v5755_v52 = vld [vmem:[#allocation3 + $0xf1] sm:$0xff] }
 0x435   : > { %v4603_v43 = vpop.permute.xlu0 %4602  ;;  %5641 = vrot.lane.b32.xlu1 %v12227_v38, %s9950_s26 }
 0x436   : > { %4690 = vst.msk [vmem:[#allocation5 + $0x40] sm:$0xf] %vm2009_vm6, %v4603_v43  ;;  %v5505_v34 = vld [vmem:[#allocation3 + $0x138] sm:$0xff] }
 0x437   : > { %v4349_v55 = vpop.permute.xlu1 %4348  ;;  %4362 = vrot.lane.b32.xlu0 %v12356_v9, %s9942_s23  ;;  %v12441_v60 = vpack.c.bf16 %v5505_v34, %v5505_v34 }
 0x438   : > { %4435 = vst.msk [vmem:[#allocation5 + $0x48] sm:$0xf] %vm1752_vm5, %v4349_v55  ;;  %v12495_v55 = vpack.c.bf16 %v5755_v52, %v5755_v52 }
 0x439   : > { %v5624_v31 = vpop.permute.xlu0 %5623  ;;  %5897 = vrot.lane.b32.xlu1 %v12439_v41, %s9949_s19  ;;  %4196 = vst.msk [vmem:[#allocation5 + $0xd0] sm:$0xf] %vm1495_vm4, %v12441_v60 }
 0x43a   : > { %v6017_v44 = vld [vmem:[#allocation3 + $0x13a] sm:$0xff]  ;;  %v6018_v62 = vld [vmem:[#allocation3 + $0x142] sm:$0xff]  ;;  %5713 = vst.msk [vmem:[#allocation5 + $0x30] sm:$0xf] %vm3038_vm12, %v5624_v31 }
 0x43b   : > { %v5506_v51 = vld [vmem:[#allocation3 + $0x140] sm:$0xff]  ;;  %v12449_v40 = vpack.c.bf16 %v6017_v44, %v6017_v44  ;;  %v12451_v9 = vpack.c.bf16 %v6018_v62, %v6018_v62  ;;  %v4605_v15 = vpop.permute.xlu1 %4604  ;;  %4618 = vrot.lane.b32.xlu0 %v12161_v12, %s9943_s24 }
 0x43c   : > { %v12455_v23 = vpack.c.bf16 %v5506_v51, %v5506_v51  ;;  %4691 = vst.msk [vmem:[#allocation5 + $0x48] sm:$0xf] %vm2009_vm6, %v4605_v15  ;;  %v5756_v51 = vld [vmem:[#allocation3 + $0xf9] sm:$0xff] }
 0x43d   : > { %6177 = vst.msk [vmem:[#allocation5 + $0xb4] sm:$0xf] %vm1495_vm4, %v12449_v40  ;;  %6178 = vst.msk [vmem:[#allocation5 + $0xbc] sm:$0xf] %vm1495_vm4, %v12451_v9  ;;  %v5880_v56 = vpop.permute.xlu0 %5879  ;;  %4364 = vrot.lane.b32.xlu1 %v12371_v42, %s9942_s23 }
 0x43e   : > { %4197 = vst.msk [vmem:[#allocation5 + $0xd8] sm:$0xf] %vm1495_vm4, %v12455_v23 }
 0x43f   : > { %5969 = vst.msk [vmem:[#allocation5 + $0x30] sm:$0xf] %vm3295_vm13, %v5880_v56  ;;  %v5626_v12 = vpop.permute.xlu1 %5625  ;;  %4874 = vrot.lane.b32.xlu0 %v12214_v11, %s9946_s30 }
 0x440   : > { %5714 = vst.msk [vmem:[#allocation5 + $0x38] sm:$0xf] %vm3038_vm12, %v5626_v12 }
 0x441   : > { %v4859_v16 = vpop.permute.xlu0 %4858  ;;  %4620 = vrot.lane.b32.xlu1 %v12163_v1, %s9943_s24 }
 0x442   : > { %4946 = vst.msk [vmem:[#allocation5 + $0x40] sm:$0xf] %vm2266_vm9, %v4859_v16  ;;  %v12510_v16 = vpack.c.bf16 %v5756_v51, %v5756_v51 }
 0x443   : > { %v5882_v57 = vpop.permute.xlu1 %5881  ;;  %5130 = vrot.lane.b32.xlu0 %v12424_v45, %s9945_s29 }
 0x444   : > { %5970 = vst.msk [vmem:[#allocation5 + $0x38] sm:$0xf] %vm3295_vm13, %v5882_v57 }
 0x445   : > { %v5115_v42 = vpop.permute.xlu0 %5114  ;;  %4876 = vrot.lane.b32.xlu1 %v12227_v38, %s9946_s30  ;;  %v9754_v38 = vld [vmem:[#allocation5 + $0x34] ss:$8 sps:$4 sm:$0xff]  }
 0x446   : > { %5202 = vst.msk [vmem:[#allocation5 + $0x40] sm:$0xf] %vm2523_vm10, %v5115_v42  ;;  %8863 = vmatprep.mubr.msk.bf16.mxu0 %vm1302_vm8, %v9754_v38 }
 0x447   : > { %v4861_v11 = vpop.permute.xlu1 %4860  ;;  %5386 = vrot.lane.b32.xlu0 %v12222_v53, %s9947_s9 }
 0x448   : > { %4947 = vst.msk [vmem:[#allocation5 + $0x48] sm:$0xf] %vm2266_vm9, %v4861_v11 }
 0x449   : > { %v4351_v1 = vpop.permute.xlu0 %4350  ;;  %5132 = vrot.lane.b32.xlu1 %v12439_v41, %s9945_s29 }
 0x44a   : > { %4436 = vst.msk [vmem:[#allocation5 + $0x50] sm:$0xf] %vm1752_vm5, %v4351_v1  ;;  %v12485_v18 = vpop.f32.mrf.mxu1 }
 0x44b   : > { %13834 = vst [vmem:[#allocation17_spill] sm:$0xff] %v12485_v18  ;;  %v5117_v22 = vpop.permute.xlu1 %5116  ;;  %5643 = vrot.lane.b32.xlu0 %v12264_v37, %s9950_s26  ;;  %4004 = vst.msk [vmem:[#allocation3 + $0x151] sm:$0xff] %vm1302_vm8, %v12485_v18  ;;  %v9756_v49 = vld [vmem:[#allocation5 + $0x30] ss:$8 sps:$4 sm:$0xff]  }
 0x44c   : > { %5203 = vst.msk [vmem:[#allocation5 + $0x48] sm:$0xf] %vm2523_vm10, %v5117_v22  ;;  %v3956_v43 = vpop.f32.mrf.mxu1  ;;  %6558 = vmatmul.mubr.bf16.gmra.mxu0 %v9756_v49 }
 0x44d   : > { %v5371_v34 = vpop.permute.xlu0 %5370  ;;  %5388 = vrot.lane.b32.xlu1 %v12224_v39, %s9947_s9 }
 0x44e   : > { %5458 = vst.msk [vmem:[#allocation5 + $0x40] sm:$0xf] %vm2780_vm11, %v5371_v34  ;;  %v12498_v31 = vpop.f32.mrf.mxu1 }
 0x44f   : > { %13835 = vst [vmem:[#allocation18_spill] sm:$0xff] %v12498_v31  ;;  %v5373_v44 = vpop.permute.xlu1 %5372  ;;  %5899 = vrot.lane.b32.xlu0 %v12495_v55, %s9949_s19  ;;  %4005 = vst.msk [vmem:[#allocation3 + $0x159] sm:$0xff] %vm1302_vm8, %v12498_v31 }
 0x450   : > { %5459 = vst.msk [vmem:[#allocation5 + $0x48] sm:$0xf] %vm2780_vm11, %v5373_v44  ;;  %v3959_v62 = vpop.f32.mrf.mxu1 }
 0x451   : > { %v4607_v15 = vpop.permute.xlu0 %4606  ;;  %5645 = vrot.lane.b32.xlu1 %v12277_v27, %s9950_s26 }
 0x452   : > { %4692 = vst.msk [vmem:[#allocation5 + $0x50] sm:$0xf] %vm2009_vm6, %v4607_v15  ;;  %v5507_v56 = vld [vmem:[#allocation3 + $0x150] sm:$0xff] }
 0x453   : > { %v4353_v12 = vpop.permute.xlu1 %4352  ;;  %4366 = vrot.lane.b32.xlu0 %v12424_v45, %s9942_s23  ;;  %v12512_v57 = vpack.c.bf16 %v5507_v56, %v5507_v56  ;;  %v5757_v56 = vld [vmem:[#allocation3 + $0x109] sm:$0xff] }
 0x454   : > { %4437 = vst.msk [vmem:[#allocation5 + $0x58] sm:$0xf] %vm1752_vm5, %v4353_v12  ;;  %v9757_v12 = vld [vmem:[#allocation5 + $0x44] ss:$8 sps:$4 sm:$0xff]  }
 0x455   : > { %v5628_v42 = vpop.permute.xlu0 %5627  ;;  %5901 = vrot.lane.b32.xlu1 %v12510_v16, %s9949_s19  ;;  %4198 = vst.msk [vmem:[#allocation5 + $0xe0] sm:$0xf] %vm1495_vm4, %v12512_v57  ;;  %8864 = vmatprep.mubr.msk.bf16.mxu0 %vm1302_vm8, %v9757_v12 }
 0x456   : > { %v6019_v11 = vld [vmem:[#allocation3 + $0x152] sm:$0xff]  ;;  %v6020_v1 = vld [vmem:[#allocation3 + $0x15a] sm:$0xff]  ;;  %5715 = vst.msk [vmem:[#allocation5 + $0x40] sm:$0xf] %vm3038_vm12, %v5628_v42 }
 0x457   : > { %v5508_v52 = vld [vmem:[#allocation3 + $0x158] sm:$0xff]  ;;  %v12520_v22 = vpack.c.bf16 %v6019_v11, %v6019_v11  ;;  %v12522_v45 = vpack.c.bf16 %v6020_v1, %v6020_v1  ;;  %v4609_v38 = vpop.permute.xlu1 %4608  ;;  %4622 = vrot.lane.b32.xlu0 %v12222_v53, %s9943_s24 }
 0x458   : > { %v12526_v49 = vpack.c.bf16 %v5508_v52, %v5508_v52  ;;  %4693 = vst.msk [vmem:[#allocation5 + $0x58] sm:$0xf] %vm2009_vm6, %v4609_v38  ;;  %v12565_v52 = vpack.c.bf16 %v5757_v56, %v5757_v56 }
 0x459   : > { %6179 = vst.msk [vmem:[#allocation5 + $0xc4] sm:$0xf] %vm1495_vm4, %v12520_v22  ;;  %6180 = vst.msk [vmem:[#allocation5 + $0xcc] sm:$0xf] %vm1495_vm4, %v12522_v45  ;;  %v5884_v43 = vpop.permute.xlu0 %5883  ;;  %4368 = vrot.lane.b32.xlu1 %v12439_v41, %s9942_s23 }
 0x45a   : > { %4199 = vst.msk [vmem:[#allocation5 + $0xe8] sm:$0xf] %vm1495_vm4, %v12526_v49 }
 0x45b   : > { %5971 = vst.msk [vmem:[#allocation5 + $0x40] sm:$0xf] %vm3295_vm13, %v5884_v43  ;;  %v5630_v53 = vpop.permute.xlu1 %5629  ;;  %4878 = vrot.lane.b32.xlu0 %v12264_v37, %s9946_s30  ;;  %v5501_v37 = vld [vmem:[#allocation3 + $0x108] sm:$0xff] }
 0x45c   : > { %5716 = vst.msk [vmem:[#allocation5 + $0x48] sm:$0xf] %vm3038_vm12, %v5630_v53  ;;  %v9432_v51 = vpack.c.bf16 %v5501_v37, %v5501_v37 }
 0x45d   : > { %v4863_v34 = vpop.permute.xlu0 %4862  ;;  %4624 = vrot.lane.b32.xlu1 %v12224_v39, %s9943_s24 }
 0x45e   : > { %4948 = vst.msk [vmem:[#allocation5 + $0x50] sm:$0xf] %vm2266_vm9, %v4863_v34  ;;  %v5758_v34 = vld [vmem:[#allocation3 + $0x111] sm:$0xff] }
 0x45f   : > { %v5886_v44 = vpop.permute.xlu1 %5885  ;;  %5134 = vrot.lane.b32.xlu0 %v12495_v55, %s9945_s29 }
 0x460   : > { %5972 = vst.msk [vmem:[#allocation5 + $0x48] sm:$0xf] %vm3295_vm13, %v5886_v44 }
 0x461   : > { %v5119_v41 = vpop.permute.xlu0 %5118  ;;  %4880 = vrot.lane.b32.xlu1 %v12277_v27, %s9946_s30 }
 0x462   : > { %5204 = vst.msk [vmem:[#allocation5 + $0x50] sm:$0xf] %vm2523_vm10, %v5119_v41 }
 0x463   : > { %v4865_v62 = vpop.permute.xlu1 %4864  ;;  %5390 = vrot.lane.b32.xlu0 %v12271_v4, %s9947_s9 }
 0x464   : > { %4949 = vst.msk [vmem:[#allocation5 + $0x58] sm:$0xf] %vm2266_vm9, %v4865_v62  ;;  %v12580_v62 = vpack.c.bf16 %v5758_v34, %v5758_v34 }
 0x465   : > { %v4355_v39 = vpop.permute.xlu0 %4354  ;;  %5136 = vrot.lane.b32.xlu1 %v12510_v16, %s9945_s29 }
 0x466   : > { %4438 = vst.msk [vmem:[#allocation5 + $0x60] sm:$0xf] %vm1752_vm5, %v4355_v39  ;;  %v12556_v15 = vpop.f32.mrf.mxu1 }
 0x467   : > { %v5121_v27 = vpop.permute.xlu1 %5120  ;;  %5647 = vrot.lane.b32.xlu0 %v9432_v51, %s9950_s26  ;;  %4006 = vst.msk [vmem:[#allocation3 + $0x169] sm:$0xff] %vm1302_vm8, %v12556_v15  ;;  %v9759_v42 = vld [vmem:[#allocation5 + $0x40] ss:$8 sps:$4 sm:$0xff]  }
 0x468   : > { %5205 = vst.msk [vmem:[#allocation5 + $0x58] sm:$0xf] %vm2523_vm10, %v5121_v27  ;;  %v3964_v11 = vpop.f32.mrf.mxu1  ;;  %6566 = vmatmul.mubr.bf16.gmra.mxu0 %v9759_v42 }
 0x469   : > { %v5375_v1 = vpop.permute.xlu0 %5374  ;;  %5392 = vrot.lane.b32.xlu1 %v12273_v59, %s9947_s9 }
 0x46a   : > { %5460 = vst.msk [vmem:[#allocation5 + $0x50] sm:$0xf] %vm2780_vm11, %v5375_v1  ;;  %v12568_v38 = vpop.f32.mrf.mxu1 }
 0x46b   : > { %v5377_v43 = vpop.permute.xlu1 %5376  ;;  %5903 = vrot.lane.b32.xlu0 %v12565_v52, %s9949_s19  ;;  %4007 = vst.msk [vmem:[#allocation3 + $0x171] sm:$0xff] %vm1302_vm8, %v12568_v38 }
 0x46c   : > { %5461 = vst.msk [vmem:[#allocation5 + $0x58] sm:$0xf] %vm2780_vm11, %v5377_v43  ;;  %v3967_v53 = vpop.f32.mrf.mxu1 }
 0x46d   : > { %v4611_v44 = vpop.permute.xlu0 %4610  ;;  %5649 = vrot.lane.b32.xlu1 %v12316_v46, %s9950_s26 }
 0x46e   : > { %4694 = vst.msk [vmem:[#allocation5 + $0x60] sm:$0xf] %vm2009_vm6, %v4611_v44  ;;  %v5509_v41 = vld [vmem:[#allocation3 + $0x168] sm:$0xff] }
 0x46f   : > { %v4357_v37 = vpop.permute.xlu1 %4356  ;;  %4370 = vrot.lane.b32.xlu0 %v12495_v55, %s9942_s23  ;;  %v12582_v39 = vpack.c.bf16 %v5509_v41, %v5509_v41 }
 0x470   : > { %4439 = vst.msk [vmem:[#allocation5 + $0x68] sm:$0xf] %vm1752_vm5, %v4357_v37 }
 0x471   : > { %v5632_v56 = vpop.permute.xlu0 %5631  ;;  %5905 = vrot.lane.b32.xlu1 %v12580_v62, %s9949_s19  ;;  %4200 = vst.msk [vmem:[#allocation5 + $0xf0] sm:$0xf] %vm1495_vm4, %v12582_v39 }
 0x472   : > { %v6021_v27 = vld [vmem:[#allocation3 + $0x16a] sm:$0xff]  ;;  %v6022_v12 = vld [vmem:[#allocation3 + $0x172] sm:$0xff]  ;;  %5717 = vst.msk [vmem:[#allocation5 + $0x50] sm:$0xf] %vm3038_vm12, %v5632_v56 }
 0x473   : > { %v5510_v42 = vld [vmem:[#allocation3 + $0x170] sm:$0xff]  ;;  %v12590_v11 = vpack.c.bf16 %v6021_v27, %v6021_v27  ;;  %v12592_v55 = vpack.c.bf16 %v6022_v12, %v6022_v12  ;;  %v4613_v1 = vpop.permute.xlu1 %4612  ;;  %4626 = vrot.lane.b32.xlu0 %v12271_v4, %s9943_s24  ;;  %v5759_v27 = vld [vmem:[#allocation3 + $0x121] sm:$0xff] }
 0x474   : > { %v12596_v43 = vpack.c.bf16 %v5510_v42, %v5510_v42  ;;  %4695 = vst.msk [vmem:[#allocation5 + $0x68] sm:$0xf] %vm2009_vm6, %v4613_v1  ;;  %v9760_v12 = vld [vmem:[#allocation5 + $0x54] ss:$8 sps:$4 sm:$0xff]  }
 0x475   : > { %6181 = vst.msk [vmem:[#allocation5 + $0xd4] sm:$0xf] %vm1495_vm4, %v12590_v11  ;;  %6182 = vst.msk [vmem:[#allocation5 + $0xdc] sm:$0xf] %vm1495_vm4, %v12592_v55  ;;  %v5888_v53 = vpop.permute.xlu0 %5887  ;;  %4372 = vrot.lane.b32.xlu1 %v12510_v16, %s9942_s23  ;;  %8865 = vmatprep.mubr.msk.bf16.mxu0 %vm1302_vm8, %v9760_v12 }
 0x476   : > { %4201 = vst.msk [vmem:[#allocation5 + $0xf8] sm:$0xf] %vm1495_vm4, %v12596_v43 }
 0x477   : > { %5973 = vst.msk [vmem:[#allocation5 + $0x50] sm:$0xf] %vm3295_vm13, %v5888_v53  ;;  %v5634_v4 = vpop.permute.xlu1 %5633  ;;  %4882 = vrot.lane.b32.xlu0 %v9432_v51, %s9946_s30  ;;  %v5503_v51 = vld [vmem:[#allocation3 + $0x120] sm:$0xff] }
 0x478   : > { %5718 = vst.msk [vmem:[#allocation5 + $0x58] sm:$0xf] %vm3038_vm12, %v5634_v4  ;;  %v9434_v37 = vpack.c.bf16 %v5503_v51, %v5503_v51  ;;  %v12634_v4 = vpack.c.bf16 %v5759_v27, %v5759_v27 }
 0x479   : > { %v4867_v34 = vpop.permute.xlu0 %4866  ;;  %4628 = vrot.lane.b32.xlu1 %v12273_v59, %s9943_s24 }
 0x47a   : > { %4950 = vst.msk [vmem:[#allocation5 + $0x60] sm:$0xf] %vm2266_vm9, %v4867_v34 }
 0x47b   : > { %v5890_v44 = vpop.permute.xlu1 %5889  ;;  %5138 = vrot.lane.b32.xlu0 %v12565_v52, %s9945_s29 }
 0x47c   : > { %5974 = vst.msk [vmem:[#allocation5 + $0x58] sm:$0xf] %vm3295_vm13, %v5890_v44 }
 0x47d   : > { %v5123_v16 = vpop.permute.xlu0 %5122  ;;  %4884 = vrot.lane.b32.xlu1 %v12316_v46, %s9946_s30 }
 0x47e   : > { %5206 = vst.msk [vmem:[#allocation5 + $0x60] sm:$0xf] %vm2523_vm10, %v5123_v16 }
 0x47f   : > { %v4869_v41 = vpop.permute.xlu1 %4868  ;;  %5394 = vrot.lane.b32.xlu0 %v12311_v13, %s9947_s9 }
 0x480   : > { %4951 = vst.msk [vmem:[#allocation5 + $0x68] sm:$0xf] %vm2266_vm9, %v4869_v41  ;;  %v12625_v56 = vpop.f32.mrf.mxu1 }
 0x481   : > { %v5379_v59 = vpop.permute.xlu0 %5378  ;;  %5140 = vrot.lane.b32.xlu1 %v12580_v62, %s9945_s29  ;;  %4008 = vst.msk [vmem:[#allocation3 + $0x181] sm:$0xff] %vm1302_vm8, %v12625_v56 }
 0x482   : > { %5462 = vst.msk [vmem:[#allocation5 + $0x60] sm:$0xf] %vm2780_vm11, %v5379_v59  ;;  %v3972_v1 = vpop.f32.mrf.mxu1 }
 0x483   : > { %v5125_v46 = vpop.permute.xlu1 %5124  ;;  %5651 = vrot.lane.b32.xlu0 %v9434_v37, %s9950_s26  ;;  %v9762_v42 = vld [vmem:[#allocation5 + $0x50] ss:$8 sps:$4 sm:$0xff]  }
 0x484   : > { %5207 = vst.msk [vmem:[#allocation5 + $0x68] sm:$0xf] %vm2523_vm10, %v5125_v46  ;;  %6574 = vmatmul.mubr.bf16.gmra.mxu0 %v9762_v42  ;;  %v12637_v34 = vpop.f32.mrf.mxu1 }
 0x485   : > { %v5636_v53 = vpop.permute.xlu0 %5635  ;;  %5396 = vrot.lane.b32.xlu1 %v12313_v3, %s9947_s9  ;;  %13836 = vst [vmem:[#allocation19_spill] sm:$0xff] %v12637_v34  ;;  %4009 = vst.msk [vmem:[#allocation3 + $0x189] sm:$0xff] %vm1302_vm8, %v12637_v34  ;;  %v5760_v3 = vld [vmem:[#allocation3 + $0x129] sm:$0xff] }
 0x486   : > { %5719 = vst.msk [vmem:[#allocation5 + $0x60] sm:$0xf] %vm3038_vm12, %v5636_v53  ;;  %v3975_v16 = vpop.f32.mrf.mxu1  ;;  %v12649_v59 = vpack.c.bf16 %v5760_v3, %v5760_v3 }
 0x487   : > { %v5381_v44 = vpop.permute.xlu1 %5380  ;;  %5907 = vrot.lane.b32.xlu0 %v12634_v4, %s9949_s19 }
 0x488   : > { %5463 = vst.msk [vmem:[#allocation5 + $0x68] sm:$0xf] %vm2780_vm11, %v5381_v44 }
 0x489   : > { %v5892_v51 = vpop.permute.xlu0 %5891  ;;  %5653 = vrot.lane.b32.xlu1 %v12384_v24, %s9950_s26 }
 0x48a   : > { %5975 = vst.msk [vmem:[#allocation5 + $0x60] sm:$0xf] %vm3295_vm13, %v5892_v51 }
 0x48b   : > { %v5638_v41 = vpop.permute.xlu1 %5637  ;;  %4374 = vrot.lane.b32.xlu0 %v12565_v52, %s9942_s23  ;;  %v4481_v52 = vld [vmem:[#allocation3 + $0x112] sm:$0xff] }
 0x48c   : > { %5720 = vst.msk [vmem:[#allocation5 + $0x68] sm:$0xf] %vm3038_vm12, %v5638_v41  ;;  %v6023_v46 = vld [vmem:[#allocation3 + $0x182] sm:$0xff]  ;;  %v6024_v12 = vld [vmem:[#allocation3 + $0x18a] sm:$0xff]  ;;  %v9309_v3 = vpack.c.bf16 %v4481_v52, %v4481_v52  ;;  %v9763_v41 = vld [vmem:[#allocation5 + $0x64] ss:$8 sps:$4 sm:$0xff]  }
 0x48d   : > { %v4359_v27 = vpop.permute.xlu0 %4358  ;;  %5909 = vrot.lane.b32.xlu1 %v12649_v59, %s9949_s19  ;;  %v12655_v42 = vpack.c.bf16 %v6023_v46, %v6023_v46  ;;  %v12657_v1 = vpack.c.bf16 %v6024_v12, %v6024_v12  ;;  %8866 = vmatprep.mubr.msk.bf16.mxu0 %vm1302_vm8, %v9763_v41  ;;  %v5761_v12 = vld [vmem:[#allocation3 + $0x139] sm:$0xff] }
 0x48e   : > { %4440 = vst.msk [vmem:[#allocation5 + $0x70] sm:$0xf] %vm1752_vm5, %v4359_v27  ;;  %v12691_v52 = vpack.c.bf16 %v5761_v12, %v5761_v12 }
 0x48f   : > { %v5894_v53 = vpop.permute.xlu1 %5893  ;;  %4630 = vrot.lane.b32.xlu0 %v12311_v13, %s9943_s24  ;;  %6183 = vst.msk [vmem:[#allocation5 + $0xe4] sm:$0xf] %vm1495_vm4, %v12655_v42  ;;  %6184 = vst.msk [vmem:[#allocation5 + $0xec] sm:$0xf] %vm1495_vm4, %v12657_v1 }
 0x490   : > { %5976 = vst.msk [vmem:[#allocation5 + $0x68] sm:$0xf] %vm3295_vm13, %v5894_v53 }
 0x491   : > { %v4615_v44 = vpop.permute.xlu0 %4614  ;;  %4376 = vrot.lane.b32.xlu1 %v12580_v62, %s9942_s23 }
 0x492   : > { %4696 = vst.msk [vmem:[#allocation5 + $0x70] sm:$0xf] %vm2009_vm6, %v4615_v44 }
 0x493   : > { %v4361_v16 = vpop.permute.xlu1 %4360  ;;  %4886 = vrot.lane.b32.xlu0 %v9434_v37, %s9946_s30 }
 0x494   : > { %4441 = vst.msk [vmem:[#allocation5 + $0x78] sm:$0xf] %vm1752_vm5, %v4361_v16  ;;  %v5762_v16 = vld [vmem:[#allocation3 + $0x141] sm:$0xff] }
 0x495   : > { %v4871_v13 = vpop.permute.xlu0 %4870  ;;  %4632 = vrot.lane.b32.xlu1 %v9309_v3, %s9943_s24 }
 0x496   : > { %4952 = vst.msk [vmem:[#allocation5 + $0x70] sm:$0xf] %vm2266_vm9, %v4871_v13 }
 0x497   : > { %v4617_v51 = vpop.permute.xlu1 %4616  ;;  %5142 = vrot.lane.b32.xlu0 %v12634_v4, %s9945_s29  ;;  %v9765_v27 = vld [vmem:[#allocation5 + $0x60] ss:$8 sps:$4 sm:$0xff]  }
 0x498   : > { %4697 = vst.msk [vmem:[#allocation5 + $0x78] sm:$0xf] %vm2009_vm6, %v4617_v51  ;;  %6582 = vmatmul.mubr.bf16.gmra.mxu0 %v9765_v27  ;;  %v9469_v51 = vpack.c.bf16 %v5762_v16, %v5762_v16 }
 0x499   : > { %v5127_v62 = vpop.permute.xlu0 %5126  ;;  %4888 = vrot.lane.b32.xlu1 %v12384_v24, %s9946_s30 }
 0x49a   : > { %5208 = vst.msk [vmem:[#allocation5 + $0x70] sm:$0xf] %vm2523_vm10, %v5127_v62 }
 0x49b   : > { %v4873_v37 = vpop.permute.xlu1 %4872  ;;  %5398 = vrot.lane.b32.xlu0 %v12378_v25, %s9947_s9 }
 0x49c   : > { %4953 = vst.msk [vmem:[#allocation5 + $0x78] sm:$0xf] %vm2266_vm9, %v4873_v37 }
 0x49d   : > { %v5383_v46 = vpop.permute.xlu0 %5382  ;;  %5144 = vrot.lane.b32.xlu1 %v12649_v59, %s9945_s29 }
 0x49e   : > { %5464 = vst.msk [vmem:[#allocation5 + $0x70] sm:$0xf] %vm2780_vm11, %v5383_v46  ;;  %v9766_v46 = vld [vmem:[#allocation5 + $0x74] ss:$8 sps:$4 sm:$0xff]  }
 0x49f   : > { %v5129_v53 = vpop.permute.xlu1 %5128  ;;  %5655 = vrot.lane.b32.xlu0 %v12441_v60, %s9950_s26  ;;  %8867 = vmatprep.mubr.msk.bf16.mxu0 %vm1302_vm8, %v9766_v46 }
 0x4a0   : > { %5209 = vst.msk [vmem:[#allocation5 + $0x78] sm:$0xf] %vm2523_vm10, %v5129_v53  ;;  %v5763_v53 = vld [vmem:[#allocation3 + $0x151] sm:$0xff] }
 0x4a1   : > { %v5640_v24 = vpop.permute.xlu0 %5639  ;;  %5400 = vrot.lane.b32.xlu1 %v12380_v10, %s9947_s9  ;;  %v12736_v16 = vpack.c.bf16 %v5763_v53, %v5763_v53 }
 0x4a2   : > { %5721 = vst.msk [vmem:[#allocation5 + $0x70] sm:$0xf] %vm3038_vm12, %v5640_v24 }
 0x4a3   : > { %v5385_v44 = vpop.permute.xlu1 %5384  ;;  %5911 = vrot.lane.b32.xlu0 %v12691_v52, %s9949_s19 }
 0x4a4   : > { %5465 = vst.msk [vmem:[#allocation5 + $0x78] sm:$0xf] %vm2780_vm11, %v5385_v44 }
 0x4a5   : > { %v5896_v3 = vpop.permute.xlu0 %5895  ;;  %5657 = vrot.lane.b32.xlu1 %v12455_v23, %s9950_s26 }
 0x4a6   : > { %5977 = vst.msk [vmem:[#allocation5 + $0x70] sm:$0xf] %vm3295_vm13, %v5896_v3 }
 0x4a7   : > { %v5642_v13 = vpop.permute.xlu1 %5641  ;;  %4378 = vrot.lane.b32.xlu0 %v12634_v4, %s9942_s23 }
 0x4a8   : > { %5722 = vst.msk [vmem:[#allocation5 + $0x78] sm:$0xf] %vm3038_vm12, %v5642_v13 }
 0x4a9   : > { %v4363_v41 = vpop.permute.xlu0 %4362  ;;  %5913 = vrot.lane.b32.xlu1 %v9469_v51, %s9949_s19 }
 0x4aa   : > { %4442 = vst.msk [vmem:[#allocation5 + $0x80] sm:$0xf] %vm1752_vm5, %v4363_v41 }
 0x4ab   : > { %v5898_v27 = vpop.permute.xlu1 %5897  ;;  %4634 = vrot.lane.b32.xlu0 %v12378_v25, %s9943_s24 }
 0x4ac   : > { %5978 = vst.msk [vmem:[#allocation5 + $0x78] sm:$0xf] %vm3295_vm13, %v5898_v27  ;;  %v5764_v27 = vld [vmem:[#allocation3 + $0x159] sm:$0xff] }
 0x4ad   : > { %v4619_v62 = vpop.permute.xlu0 %4618  ;;  %4380 = vrot.lane.b32.xlu1 %v12649_v59, %s9942_s23 }
 0x4ae   : > { %4698 = vst.msk [vmem:[#allocation5 + $0x80] sm:$0xf] %vm2009_vm6, %v4619_v62 }
 0x4af   : > { %v4365_v4 = vpop.permute.xlu1 %4364  ;;  %4890 = vrot.lane.b32.xlu0 %v12441_v60, %s9946_s30 }
 0x4b0   : > { %4443 = vst.msk [vmem:[#allocation5 + $0x88] sm:$0xf] %vm1752_vm5, %v4365_v4 }
 0x4b1   : > { %v4875_v37 = vpop.permute.xlu0 %4874  ;;  %4636 = vrot.lane.b32.xlu1 %v12380_v10, %s9943_s24 }
 0x4b2   : > { %4954 = vst.msk [vmem:[#allocation5 + $0x80] sm:$0xf] %vm2266_vm9, %v4875_v37 }
 0x4b3   : > { %v4621_v25 = vpop.permute.xlu1 %4620  ;;  %5146 = vrot.lane.b32.xlu0 %v12691_v52, %s9945_s29  ;;  %v9768_v59 = vld [vmem:[#allocation5 + $0x70] ss:$8 sps:$4 sm:$0xff]  }
 0x4b4   : > { %4699 = vst.msk [vmem:[#allocation5 + $0x88] sm:$0xf] %vm2009_vm6, %v4621_v25  ;;  %6590 = vmatmul.mubr.bf16.gmra.mxu0 %v9768_v59  ;;  %v9471_v25 = vpack.c.bf16 %v5764_v27, %v5764_v27 }
 0x4b5   : > { %v5131_v12 = vpop.permute.xlu0 %5130  ;;  %4892 = vrot.lane.b32.xlu1 %v12455_v23, %s9946_s30 }
 0x4b6   : > { %5210 = vst.msk [vmem:[#allocation5 + $0x80] sm:$0xf] %vm2523_vm10, %v5131_v12 }
 0x4b7   : > { %v4877_v10 = vpop.permute.xlu1 %4876  ;;  %5402 = vrot.lane.b32.xlu0 %v12449_v40, %s9947_s9 }
 0x4b8   : > { %4955 = vst.msk [vmem:[#allocation5 + $0x88] sm:$0xf] %vm2266_vm9, %v4877_v10 }
 0x4b9   : > { %v5387_v60 = vpop.permute.xlu0 %5386  ;;  %5148 = vrot.lane.b32.xlu1 %v9469_v51, %s9945_s29 }
 0x4ba   : > { %5466 = vst.msk [vmem:[#allocation5 + $0x80] sm:$0xf] %vm2780_vm11, %v5387_v60  ;;  %v12732_v23 = vpop.f32.mrf.mxu0  ;;  %v9769_v60 = vld [vmem:[#allocation5 + $0x84] ss:$8 sps:$4 sm:$0xff]  }
 0x4bb   : > { %v5133_v24 = vpop.permute.xlu1 %5132  ;;  %5659 = vrot.lane.b32.xlu0 %v12512_v57, %s9950_s26  ;;  %8868 = vmatprep.mubr.msk.bf16.mxu0 %vm1302_vm8, %v9769_v60  ;;  %vm6662_vm14 = vcmp.gt.f32.partialorder %v12732_v23, 0.0 }
 0x4bc   : > { %5211 = vst.msk [vmem:[#allocation5 + $0x88] sm:$0xf] %vm2523_vm10, %v5133_v24  ;;  %v6537_v3 = vpop.f32.mrf.mxu0  ;;  %v5765_v24 = vld [vmem:[#allocation3 + $0x169] sm:$0xff] }
 0x4bd   : > { %v5644_v44 = vpop.permute.xlu0 %5643  ;;  %5404 = vrot.lane.b32.xlu1 %v12451_v9, %s9947_s9  ;;  %v12780_v3 = vpack.c.bf16 %v5765_v24, %v5765_v24 }
 0x4be   : > { %5723 = vst.msk [vmem:[#allocation5 + $0x80] sm:$0xf] %vm3038_vm12, %v5644_v44  ;;  %v12742_v41 = vpop.f32.mrf.mxu0 }
 0x4bf   : > { %v5389_v13 = vpop.permute.xlu1 %5388  ;;  %5915 = vrot.lane.b32.xlu0 %v12736_v16, %s9949_s19  ;;  %vm6663_vm0 = vcmp.gt.f32.partialorder %v12742_v41, 0.0 }
 0x4c0   : > { %5467 = vst.msk [vmem:[#allocation5 + $0x88] sm:$0xf] %vm2780_vm11, %v5389_v13  ;;  %v6540_v4 = vpop.f32.mrf.mxu0 }
 0x4c1   : > { %v5900_v62 = vpop.permute.xlu0 %5899  ;;  %5661 = vrot.lane.b32.xlu1 %v12526_v49, %s9950_s26 }
 0x4c2   : > { %5979 = vst.msk [vmem:[#allocation5 + $0x80] sm:$0xf] %vm3295_vm13, %v5900_v62  ;;  %v5766_v62 = vld [vmem:[#allocation3 + $0x171] sm:$0xff] }
 0x4c3   : > { %v5646_v37 = vpop.permute.xlu1 %5645  ;;  %4382 = vrot.lane.b32.xlu0 %v12691_v52, %s9942_s23 }
 0x4c4   : > { %5724 = vst.msk [vmem:[#allocation5 + $0x88] sm:$0xf] %vm3038_vm12, %v5646_v37 }
 0x4c5   : > { %v4367_v46 = vpop.permute.xlu0 %4366  ;;  %5917 = vrot.lane.b32.xlu1 %v9471_v25, %s9949_s19 }
 0x4c6   : > { %4444 = vst.msk [vmem:[#allocation5 + $0x90] sm:$0xf] %vm1752_vm5, %v4367_v46 }
 0x4c7   : > { %v5902_v59 = vpop.permute.xlu1 %5901  ;;  %4638 = vrot.lane.b32.xlu0 %v12449_v40, %s9943_s24 }
 0x4c8   : > { %5980 = vst.msk [vmem:[#allocation5 + $0x88] sm:$0xf] %vm3295_vm13, %v5902_v59  ;;  %v12793_v59 = vpack.c.bf16 %v5766_v62, %v5766_v62  ;;  %v5512_v62 = vld [vmem:[#allocation3 + $0x188] sm:$0xff] }
 0x4c9   : > { %v4623_v12 = vpop.permute.xlu0 %4622  ;;  %4384 = vrot.lane.b32.xlu1 %v9469_v51, %s9942_s23 }
 0x4ca   : > { %4700 = vst.msk [vmem:[#allocation5 + $0x90] sm:$0xf] %vm2009_vm6, %v4623_v12 }
 0x4cb   : > { %v4369_v52 = vpop.permute.xlu1 %4368  ;;  %4894 = vrot.lane.b32.xlu0 %v12512_v57, %s9946_s30 }
 0x4cc   : > { %4445 = vst.msk [vmem:[#allocation5 + $0x98] sm:$0xf] %vm1752_vm5, %v4369_v52 }
 0x4cd   : > { %v4879_v10 = vpop.permute.xlu0 %4878  ;;  %4640 = vrot.lane.b32.xlu1 %v12451_v9, %s9943_s24 }
 0x4ce   : > { %4956 = vst.msk [vmem:[#allocation5 + $0x90] sm:$0xf] %vm2266_vm9, %v4879_v10 }
 0x4cf   : > { %v4625_v40 = vpop.permute.xlu1 %4624  ;;  %5150 = vrot.lane.b32.xlu0 %v12736_v16, %s9945_s29  ;;  %v9771_v51 = vld [vmem:[#allocation5 + $0x80] ss:$8 sps:$4 sm:$0xff]  }
 0x4d0   : > { %4701 = vst.msk [vmem:[#allocation5 + $0x98] sm:$0xf] %vm2009_vm6, %v4625_v40  ;;  %6598 = vmatmul.mubr.bf16.gmra.mxu0 %v9771_v51 }
 0x4d1   : > { %v5135_v53 = vpop.permute.xlu0 %5134  ;;  %4896 = vrot.lane.b32.xlu1 %v12526_v49, %s9946_s30 }
 0x4d2   : > { %5212 = vst.msk [vmem:[#allocation5 + $0x90] sm:$0xf] %vm2523_vm10, %v5135_v53  ;;  %v9772_v53 = vld [vmem:[#allocation5 + $0x94] ss:$8 sps:$4 sm:$0xff]  }
 0x4d3   : > { %v4881_v9 = vpop.permute.xlu1 %4880  ;;  %5406 = vrot.lane.b32.xlu0 %v12520_v22, %s9947_s9  ;;  %8869 = vmatprep.mubr.msk.bf16.mxu0 %vm1302_vm8, %v9772_v53 }
 0x4d4   : > { %4957 = vst.msk [vmem:[#allocation5 + $0x98] sm:$0xf] %vm2266_vm9, %v4881_v9 }
 0x4d5   : > { %v5391_v57 = vpop.permute.xlu0 %5390  ;;  %5152 = vrot.lane.b32.xlu1 %v9471_v25, %s9945_s29 }
 0x4d6   : > { %5468 = vst.msk [vmem:[#allocation5 + $0x90] sm:$0xf] %vm2780_vm11, %v5391_v57 }
 0x4d7   : > { %v5137_v44 = vpop.permute.xlu1 %5136  ;;  %5663 = vrot.lane.b32.xlu0 %v12582_v39, %s9950_s26 }
 0x4d8   : > { %5213 = vst.msk [vmem:[#allocation5 + $0x98] sm:$0xf] %vm2523_vm10, %v5137_v44  ;;  %v5767_v44 = vld [vmem:[#allocation3 + $0x181] sm:$0xff] }
 0x4d9   : > { %v5648_v49 = vpop.permute.xlu0 %5647  ;;  %5408 = vrot.lane.b32.xlu1 %v12522_v45, %s9947_s9 }
 0x4da   : > { %5725 = vst.msk [vmem:[#allocation5 + $0x90] sm:$0xf] %vm3038_vm12, %v5648_v49  ;;  %v12786_v27 = vpop.f32.mrf.mxu0 }
 0x4db   : > { %v5393_v13 = vpop.permute.xlu1 %5392  ;;  %5919 = vrot.lane.b32.xlu0 %v12780_v3, %s9949_s19  ;;  %vm6664_vm15 = vcmp.gt.f32.partialorder %v12786_v27, 0.0 }
 0x4dc   : > { %5469 = vst.msk [vmem:[#allocation5 + $0x98] sm:$0xf] %vm2780_vm11, %v5393_v13  ;;  %v6545_v37 = vpop.f32.mrf.mxu0 }
 0x4dd   : > { %v5904_v4 = vpop.permute.xlu0 %5903  ;;  %5665 = vrot.lane.b32.xlu1 %v12596_v43, %s9950_s26  ;;  %v9474_v37 = vpack.c.bf16 %v5767_v44, %v5767_v44 }
 0x4de   : > { %5981 = vst.msk [vmem:[#allocation5 + $0x90] sm:$0xf] %vm3295_vm13, %v5904_v4  ;;  %v12796_v12 = vpop.f32.mrf.mxu0 }
 0x4df   : > { %v5650_v46 = vpop.permute.xlu1 %5649  ;;  %4386 = vrot.lane.b32.xlu0 %v12736_v16, %s9942_s23 }
 0x4e0   : > { %5726 = vst.msk [vmem:[#allocation5 + $0x98] sm:$0xf] %vm3038_vm12, %v5650_v46  ;;  %v6548_v10 = vpop.f32.mrf.mxu0 }
 0x4e1   : > { %v4371_v52 = vpop.permute.xlu0 %4370  ;;  %5921 = vrot.lane.b32.xlu1 %v12793_v59, %s9949_s19  ;;  %v9443_v10 = vpack.c.bf16 %v5512_v62, %v5512_v62  ;;  %v5769_v62 = vld [vmem:[#allocation3 + $0x199] sm:$0xff] }
 0x4e2   : > { %4446 = vst.msk [vmem:[#allocation5 + $0xa0] sm:$0xf] %vm1752_vm5, %v4371_v52 }
 0x4e3   : > { %v5906_v40 = vpop.permute.xlu1 %5905  ;;  %4642 = vrot.lane.b32.xlu0 %v12520_v22, %s9943_s24 }
 0x4e4   : > { %5982 = vst.msk [vmem:[#allocation5 + $0x98] sm:$0xf] %vm3295_vm13, %v5906_v40 }
 0x4e5   : > { %v4627_v16 = vpop.permute.xlu0 %4626  ;;  %4388 = vrot.lane.b32.xlu1 %v9471_v25, %s9942_s23 }
 0x4e6   : > { %4702 = vst.msk [vmem:[#allocation5 + $0xa0] sm:$0xf] %vm2009_vm6, %v4627_v16  ;;  %v5768_v16 = vld [vmem:[#allocation3 + $0x189] sm:$0xff] }
 0x4e7   : > { %v4373_v60 = vpop.permute.xlu1 %4372  ;;  %4898 = vrot.lane.b32.xlu0 %v12582_v39, %s9946_s30 }
 0x4e8   : > { %4447 = vst.msk [vmem:[#allocation5 + $0xa8] sm:$0xf] %vm1752_vm5, %v4373_v60 }
 0x4e9   : > { %v4883_v51 = vpop.permute.xlu0 %4882  ;;  %4644 = vrot.lane.b32.xlu1 %v12522_v45, %s9943_s24  ;;  %v5511_v45 = vld [vmem:[#allocation3 + $0x180] sm:$0xff] }
 0x4ea   : > { %4958 = vst.msk [vmem:[#allocation5 + $0xa0] sm:$0xf] %vm2266_vm9, %v4883_v51  ;;  %v9442_v24 = vpack.c.bf16 %v5511_v45, %v5511_v45 }
 0x4eb   : > { %v4629_v22 = vpop.permute.xlu1 %4628  ;;  %5154 = vrot.lane.b32.xlu0 %v12780_v3, %s9945_s29  ;;  %v9774_v25 = vld [vmem:[#allocation5 + $0x90] ss:$8 sps:$4 sm:$0xff]  }
 0x4ec   : > { %4703 = vst.msk [vmem:[#allocation5 + $0xa8] sm:$0xf] %vm2009_vm6, %v4629_v22  ;;  %6606 = vmatmul.mubr.bf16.gmra.mxu0 %v9774_v25  ;;  %v4489_v25 = vld [vmem:[#allocation3 + $0x172] sm:$0xff] }
 0x4ed   : > { %v5139_v9 = vpop.permute.xlu0 %5138  ;;  %4900 = vrot.lane.b32.xlu1 %v12596_v43, %s9946_s30  ;;  %v9317_v45 = vpack.c.bf16 %v4489_v25, %v4489_v25 }
 0x4ee   : > { %5214 = vst.msk [vmem:[#allocation5 + $0xa0] sm:$0xf] %vm2523_vm10, %v5139_v9 }
 0x4ef   : > { %v4885_v39 = vpop.permute.xlu1 %4884  ;;  %5410 = vrot.lane.b32.xlu0 %v12590_v11, %s9947_s9 }
 0x4f0   : > { %4959 = vst.msk [vmem:[#allocation5 + $0xa8] sm:$0xf] %vm2266_vm9, %v4885_v39  ;;  %v12825_v43 = vpop.f32.mrf.mxu0 }
 0x4f1   : > { %v5395_v57 = vpop.permute.xlu0 %5394  ;;  %5156 = vrot.lane.b32.xlu1 %v12793_v59, %s9945_s29  ;;  %vm6666_vm1 = vcmp.gt.f32.partialorder %v12825_v43, 0.0 }
 0x4f2   : > { %5470 = vst.msk [vmem:[#allocation5 + $0xa0] sm:$0xf] %vm2780_vm11, %v5395_v57  ;;  %v6553_v13 = vpop.f32.mrf.mxu0  ;;  %v9775_v57 = vld [vmem:[#allocation5 + $0xa4] ss:$8 sps:$4 sm:$0xff]  }
 0x4f3   : > { %v5141_v49 = vpop.permute.xlu1 %5140  ;;  %5667 = vrot.lane.b32.xlu0 %v9442_v24, %s9950_s26  ;;  %8870 = vmatprep.mubr.msk.bf16.mxu0 %vm1302_vm8, %v9775_v57 }
 0x4f4   : > { %5215 = vst.msk [vmem:[#allocation5 + $0xa8] sm:$0xf] %vm2523_vm10, %v5141_v49  ;;  %v12832_v46 = vpop.f32.mrf.mxu0 }
 0x4f5   : > { %v5652_v4 = vpop.permute.xlu0 %5651  ;;  %5412 = vrot.lane.b32.xlu1 %v12592_v55, %s9947_s9  ;;  %v9475_v55 = vpack.c.bf16 %v5768_v16, %v5768_v16 }
 0x4f6   : > { %5727 = vst.msk [vmem:[#allocation5 + $0xa0] sm:$0xf] %vm3038_vm12, %v5652_v4  ;;  %v6556_v40 = vpop.f32.mrf.mxu0 }
 0x4f7   : > { %v5397_v52 = vpop.permute.xlu1 %5396  ;;  %5923 = vrot.lane.b32.xlu0 %v9474_v37, %s9949_s19  ;;  %v9476_v40 = vpack.c.bf16 %v5769_v62, %v5769_v62 }
 0x4f8   : > { %5471 = vst.msk [vmem:[#allocation5 + $0xa8] sm:$0xf] %vm2780_vm11, %v5397_v52  ;;  %v5514_v52 = vld [vmem:[#allocation3 + $0x1a0] sm:$0xff] }
 0x4f9   : > { %v5908_v60 = vpop.permute.xlu0 %5907  ;;  %5669 = vrot.lane.b32.xlu1 %v9443_v10, %s9950_s26 }
 0x4fa   : > { %5983 = vst.msk [vmem:[#allocation5 + $0xa0] sm:$0xf] %vm3295_vm13, %v5908_v60  ;;  %v9445_v60 = vpack.c.bf16 %v5514_v52, %v5514_v52 }
 0x4fb   : > { %v5654_v51 = vpop.permute.xlu1 %5653  ;;  %4390 = vrot.lane.b32.xlu0 %v12780_v3, %s9942_s23 }
 0x4fc   : > { %5728 = vst.msk [vmem:[#allocation5 + $0xa8] sm:$0xf] %vm3038_vm12, %v5654_v51 }
 0x4fd   : > { %v4375_v22 = vpop.permute.xlu0 %4374  ;;  %5925 = vrot.lane.b32.xlu1 %v9475_v55, %s9949_s19 }
 0x4fe   : > { %4448 = vst.msk [vmem:[#allocation5 + $0xb0] sm:$0xf] %vm1752_vm5, %v4375_v22 }
 0x4ff   : > { %v5910_v53 = vpop.permute.xlu1 %5909  ;;  %4646 = vrot.lane.b32.xlu0 %v12590_v11, %s9943_s24 }
 0x500   : > { %5984 = vst.msk [vmem:[#allocation5 + $0xa8] sm:$0xf] %vm3295_vm13, %v5910_v53 }
 0x501   : > { %v4631_v9 = vpop.permute.xlu0 %4630  ;;  %4392 = vrot.lane.b32.xlu1 %v12793_v59, %s9942_s23  ;;  %v5513_v59 = vld [vmem:[#allocation3 + $0x198] sm:$0xff] }
 0x502   : > { %4704 = vst.msk [vmem:[#allocation5 + $0xb0] sm:$0xf] %vm2009_vm6, %v4631_v9  ;;  %v9444_v13 = vpack.c.bf16 %v5513_v59, %v5513_v59  ;;  %v6026_v59 = vld [vmem:[#allocation3 + $0x1a2] sm:$0xff] }
 0x503   : > { %v4377_v3 = vpop.permute.xlu1 %4376  ;;  %4902 = vrot.lane.b32.xlu0 %v9442_v24, %s9946_s30 }
 0x504   : > { %4449 = vst.msk [vmem:[#allocation5 + $0xb8] sm:$0xf] %vm1752_vm5, %v4377_v3 }
 0x505   : > { %v4887_v39 = vpop.permute.xlu0 %4886  ;;  %4648 = vrot.lane.b32.xlu1 %v9317_v45, %s9943_s24 }
 0x506   : > { %4960 = vst.msk [vmem:[#allocation5 + $0xb0] sm:$0xf] %vm2266_vm9, %v4887_v39 }
 0x507   : > { %v4633_v11 = vpop.permute.xlu1 %4632  ;;  %5158 = vrot.lane.b32.xlu0 %v9474_v37, %s9945_s29  ;;  %v9777_v44 = vld [vmem:[#allocation5 + $0xa0] ss:$8 sps:$4 sm:$0xff]  }
 0x508   : > { %4705 = vst.msk [vmem:[#allocation5 + $0xb8] sm:$0xf] %vm2009_vm6, %v4633_v11  ;;  %6614 = vmatmul.mubr.bf16.gmra.mxu0 %v9777_v44  ;;  %v6025_v44 = vld [vmem:[#allocation3 + $0x19a] sm:$0xff] }
 0x509   : > { %v5143_v49 = vpop.permute.xlu0 %5142  ;;  %4904 = vrot.lane.b32.xlu1 %v9443_v10, %s9946_s30  ;;  %v9508_v62 = vpack.c.bf16 %v6025_v44, %v6025_v44 }
 0x50a   : > { %5216 = vst.msk [vmem:[#allocation5 + $0xb0] sm:$0xf] %vm2523_vm10, %v5143_v49 }
 0x50b   : > { %v4889_v24 = vpop.permute.xlu1 %4888  ;;  %5414 = vrot.lane.b32.xlu0 %v12655_v42, %s9947_s9  ;;  %6185 = vst.msk [vmem:[#allocation5 + $0xf4] sm:$0xf] %vm1495_vm4, %v9508_v62 }
 0x50c   : > { %4961 = vst.msk [vmem:[#allocation5 + $0xb8] sm:$0xf] %vm2266_vm9, %v4889_v24  ;;  %v12863_v37 = vpop.f32.mrf.mxu0  ;;  %v9778_v24 = vld [vmem:[#allocation5 + $0xb4] ss:$8 sps:$4 sm:$0xff]  }
 0x50d   : > { %v5399_v4 = vpop.permute.xlu0 %5398  ;;  %5160 = vrot.lane.b32.xlu1 %v9475_v55, %s9945_s29  ;;  %v5770_v55 = vld [vmem:[#allocation3 + $0x1a1] sm:$0xff]  ;;  %8871 = vmatprep.mubr.msk.bf16.mxu0 %vm1302_vm8, %v9778_v24 }
 0x50e   : > { %5472 = vst.msk [vmem:[#allocation5 + $0xb0] sm:$0xf] %vm2780_vm11, %v5399_v4  ;;  %v6561_v16 = vpop.f32.mrf.mxu0  ;;  %v9477_v9 = vpack.c.bf16 %v5770_v55, %v5770_v55  ;;  %v9509_v4 = vpack.c.bf16 %v6026_v59, %v6026_v59  ;;  %v9781_v59 = vld [vmem:[#allocation5 + $0xc4] ss:$8 sps:$4 sm:$0xff]  }
 0x50f   : > { %v5145_v10 = vpop.permute.xlu1 %5144  ;;  %5671 = vrot.lane.b32.xlu0 %v9444_v13, %s9950_s26 }
 0x510   : > { %5217 = vst.msk [vmem:[#allocation5 + $0xb8] sm:$0xf] %vm2523_vm10, %v5145_v10  ;;  %v12870_v51 = vpop.f32.mrf.mxu0 }
 0x511   : > { %v5656_v42 = vpop.permute.xlu0 %5655  ;;  %5416 = vrot.lane.b32.xlu1 %v12657_v1, %s9947_s9  ;;  %6186 = vst.msk [vmem:[#allocation5 + $0xfc] sm:$0xf] %vm1495_vm4, %v9509_v4  ;;  %vm6665_vm4 = vcmp.gt.f32.partialorder %v12796_v12, 0.0 }
 0x512   : > { %5729 = vst.msk [vmem:[#allocation5 + $0xb0] sm:$0xf] %vm3038_vm12, %v5656_v42  ;;  %v6564_v53 = vpop.f32.mrf.mxu0 }
 0x513   : > { %v5401_v22 = vpop.permute.xlu1 %5400  ;;  %5927 = vrot.lane.b32.xlu0 %v9476_v40, %s9949_s19 }
 0x514   : > { %5473 = vst.msk [vmem:[#allocation5 + $0xb8] sm:$0xf] %vm2780_vm11, %v5401_v22 }
 0x515   : > { %v5912_v25 = vpop.permute.xlu0 %5911  ;;  %5673 = vrot.lane.b32.xlu1 %v9445_v60, %s9950_s26  ;;  %s9953_s26 = smov 108  }
 0x516   : > { %5985 = vst.msk [vmem:[#allocation5 + $0xb0] sm:$0xf] %vm3295_vm13, %v5912_v25 }
 0x517   : > { %v5658_v3 = vpop.permute.xlu1 %5657  ;;  %6982 = vrot.lane.b32.xlu0 %v11698_v32, %s9941_s22 }
 0x518   : > { %5730 = vst.msk [vmem:[#allocation5 + $0xb8] sm:$0xf] %vm3038_vm12, %v5658_v3 }
 0x519   : > { %v4379_v1 = vpop.permute.xlu0 %4378  ;;  %5929 = vrot.lane.b32.xlu1 %v9477_v9, %s9949_s19 }
 0x51a   : > { %4450 = vst.msk [vmem:[#allocation5 + $0xc0] sm:$0xf] %vm1752_vm5, %v4379_v1 }
 0x51b   : > { %v5914_v45 = vpop.permute.xlu1 %5913  ;;  %6986 = vrot.lane.b32.xlu0 %v11757_v30, %s9941_s22 }
 0x51c   : > { %5986 = vst.msk [vmem:[#allocation5 + $0xb8] sm:$0xf] %vm3295_vm13, %v5914_v45 }
 0x51d   : > { %v4635_v39 = vpop.permute.xlu0 %4634  ;;  %6984 = vrot.lane.b32.xlu1 %v11706_v33, %s9941_s22 }
 0x51e   : > { %4706 = vst.msk [vmem:[#allocation5 + $0xc0] sm:$0xf] %vm2009_vm6, %v4635_v39 }
 0x51f   : > { %v4381_v11 = vpop.permute.xlu1 %4380  ;;  %6990 = vrot.lane.b32.xlu0 %v11817_v2, %s9941_s22 }
 0x520   : > { %4451 = vst.msk [vmem:[#allocation5 + $0xc8] sm:$0xf] %vm1752_vm5, %v4381_v11 }
 0x521   : > { %v4891_v57 = vpop.permute.xlu0 %4890  ;;  %6988 = vrot.lane.b32.xlu1 %v11765_v47, %s9941_s22 }
 0x522   : > { %4962 = vst.msk [vmem:[#allocation5 + $0xc0] sm:$0xf] %vm2266_vm9, %v4891_v57 }
 0x523   : > { %v4637_v49 = vpop.permute.xlu1 %4636  ;;  %6994 = vrot.lane.b32.xlu0 %v11879_v58, %s9941_s22  ;;  %v9780_v13 = vld [vmem:[#allocation5 + $0xb0] ss:$8 sps:$4 sm:$0xff]  }
 0x524   : > { %4707 = vst.msk [vmem:[#allocation5 + $0xc8] sm:$0xf] %vm2009_vm6, %v4637_v49  ;;  %6622 = vmatmul.mubr.bf16.gmra.mxu0 %v9780_v13 }
 0x525   : > { %v5147_v52 = vpop.permute.xlu0 %5146  ;;  %6992 = vrot.lane.b32.xlu1 %v11825_v36, %s9941_s22  ;;  %8872 = vmatprep.mubr.msk.bf16.mxu0 %vm1302_vm8, %v9781_v59 }
 0x526   : > { %5218 = vst.msk [vmem:[#allocation5 + $0xc0] sm:$0xf] %vm2523_vm10, %v5147_v52 }
 0x527   : > { %v4893_v10 = vpop.permute.xlu1 %4892  ;;  %6998 = vrot.lane.b32.xlu0 %v11955_v50, %s9941_s22 }
 0x528   : > { %4963 = vst.msk [vmem:[#allocation5 + $0xc8] sm:$0xf] %vm2266_vm9, %v4893_v10  ;;  %v12908_v16 = vpop.f32.mrf.mxu0 }
 0x529   : > { %v5403_v40 = vpop.permute.xlu0 %5402  ;;  %6996 = vrot.lane.b32.xlu1 %v11894_v61, %s9941_s22 }
 0x52a   : > { %5474 = vst.msk [vmem:[#allocation5 + $0xc0] sm:$0xf] %vm2780_vm11, %v5403_v40  ;;  %v6569_v60 = vpop.f32.mrf.mxu0 }
 0x52b   : > { %v5149_v42 = vpop.permute.xlu1 %5148  ;;  %7002 = vrot.lane.b32.xlu0 %v12012_v0, %s9941_s22 }
 0x52c   : > { %5219 = vst.msk [vmem:[#allocation5 + $0xc8] sm:$0xf] %vm2523_vm10, %v5149_v42  ;;  %v12916_v22 = vpop.f32.mrf.mxu0 }
 0x52d   : > { %v5660_v55 = vpop.permute.xlu0 %5659  ;;  %7000 = vrot.lane.b32.xlu1 %v11964_v5, %s9941_s22 }
 0x52e   : > { %5731 = vst.msk [vmem:[#allocation5 + $0xc0] sm:$0xf] %vm3038_vm12, %v5660_v55  ;;  %v6572_v25 = vpop.f32.mrf.mxu0 }
 0x52f   : > { %v5405_v53 = vpop.permute.xlu1 %5404  ;;  %7006 = vrot.lane.b32.xlu0 %v12074_v26, %s9941_s22 }
 0x530   : > { %5475 = vst.msk [vmem:[#allocation5 + $0xc8] sm:$0xf] %vm2780_vm11, %v5405_v53 }
 0x531   : > { %v5916_v9 = vpop.permute.xlu0 %5915  ;;  %7004 = vrot.lane.b32.xlu1 %v12021_v7, %s9941_s22 }
 0x532   : > { %5987 = vst.msk [vmem:[#allocation5 + $0xc0] sm:$0xf] %vm3295_vm13, %v5916_v9 }
 0x533   : > { %v5662_v3 = vpop.permute.xlu1 %5661  ;;  %7010 = vrot.lane.b32.xlu0 %v12135_v20, %s9941_s22 }
 0x534   : > { %5732 = vst.msk [vmem:[#allocation5 + $0xc8] sm:$0xf] %vm3038_vm12, %v5662_v3  ;;  %v6694_v3 = vmul.f32 0.1, %v12732_v23 }
 0x535   : > { %v4383_v1 = vpop.permute.xlu0 %4382  ;;  %7008 = vrot.lane.b32.xlu1 %v12082_v29, %s9941_s22 }
 0x536   : > { %4452 = vst.msk [vmem:[#allocation5 + $0xd0] sm:$0xf] %vm1752_vm5, %v4383_v1 }
 0x537   : > { %v5918_v45 = vpop.permute.xlu1 %5917  ;;  %7014 = vrot.lane.b32.xlu0 %v12193_v48, %s9941_s22 }
 0x538   : > { %5988 = vst.msk [vmem:[#allocation5 + $0xc8] sm:$0xf] %vm3295_vm13, %v5918_v45 }
 0x539   : > { %v4639_v39 = vpop.permute.xlu0 %4638  ;;  %7012 = vrot.lane.b32.xlu1 %v12141_v28, %s9941_s22 }
 0x53a   : > { %4708 = vst.msk [vmem:[#allocation5 + $0xd0] sm:$0xf] %vm2009_vm6, %v4639_v39  ;;  %v6726_v39 = vsel %vm6662_vm14, %v12732_v23, %v6694_v3  ;;  %v6698_v23 = vmul.f32 0.1, %v12825_v43  ;;  %vm6668_vm14 = vcmp.gt.f32.partialorder %v12863_v37, 0.0 }
 0x53b   : > { %v4385_v11 = vpop.permute.xlu1 %4384  ;;  %7018 = vrot.lane.b32.xlu0 %v12245_v14, %s9941_s22  ;;  %v8876_v59 = vmul.f32 -1.442695, %v6726_v39 }
 0x53c   : > { %4453 = vst.msk [vmem:[#allocation5 + $0xd8] sm:$0xf] %vm1752_vm5, %v4385_v11 }
 0x53d   : > { %v4895_v57 = vpop.permute.xlu0 %4894  ;;  %7016 = vrot.lane.b32.xlu1 %v12202_v6, %s9941_s22  ;;  %9796 = vpow2.f32 %v8876_v59 }
 0x53e   : > { %4964 = vst.msk [vmem:[#allocation5 + $0xd0] sm:$0xf] %vm2266_vm9, %v4895_v57  ;;  %v6696_v57 = vmul.f32 0.1, %v12786_v27 }
 0x53f   : > { %v4641_v44 = vpop.permute.xlu1 %4640  ;;  %7022 = vrot.lane.b32.xlu0 %v12275_v17, %s9941_s22  ;;  %v9783_v49 = vld [vmem:[#allocation5 + $0xc0] ss:$8 sps:$4 sm:$0xff]  }
 0x540   : > { %4709 = vst.msk [vmem:[#allocation5 + $0xd8] sm:$0xf] %vm2009_vm6, %v4641_v44  ;;  %6630 = vmatmul.mubr.bf16.gmra.mxu0 %v9783_v49  ;;  %v6695_v49 = vmul.f32 0.1, %v12742_v41 }
 0x541   : > { %v5151_v24 = vpop.permute.xlu0 %5150  ;;  %7020 = vrot.lane.b32.xlu1 %v12254_v35, %s9941_s22 }
 0x542   : > { %5220 = vst.msk [vmem:[#allocation5 + $0xd0] sm:$0xf] %vm2523_vm10, %v5151_v24 }
 0x543   : > { %v4897_v13 = vpop.permute.xlu1 %4896  ;;  %7026 = vrot.lane.b32.xlu0 %v12347_v54, %s9941_s22 }
 0x544   : > { %4965 = vst.msk [vmem:[#allocation5 + $0xd8] sm:$0xf] %vm2266_vm9, %v4897_v13  ;;  %v12955_v4 = vpop.f32.mrf.mxu0 }
 0x545   : > { %v5407_v62 = vpop.permute.xlu0 %5406  ;;  %7024 = vrot.lane.b32.xlu1 %v12294_v63, %s9941_s22 }
 0x546   : > { %5476 = vst.msk [vmem:[#allocation5 + $0xd0] sm:$0xf] %vm2780_vm11, %v5407_v62  ;;  %v6577_v10 = vpop.f32.mrf.mxu0  ;;  %v9784_v62 = vld [vmem:[#allocation5 + $0xd4] ss:$8 sps:$4 sm:$0xff]  }
 0x547   : > { %v5153_v52 = vpop.permute.xlu1 %5152  ;;  %7030 = vrot.lane.b32.xlu0 %v12414_v19, %s9941_s22  ;;  %8873 = vmatprep.mubr.msk.bf16.mxu0 %vm1302_vm8, %v9784_v62 }
 0x548   : > { %5221 = vst.msk [vmem:[#allocation5 + $0xd8] sm:$0xf] %vm2523_vm10, %v5153_v52  ;;  %v12963_v42 = vpop.f32.mrf.mxu0  ;;  %v6728_v52 = vsel %vm6664_vm15, %v12786_v27, %v6696_v57  ;;  %v6697_v27 = vmul.f32 0.1, %v12796_v12  ;;  %v6699_v57 = vmul.f32 0.1, %v12832_v46 }
 0x549   : > { %v5664_v40 = vpop.permute.xlu0 %5663  ;;  %7028 = vrot.lane.b32.xlu1 %v12359_v8, %s9941_s22  ;;  %vm6667_vm15 = vcmp.gt.f32.partialorder %v12832_v46, 0.0 }
 0x54a   : > { %5733 = vst.msk [vmem:[#allocation5 + $0xd0] sm:$0xf] %vm3038_vm12, %v5664_v40  ;;  %v6580_v55 = vpop.f32.mrf.mxu0  ;;  %v6731_v62 = vsel %vm6667_vm15, %v12832_v46, %v6699_v57 }
 0x54b   : > { %v5409_v60 = vpop.permute.xlu1 %5408  ;;  %7034 = vrot.lane.b32.xlu0 %v12485_v18, %s9941_s22  ;;  %v6727_v55 = vsel %vm6663_vm0, %v12742_v41, %v6695_v49  ;;  %v6700_v41 = vmul.f32 0.1, %v12863_v37  ;;  %v6702_v49 = vmul.f32 0.1, %v12908_v16  ;;  %vm6670_vm0 = vcmp.gt.f32.partialorder %v12908_v16, 0.0 }
 0x54c   : > { %5477 = vst.msk [vmem:[#allocation5 + $0xd8] sm:$0xf] %vm2780_vm11, %v5409_v60 }
 0x54d   : > { %v5920_v53 = vpop.permute.xlu0 %5919  ;;  %7032 = vrot.lane.b32.xlu1 %v12427_v21, %s9941_s22  ;;  %v6732_v59 = vsel %vm6668_vm14, %v12863_v37, %v6700_v41  ;;  %v8881_v37 = vmul.f32 -1.442695, %v6731_v62  ;;  %vm6671_vm14 = vcmp.gt.f32.partialorder %v12916_v22, 0.0 }
 0x54e   : > { %5989 = vst.msk [vmem:[#allocation5 + $0xd0] sm:$0xf] %vm3295_vm13, %v5920_v53 }
 0x54f   : > { %v5666_v25 = vpop.permute.xlu1 %5665  ;;  %7038 = vrot.lane.b32.xlu0 %v12556_v15, %s9941_s22 }
 0x550   : > { %5734 = vst.msk [vmem:[#allocation5 + $0xd8] sm:$0xf] %vm3038_vm12, %v5666_v25  ;;  %v8878_v25 = vmul.f32 -1.442695, %v6728_v52 }
 0x551   : > { %v4387_v9 = vpop.permute.xlu0 %4386  ;;  %7036 = vrot.lane.b32.xlu1 %v12498_v31, %s9941_s22 }
 0x552   : > { %4454 = vst.msk [vmem:[#allocation5 + $0xe0] sm:$0xf] %vm1752_vm5, %v4387_v9  ;;  %v6730_v9 = vsel %vm6666_vm1, %v12825_v43, %v6698_v23  ;;  %9798 = vpow2.f32 %v8878_v25  ;;  %v6729_v43 = vsel %vm6665_vm4, %v12796_v12, %v6697_v27  ;;  %v6701_v12 = vmul.f32 0.1, %v12870_v51 }
 0x553   : > { %v5922_v1 = vpop.permute.xlu1 %5921  ;;  %7042 = vrot.lane.b32.xlu0 %v12625_v56, %s9941_s22  ;;  %vm6669_vm1 = vcmp.gt.f32.partialorder %v12870_v51, 0.0  ;;  %vm6672_vm4 = vcmp.gt.f32.partialorder %v12955_v4, 0.0  ;;  %v6703_v25 = vmul.f32 0.1, %v12916_v22 }
 0x554   : > { %5990 = vst.msk [vmem:[#allocation5 + $0xd8] sm:$0xf] %vm3295_vm13, %v5922_v1  ;;  %v6733_v46 = vsel %vm6669_vm1, %v12870_v51, %v6701_v12 }
 0x555   : > { %v4643_v45 = vpop.permute.xlu0 %4642  ;;  %7040 = vrot.lane.b32.xlu1 %v12568_v38, %s9941_s22  ;;  %v8883_v41 = vmul.f32 -1.442695, %v6733_v46 }
 0x556   : > { %4710 = vst.msk [vmem:[#allocation5 + $0xe0] sm:$0xf] %vm2009_vm6, %v4643_v45  ;;  %v8877_v45 = vmul.f32 -1.442695, %v6727_v55 }
 0x557   : > { %v4389_v11 = vpop.permute.xlu1 %4388 }
 0x558   : > { %4455 = vst.msk [vmem:[#allocation5 + $0xe8] sm:$0xf] %vm1752_vm5, %v4389_v11  ;;  %v12993_v24 = vpop.f32.mrf.mxu0  ;;  %v8880_v11 = vmul.f32 -1.442695, %v6730_v9  ;;  %9800 = vpow2.f32 %v8877_v45  ;;  %v9797_v9 = vpop.eup %9796 }
 0x559   : > { %v4899_v44 = vpop.permute.xlu0 %4898  ;;  %7044 = vrot.lane.b32.xlu1 %v12637_v34, %s9941_s22  ;;  %vm6674_vm15 = vcmp.gt.f32.partialorder %v12993_v24, 0.0  ;;  %v6854_v51 = vadd.f32 1.0, %v9797_v9  ;;  %v9787_v9 = vld [vmem:[#allocation5 + $0xe4] ss:$8 sps:$4 sm:$0xff]  }
 0x55a   : > { %4966 = vst.msk [vmem:[#allocation5 + $0xe0] sm:$0xf] %vm2266_vm9, %v4899_v44  ;;  %v6585_v10 = vpop.f32.mrf.mxu0  ;;  %9802 = vpow2.f32 %v8880_v11  ;;  %v6705_v11 = vmul.f32 0.1, %v12963_v42 }
 0x55b   : > { %v4645_v13 = vpop.permute.xlu1 %4644  ;;  %v9786_v40 = vld [vmem:[#allocation5 + $0xd0] ss:$8 sps:$4 sm:$0xff]   ;;  %v8882_v10 = vmul.f32 -1.442695, %v6732_v59 }
 0x55c   : > { %4711 = vst.msk [vmem:[#allocation5 + $0xe8] sm:$0xf] %vm2009_vm6, %v4645_v13  ;;  %v13003_v53 = vpop.f32.mrf.mxu0  ;;  %6638 = vmatmul.mubr.bf16.gmra.mxu0 %v9786_v40  ;;  %v8879_v13 = vmul.f32 -1.442695, %v6729_v43  ;;  %v6734_v40 = vsel %vm6670_vm0, %v12908_v16, %v6702_v49  ;;  %vm6673_vm0 = vcmp.gt.f32.partialorder %v12963_v42, 0.0 }
 0x55d   : > { %v5155_v60 = vpop.permute.xlu0 %5154  ;;  %v6737_v12 = vsel %vm6673_vm0, %v12963_v42, %v6705_v11  ;;  %vm6675_vm1 = vcmp.gt.f32.partialorder %v13003_v53, 0.0  ;;  %8874 = vmatprep.mubr.msk.bf16.mxu0 %vm1302_vm8, %v9787_v9 }
 0x55e   : > { %5222 = vst.msk [vmem:[#allocation5 + $0xe0] sm:$0xf] %vm2523_vm10, %v5155_v60  ;;  %v6588_v1 = vpop.f32.mrf.mxu0  ;;  %v6704_v60 = vmul.f32 0.1, %v12955_v4  ;;  %9804 = vpow2.f32 %v8879_v13  ;;  %v6707_v13 = vmul.f32 0.1, %v13003_v53 }
 0x55f   : > { %v4901_v3 = vpop.permute.xlu1 %4900  ;;  %9806 = vpow2.f32 %v8882_v10  ;;  %v6706_v1 = vmul.f32 0.1, %v12993_v24  ;;  %v9799_v43 = vpop.eup %9798 }
 0x560   : > { %4967 = vst.msk [vmem:[#allocation5 + $0xe8] sm:$0xf] %vm2266_vm9, %v4901_v3  ;;  %v8884_v3 = vmul.f32 -1.442695, %v6734_v40  ;;  %9808 = vpow2.f32 %v8881_v37  ;;  %v6736_v16 = vsel %vm6672_vm4, %v12955_v4, %v6704_v60  ;;  %v6856_v62 = vadd.f32 1.0, %v9799_v43 }
 0x561   : > { %v5411_v39 = vpop.permute.xlu0 %5410  ;;  %v6738_v4 = vsel %vm6674_vm15, %v12993_v24, %v6706_v1  ;;  %v8887_v60 = vmul.f32 -1.442695, %v6737_v12 }
 0x562   : > { %5478 = vst.msk [vmem:[#allocation5 + $0xe0] sm:$0xf] %vm2780_vm11, %v5411_v39  ;;  %v6735_v39 = vsel %vm6671_vm14, %v12916_v22, %v6703_v25  ;;  %9810 = vpow2.f32 %v8884_v3  ;;  %v8888_v10 = vmul.f32 -1.442695, %v6738_v4 }
 0x563   : > { %v5157_v44 = vpop.permute.xlu1 %5156  ;;  %9812 = vpow2.f32 %v8883_v41 }
 0x564   : > { %5223 = vst.msk [vmem:[#allocation5 + $0xe8] sm:$0xf] %vm2523_vm10, %v5157_v44  ;;  %v8886_v44 = vmul.f32 -1.442695, %v6736_v16  ;;  %9814 = vrcp.f32 %v6854_v51 }
 0x565   : > { %v5668_v23 = vpop.permute.xlu0 %5667  ;;  %v9801_v49 = vpop.eup %9800 }
 0x566   : > { %5735 = vst.msk [vmem:[#allocation5 + $0xe0] sm:$0xf] %vm3038_vm12, %v5668_v23  ;;  %v8885_v23 = vmul.f32 -1.442695, %v6735_v39  ;;  %9816 = vpow2.f32 %v8886_v44  ;;  %v6855_v24 = vadd.f32 1.0, %v9801_v49 }
 0x567   : > { %v5413_v52 = vpop.permute.xlu1 %5412  ;;  %v9803_v22 = vpop.eup %9802 }
 0x568   : > { %5479 = vst.msk [vmem:[#allocation5 + $0xe8] sm:$0xf] %vm2780_vm11, %v5413_v52  ;;  %v6858_v40 = vadd.f32 1.0, %v9803_v22  ;;  %9818 = vpow2.f32 %v8885_v23 }
 0x569   : > { %v5924_v55 = vpop.permute.xlu0 %5923  ;;  %9820 = vrcp.f32 %v6856_v62 }
 0x56a   : > { %5991 = vst.msk [vmem:[#allocation5 + $0xe0] sm:$0xf] %vm3295_vm13, %v5924_v55  ;;  %v6739_v55 = vsel %vm6675_vm1, %v13003_v53, %v6707_v13  ;;  %9822 = vpow2.f32 %v8888_v10 }
 0x56b   : > { %v5670_v27 = vpop.permute.xlu1 %5669  ;;  %v9805_v25 = vpop.eup %9804  ;;  %9824 = vrcp.f32 %v6855_v24 }
 0x56c   : > { %5736 = vst.msk [vmem:[#allocation5 + $0xe8] sm:$0xf] %vm3038_vm12, %v5670_v27  ;;  %v9807_v1 = vpop.eup %9806  ;;  %v6857_v39 = vadd.f32 1.0, %v9805_v25  ;;  %9826 = vpow2.f32 %v8887_v60 }
 0x56d   : > { %v4391_v45 = vpop.permute.xlu0 %4390  ;;  %v9809_v53 = vpop.eup %9808  ;;  %9828 = vrcp.f32 %v6858_v40  ;;  %v6860_v4 = vadd.f32 1.0, %v9807_v1 }
 0x56e   : > { %4456 = vst.msk [vmem:[#allocation5 + $0xf0] sm:$0xf] %vm1752_vm5, %v4391_v45  ;;  %v8889_v45 = vmul.f32 -1.442695, %v6739_v55  ;;  %v6859_v23 = vadd.f32 1.0, %v9809_v53 }
 0x56f   : > { %v5926_v57 = vpop.permute.xlu1 %5925  ;;  %v9811_v49 = vpop.eup %9810 }
 0x570   : > { %5992 = vst.msk [vmem:[#allocation5 + $0xe8] sm:$0xf] %vm3295_vm13, %v5926_v57  ;;  %v9813_v12 = vpop.eup %9812  ;;  %v6862_v24 = vadd.f32 1.0, %v9811_v49 }
 0x571   : > { %v4647_v59 = vpop.permute.xlu0 %4646  ;;  %v13053_v10 = vpop.eup %9814  ;;  %v6861_v60 = vadd.f32 1.0, %v9813_v12 }
 0x572   : > { %4712 = vst.msk [vmem:[#allocation5 + $0xf0] sm:$0xf] %vm2009_vm6, %v4647_v59 }
 0x573   : > { %v4393_v52 = vpop.permute.xlu1 %4392 }
 0x574   : > { %4457 = vst.msk [vmem:[#allocation5 + $0xf8] sm:$0xf] %vm1752_vm5, %v4393_v52  ;;  %v6591_v46 = vpop.f32.mrf.mxu0 }
 0x575   : > { %v4903_v37 = vpop.permute.xlu0 %4902  ;;  %vm6676_vm4 = vcmp.gt.f32.partialorder %v6591_v46, 0.0  ;;  %v6708_v42 = vmul.f32 0.1, %v6591_v46 }
 0x576   : > { %4968 = vst.msk [vmem:[#allocation5 + $0xf0] sm:$0xf] %vm2266_vm9, %v4903_v37  ;;  %v6593_v3 = vpop.f32.mrf.mxu0  ;;  %v9817_v37 = vpop.eup %9816 }
 0x577   : > { %v4649_v27 = vpop.permute.xlu1 %4648  ;;  %v9789_v16 = vld [vmem:[#allocation5 + $0xe0] ss:$8 sps:$4 sm:$0xff]   ;;  %v6740_v41 = vsel %vm6676_vm4, %v6591_v46, %v6708_v42  ;;  %v9819_v55 = vpop.eup %9818  ;;  %v6864_v42 = vadd.f32 1.0, %v9817_v37 }
 0x578   : > { %4713 = vst.msk [vmem:[#allocation5 + $0xf8] sm:$0xf] %vm2009_vm6, %v4649_v27  ;;  %v8890_v11 = vmul.f32 -1.442695, %v6740_v41  ;;  %v6594_v57 = vpop.f32.mrf.mxu0  ;;  %6646 = vmatmul.mubr.bf16.gmra.mxu0 %v9789_v16  ;;  %v13057_v25 = vpop.eup %9820  ;;  %v7142_v27 = vsub.f32 1.0, %v13053_v10  ;;  %v6863_v1 = vadd.f32 1.0, %v9819_v55 }
 0x579   : > { %v5159_v51 = vpop.permute.xlu0 %5158  ;;  %vm6677_vm5 = vcmp.gt.f32.partialorder %v6594_v57, 0.0  ;;  %v6709_v43 = vmul.f32 0.1, %v6594_v57  ;;  %v9823_v9 = vpop.eup %9822 }
 0x57a   : > { %5224 = vst.msk [vmem:[#allocation5 + $0xf0] sm:$0xf] %vm2523_vm10, %v5159_v51  ;;  %9830 = vpow2.f32 %v8890_v11  ;;  %v6596_v59 = vpop.f32.mrf.mxu0  ;;  %v13061_v16 = vpop.eup %9824  ;;  %v6866_v53 = vadd.f32 1.0, %v9823_v9  ;;  %v7144_v11 = vsub.f32 1.0, %v13057_v25 }
 0x57b   : > { %v4905_v44 = vpop.permute.xlu1 %4904  ;;  %9832 = vpow2.f32 %v8889_v45  ;;  %v6741_v13 = vsel %vm6677_vm5, %v6594_v57, %v6709_v43  ;;  %v9827_v45 = vpop.eup %9826  ;;  %v7143_v49 = vsub.f32 1.0, %v13061_v16 }
 0x57c   : > { %4969 = vst.msk [vmem:[#allocation5 + $0xf8] sm:$0xf] %vm2266_vm9, %v4905_v44  ;;  %9834 = vrcp.f32 %v6857_v39  ;;  %v8891_v62 = vmul.f32 -1.442695, %v6741_v13  ;;  %v13064_v51 = vpop.eup %9828  ;;  %v7174_v39 = vmul.f32 %v7142_v27, %v11698_v32 }
 0x57d   : > { %v5415_v22 = vpop.permute.xlu0 %5414  ;;  %9836 = vrcp.f32 %v6860_v4  ;;  %v6865_v4 = vadd.f32 1.0, %v9827_v45  ;;  %v7146_v12 = vsub.f32 1.0, %v13064_v51  ;;  %v7175_v55 = vmul.f32 %v7143_v49, %v11706_v33 }
 0x57e   : > { %5480 = vst.msk [vmem:[#allocation5 + $0xf0] sm:$0xf] %vm2780_vm11, %v5415_v22  ;;  %9838 = vrcp.f32 %v6859_v23 }
 0x57f   : > { %v5161_v52 = vpop.permute.xlu1 %5160  ;;  %9840 = vpow2.f32 %v8891_v62  ;;  %v7176_v62 = vmul.f32 %v7144_v11, %v11757_v30 }
 0x580   : > { %5225 = vst.msk [vmem:[#allocation5 + $0xf8] sm:$0xf] %vm2523_vm10, %v5161_v52  ;;  %9842 = vrcp.f32 %v6862_v24 }
 0x581   : > { %v5672_v40 = vpop.permute.xlu0 %5671  ;;  %9844 = vrcp.f32 %v6861_v60 }
 0x582   : > { %5737 = vst.msk [vmem:[#allocation5 + $0xf0] sm:$0xf] %vm3038_vm12, %v5672_v40  ;;  %9846 = vrcp.f32 %v6864_v42 }
 0x583   : > { %v5417_v46 = vpop.permute.xlu1 %5416  ;;  %9848 = vrcp.f32 %v6863_v1 }
 0x584   : > { %5481 = vst.msk [vmem:[#allocation5 + $0xf8] sm:$0xf] %vm2780_vm11, %v5417_v46  ;;  %9850 = vrcp.f32 %v6866_v53 }
 0x585   : > { %v5928_v3 = vpop.permute.xlu0 %5927  ;;  %9852 = vrcp.f32 %v6865_v4 }
 0x586   : > { %5993 = vst.msk [vmem:[#allocation5 + $0xf0] sm:$0xf] %vm3295_vm13, %v5928_v3  ;;  %v7178_v3 = vmul.f32 %v7146_v12, %v11817_v2 }
 0x587   : > { %v5674_v41 = vpop.permute.xlu1 %5673  ;;  %v9831_v57 = vpop.eup %9830 }
 0x588   : > { %5738 = vst.msk [vmem:[#allocation5 + $0xf8] sm:$0xf] %vm3038_vm12, %v5674_v41  ;;  %v9833_v44 = vpop.eup %9832  ;;  %v6868_v22 = vadd.f32 1.0, %v9831_v57 }
 0x589   : > { %v13069_v43 = vpop.permute.xlu0 %6982  ;;  %v13073_v23 = vpop.eup %9834  ;;  %v6867_v24 = vadd.f32 1.0, %v9833_v44 }
 0x58a   : > { %v7206_v59 = vadd.f32 %v7174_v39, %v13069_v43  ;;  %v13079_v52 = vpop.eup %9836  ;;  %v7145_v46 = vsub.f32 1.0, %v13073_v23  ;;  %9854 = vrcp.f32 %v6868_v22 }
 0x58b   : > { %v5930_v13 = vpop.permute.xlu1 %5929  ;;  %13837 = vst [vmem:[#allocation20_spill] sm:$0xff] %v13079_v52  ;;  %v13083_v40 = vpop.eup %9838  ;;  %v7148_v1 = vsub.f32 1.0, %v13079_v52  ;;  %9856 = vrcp.f32 %v6867_v24 }
 0x58c   : > { %5994 = vst.msk [vmem:[#allocation5 + $0xf8] sm:$0xf] %vm3295_vm13, %v5930_v13  ;;  %7270 = vrot.lane.b32.xlu0 %v7206_v59, %s9944_s25  ;;  %v9841_v42 = vpop.eup %9840  ;;  %v7147_v53 = vsub.f32 1.0, %v13083_v40  ;;  %v7177_v44 = vmul.f32 %v7145_v46, %v11765_v47  ;;  %v9790_v13 = vld [vmem:[#allocation5 + $0xf4] ss:$8 sps:$4 sm:$0xff]  }
 0x58d   : > { %v13081_v37 = vpop.permute.xlu0 %6986  ;;  %v13094_v45 = vpop.eup %9842  ;;  %v6869_v39 = vadd.f32 1.0, %v9841_v42  ;;  %v7180_v12 = vmul.f32 %v7148_v1, %v11879_v58  ;;  %8875 = vmatprep.mubr.msk.bf16.mxu0 %vm1302_vm8, %v9790_v13 }
 0x58e   : > { %v7208_v60 = vadd.f32 %v7176_v62, %v13081_v37  ;;  %13838 = vst [vmem:[#allocation21_spill] sm:$0xff] %v13094_v45  ;;  %v13102_v4 = vpop.eup %9844 }
 0x58f   : > { %v13088_v27 = vpop.permute.xlu1 %6984  ;;  %13839 = vst [vmem:[#allocation22_spill] sm:$0xff] %v13102_v4  ;;  %9858 = vrcp.f32 %v6869_v39  ;;  %v7149_v1 = vsub.f32 1.0, %v13102_v4 }
 0x590   : > { %v7207_v9 = vadd.f32 %v7175_v55, %v13088_v27  ;;  %7274 = vrot.lane.b32.xlu0 %v7208_v60, %s9944_s25  ;;  %v6599_v57 = vpop.f32.mrf.mxu0  ;;  %v7150_v60 = vsub.f32 1.0, %v13094_v45  ;;  %v9847_v55 = vpop.eup %9846 }
 0x591   : > { %v13096_v41 = vpop.permute.xlu0 %6990  ;;  %vm6678_vm6 = vcmp.gt.f32.partialorder %v6599_v57, 0.0  ;;  %v6710_v59 = vmul.f32 0.1, %v6599_v57  ;;  %v7181_v4 = vmul.f32 %v7149_v1, %v11894_v61 }
 0x592   : > { %v7210_v11 = vadd.f32 %v7178_v3, %v13096_v41  ;;  %7272 = vrot.lane.b32.xlu1 %v7207_v9, %s9944_s25  ;;  %v6601_v62 = vpop.f32.mrf.mxu0  ;;  %v7179_v9 = vmul.f32 %v7147_v53, %v11825_v36  ;;  %v7182_v39 = vmul.f32 %v7150_v60, %v11955_v50 }
 0x593   : > { %v13104_v49 = vpop.permute.xlu1 %6988  ;;  %v9792_v24 = vld [vmem:[#allocation5 + $0xf0] ss:$8 sps:$4 sm:$0xff]   ;;  %v6742_v42 = vsel %vm6678_vm6, %v6599_v57, %v6710_v59  ;;  %v13117_v62 = vpop.eup %9848 }
 0x594   : > { %v7209_v22 = vadd.f32 %v7177_v44, %v13104_v49  ;;  %7278 = vrot.lane.b32.xlu0 %v7210_v11, %s9944_s25  ;;  %v8892_v3 = vmul.f32 -1.442695, %v6742_v42  ;;  %v6602_v11 = vpop.f32.mrf.mxu0  ;;  %6654 = vmatmul.mubr.bf16.gmra.mxu0 %v9792_v24  ;;  %13840 = vst [vmem:[#allocation23_spill] sm:$0xff] %v13117_v62 }
 0x595   : > { %v13110_v46 = vpop.permute.xlu0 %6994  ;;  %vm6679_vm9 = vcmp.gt.f32.partialorder %v6602_v11, 0.0  ;;  %v6711_v57 = vmul.f32 0.1, %v6602_v11 }
 0x596   : > { %v7212_v44 = vadd.f32 %v7180_v12, %v13110_v46  ;;  %7276 = vrot.lane.b32.xlu1 %v7209_v22, %s9944_s25  ;;  %9860 = vpow2.f32 %v8892_v3  ;;  %v6604_v53 = vpop.f32.mrf.mxu0  ;;  %v7152_v12 = vsub.f32 1.0, %v9847_v55  ;;  %v9851_v22 = vpop.eup %9850  ;;  %v7151_v3 = vsub.f32 1.0, %v13117_v62 }
 0x597   : > { %v13119_v59 = vpop.permute.xlu1 %6992  ;;  %v6743_v42 = vsel %vm6679_vm9, %v6602_v11, %v6711_v57  ;;  %v7154_v11 = vsub.f32 1.0, %v9851_v22 }
 0x598   : > { %v7211_v13 = vadd.f32 %v7179_v9, %v13119_v59  ;;  %7282 = vrot.lane.b32.xlu0 %v7212_v44, %s9944_s25  ;;  %v8893_v45 = vmul.f32 -1.442695, %v6743_v42  ;;  %v9853_v9 = vpop.eup %9852  ;;  %v7184_v44 = vmul.f32 %v7152_v12, %v12012_v0  ;;  %v7183_v1 = vmul.f32 %v7151_v3, %v11964_v5 }
 0x599   : > { %v13124_v24 = vpop.permute.xlu0 %6998  ;;  %v9855_v57 = vpop.eup %9854  ;;  %v7153_v50 = vsub.f32 1.0, %v9853_v9 }
 0x59a   : > { %13841 = vst [vmem:[#allocation24_spill] sm:$0xff] %v13124_v24  ;;  %v7214_v58 = vadd.f32 %v7182_v39, %v13124_v24  ;;  %7280 = vrot.lane.b32.xlu1 %v7211_v13, %s9944_s25  ;;  %9862 = vpow2.f32 %v8893_v45  ;;  %v9857_v39 = vpop.eup %9856 }
 0x59b   : > { %v13130_v52 = vpop.permute.xlu1 %6996  ;;  %v7155_v0 = vsub.f32 1.0, %v9857_v39 }
 0x59c   : > { %v7213_v60 = vadd.f32 %v7181_v4, %v13130_v52  ;;  %7286 = vrot.lane.b32.xlu0 %v7214_v58, %s9944_s25  ;;  %v7186_v58 = vmul.f32 %v7154_v11, %v12074_v26  ;;  %v7156_v4 = vsub.f32 1.0, %v9855_v57  ;;  %v9859_v3 = vpop.eup %9858 }
 0x59d   : > { %v7003_v53 = vpop.permute.xlu0 %7002  ;;  %v7187_v26 = vmul.f32 %v7155_v0, %v12082_v29 }
 0x59e   : > { %v13135_v42 = vmul.f32 %v9847_v55, %v7003_v53  ;;  %v7216_v13 = vadd.f32 %v7184_v44, %v7003_v53  ;;  %7284 = vrot.lane.b32.xlu1 %v7213_v60, %s9944_s25  ;;  %v7185_v60 = vmul.f32 %v7153_v50, %v12021_v7  ;;  %v7157_v50 = vsub.f32 1.0, %v9859_v3 }
 0x59f   : > { %v13139_v62 = vpop.permute.xlu1 %7000 }
 0x5a0   : > { %13842 = vst [vmem:[#allocation25_spill] sm:$0xff] %v13135_v42  ;;  %v7215_v45 = vadd.f32 %v7183_v1, %v13139_v62  ;;  %7290 = vrot.lane.b32.xlu0 %v7216_v13, %s9944_s25  ;;  %v7188_v13 = vmul.f32 %v7156_v4, %v12135_v20  ;;  %v7189_v0 = vmul.f32 %v7157_v50, %v12141_v28 }
 0x5a1   : > { %v7007_v12 = vpop.permute.xlu0 %7006 }
 0x5a2   : > { %v13144_v24 = vmul.f32 %v9851_v22, %v7007_v12  ;;  %v7218_v55 = vadd.f32 %v7186_v58, %v7007_v12  ;;  %7288 = vrot.lane.b32.xlu1 %v7215_v45, %s9944_s25 }
 0x5a3   : > { %v7005_v44 = vpop.permute.xlu1 %7004  ;;  %v9861_v11 = vpop.eup %9860 }
 0x5a4   : > { %13843 = vst [vmem:[#allocation26_spill] sm:$0xff] %v13144_v24  ;;  %v13148_v53 = vmul.f32 %v9853_v9, %v7005_v44  ;;  %v7217_v42 = vadd.f32 %v7185_v60, %v7005_v44  ;;  %7294 = vrot.lane.b32.xlu0 %v7218_v55, %s9944_s25  ;;  %v6870_v22 = vadd.f32 1.0, %v9861_v11 }
 0x5a5   : > { %v7011_v1 = vpop.permute.xlu0 %7010 }
 0x5a6   : > { %v13153_v24 = vmul.f32 %v9855_v57, %v7011_v1  ;;  %v7220_v58 = vadd.f32 %v7188_v13, %v7011_v1  ;;  %7292 = vrot.lane.b32.xlu1 %v7217_v42, %s9944_s25  ;;  %9864 = vrcp.f32 %v6870_v22 }
 0x5a7   : > { %v7009_v45 = vpop.permute.xlu1 %7008  ;;  %v9863_v55 = vpop.eup %9862 }
 0x5a8   : > { %v13156_v9 = vmul.f32 %v9857_v39, %v7009_v45  ;;  %v7219_v12 = vadd.f32 %v7187_v26, %v7009_v45  ;;  %7298 = vrot.lane.b32.xlu0 %v7220_v58, %s9944_s25  ;;  %v6871_v4 = vadd.f32 1.0, %v9863_v55 }
 0x5a9   : > { %v7015_v50 = vpop.permute.xlu0 %7014 }
 0x5aa   : > { %7296 = vrot.lane.b32.xlu1 %v7219_v12, %s9944_s25  ;;  %9866 = vrcp.f32 %v6871_v4 }
 0x5ab   : > { %v7013_v60 = vpop.permute.xlu1 %7012 }
 0x5ac   : > { %v13161_v57 = vmul.f32 %v9859_v3, %v7013_v60  ;;  %v7221_v44 = vadd.f32 %v7189_v0, %v7013_v60  ;;  %v6607_v42 = vpop.f32.mrf.mxu0 }
 0x5ad   : > { %vm6680_vm10 = vcmp.gt.f32.partialorder %v6607_v42, 0.0  ;;  %v6712_v39 = vmul.f32 0.1, %v6607_v42 }
 0x5ae   : > { %7300 = vrot.lane.b32.xlu1 %v7221_v44, %s9944_s25  ;;  %v6609_v13 = vpop.f32.mrf.mxu0 }
 0x5af   : > { %v6744_v26 = vsel %vm6680_vm10, %v6607_v42, %v6712_v39  ;;  %v7017_v44 = vpop.permute.xlu1 %7016 }
 0x5b0   : > { %v8894_v11 = vmul.f32 -1.442695, %v6744_v26  ;;  %v6610_v1 = vpop.f32.mrf.mxu0 }
 0x5b1   : > { %vm6681_vm11 = vcmp.gt.f32.partialorder %v6610_v1, 0.0  ;;  %v6713_v22 = vmul.f32 0.1, %v6610_v1 }
 0x5b2   : > { %9868 = vpow2.f32 %v8894_v11  ;;  %v6612_v58 = vpop.f32.mrf.mxu0 }
 0x5b3   : > { %v9865_v45 = vpop.eup %9864  ;;  %v6745_v12 = vsel %vm6681_vm11, %v6610_v1, %v6713_v22 }
 0x5b4   : > { %v7158_v55 = vsub.f32 1.0, %v9865_v45  ;;  %v13164_v3 = vmul.f32 %v9865_v45, %v7015_v50  ;;  %v8895_v4 = vmul.f32 -1.442695, %v6745_v12 }
 0x5b6   : > { %v7190_v0 = vmul.f32 %v7158_v55, %v12193_v48  ;;  %9870 = vpow2.f32 %v8895_v4 }
 0x5b7   : > { %v9867_v60 = vpop.eup %9866 }
 0x5b8   : > { %v7222_v13 = vadd.f32 %v7190_v0, %v7015_v50  ;;  %v7159_v42 = vsub.f32 1.0, %v9867_v60  ;;  %v13167_v39 = vmul.f32 %v9867_v60, %v7017_v44 }
 0x5ba   : > { %13844 = vst [vmem:[#allocation27_spill] sm:$0xff] %v13167_v39  ;;  %v7191_v26 = vmul.f32 %v7159_v42, %v12202_v6  ;;  %7302 = vrot.lane.b32.xlu0 %v7222_v13, %s9944_s25  ;;  %v7021_v6 = vpop.permute.xlu1 %7020 }
 0x5bc   : > { %v7223_v11 = vadd.f32 %v7191_v26, %v7017_v44  ;;  %v7019_v26 = vpop.permute.xlu0 %7018 }
 0x5be   : > { %7304 = vrot.lane.b32.xlu1 %v7223_v11, %s9944_s25 }
 0x5bf   : > { %v9869_v1 = vpop.eup %9868 }
 0x5c0   : > { %v6872_v22 = vadd.f32 1.0, %v9869_v1 }
 0x5c2   : > { %9872 = vrcp.f32 %v6872_v22 }
 0x5c3   : > { %v9871_v58 = vpop.eup %9870 }
 0x5c4   : > { %v6873_v45 = vadd.f32 1.0, %v9871_v58 }
 0x5c6   : > { %9874 = vrcp.f32 %v6873_v45 }
 0x5c8   : > { %v6615_v12 = vpop.f32.mrf.mxu0 }
 0x5c9   : > { %vm6682_vm12 = vcmp.gt.f32.partialorder %v6615_v12, 0.0  ;;  %v6714_v55 = vmul.f32 0.1, %v6615_v12 }
 0x5ca   : > { %v6617_v50 = vpop.f32.mrf.mxu0 }
 0x5cb   : > { %v6746_v4 = vsel %vm6682_vm12, %v6615_v12, %v6714_v55  ;;  %vm9952_vm12 = vmmov 0  }
 0x5cc   : > { %v8896_v0 = vmul.f32 -1.442695, %v6746_v4  ;;  %v6618_v60 = vpop.f32.mrf.mxu0 }
 0x5cd   : > { %vm6683_vm13 = vcmp.gt.f32.partialorder %v6618_v60, 0.0  ;;  %v6715_v42 = vmul.f32 0.1, %v6618_v60 }
 0x5ce   : > { %9876 = vpow2.f32 %v8896_v0  ;;  %v6620_v13 = vpop.f32.mrf.mxu0 }
 0x5cf   : > { %v9873_v44 = vpop.eup %9872  ;;  %v6747_v11 = vsel %vm6683_vm13, %v6618_v60, %v6715_v42 }
 0x5d0   : > { %v8897_v39 = vmul.f32 -1.442695, %v6747_v11  ;;  %v7160_v1 = vsub.f32 1.0, %v9873_v44  ;;  %v13172_v22 = vmul.f32 %v9873_v44, %v7019_v26 }
 0x5d2   : > { %9878 = vpow2.f32 %v8897_v39  ;;  %v7192_v58 = vmul.f32 %v7160_v1, %v12245_v14 }
 0x5d3   : > { %v9875_v45 = vpop.eup %9874 }
 0x5d4   : > { %v7161_v50 = vsub.f32 1.0, %v9875_v45  ;;  %v13175_v12 = vmul.f32 %v9875_v45, %v7021_v6  ;;  %v7224_v55 = vadd.f32 %v7192_v58, %v7019_v26 }
 0x5d6   : > { %13845 = vst [vmem:[#allocation28_spill] sm:$0xff] %v13175_v12  ;;  %v7193_v4 = vmul.f32 %v7161_v50, %v12254_v35  ;;  %7306 = vrot.lane.b32.xlu0 %v7224_v55, %s9944_s25  ;;  %v7023_v55 = vpop.permute.xlu0 %7022  ;;  %v7025_v35 = vpop.permute.xlu1 %7024 }
 0x5d8   : > { %v7225_v0 = vadd.f32 %v7193_v4, %v7021_v6 }
 0x5da   : > { %7308 = vrot.lane.b32.xlu1 %v7225_v0, %s9944_s25 }
 0x5db   : > { %v9877_v60 = vpop.eup %9876 }
 0x5dc   : > { %v6874_v42 = vadd.f32 1.0, %v9877_v60 }
 0x5de   : > { %9880 = vrcp.f32 %v6874_v42 }
 0x5df   : > { %v9879_v13 = vpop.eup %9878 }
 0x5e0   : > { %v6875_v39 = vadd.f32 1.0, %v9879_v13 }
 0x5e2   : > { %9882 = vrcp.f32 %v6875_v39 }
 0x5e4   : > { %v6623_v44 = vpop.f32.mrf.mxu0 }
 0x5e5   : > { %vm6684_vm14 = vcmp.gt.f32.partialorder %v6623_v44, 0.0  ;;  %v6716_v11 = vmul.f32 0.1, %v6623_v44 }
 0x5e6   : > { %v6625_v1 = vpop.f32.mrf.mxu0 }
 0x5e7   : > { %v6748_v45 = vsel %vm6684_vm14, %v6623_v44, %v6716_v11 }
 0x5e8   : > { %v8898_v12 = vmul.f32 -1.442695, %v6748_v45  ;;  %v6626_v26 = vpop.f32.mrf.mxu0 }
 0x5e9   : > { %vm6685_vm15 = vcmp.gt.f32.partialorder %v6626_v26, 0.0  ;;  %v6717_v58 = vmul.f32 0.1, %v6626_v26 }
 0x5ea   : > { %9884 = vpow2.f32 %v8898_v12  ;;  %v6628_v50 = vpop.f32.mrf.mxu0 }
 0x5eb   : > { %v9881_v6 = vpop.eup %9880  ;;  %v6749_v4 = vsel %vm6685_vm15, %v6626_v26, %v6717_v58 }
 0x5ec   : > { %v8899_v0 = vmul.f32 -1.442695, %v6749_v4  ;;  %v7162_v60 = vsub.f32 1.0, %v9881_v6  ;;  %v13180_v42 = vmul.f32 %v9881_v6, %v7023_v55 }
 0x5ee   : > { %9886 = vpow2.f32 %v8899_v0  ;;  %v7194_v13 = vmul.f32 %v7162_v60, %v12275_v17 }
 0x5ef   : > { %v9883_v39 = vpop.eup %9882 }
 0x5f0   : > { %v7226_v1 = vadd.f32 %v7194_v13, %v7023_v55  ;;  %v7163_v44 = vsub.f32 1.0, %v9883_v39  ;;  %v13183_v11 = vmul.f32 %v9883_v39, %v7025_v35 }
 0x5f2   : > { %13846 = vst [vmem:[#allocation29_spill] sm:$0xff] %v13183_v11  ;;  %7310 = vrot.lane.b32.xlu0 %v7226_v1, %s9944_s25  ;;  %v7195_v12 = vmul.f32 %v7163_v44, %v12294_v63  ;;  %v13809_v63 = vmov 0.0  }
 0x5f3   : > { %9615 = vmatprep.subr.mxu0 %v13809_v63  ;;  %9622 = vmatprep.subr.mxu1 %v13809_v63 }
 0x5f4   : > { %v7227_v45 = vadd.f32 %v7195_v12, %v7025_v35 }
 0x5f6   : > { %7312 = vrot.lane.b32.xlu1 %v7227_v45, %s9944_s25 }
 0x5f7   : > { %v9885_v26 = vpop.eup %9884 }
 0x5f8   : > { %v6876_v58 = vadd.f32 1.0, %v9885_v26 }
 0x5fa   : > { %9888 = vrcp.f32 %v6876_v58 }
 0x5fb   : > { %v9887_v50 = vpop.eup %9886 }
 0x5fc   : > { %v6877_v6 = vadd.f32 1.0, %v9887_v50 }
 0x5fe   : > { %9890 = vrcp.f32 %v6877_v6  ;;  %v13194_v6 = vpop.permute.xlu0 %7026 }
 0x600   : > { %v6631_v4 = vpop.f32.mrf.mxu0 }
 0x601   : > { %vm6686_vm0 = vcmp.gt.f32.partialorder %v6631_v4, 0.0  ;;  %v6718_v0 = vmul.f32 0.1, %v6631_v4 }
 0x602   : > { %v6633_v55 = vpop.f32.mrf.mxu0 }
 0x603   : > { %v6750_v60 = vsel %vm6686_vm0, %v6631_v4, %v6718_v0 }
 0x604   : > { %v8900_v13 = vmul.f32 -1.442695, %v6750_v60  ;;  %v6634_v39 = vpop.f32.mrf.mxu0  ;;  %v13199_v60 = vpop.permute.xlu1 %7028 }
 0x605   : > { %vm6687_vm1 = vcmp.gt.f32.partialorder %v6634_v39, 0.0  ;;  %v6719_v1 = vmul.f32 0.1, %v6634_v39 }
 0x606   : > { %9892 = vpow2.f32 %v8900_v13  ;;  %v6636_v44 = vpop.f32.mrf.mxu0 }
 0x607   : > { %v13188_v35 = vpop.eup %9888  ;;  %v6751_v12 = vsel %vm6687_vm1, %v6634_v39, %v6719_v1 }
 0x608   : > { %v8901_v45 = vmul.f32 -1.442695, %v6751_v12  ;;  %v7164_v26 = vsub.f32 1.0, %v13188_v35 }
 0x60a   : > { %9894 = vpow2.f32 %v8901_v45  ;;  %v7196_v50 = vmul.f32 %v7164_v26, %v12347_v54 }
 0x60b   : > { %v13191_v58 = vpop.eup %9890 }
 0x60c   : > { %v7165_v4 = vsub.f32 1.0, %v13191_v58  ;;  %v7228_v0 = vadd.f32 %v7196_v50, %v13194_v6 }
 0x60e   : > { %v7197_v55 = vmul.f32 %v7165_v4, %v12359_v8  ;;  %7314 = vrot.lane.b32.xlu0 %v7228_v0, %s9944_s25 }
 0x610   : > { %v7229_v13 = vadd.f32 %v7197_v55, %v13199_v60 }
 0x612   : > { %7316 = vrot.lane.b32.xlu1 %v7229_v13, %s9944_s25 }
 0x613   : > { %v9893_v39 = vpop.eup %9892 }
 0x614   : > { %v6878_v1 = vadd.f32 1.0, %v9893_v39 }
 0x616   : > { %9896 = vrcp.f32 %v6878_v1 }
 0x617   : > { %v9895_v44 = vpop.eup %9894 }
 0x618   : > { %v6879_v12 = vadd.f32 1.0, %v9895_v44 }
 0x61a   : > { %9898 = vrcp.f32 %v6879_v12 }
 0x61c   : > { %v6639_v45 = vpop.f32.mrf.mxu0 }
 0x61d   : > { %vm6688_vm4 = vcmp.gt.f32.partialorder %v6639_v45, 0.0  ;;  %v6720_v26 = vmul.f32 0.1, %v6639_v45 }
 0x61e   : > { %v6641_v50 = vpop.f32.mrf.mxu0 }
 0x61f   : > { %v6752_v54 = vsel %vm6688_vm4, %v6639_v45, %v6720_v26  ;;  %v13215_v45 = vpop.permute.xlu0 %7030  ;;  %v13222_v50 = vpop.permute.xlu1 %7032 }
 0x620   : > { %v8902_v4 = vmul.f32 -1.442695, %v6752_v54  ;;  %v6642_v8 = vpop.f32.mrf.mxu0  ;;  %v7582_v54 = vld [vmem:[%s13789_s3 + $0x8] sm:$0xff]  ;;  %13848 = vst [vmem:[#allocation31_spill] sm:$0xff] %v13222_v50 }
 0x621   : > { %vm6689_vm5 = vcmp.gt.f32.partialorder %v6642_v8, 0.0  ;;  %v6721_v11 = vmul.f32 0.1, %v6642_v8  ;;  %9616 = vmatpush3.msra.mxu0 %v7582_v54 }
 0x622   : > { %9900 = vpow2.f32 %v8902_v4  ;;  %v6644_v0 = vpop.f32.mrf.mxu0  ;;  %9617 = vmatprep.subr.mxu0 %v13809_v63 }
 0x623   : > { %v13204_v55 = vpop.eup %9896  ;;  %v6753_v13 = vsel %vm6689_vm5, %v6642_v8, %v6721_v11 }
 0x624   : > { %v8903_v39 = vmul.f32 -1.442695, %v6753_v13  ;;  %v7166_v1 = vsub.f32 1.0, %v13204_v55 }
 0x626   : > { %9902 = vpow2.f32 %v8903_v39  ;;  %v7198_v44 = vmul.f32 %v7166_v1, %v12414_v19 }
 0x627   : > { %v13213_v12 = vpop.eup %9898 }
 0x628   : > { %13847 = vst [vmem:[#allocation30_spill] sm:$0xff] %v13213_v12  ;;  %v7230_v8 = vadd.f32 %v7198_v44, %v13215_v45  ;;  %v7167_v11 = vsub.f32 1.0, %v13213_v12 }
 0x62a   : > { %7318 = vrot.lane.b32.xlu0 %v7230_v8, %s9944_s25  ;;  %v7199_v26 = vmul.f32 %v7167_v11, %v12427_v21 }
 0x62c   : > { %v7231_v4 = vadd.f32 %v7199_v26, %v13222_v50 }
 0x62e   : > { %7320 = vrot.lane.b32.xlu1 %v7231_v4, %s9944_s25 }
 0x62f   : > { %v9901_v0 = vpop.eup %9900 }
 0x630   : > { %v6880_v13 = vadd.f32 1.0, %v9901_v0 }
 0x632   : > { %9904 = vrcp.f32 %v6880_v13 }
 0x633   : > { %v9903_v39 = vpop.eup %9902 }
 0x634   : > { %v6881_v1 = vadd.f32 1.0, %v9903_v39 }
 0x636   : > { %9906 = vrcp.f32 %v6881_v1  ;;  %v13232_v1 = vpop.permute.xlu0 %7034 }
 0x638   : > { %v6647_v54 = vpop.f32.mrf.mxu0 }
 0x639   : > { %vm6690_vm6 = vcmp.gt.f32.partialorder %v6647_v54, 0.0  ;;  %v6722_v44 = vmul.f32 0.1, %v6647_v54 }
 0x63a   : > { %v6649_v63 = vpop.f32.mrf.mxu0 }
 0x63b   : > { %v6754_v19 = vsel %vm6690_vm6, %v6647_v54, %v6722_v44  ;;  %v13238_v54 = vpop.permute.xlu1 %7036 }
 0x63c   : > { %v8904_v8 = vmul.f32 -1.442695, %v6754_v19  ;;  %v6650_v12 = vpop.f32.mrf.mxu0  ;;  %13850 = vst [vmem:[#allocation33_spill] sm:$0xff] %v13238_v54 }
 0x63d   : > { %vm6691_vm9 = vcmp.gt.f32.partialorder %v6650_v12, 0.0  ;;  %v6723_v11 = vmul.f32 0.1, %v6650_v12 }
 0x63e   : > { %9908 = vpow2.f32 %v8904_v8  ;;  %v6652_v21 = vpop.f32.mrf.mxu0 }
 0x63f   : > { %v13226_v26 = vpop.eup %9904  ;;  %v6755_v4 = vsel %vm6691_vm9, %v6650_v12, %v6723_v11 }
 0x640   : > { %v8905_v50 = vmul.f32 -1.442695, %v6755_v4  ;;  %v7168_v0 = vsub.f32 1.0, %v13226_v26 }
 0x642   : > { %9910 = vpow2.f32 %v8905_v50  ;;  %v7200_v13 = vmul.f32 %v7168_v0, %v12485_v18 }
 0x643   : > { %v13230_v39 = vpop.eup %9906 }
 0x644   : > { %13849 = vst [vmem:[#allocation32_spill] sm:$0xff] %v13230_v39  ;;  %v7232_v63 = vadd.f32 %v7200_v13, %v13232_v1  ;;  %v7169_v19 = vsub.f32 1.0, %v13230_v39 }
 0x646   : > { %7322 = vrot.lane.b32.xlu0 %v7232_v63, %s9944_s25  ;;  %v7201_v21 = vmul.f32 %v7169_v19, %v12498_v31 }
 0x648   : > { %v7233_v12 = vadd.f32 %v7201_v21, %v13238_v54 }
 0x64a   : > { %7324 = vrot.lane.b32.xlu1 %v7233_v12, %s9944_s25 }
 0x64b   : > { %v9909_v50 = vpop.eup %9908 }
 0x64c   : > { %v6882_v44 = vadd.f32 1.0, %v9909_v50 }
 0x64e   : > { %9912 = vrcp.f32 %v6882_v44  ;;  %v7581_v44 = vld [vmem:[%s13789_s3] sm:$0xff] }
 0x64f   : > { %v9911_v8 = vpop.eup %9910  ;;  %9618 = vmatpush3.msra.mxu0 %v7581_v44 }
 0x650   : > { %v6883_v11 = vadd.f32 1.0, %v9911_v8 }
 0x652   : > { %9914 = vrcp.f32 %v6883_v11  ;;  %v13251_v11 = vpop.permute.xlu0 %7038 }
 0x654   : > { %v6655_v4 = vpop.f32.mrf.mxu0 }
 0x655   : > { %vm6692_vm10 = vcmp.gt.f32.partialorder %v6655_v4, 0.0  ;;  %v6724_v0 = vmul.f32 0.1, %v6655_v4 }
 0x656   : > { %v6657_v13 = vpop.f32.mrf.mxu0 }
 0x657   : > { %v6756_v18 = vsel %vm6692_vm10, %v6655_v4, %v6724_v0  ;;  %v13257_v0 = vpop.permute.xlu1 %7040 }
 0x658   : > { %v8906_v63 = vmul.f32 -1.442695, %v6756_v18  ;;  %v6658_v39 = vpop.f32.mrf.mxu0 }
 0x659   : > { %vm6693_vm11 = vcmp.gt.f32.partialorder %v6658_v39, 0.0  ;;  %v6725_v19 = vmul.f32 0.1, %v6658_v39 }
 0x65a   : > { %9916 = vpow2.f32 %v8906_v63  ;;  %v6660_v31 = vpop.f32.mrf.mxu0 }
 0x65b   : > { %v13242_v21 = vpop.eup %9912  ;;  %v6757_v12 = vsel %vm6693_vm11, %v6658_v39, %v6725_v19 }
 0x65c   : > { %v8907_v54 = vmul.f32 -1.442695, %v6757_v12  ;;  %v7170_v50 = vsub.f32 1.0, %v13242_v21 }
 0x65e   : > { %9918 = vpow2.f32 %v8907_v54  ;;  %v7202_v8 = vmul.f32 %v7170_v50, %v12556_v15 }
 0x65f   : > { %v13249_v18 = vpop.eup %9914 }
 0x660   : > { %v7234_v31 = vadd.f32 %v7202_v8, %v13251_v11  ;;  %v7171_v4 = vsub.f32 1.0, %v13249_v18 }
 0x662   : > { %7326 = vrot.lane.b32.xlu0 %v7234_v31, %s9944_s25  ;;  %v7203_v39 = vmul.f32 %v7171_v4, %v12568_v38  ;;  %v13267_v4 = vpop.permute.xlu0 %7042 }
 0x664   : > { %v7235_v13 = vadd.f32 %v7203_v39, %v13257_v0 }
 0x666   : > { %7328 = vrot.lane.b32.xlu1 %v7235_v13, %s9944_s25 }
 0x667   : > { %v9917_v54 = vpop.eup %9916 }
 0x668   : > { %v6884_v63 = vadd.f32 1.0, %v9917_v54 }
 0x66a   : > { %9920 = vrcp.f32 %v6884_v63  ;;  %v13273_v63 = vpop.permute.xlu1 %7044 }
 0x66b   : > { %v9919_v19 = vpop.eup %9918 }
 0x66c   : > { %v6885_v12 = vadd.f32 1.0, %v9919_v19 }
 0x66e   : > { %9922 = vrcp.f32 %v6885_v12  ;;  %v13280_v12 = vld [vmem:[%s13792_s6] ss:$0 sm:$0xff] }
 0x66f   : > { %13852 = vst [vmem:[#allocation35_spill] sm:$0xff] %v13280_v12 }
 0x677   : > { %v13261_v50 = vpop.eup %9920 }
 0x678   : > { %v7172_v44 = vsub.f32 1.0, %v13261_v50 }
 0x67a   : > { %v7204_v8 = vmul.f32 %v7172_v44, %v12625_v56  ;;  %v7079_v44 = vmul.f32 %v13061_v16, %v13088_v27 }
 0x67b   : > { %v13265_v31 = vpop.eup %9922 }
 0x67c   : > { %13851 = vst [vmem:[#allocation34_spill] sm:$0xff] %v13265_v31  ;;  %v7236_v39 = vadd.f32 %v7204_v8, %v13267_v4  ;;  %v7173_v13 = vsub.f32 1.0, %v13265_v31  ;;  %v7078_v8 = vmul.f32 %v13053_v10, %v13069_v43 }
 0x67e   : > { %7330 = vrot.lane.b32.xlu0 %v7236_v39, %s9944_s25  ;;  %v7205_v54 = vmul.f32 %v7173_v13, %v12637_v34  ;;  %v7271_v39 = vpop.permute.xlu0 %7270  ;;  %v7273_v13 = vpop.permute.xlu1 %7272  ;;  %v7080_v34 = vmul.f32 %v13057_v25, %v13081_v37 }
 0x680   : > { %v7237_v19 = vadd.f32 %v7205_v54, %v13273_v63  ;;  %v7111_v54 = vadd.f32 %v7079_v44, %v11706_v33  ;;  %v7112_v33 = vadd.f32 %v7080_v34, %v11757_v30  ;;  %v7082_v30 = vmul.f32 %v13064_v51, %v13096_v41  ;;  %v7662_v51 = vld [vmem:[%s13790_s4] sm:$0xf] }
 0x681   : > { %9623 = vmatpush3.msk.msra.mxu1 %vm565_vm2, %v7662_v51 }
 0x682   : > { %7332 = vrot.lane.b32.xlu1 %v7237_v19, %s9944_s25  ;;  %7583 = vrot.lane.b32.xlu0 %v13280_v12, %s9949_s19  ;;  %v7110_v19 = vadd.f32 %v7078_v8, %v11698_v32  ;;  %v13293_v31 = vsel %vm794_vm7, %v7111_v54, %v7273_v13  ;;  %v7081_v12 = vmul.f32 %v13073_v23, %v13104_v49  ;;  %v7275_v27 = vpop.permute.xlu0 %7274  ;;  %v7277_v43 = vpop.permute.xlu1 %7276 }
 0x683   : > { %v7468_v10 = vmul.f32 %v13293_v31, %v13293_v31  ;;  %v7399_v25 = vsel %vm1302_vm8, %v13293_v31, 0.0  ;;  %v13309_v23 = vsel %vm794_vm7, %v7112_v33, %v7275_v27  ;;  %v7083_v13 = vmul.f32 %v13083_v40, %v13119_v59 }
 0x684   : > { %v13298_v16 = vsel %vm794_vm7, %v7110_v19, %v7271_v39  ;;  %v7113_v37 = vadd.f32 %v7081_v12, %v11765_v47  ;;  %v7469_v47 = vmul.f32 %v13309_v23, %v13309_v23  ;;  %v13853_v12 = vmov 0.0  }
 0x685   : > { %v7467_v32 = vmul.f32 %v13298_v16, %v13298_v16  ;;  %v7398_v49 = vsel %vm1302_vm8, %v13298_v16, 0.0  ;;  %v7500_v44 = vsel %vm1302_vm8, %v7468_v10, 0.0  ;;  %9619 = vmatprep.mubr.msk.f32.mxu0 %vm9952_vm12, %v13853_v12  ;;  %9624 = vmatprep.mubr.msk.f32.mxu1 %vm9952_vm12, %v13853_v12  ;;  %v7401_v41 = vsel %vm1302_vm8, %v13309_v23, 0.0 }
 0x686   : > { %v7400_v34 = vadd.f32 %v7399_v25, %v7398_v49  ;;  %v13317_v8 = vsel %vm794_vm7, %v7113_v37, %v7277_v43  ;;  %v7279_v19 = vpop.permute.xlu0 %7278  ;;  %v7114_v10 = vadd.f32 %v7082_v30, %v11817_v2  ;;  %v7281_v59 = vpop.permute.xlu1 %7280  ;;  %v7115_v25 = vadd.f32 %v7083_v13, %v11825_v36 }
 0x687   : > { %v7499_v39 = vsel %vm1302_vm8, %v7467_v32, 0.0  ;;  %v7470_v27 = vmul.f32 %v13317_v8, %v13317_v8  ;;  %v7502_v32 = vsel %vm1302_vm8, %v7469_v47, 0.0  ;;  %v7403_v40 = vsel %vm1302_vm8, %v13317_v8, 0.0 }
 0x688   : > { %v7501_v54 = vadd.f32 %v7500_v44, %v7499_v39  ;;  %v7402_v33 = vadd.f32 %v7401_v41, %v7400_v34  ;;  %v13340_v43 = vsel %vm794_vm7, %v7114_v10, %v7279_v19  ;;  %v13854_v44 = vld [vmem:[#allocation20_spill] sm:$0xff]  ;;  %v13346_v2 = vsel %vm794_vm7, %v7115_v25, %v7281_v59  ;;  %v13855_v34 = vld [vmem:[#allocation22_spill] sm:$0xff] }
 0x689   : > { %v7504_v49 = vsel %vm1302_vm8, %v7470_v27, 0.0  ;;  %v7084_v39 = vmul.f32 %v13854_v44, %v13110_v46  ;;  %v7471_v30 = vmul.f32 %v13340_v43, %v13340_v43  ;;  %v7085_v47 = vmul.f32 %v13855_v34, %v13130_v52  ;;  %v13856_v41 = vld [vmem:[#allocation6_spill] sm:$0xff]  ;;  %v13857_v25 = vld [vmem:[#allocation24_spill] sm:$0xff] }
 0x68a   : > { %v7503_v37 = vadd.f32 %v7502_v32, %v7501_v54  ;;  %v7404_v12 = vadd.f32 %v7403_v40, %v7402_v33  ;;  %v7405_v13 = vsel %vm1302_vm8, %v13340_v43, 0.0  ;;  %v7283_v54 = vpop.permute.xlu0 %7282  ;;  %v7472_v51 = vmul.f32 %v13346_v2, %v13346_v2  ;;  %v7285_v33 = vpop.permute.xlu1 %7284 }
 0x68b   : > { %v7116_v46 = vadd.f32 %v7084_v39, %v13856_v41  ;;  %v7506_v27 = vsel %vm1302_vm8, %v7471_v30, 0.0  ;;  %v7407_v10 = vsel %vm1302_vm8, %v13346_v2, 0.0  ;;  %v7117_v32 = vadd.f32 %v7085_v47, %v11894_v61  ;;  %v13859_v30 = vld [vmem:[#allocation23_spill] sm:$0xff] }
 0x68c   : > { %v7505_v36 = vadd.f32 %v7504_v49, %v7503_v37  ;;  %v7406_v19 = vadd.f32 %v7405_v13, %v7404_v12  ;;  %v7508_v59 = vsel %vm1302_vm8, %v7472_v51, 0.0  ;;  %v13858_v37 = vld [vmem:[#allocation21_spill] sm:$0xff]  ;;  %v7087_v34 = vmul.f32 %v13859_v30, %v13139_v62 }
 0x68d   : > { %v13362_v52 = vsel %vm794_vm7, %v7116_v46, %v7283_v54  ;;  %v7086_v49 = vmul.f32 %v13858_v37, %v13857_v25  ;;  %v13368_v39 = vsel %vm794_vm7, %v7117_v32, %v7285_v33  ;;  %v13860_v54 = vld [vmem:[#allocation7_spill] sm:$0xff]  ;;  %v13862_v30 = vld [vmem:[#allocation25_spill] sm:$0xff] }
 0x68e   : > { %v7507_v40 = vadd.f32 %v7506_v27, %v7505_v36  ;;  %v7408_v44 = vadd.f32 %v7407_v10, %v7406_v19  ;;  %v7473_v12 = vmul.f32 %v13362_v52, %v13362_v52  ;;  %v7409_v47 = vsel %vm1302_vm8, %v13362_v52, 0.0  ;;  %v7287_v36 = vpop.permute.xlu0 %7286  ;;  %v7289_v27 = vpop.permute.xlu1 %7288 }
 0x68f   : > { %v7474_v13 = vmul.f32 %v13368_v39, %v13368_v39  ;;  %v7118_v51 = vadd.f32 %v7086_v49, %v13860_v54  ;;  %v7411_v19 = vsel %vm1302_vm8, %v13368_v39, 0.0  ;;  %v7119_v10 = vadd.f32 %v7087_v34, %v11964_v5 }
 0x690   : > { %v7509_v61 = vadd.f32 %v7508_v59, %v7507_v40  ;;  %v7410_v41 = vadd.f32 %v7409_v47, %v7408_v44  ;;  %v7510_v46 = vsel %vm1302_vm8, %v7473_v12, 0.0  ;;  %v13861_v12 = vld [vmem:[#allocation8_spill] sm:$0xff]  ;;  %v7121_v54 = vadd.f32 %v13148_v53, %v12021_v7  ;;  %v13863_v53 = vld [vmem:[#allocation9_spill] sm:$0xff] }
 0x691   : > { %v13384_v62 = vsel %vm794_vm7, %v7118_v51, %v7287_v36  ;;  %v7512_v32 = vsel %vm1302_vm8, %v7474_v13, 0.0  ;;  %v13388_v59 = vsel %vm794_vm7, %v7119_v10, %v7289_v27  ;;  %v7120_v34 = vadd.f32 %v13862_v30, %v13861_v12 }
 0x692   : > { %v7511_v33 = vadd.f32 %v7510_v46, %v7509_v61  ;;  %v7412_v40 = vadd.f32 %v7411_v19, %v7410_v41  ;;  %v7475_v25 = vmul.f32 %v13384_v62, %v13384_v62  ;;  %v7413_v49 = vsel %vm1302_vm8, %v13384_v62, 0.0  ;;  %v7291_v44 = vpop.permute.xlu0 %7290  ;;  %v7293_v13 = vpop.permute.xlu1 %7292 }
 0x693   : > { %v7476_v5 = vmul.f32 %v13388_v59, %v13388_v59  ;;  %v7415_v36 = vsel %vm1302_vm8, %v13388_v59, 0.0  ;;  %v13404_v51 = vsel %vm794_vm7, %v7120_v34, %v7291_v44  ;;  %v13408_v27 = vsel %vm794_vm7, %v7121_v54, %v7293_v13 }
 0x694   : > { %v7513_v37 = vadd.f32 %v7512_v32, %v7511_v33  ;;  %v7414_v61 = vadd.f32 %v7413_v49, %v7412_v40  ;;  %v7514_v47 = vsel %vm1302_vm8, %v7475_v25, 0.0  ;;  %v7477_v10 = vmul.f32 %v13404_v51, %v13404_v51  ;;  %v13864_v25 = vld [vmem:[#allocation26_spill] sm:$0xff] }
 0x695   : > { %v7516_v46 = vsel %vm1302_vm8, %v7476_v5, 0.0  ;;  %v7417_v32 = vsel %vm1302_vm8, %v13404_v51, 0.0  ;;  %v7478_v7 = vmul.f32 %v13408_v27, %v13408_v27  ;;  %v7419_v5 = vsel %vm1302_vm8, %v13408_v27, 0.0 }
 0x696   : > { %v7515_v41 = vadd.f32 %v7514_v47, %v7513_v37  ;;  %v7416_v19 = vadd.f32 %v7415_v36, %v7414_v61  ;;  %v7295_v40 = vpop.permute.xlu0 %7294  ;;  %v7122_v37 = vadd.f32 %v13864_v25, %v13863_v53  ;;  %v7518_v44 = vsel %vm1302_vm8, %v7477_v10, 0.0  ;;  %v7297_v12 = vpop.permute.xlu1 %7296 }
 0x697   : > { %v7123_v30 = vadd.f32 %v13156_v9, %v12082_v29  ;;  %v7520_v47 = vsel %vm1302_vm8, %v7478_v7, 0.0  ;;  %v7124_v9 = vadd.f32 %v13153_v24, %v12135_v20  ;;  %v7125_v7 = vadd.f32 %v13161_v57, %v12141_v28  ;;  %v13866_v28 = vld [vmem:[#allocation27_spill] sm:$0xff] }
 0x698   : > { %v7517_v33 = vadd.f32 %v7516_v46, %v7515_v41  ;;  %v7418_v49 = vadd.f32 %v7417_v32, %v7416_v19  ;;  %v13424_v34 = vsel %vm794_vm7, %v7122_v37, %v7295_v40  ;;  %v7126_v20 = vadd.f32 %v13164_v3, %v12193_v48 }
 0x699   : > { %v13428_v13 = vsel %vm794_vm7, %v7123_v30, %v7297_v12  ;;  %v7479_v54 = vmul.f32 %v13424_v34, %v13424_v34  ;;  %v7421_v46 = vsel %vm1302_vm8, %v13424_v34, 0.0  ;;  %v13865_v30 = vld [vmem:[#allocation10_spill] sm:$0xff] }
 0x69a   : > { %v7519_v61 = vadd.f32 %v7518_v44, %v7517_v33  ;;  %v7420_v36 = vadd.f32 %v7419_v5, %v7418_v49  ;;  %v7299_v19 = vpop.permute.xlu0 %7298  ;;  %v7480_v29 = vmul.f32 %v13428_v13, %v13428_v13  ;;  %v7423_v32 = vsel %vm1302_vm8, %v13428_v13, 0.0  ;;  %v7301_v40 = vpop.permute.xlu1 %7300 }
 0x69b   : > { %v7522_v33 = vsel %vm1302_vm8, %v7479_v54, 0.0  ;;  %v13444_v53 = vsel %vm794_vm7, %v7124_v9, %v7299_v19  ;;  %v13450_v44 = vsel %vm794_vm7, %v7125_v7, %v7301_v40  ;;  %v7127_v57 = vadd.f32 %v13866_v28, %v13865_v30 }
 0x69c   : > { %v7521_v41 = vadd.f32 %v7520_v47, %v7519_v61  ;;  %v7422_v10 = vadd.f32 %v7421_v46, %v7420_v36  ;;  %v7524_v37 = vsel %vm1302_vm8, %v7480_v29, 0.0  ;;  %v7481_v5 = vmul.f32 %v13444_v53, %v13444_v53 }
 0x69d   : > { %v7425_v36 = vsel %vm1302_vm8, %v13444_v53, 0.0  ;;  %v7482_v48 = vmul.f32 %v13450_v44, %v13450_v44  ;;  %v7128_v46 = vadd.f32 %v13172_v22, %v12245_v14  ;;  %v7427_v29 = vsel %vm1302_vm8, %v13450_v44, 0.0 }
 0x69e   : > { %v7523_v25 = vadd.f32 %v7522_v33, %v7521_v41  ;;  %v7303_v49 = vpop.permute.xlu0 %7302  ;;  %v7424_v24 = vadd.f32 %v7423_v32, %v7422_v10  ;;  %v7305_v12 = vpop.permute.xlu1 %7304  ;;  %v7526_v19 = vsel %vm1302_vm8, %v7481_v5, 0.0  ;;  %v13867_v33 = vld [vmem:[#allocation11_spill] sm:$0xff]  ;;  %v13868_v32 = vld [vmem:[#allocation28_spill] sm:$0xff] }
 0x69f   : > { %v13457_v47 = vsel %vm794_vm7, %v7126_v20, %v7303_v49  ;;  %v13464_v41 = vsel %vm794_vm7, %v7127_v57, %v7305_v12  ;;  %v7129_v40 = vadd.f32 %v13868_v32, %v13867_v33  ;;  %v7100_v20 = vmul.f32 %v13188_v35, %v13194_v6 }
 0x6a0   : > { %v7525_v61 = vadd.f32 %v7524_v37, %v7523_v25  ;;  %v7426_v54 = vadd.f32 %v7425_v36, %v7424_v24  ;;  %v7483_v9 = vmul.f32 %v13457_v47, %v13457_v47  ;;  %v7528_v37 = vsel %vm1302_vm8, %v7482_v48, 0.0 }
 0x6a1   : > { %v7429_v14 = vsel %vm1302_vm8, %v13457_v47, 0.0  ;;  %v7484_v22 = vmul.f32 %v13464_v41, %v13464_v41  ;;  %v7130_v12 = vadd.f32 %v13180_v42, %v12275_v17  ;;  %v7431_v28 = vsel %vm1302_vm8, %v13464_v41, 0.0 }
 0x6a2   : > { %v7307_v3 = vpop.permute.xlu0 %7306  ;;  %v7309_v10 = vpop.permute.xlu1 %7308  ;;  %v7527_v7 = vadd.f32 %v7526_v19, %v7525_v61  ;;  %v7428_v24 = vadd.f32 %v7427_v29, %v7426_v54  ;;  %v7530_v30 = vsel %vm1302_vm8, %v7483_v9, 0.0  ;;  %v7101_v36 = vmul.f32 %v13191_v58, %v13199_v60  ;;  %v13870_v54 = vld [vmem:[#allocation29_spill] sm:$0xff] }
 0x6a3   : > { %v13476_v25 = vsel %vm794_vm7, %v7128_v46, %v7307_v3  ;;  %v13486_v5 = vsel %vm794_vm7, %v7129_v40, %v7309_v10  ;;  %v13869_v3 = vld [vmem:[#allocation12_spill] sm:$0xff]  ;;  %v7532_v42 = vsel %vm1302_vm8, %v7484_v22, 0.0  ;;  %v13871_v29 = vld [vmem:[#allocation13_spill] sm:$0xff]  ;;  %v7102_v32 = vmul.f32 %v13204_v55, %v13215_v45 }
 0x6a4   : > { %v7485_v57 = vmul.f32 %v13476_v25, %v13476_v25  ;;  %v7529_v35 = vadd.f32 %v7528_v37, %v7527_v7  ;;  %v7430_v6 = vadd.f32 %v7429_v14, %v7428_v24  ;;  %v7131_v17 = vadd.f32 %v13870_v54, %v13869_v3  ;;  %v13872_v14 = vld [vmem:[#allocation14_spill] sm:$0xff] }
 0x6a5   : > { %v7433_v46 = vsel %vm1302_vm8, %v13476_v25, 0.0  ;;  %v7486_v19 = vmul.f32 %v13486_v5, %v13486_v5  ;;  %v7132_v9 = vadd.f32 %v7100_v20, %v13871_v29  ;;  %v7435_v7 = vsel %vm1302_vm8, %v13486_v5, 0.0 }
 0x6a6   : > { %v7311_v49 = vpop.permute.xlu0 %7310  ;;  %v7313_v61 = vpop.permute.xlu1 %7312  ;;  %v7531_v58 = vadd.f32 %v7530_v30, %v7529_v35  ;;  %v7432_v60 = vadd.f32 %v7431_v28, %v7430_v6  ;;  %v7534_v40 = vsel %vm1302_vm8, %v7485_v57, 0.0  ;;  %v7133_v22 = vadd.f32 %v7101_v36, %v13872_v14  ;;  %v13873_v30 = vld [vmem:[#allocation31_spill] sm:$0xff]  ;;  %v13874_v28 = vld [vmem:[#allocation30_spill] sm:$0xff] }
 0x6a7   : > { %v13498_v48 = vsel %vm794_vm7, %v7130_v12, %v7311_v49  ;;  %v13509_v33 = vsel %vm794_vm7, %v7131_v17, %v7313_v61  ;;  %v7103_v61 = vmul.f32 %v13874_v28, %v13873_v30  ;;  %v7536_v55 = vsel %vm1302_vm8, %v7486_v19, 0.0  ;;  %v13875_v17 = vld [vmem:[#allocation15_spill] sm:$0xff] }
 0x6a8   : > { %v7487_v37 = vmul.f32 %v13498_v48, %v13498_v48  ;;  %v7533_v20 = vadd.f32 %v7532_v42, %v7531_v58  ;;  %v7434_v24 = vadd.f32 %v7433_v46, %v7432_v60  ;;  %v7437_v45 = vsel %vm1302_vm8, %v13498_v48, 0.0  ;;  %v13877_v58 = vld [vmem:[#allocation32_spill] sm:$0xff] }
 0x6a9   : > { %v7488_v57 = vmul.f32 %v13509_v33, %v13509_v33  ;;  %v7104_v36 = vmul.f32 %v13226_v26, %v13232_v1  ;;  %v7134_v42 = vadd.f32 %v7102_v32, %v13875_v17  ;;  %v7439_v19 = vsel %vm1302_vm8, %v13509_v33, 0.0 }
 0x6aa   : > { %v7315_v10 = vpop.permute.xlu0 %7314  ;;  %v7317_v49 = vpop.permute.xlu1 %7316  ;;  %v7535_v6 = vadd.f32 %v7534_v40, %v7533_v20  ;;  %v7436_v3 = vadd.f32 %v7435_v7, %v7434_v24  ;;  %v7538_v46 = vsel %vm1302_vm8, %v7487_v37, 0.0  ;;  %v13878_v7 = vld [vmem:[#allocation16_spill] sm:$0xff] }
 0x6ab   : > { %v13520_v12 = vsel %vm794_vm7, %v7132_v9, %v7315_v10  ;;  %v13532_v54 = vsel %vm794_vm7, %v7133_v22, %v7317_v49  ;;  %v13876_v10 = vld [vmem:[#allocation33_spill] sm:$0xff]  ;;  %v7135_v14 = vadd.f32 %v7103_v61, %v13878_v7  ;;  %v7540_v32 = vsel %vm1302_vm8, %v7488_v57, 0.0 }
 0x6ac   : > { %v7489_v29 = vmul.f32 %v13520_v12, %v13520_v12  ;;  %v7105_v60 = vmul.f32 %v13877_v58, %v13876_v10  ;;  %v7537_v26 = vadd.f32 %v7536_v55, %v7535_v6  ;;  %v7438_v1 = vadd.f32 %v7437_v45, %v7436_v3  ;;  %v13879_v49 = vld [vmem:[#allocation17_spill] sm:$0xff]  ;;  %v13880_v6 = vld [vmem:[#allocation18_spill] sm:$0xff] }
 0x6ad   : > { %v7441_v37 = vsel %vm1302_vm8, %v13520_v12, 0.0  ;;  %v7490_v22 = vmul.f32 %v13532_v54, %v13532_v54  ;;  %v7136_v20 = vadd.f32 %v7104_v36, %v13879_v49  ;;  %v7106_v45 = vmul.f32 %v13242_v21, %v13251_v11 }
 0x6ae   : > { %v7319_v35 = vpop.permute.xlu0 %7318  ;;  %v7321_v9 = vpop.permute.xlu1 %7320  ;;  %v7539_v30 = vadd.f32 %v7538_v46, %v7537_v26  ;;  %v7440_v28 = vadd.f32 %v7439_v19, %v7438_v1  ;;  %v7542_v61 = vsel %vm1302_vm8, %v7489_v29, 0.0  ;;  %v7443_v57 = vsel %vm1302_vm8, %v13532_v54, 0.0 }
 0x6af   : > { %v13543_v40 = vsel %vm794_vm7, %v7134_v42, %v7319_v35  ;;  %v13553_v55 = vsel %vm794_vm7, %v7135_v14, %v7321_v9  ;;  %v7137_v3 = vadd.f32 %v7105_v60, %v13880_v6  ;;  %v7107_v19 = vmul.f32 %v13249_v18, %v13257_v0 }
 0x6b0   : > { %v7491_v35 = vmul.f32 %v13543_v40, %v13543_v40  ;;  %v7541_v17 = vadd.f32 %v7540_v32, %v7539_v30  ;;  %v7442_v42 = vadd.f32 %v7441_v37, %v7440_v28  ;;  %v7544_v21 = vsel %vm1302_vm8, %v7490_v22, 0.0 }
 0x6b1   : > { %v7445_v11 = vsel %vm1302_vm8, %v13543_v40, 0.0  ;;  %v7492_v29 = vmul.f32 %v13553_v55, %v13553_v55  ;;  %v7138_v26 = vadd.f32 %v7106_v45, %v12556_v15  ;;  %v7447_v18 = vsel %vm1302_vm8, %v13553_v55, 0.0 }
 0x6b2   : > { %v7543_v10 = vadd.f32 %v7542_v61, %v7541_v17  ;;  %v7444_v58 = vadd.f32 %v7443_v57, %v7442_v42  ;;  %v7546_v1 = vsel %vm1302_vm8, %v7491_v35, 0.0  ;;  %v7139_v22 = vadd.f32 %v7107_v19, %v12568_v38  ;;  %v13881_v19 = vld [vmem:[#allocation34_spill] sm:$0xff] }
 0x6b3   : > { %v7548_v49 = vsel %vm1302_vm8, %v7492_v29, 0.0  ;;  %v7108_v45 = vmul.f32 %v13261_v50, %v13267_v4 }
 0x6b4   : > { %v7545_v14 = vadd.f32 %v7544_v21, %v7543_v10  ;;  %v7446_v32 = vadd.f32 %v7445_v11, %v7444_v58  ;;  %v7109_v21 = vmul.f32 %v13881_v19, %v13273_v63 }
 0x6b5   : > { %v7140_v4 = vadd.f32 %v7108_v45, %v12625_v56 }
 0x6b6   : > { %v7448_v30 = vadd.f32 %v7447_v18, %v7446_v32 }
 0x6b8   : > { %v7323_v24 = vpop.permute.xlu0 %7322 }
 0x6b9   : > { %v13564_v46 = vsel %vm794_vm7, %v7136_v20, %v7323_v24  ;;  %v7547_v24 = vadd.f32 %v7546_v1, %v7545_v14 }
 0x6ba   : > { %v7493_v0 = vmul.f32 %v13564_v46, %v13564_v46  ;;  %v7449_v15 = vsel %vm1302_vm8, %v13564_v46, 0.0 }
 0x6bb   : > { %v7549_v35 = vadd.f32 %v7548_v49, %v7547_v24  ;;  %v7450_v6 = vadd.f32 %v7449_v15, %v7448_v30 }
 0x6bc   : > { %v7325_v36 = vpop.permute.xlu1 %7324  ;;  %v7550_v61 = vsel %vm1302_vm8, %v7493_v0, 0.0 }
 0x6bd   : > { %v13574_v60 = vsel %vm794_vm7, %v7137_v3, %v7325_v36  ;;  %v7551_v42 = vadd.f32 %v7550_v61, %v7549_v35 }
 0x6be   : > { %v7494_v20 = vmul.f32 %v13574_v60, %v13574_v60  ;;  %v7451_v38 = vsel %vm1302_vm8, %v13574_v60, 0.0 }
 0x6bf   : > { %v7452_v50 = vadd.f32 %v7451_v38, %v7450_v6 }
 0x6c0   : > { %v7552_v3 = vsel %vm1302_vm8, %v7494_v20, 0.0 }
 0x6c1   : > { %v7553_v10 = vadd.f32 %v7552_v3, %v7551_v42 }
 0x6d4   : > { %v7327_v9 = vpop.permute.xlu0 %7326 }
 0x6d5   : > { %v13583_v37 = vsel %vm794_vm7, %v7138_v26, %v7327_v9 }
 0x6d6   : > { %v7495_v57 = vmul.f32 %v13583_v37, %v13583_v37  ;;  %v7453_v36 = vsel %vm1302_vm8, %v13583_v37, 0.0 }
 0x6d7   : > { %v7454_v58 = vadd.f32 %v7453_v36, %v7452_v50 }
 0x6d8   : > { %v7329_v7 = vpop.permute.xlu1 %7328  ;;  %v7554_v11 = vsel %vm1302_vm8, %v7495_v57, 0.0 }
 0x6d9   : > { %v13592_v28 = vsel %vm794_vm7, %v7139_v22, %v7329_v7  ;;  %v7555_v63 = vadd.f32 %v7554_v11, %v7553_v10  ;;  %v13882_v7 = vld [vmem:[#allocation19_spill] sm:$0xff] }
 0x6da   : > { %v7496_v17 = vmul.f32 %v13592_v28, %v13592_v28  ;;  %v7455_v29 = vsel %vm1302_vm8, %v13592_v28, 0.0  ;;  %v7141_v14 = vadd.f32 %v7109_v21, %v13882_v7 }
 0x6db   : > { %v7456_v0 = vadd.f32 %v7455_v29, %v7454_v58 }
 0x6dc   : > { %v7556_v1 = vsel %vm1302_vm8, %v7496_v17, 0.0 }
 0x6dd   : > { %v7557_v49 = vadd.f32 %v7556_v1, %v7555_v63 }
 0x6f0   : > { %v7331_v9 = vpop.permute.xlu0 %7330 }
 0x6f1   : > { %v13613_v26 = vsel %vm794_vm7, %v7140_v4, %v7331_v9 }
 0x6f2   : > { %v7457_v18 = vsel %vm1302_vm8, %v13613_v26, 0.0  ;;  %v7497_v56 = vmul.f32 %v13613_v26, %v13613_v26 }
 0x6f3   : > { %v7458_v15 = vadd.f32 %v7457_v18, %v7456_v0 }
 0x6f4   : > { %v7558_v32 = vsel %vm1302_vm8, %v7497_v56, 0.0  ;;  %v7333_v22 = vpop.permute.xlu1 %7332 }
 0x6f5   : > { %v13623_v20 = vsel %vm794_vm7, %v7141_v14, %v7333_v22  ;;  %v7559_v45 = vadd.f32 %v7558_v32, %v7557_v49  ;;  %v13883_v22 = vld [vmem:[#allocation35_spill] sm:$0xff]  ;;  %v7584_v49 = vpop.permute.xlu0 %7583 }
 0x6f6   : > { %v7459_v24 = vsel %vm1302_vm8, %v13623_v20, 0.0  ;;  %v7498_v30 = vmul.f32 %v13623_v20, %v13623_v20  ;;  %7663 = vrot.lane.b32.xlu1 %v13883_v22, %s9953_s26  ;;  %7808 = vrot.lane.b32.xlu0 %v13883_v22, %s9954_s16 }
 0x6f7   : > { %v7460_v61 = vadd.f32 %v7459_v24, %v7458_v15 }
 0x6f8   : > { %v7560_v38 = vsel %vm1302_vm8, %v7498_v30, 0.0 }
 0x6f9   : > { %v7461_v57 = vrot.slane %v7460_v61, 4  ;;  %v7561_v35 = vadd.f32 %v7560_v38, %v7559_v45  ;;  %v9793_v38 = vld [vmem:[%s13791_s5] sm:$0xff]  }
 0x6fa   : > { %9661 = vmatprep.subr.bf16.mxu1 %v9793_v38  ;;  %9627 = vmatprep.subr.bf16.mxu0 %v9793_v38 }
 0x6fb   : > { %v7462_v6 = vadd.f32 %v7461_v57, %v7460_v61  ;;  %v7562_v3 = vrot.slane %v7561_v35, 4 }
 0x6fd   : > { %v7463_v36 = vrot.slane %v7462_v6, 2  ;;  %v7563_v17 = vadd.f32 %v7562_v3, %v7561_v35 }
 0x6ff   : > { %v7464_v42 = vadd.f32 %v7463_v36, %v7462_v6  ;;  %v7564_v50 = vrot.slane %v7563_v17, 2 }
 0x701   : > { %v7465_v4 = vrot.slane %v7464_v42, 1  ;;  %v7565_v19 = vadd.f32 %v7564_v50, %v7563_v17  ;;  %v7748_v50 = vlaneseq }
 0x703   : > { %v7466_v21 = vadd.f32 %v7465_v4, %v7464_v42  ;;  %v7566_v11 = vrot.slane %v7565_v19, 1  ;;  %v7749_v4 = vshrl.u32 %v7748_v50, 7 }
 0x705   : > { %v7567_v29 = vadd.f32 %v7566_v11, %v7565_v19  ;;  %v7568_v9 = vmul.f32 0.00390625, %v7466_v21  ;;  %v7750_v19 = vsub.s32 0, %v7749_v4 }
 0x707   : > { %v7569_v10 = vmul.f32 0.00390625, %v7567_v29  ;;  %v7570_v58 = vmul.f32 %v7568_v9, %v7568_v9 }
 0x709   : > { %v7571_v1 = vsub.f32 %v7569_v10, %v7570_v58 }
 0x70b   : > { %v7572_v18 = vmax.f32 %v7571_v1, 0.0 }
 0x70d   : > { %9924 = vrsqrt.f32 %v7572_v18  ;;  %vm7575_vm2 = vcmp.eq.f32.partialorder %v7572_v18, inf  ;;  %v7578_v0 = vand.u32 2147483648, %v7572_v18  ;;  %vm7577_vm13 = vcmp.eq.f32.partialorder %v7572_v18, 0.0 }
 0x71a   : > { %v9925_v56 = vpop.eup %9924 }
 0x71b   : > { %v7574_v63 = vmul.f32 %v9925_v56, %v7572_v18 }
 0x71d   : > { %v7576_v7 = vsel %vm7575_vm2, %v7572_v18, %v7574_v63 }
 0x71e   : > { %v7579_v14 = vsel %vm7577_vm13, %v7578_v0, %v7576_v7 }
 0x71f   : > { %v7580_v32 = vadd.f32 %v7579_v14, %v7568_v9 }
 0x721   : > { %9620 = vmatmul.mubr.msk.f32.vlgmr.msra.gmra.mxu0 %vm1302_vm8, %v7580_v32 }
 0x722   : > { %9628 = vmatpush3.bf16.msra.mxu0 %v9793_v38 }
 0x768   : > { %v7664_v57 = vpop.permute.xlu1 %7663 }
 0x7e1   : > { %v7655_v15 = vpop.f32.mrf.mxu0 }
 0x7e2   : > { %v7656_v24 = vadd.f32 %v7655_v15, %v7584_v49 }
 0x7e3   : > { %v9621_v30 = vpop.f32.mrf.mxu0 }
 0x7e4   : > { %vm7659_vm14 = vcmp.gt.f32.partialorder %v7656_v24, 0.0  ;;  %v7660_v45 = vmul.f32 0.1, %v7656_v24 }
 0x7e6   : > { %v7661_v61 = vsel %vm7659_vm14, %v7656_v24, %v7660_v45 }
 0x7e7   : > { %9625 = vmatmul.mubr.msk.f32.vlgmr.msra.gmra.mxu1 %vm468_vm3, %v7661_v61 }
 0x7e8   : > { %9662 = vmatpush3.bf16.msra.mxu1 %v9793_v38 }
 0x8a7   : > { %v7738_v35 = vpop.f32.mrf.mxu1 }
 0x8a8   : > { %v7739_v6 = vadd.f32 %v7738_v35, %v7664_v57 }
 0x8a9   : > { %v9626_v3 = vpop.f32.mrf.mxu1 }
 0x8aa   : > { %v8911_v36 = vmul.f32 -1.442695, %v7739_v6 }
 0x8ac   : > { %9926 = vpow2.f32 %v8911_v36 }
 0x8b9   : > { %v9927_v17 = vpop.eup %9926 }
 0x8ba   : > { %v7745_v42 = vadd.f32 1.0, %v9927_v17 }
 0x8bc   : > { %9928 = vrcp.f32 %v7745_v42 }
 0x8c9   : > { %v9929_v21 = vpop.eup %9928 }
 0x8ca   : > { %v7751_v11 = vrot.slane %v9929_v21, %v7750_v19 }
 0x8cc   : > { %v7752_v29 = vmul.f32 %v7751_v11, %v13298_v16  ;;  %v7753_v9 = vmul.f32 %v7751_v11, %v13293_v31  ;;  %v7754_v10 = vmul.f32 %v7751_v11, %v13309_v23  ;;  %v7755_v58 = vmul.f32 %v7751_v11, %v13317_v8 }
 0x8cd   : > { %v7760_v1 = vmul.f32 %v7751_v11, %v13384_v62  ;;  %v7761_v18 = vmul.f32 %v7751_v11, %v13388_v59  ;;  %v7762_v56 = vmul.f32 %v7751_v11, %v13404_v51  ;;  %v7763_v63 = vmul.f32 %v7751_v11, %v13408_v27 }
 0x8ce   : > { %v7756_v0 = vmul.f32 %v7751_v11, %v13340_v43  ;;  %v7757_v7 = vmul.f32 %v7751_v11, %v13346_v2  ;;  %v7764_v16 = vmul.f32 %v7751_v11, %v13424_v34  ;;  %v7765_v31 = vmul.f32 %v7751_v11, %v13428_v13 }
 0x8cf   : > { %v7784_v14 = vpack.c.bf16 %v7753_v9, %v7752_v29  ;;  %v7785_v23 = vpack.c.bf16 %v7755_v58, %v7754_v10  ;;  %v7788_v32 = vpack.c.bf16 %v7761_v18, %v7760_v1  ;;  %v7789_v8 = vpack.c.bf16 %v7763_v63, %v7762_v56 }
 0x8d0   : > { %v7786_v62 = vpack.c.bf16 %v7757_v7, %v7756_v0  ;;  %v7790_v59 = vpack.c.bf16 %v7765_v31, %v7764_v16  ;;  %v7758_v43 = vmul.f32 %v7751_v11, %v13362_v52  ;;  %v7759_v2 = vmul.f32 %v7751_v11, %v13368_v39 }
 0x8d1   : > { %9629 = vmatprep.mubr.msk.bf16.mxu0 %vm1302_vm8, %v7784_v14  ;;  %9637 = vmatprep.mubr.msk.bf16.mxu1 %vm1302_vm8, %v7788_v32  ;;  %v7766_v51 = vmul.f32 %v7751_v11, %v13444_v53  ;;  %v7767_v27 = vmul.f32 %v7751_v11, %v13450_v44  ;;  %v7768_v34 = vmul.f32 %v7751_v11, %v13457_v47 }
 0x8d2   : > { %9630 = vmatmul.mubr.msk.bf16.vlgmr.msra.gmra.mxu0 %vm1302_vm8, %v7785_v23  ;;  %9638 = vmatmul.mubr.msk.bf16.vlgmr.msra.gmra.mxu1 %vm1302_vm8, %v7789_v8  ;;  %v7769_v13 = vmul.f32 %v7751_v11, %v13464_v41  ;;  %v7787_v22 = vpack.c.bf16 %v7759_v2, %v7758_v43  ;;  %v7770_v52 = vmul.f32 %v7751_v11, %v13476_v25 }
 0x8d3   : > { %9633 = vmatprep.mubr.msk.bf16.mxu0 %vm1302_vm8, %v7786_v62  ;;  %9641 = vmatprep.mubr.msk.bf16.mxu1 %vm1302_vm8, %v7790_v59  ;;  %v7791_v49 = vpack.c.bf16 %v7767_v27, %v7766_v51  ;;  %v7771_v39 = vmul.f32 %v7751_v11, %v13486_v5  ;;  %v7772_v53 = vmul.f32 %v7751_v11, %v13498_v48 }
 0x8d4   : > { %v7792_v15 = vpack.c.bf16 %v7769_v13, %v7768_v34  ;;  %v7773_v44 = vmul.f32 %v7751_v11, %v13509_v33  ;;  %v7774_v41 = vmul.f32 %v7751_v11, %v13520_v12  ;;  %v7775_v30 = vmul.f32 %v7751_v11, %v13532_v54 }
 0x8d5   : > { %v7793_v47 = vpack.c.bf16 %v7771_v39, %v7770_v52  ;;  %v7776_v45 = vmul.f32 %v7751_v11, %v13543_v40  ;;  %v7777_v25 = vmul.f32 %v7751_v11, %v13553_v55  ;;  %v7778_v48 = vmul.f32 %v7751_v11, %v13564_v46 }
 0x8d6   : > { %v7794_v24 = vpack.c.bf16 %v7773_v44, %v7772_v53  ;;  %v7795_v61 = vpack.c.bf16 %v7775_v30, %v7774_v41  ;;  %v7779_v33 = vmul.f32 %v7751_v11, %v13574_v60  ;;  %v7780_v38 = vmul.f32 %v7751_v11, %v13583_v37  ;;  %v13685_v60 = vpop.permute.xlu0 %7808 }
 0x8d7   : > { %v7796_v5 = vpack.c.bf16 %v7777_v25, %v7776_v45  ;;  %v7781_v12 = vmul.f32 %v7751_v11, %v13592_v28  ;;  %v7782_v55 = vmul.f32 %v7751_v11, %v13613_v26  ;;  %v7783_v57 = vmul.f32 %v7751_v11, %v13623_v20 }
 0x8d8   : > { %v7797_v54 = vpack.c.bf16 %v7779_v33, %v7778_v48 }
 0x8d9   : > { %v7798_v40 = vpack.c.bf16 %v7781_v12, %v7780_v38  ;;  %v7799_v46 = vpack.c.bf16 %v7783_v57, %v7782_v55 }
 0x8da   : > { %9634 = vmatmul.mubr.msk.bf16.gmra.mxu0 %vm1302_vm8, %v7787_v22  ;;  %9642 = vmatmul.mubr.msk.bf16.gmra.mxu1 %vm1302_vm8, %v7791_v49 }
 0x8db   : > { %9645 = vmatprep.mubr.msk.bf16.mxu1 %vm1302_vm8, %v7792_v15 }
 0x8e2   : > { %9646 = vmatmul.mubr.msk.bf16.gmra.mxu1 %vm1302_vm8, %v7793_v47 }
 0x8e3   : > { %9649 = vmatprep.mubr.msk.bf16.mxu1 %vm1302_vm8, %v7794_v24 }
 0x8ea   : > { %9650 = vmatmul.mubr.msk.bf16.gmra.mxu1 %vm1302_vm8, %v7795_v61 }
 0x8eb   : > { %9653 = vmatprep.mubr.msk.bf16.mxu1 %vm1302_vm8, %v7796_v5 }
 0x8f2   : > { %9654 = vmatmul.mubr.msk.bf16.gmra.mxu1 %vm1302_vm8, %v7797_v54 }
 0x8f3   : > { %9657 = vmatprep.mubr.msk.bf16.mxu1 %vm1302_vm8, %v7798_v40 }
 0x8fa   : > { %9658 = vmatmul.mubr.msk.bf16.gmra.mxu1 %vm1302_vm8, %v7799_v46 }
 0x992   : > { %v9631_v37 = vpop.f32.mrf.mxu0  ;;  %v9639_v28 = vpop.f32.mrf.mxu1 }
 0x993   : > { %v7902_v35 = vadd.f32 %v9631_v37, %v13685_v60  ;;  %v7934_v6 = vadd.f32 %v9639_v28, %v13685_v60 }
 0x994   : > { %v7893_v3 = vpop.f32.mrf.mxu0  ;;  %v7925_v36 = vpop.f32.mrf.mxu1 }
 0x995   : > { %8022 = vst.msk [vmem:[%s10016_s14 + $0x10] sm:$0xff] %vm794_vm7, %v7902_v35  ;;  %8030 = vst.msk [vmem:[%s10016_s14 + $0x50] sm:$0xff] %vm794_vm7, %v7934_v6  ;;  %v7894_v26 = vadd.f32 %v7893_v3, %v13685_v60  ;;  %v7926_v20 = vadd.f32 %v7925_v36, %v13685_v60 }
 0x996   : > { %v9632_v17 = vpop.f32.mrf.mxu0  ;;  %v9640_v42 = vpop.f32.mrf.mxu1 }
 0x997   : > { %8020 = vst.msk [vmem:[%s10016_s14] sm:$0xff] %vm794_vm7, %v7894_v26  ;;  %8028 = vst.msk [vmem:[%s10016_s14 + $0x40] sm:$0xff] %vm794_vm7, %v7926_v20  ;;  %v7905_v50 = vadd.f32 %v9632_v17, %v13685_v60  ;;  %v7937_v4 = vadd.f32 %v9640_v42, %v13685_v60 }
 0x998   : > { %v7896_v19 = vpop.f32.mrf.mxu0  ;;  %v7928_v21 = vpop.f32.mrf.mxu1 }
 0x999   : > { %8023 = vst.msk [vmem:[%s10016_s14 + $0x18] sm:$0xff] %vm794_vm7, %v7905_v50  ;;  %8031 = vst.msk [vmem:[%s10016_s14 + $0x58] sm:$0xff] %vm794_vm7, %v7937_v4  ;;  %v7897_v11 = vadd.f32 %v7896_v19, %v13685_v60  ;;  %v7929_v29 = vadd.f32 %v7928_v21, %v13685_v60 }
 0x99a   : > { %v9635_v9 = vpop.f32.mrf.mxu0  ;;  %v9643_v10 = vpop.f32.mrf.mxu1 }
 0x99b   : > { %8021 = vst.msk [vmem:[%s10016_s14 + $0x8] sm:$0xff] %vm794_vm7, %v7897_v11  ;;  %8029 = vst.msk [vmem:[%s10016_s14 + $0x48] sm:$0xff] %vm794_vm7, %v7929_v29  ;;  %v7918_v58 = vadd.f32 %v9635_v9, %v13685_v60  ;;  %v7950_v1 = vadd.f32 %v9643_v10, %v13685_v60 }
 0x99c   : > { %v7909_v18 = vpop.f32.mrf.mxu0  ;;  %v7941_v56 = vpop.f32.mrf.mxu1 }
 0x99d   : > { %8026 = vst.msk [vmem:[%s10016_s14 + $0x30] sm:$0xff] %vm794_vm7, %v7918_v58  ;;  %8034 = vst.msk [vmem:[%s10016_s14 + $0x70] sm:$0xff] %vm794_vm7, %v7950_v1  ;;  %v7910_v63 = vadd.f32 %v7909_v18, %v13685_v60  ;;  %v7942_v0 = vadd.f32 %v7941_v56, %v13685_v60 }
 0x99e   : > { %v9636_v7 = vpop.f32.mrf.mxu0  ;;  %v9644_v16 = vpop.f32.mrf.mxu1 }
 0x99f   : > { %8024 = vst.msk [vmem:[%s10016_s14 + $0x20] sm:$0xff] %vm794_vm7, %v7910_v63  ;;  %8032 = vst.msk [vmem:[%s10016_s14 + $0x60] sm:$0xff] %vm794_vm7, %v7942_v0  ;;  %v7921_v31 = vadd.f32 %v9636_v7, %v13685_v60  ;;  %v7953_v14 = vadd.f32 %v9644_v16, %v13685_v60 }
 0x9a0   : > { %v7912_v23 = vpop.f32.mrf.mxu0  ;;  %v7944_v32 = vpop.f32.mrf.mxu1 }
 0x9a1   : > { %8027 = vst.msk [vmem:[%s10016_s14 + $0x38] sm:$0xff] %vm794_vm7, %v7921_v31  ;;  %8035 = vst.msk [vmem:[%s10016_s14 + $0x78] sm:$0xff] %vm794_vm7, %v7953_v14  ;;  %v7913_v8 = vadd.f32 %v7912_v23, %v13685_v60  ;;  %v7945_v62 = vadd.f32 %v7944_v32, %v13685_v60 }
 0x9a2   : > { %v9647_v59 = vpop.f32.mrf.mxu1 }
 0x9a3   : > { %8025 = vst.msk [vmem:[%s10016_s14 + $0x28] sm:$0xff] %vm794_vm7, %v7913_v8  ;;  %8033 = vst.msk [vmem:[%s10016_s14 + $0x68] sm:$0xff] %vm794_vm7, %v7945_v62  ;;  %v7966_v43 = vadd.f32 %v9647_v59, %v13685_v60 }
 0x9a4   : > { %v7957_v2 = vpop.f32.mrf.mxu1 }
 0x9a5   : > { %8038 = vst.msk [vmem:[%s10016_s14 + $0x90] sm:$0xff] %vm794_vm7, %v7966_v43  ;;  %v7958_v51 = vadd.f32 %v7957_v2, %v13685_v60 }
 0x9a6   : > { %v9648_v27 = vpop.f32.mrf.mxu1 }
 0x9a7   : > { %8036 = vst.msk [vmem:[%s10016_s14 + $0x80] sm:$0xff] %vm794_vm7, %v7958_v51  ;;  %v7969_v34 = vadd.f32 %v9648_v27, %v13685_v60 }
 0x9a8   : > { %v7960_v13 = vpop.f32.mrf.mxu1 }
 0x9a9   : > { %8039 = vst.msk [vmem:[%s10016_s14 + $0x98] sm:$0xff] %vm794_vm7, %v7969_v34  ;;  %v7961_v22 = vadd.f32 %v7960_v13, %v13685_v60 }
 0x9aa   : > { %v9651_v49 = vpop.f32.mrf.mxu1 }
 0x9ab   : > { %8037 = vst.msk [vmem:[%s10016_s14 + $0x88] sm:$0xff] %vm794_vm7, %v7961_v22  ;;  %v7982_v15 = vadd.f32 %v9651_v49, %v13685_v60 }
 0x9ac   : > { %v7973_v52 = vpop.f32.mrf.mxu1 }
 0x9ad   : > { %8042 = vst.msk [vmem:[%s10016_s14 + $0xb0] sm:$0xff] %vm794_vm7, %v7982_v15  ;;  %v7974_v39 = vadd.f32 %v7973_v52, %v13685_v60 }
 0x9ae   : > { %v9652_v53 = vpop.f32.mrf.mxu1 }
 0x9af   : > { %8040 = vst.msk [vmem:[%s10016_s14 + $0xa0] sm:$0xff] %vm794_vm7, %v7974_v39  ;;  %v7985_v44 = vadd.f32 %v9652_v53, %v13685_v60 }
 0x9b0   : > { %v7976_v47 = vpop.f32.mrf.mxu1 }
 0x9b1   : > { %8043 = vst.msk [vmem:[%s10016_s14 + $0xb8] sm:$0xff] %vm794_vm7, %v7985_v44  ;;  %v7977_v24 = vadd.f32 %v7976_v47, %v13685_v60 }
 0x9b2   : > { %v9655_v41 = vpop.f32.mrf.mxu1 }
 0x9b3   : > { %8041 = vst.msk [vmem:[%s10016_s14 + $0xa8] sm:$0xff] %vm794_vm7, %v7977_v24  ;;  %v7998_v30 = vadd.f32 %v9655_v41, %v13685_v60 }
 0x9b4   : > { %v7989_v45 = vpop.f32.mrf.mxu1 }
 0x9b5   : > { %8046 = vst.msk [vmem:[%s10016_s14 + $0xd0] sm:$0xff] %vm794_vm7, %v7998_v30  ;;  %v7990_v25 = vadd.f32 %v7989_v45, %v13685_v60 }
 0x9b6   : > { %v9656_v61 = vpop.f32.mrf.mxu1 }
 0x9b7   : > { %8044 = vst.msk [vmem:[%s10016_s14 + $0xc0] sm:$0xff] %vm794_vm7, %v7990_v25  ;;  %v8001_v5 = vadd.f32 %v9656_v61, %v13685_v60 }
 0x9b8   : > { %v7992_v48 = vpop.f32.mrf.mxu1 }
 0x9b9   : > { %8047 = vst.msk [vmem:[%s10016_s14 + $0xd8] sm:$0xff] %vm794_vm7, %v8001_v5  ;;  %v7993_v33 = vadd.f32 %v7992_v48, %v13685_v60 }
 0x9ba   : > { %v9659_v38 = vpop.f32.mrf.mxu1 }
 0x9bb   : > { %8045 = vst.msk [vmem:[%s10016_s14 + $0xc8] sm:$0xff] %vm794_vm7, %v7993_v33  ;;  %v8014_v12 = vadd.f32 %v9659_v38, %v13685_v60 }
 0x9bc   : > { %v8005_v54 = vpop.f32.mrf.mxu1 }
 0x9bd   : > { %8050 = vst.msk [vmem:[%s10016_s14 + $0xf0] sm:$0xff] %vm794_vm7, %v8014_v12  ;;  %v8006_v40 = vadd.f32 %v8005_v54, %v13685_v60 }
 0x9be   : > { %v9660_v55 = vpop.f32.mrf.mxu1 }
 0x9bf   : > { %8048 = vst.msk [vmem:[%s10016_s14 + $0xe0] sm:$0xff] %vm794_vm7, %v8006_v40  ;;  %v8017_v57 = vadd.f32 %v9660_v55, %v13685_v60 }
 0x9c0   : > { %v8008_v46 = vpop.f32.mrf.mxu1 }
 0x9c1   : > { %8051 = vst.msk [vmem:[%s10016_s14 + $0xf8] sm:$0xff] %vm794_vm7, %v8017_v57  ;;  %v8009_v37 = vadd.f32 %v8008_v46, %v13685_v60 }
 0x9c3   : > { %8049 = vst.msk [vmem:[%s10016_s14 + $0xe8] sm:$0xff] %vm794_vm7, %v8009_v37 }
 0x9c4 PF: > { %s19_s27 = sadd.s32 1, %s9938_s27  }
 0x9c5   : > { %p16_p5 = scmp.ge.s32.totalorder %s19_s27, 4  }
 0x9c7   :  { %18 = sbr.rel (!%p16_p5) target bundleno = 1 (0x1), region = 98 }

</bundles_post_ra>
